<compile_context>
chip_gen: v7x
topology: tpu7x:2x2x1
jax: 0.10.0
libtpu: 0.0.40
codegen_flags: <defaults>
</compile_context>

<pallas_src>
import numpy as np
import jax
import jax.numpy as jnp
from jax import lax
from jax.experimental import pallas as pl
from jax.experimental.pallas import tpu as pltpu

HIDDEN_SIZE = 50
INPUT_SIZE = 1
OUTPUT_SIZE = 1
SEQUENCE_LENGTH = 25   # module-level global used by ODEFunc for index clamping
BATCH_BLOCK = 128      # MXU-row-width batch tile (review item 1)
X_PAD = 8              # zero-pad the scalar input feature dim to a full sublane
                       # so projections are aligned (TB,8)@(8,H) MXU dots


# ---------------------------------------------------------------------------
# Host-side static schedule: per-RK4-stage sequence indices and per-step dt.
# (torchdiffeq 'rk4' = fixed-grid 3/8-rule rk4_alt_step_func on the 25-point
#  t = linspace(0, 1, 25) grid; idx = min(int(t*(S-1)), S-1) depends only on
#  the static grid, emulated with float32 arithmetic like torch.)
# ---------------------------------------------------------------------------
def _rk4_schedule(seq_len):
    t = np.linspace(0.0, 1.0, seq_len, dtype=np.float32)
    idxs, dts = [], []
    for i in range(seq_len - 1):
        t0 = np.float32(t[i])
        t1 = np.float32(t[i + 1])
        dt = np.float32(t1 - t0)
        stage_ts = [
            t0,
            np.float32(t0 + dt * np.float32(1.0 / 3.0)),
            np.float32(t0 + dt * np.float32(2.0 / 3.0)),
            t1,
        ]
        for ts in stage_ts:
            idxs.append(min(int(float(ts) * (SEQUENCE_LENGTH - 1)),
                            SEQUENCE_LENGTH - 1))
        dts.append(float(dt))
    return idxs, dts


# ---------------------------------------------------------------------------
# Pallas kernel factory
# ---------------------------------------------------------------------------
def make_neural_ode_kernel(seq_len, tb):
    H = HIDDEN_SIZE

    def kernel(sched_ref, dts_ref, x_ref,
               w_in_ref, b_in_ref,
               w1h_ref, w1x_ref, b1_ref,
               w2_ref, b2_ref,
               w_out_ref, b_out_ref,
               out_ref,
               xproj_ref):
        # ---- hoist loop-invariant weights & bias broadcasts (once only) ----
        w1h = w1h_ref[...]                                   # (H, H)
        w2 = w2_ref[...]                                     # (H, H)
        w1x = w1x_ref[...]                                   # (X_PAD, H)
        b1_b = jnp.broadcast_to(b1_ref[...], (tb, H))        # (TB, H)
        b2_b = jnp.broadcast_to(b2_ref[...], (tb, H))        # (TB, H)

        # ---- xproj[s] = x[s] @ W1_x + b1 for all time points --------------
        # 25 independent small MXU dots, off the serial RK4 chain; static
        # indices, each chunk small enough to avoid register spills.
        for s in range(seq_len):
            xs = x_ref[pl.ds(s * tb, tb), :]                 # (TB, X_PAD)
            xproj_ref[pl.ds(s * tb, tb), :] = (
                jnp.dot(xs, w1x, preferred_element_type=jnp.float32) + b1_b)

        # ---- h0 = input_fc(x[:, 0, :]) as an aligned MXU dot ---------------
        h0 = (jnp.dot(x_ref[pl.ds(0, tb), :], w_in_ref[...],
                      preferred_element_type=jnp.float32)
              + jnp.broadcast_to(b_in_ref[...], (tb, H)))

        # ODE RHS: f(xp, h) = tanh(h @ W1_h + xp) @ W2 + b2
        def ode_f(xp, h):
            z = jnp.dot(h, w1h, preferred_element_type=jnp.float32) + xp
            return (jnp.dot(jnp.tanh(z), w2,
                            preferred_element_type=jnp.float32) + b2_b)

        def xp_row(s):
            start = pl.multiple_of(s * tb, tb)
            return xproj_ref[pl.ds(start, tb), :]

        one_third = 1.0 / 3.0

        # ---- fixed-grid 3/8-rule RK4, fori_loop over steps -----------------
        # Stage indices / dt come from SMEM (fp-faithful schedule); the k
        # accumulation is restructured so fewer full-size k tensors are live.
        def rk4_step(i, h):
            base = 4 * i
            s0 = sched_ref[base]
            s1 = sched_ref[base + 1]
            s2 = sched_ref[base + 2]
            s3 = sched_ref[base + 3]
            dt = dts_ref[i]

            k1 = ode_f(xp_row(s0), h)
            k2 = ode_f(xp_row(s1), h + (dt * one_third) * k1)
            ksum = k1 + 3.0 * k2
            kdiff = k1 - k2
            k3 = ode_f(xp_row(s2), h + dt * (k2 - one_third * k1))
            ksum = ksum + 3.0 * k3
            k4 = ode_f(xp_row(s3), h + dt * (kdiff + k3))
            return h + (dt * 0.125) * (ksum + k4)

        h = lax.fori_loop(0, seq_len - 1, rk4_step, h0)

        # ---- output_fc ------------------------------------------------------
        out_ref[...] = (jnp.dot(h, w_out_ref[...],
                                preferred_element_type=jnp.float32)
                        + b_out_ref[...])

    return kernel


# ---------------------------------------------------------------------------
# Wrapper
# ---------------------------------------------------------------------------
def neural_ode_forward(x, params):
    (w_in, b_in, w1h, w1x, b1, w2, b2, w_out, b_out) = params
    B, S, D = x.shape
    assert S == SEQUENCE_LENGTH and D == INPUT_SIZE

    TB = BATCH_BLOCK
    nb = -(-B // TB)                      # number of batch blocks (>= 1)
    B_pad = nb * TB
    # TODO(synk): independent batch-block chains could additionally be
    # interleaved inside one invocation to hide MXU/EUP latency; with nb >= 2
    # the "parallel" grid axis already splits blocks across v7x's two TCs.

    # (B,S,1) -> block-contiguous (nb, S*TB) rows, feature dim padded to X_PAD
    xt = jnp.transpose(x.astype(jnp.float32), (1, 0, 2))[..., 0]   # (S, B)
    if B_pad != B:
        xt = jnp.pad(xt, ((0, 0), (0, B_pad - B)))
    xt = xt.reshape(S, nb, TB).transpose(1, 0, 2).reshape(nb, S * TB)
    x_blk = jnp.zeros((nb, S * TB, X_PAD), jnp.float32).at[..., 0].set(xt)

    # zero-pad the 1-row projection weights to X_PAD rows (exact same result)
    w_in8 = jnp.zeros((X_PAD, HIDDEN_SIZE), jnp.float32).at[0].set(w_in[0])
    w1x8 = jnp.zeros((X_PAD, HIDDEN_SIZE), jnp.float32).at[0].set(w1x[0])

    idxs, dts = _rk4_schedule(S)
    sched = jnp.asarray(np.asarray(idxs, dtype=np.int32))      # (4*(S-1),)
    dt_arr = jnp.asarray(np.asarray(dts, dtype=np.float32))    # (S-1,)

    kernel = make_neural_ode_kernel(S, TB)

    weights = (w_in8, b_in, w1h, w1x8, b1, w2, b2, w_out, b_out)
    weight_specs = [pl.BlockSpec(w.shape, lambda b: (0, 0)) for w in weights]

    out = pl.pallas_call(
        kernel,
        out_shape=jax.ShapeDtypeStruct((B_pad, OUTPUT_SIZE), jnp.float32),
        grid_spec=pltpu.PrefetchScalarGridSpec(
            num_scalar_prefetch=0,
            grid=(nb,),
            in_specs=[
                pl.BlockSpec(memory_space=pltpu.MemorySpace.SMEM),   # schedule
                pl.BlockSpec(memory_space=pltpu.MemorySpace.SMEM),   # dts
                pl.BlockSpec((None, S * TB, X_PAD), lambda b: (b, 0, 0)),
            ] + weight_specs,
            out_specs=pl.BlockSpec((TB, OUTPUT_SIZE), lambda b: (b, 0)),
            scratch_shapes=[pltpu.VMEM((S * TB, HIDDEN_SIZE), jnp.float32)],
        ),
        compiler_params=pltpu.CompilerParams(
            dimension_semantics=("parallel",)),
    )(sched, dt_arr, x_blk, *weights)

    return out[:B]


# ---------------------------------------------------------------------------
# Deterministic parameter init (PyTorch-Linear-style uniform +-1/sqrt(fan_in)),
# stored as (in_features, out_features).
# ---------------------------------------------------------------------------
def init_params(key):
    ks = jax.random.split(key, 9)

    def unif(k, shape, fan_in):
        bound = 1.0 / np.sqrt(fan_in)
        return jax.random.uniform(k, shape, jnp.float32, -bound, bound)

    # input_fc: Linear(INPUT_SIZE, HIDDEN_SIZE)
    w_in = unif(ks[0], (INPUT_SIZE, HIDDEN_SIZE), INPUT_SIZE)
    b_in = unif(ks[1], (1, HIDDEN_SIZE), INPUT_SIZE)
    # ode_func.net[0]: Linear(HIDDEN_SIZE + INPUT_SIZE, HIDDEN_SIZE), split
    fan1 = HIDDEN_SIZE + INPUT_SIZE
    w1h = unif(ks[2], (HIDDEN_SIZE, HIDDEN_SIZE), fan1)
    w1x = unif(ks[3], (INPUT_SIZE, HIDDEN_SIZE), fan1)
    b1 = unif(ks[4], (1, HIDDEN_SIZE), fan1)
    # ode_func.net[2]: Linear(HIDDEN_SIZE, HIDDEN_SIZE)
    w2 = unif(ks[5], (HIDDEN_SIZE, HIDDEN_SIZE), HIDDEN_SIZE)
    b2 = unif(ks[6], (1, HIDDEN_SIZE), HIDDEN_SIZE)
    # output_fc: Linear(HIDDEN_SIZE, OUTPUT_SIZE)
    w_out = unif(ks[7], (HIDDEN_SIZE, OUTPUT_SIZE), HIDDEN_SIZE)
    b_out = unif(ks[8], (1, OUTPUT_SIZE), HIDDEN_SIZE)
    return (w_in, b_in, w1h, w1x, b1, w2, b2, w_out, b_out)


# ---------------------------------------------------------------------------
# Pure-JAX reference (mirrors PyTorch + torchdiffeq 'rk4' semantics literally).
# ---------------------------------------------------------------------------
def reference_forward(x, params):
    (w_in, b_in, w1h, w1x, b1, w2, b2, w_out, b_out) = params
    S = x.shape[1]
    idxs, dts = _rk4_schedule(S)
    x = x.astype(jnp.float32)

    def f(idx, h):
        xp = x[:, idx, :] * w1x + b1
        return jnp.tanh(h @ w1h + xp) @ w2 + b2

    h = x[:, 0, :] * w_in + b_in
    one_third = 1.0 / 3.0
    for i in range(S - 1):
        dt = float(dts[i])
        s0, s1, s2, s3 = (int(idxs[4 * i + j]) for j in range(4))
        k1 = f(s0, h)
        k2 = f(s1, h + dt * k1 * one_third)
        k3 = f(s2, h + dt * (k2 - k1 * one_third))
        k4 = f(s3, h + dt * (k1 - k2 + k3))
        h = h + (k1 + 3.0 * (k2 + k3) + k4) * dt * 0.125
    return h @ w_out + b_out


if __name__ == "__main__":
    key = jax.random.PRNGKey(0)
    k_x, k_p = jax.random.split(key)
    batch = 2
    x = jax.random.normal(k_x, (batch, SEQUENCE_LENGTH, INPUT_SIZE),
                          dtype=jnp.float32)
    params = init_params(k_p)

    out = neural_ode_forward(x, params)
    out = jax.block_until_ready(out)

    ref = reference_forward(x, params)
    assert out.shape == (batch, OUTPUT_SIZE)
    np.testing.assert_allclose(np.asarray(out), np.asarray(ref),
                               rtol=1e-4, atol=2e-5)
    print("KERNEL_OK")
</pallas_src>

<mosaic_0001>
module attributes {stable_mosaic.version = 11 : i64} {
  func.func @kernel(%arg0: i32, %arg1: memref<96xi32, #tpu.memory_space<smem>>, %arg2: memref<24xf32, #tpu.memory_space<smem>>, %arg3: memref<1x3200x8xf32, #tpu.memory_space<vmem>>, %arg4: memref<8x50xf32, #tpu.memory_space<vmem>>, %arg5: memref<1x50xf32, #tpu.memory_space<vmem>>, %arg6: memref<50x50xf32, #tpu.memory_space<vmem>>, %arg7: memref<8x50xf32, #tpu.memory_space<vmem>>, %arg8: memref<1x50xf32, #tpu.memory_space<vmem>>, %arg9: memref<50x50xf32, #tpu.memory_space<vmem>>, %arg10: memref<1x50xf32, #tpu.memory_space<vmem>>, %arg11: memref<50x1xf32, #tpu.memory_space<vmem>>, %arg12: memref<1x1xf32, #tpu.memory_space<vmem>>, %arg13: memref<128x1xf32, #tpu.memory_space<vmem>>, %arg14: memref<3200x50xf32, #tpu.memory_space<vmem>>) attributes {dimension_semantics = [#tpu.dimension_semantics<parallel>], iteration_bounds = array<i64: 1>, scalar_prefetch = 0 : i64, scratch_operands = 1 : i64, tpu.core_type = #tpu.core_type<tc>, window_params = [{transform_indices = @transform_0, window_bounds = array<i64: 96>}, {transform_indices = @transform_1, window_bounds = array<i64: 24>}, {transform_indices = @transform_2, window_bounds = array<i64: 1, 3200, 8>}, {pipeline_mode = #tpu.pipeline_mode<synchronous>, transform_indices = @transform_3, window_bounds = array<i64: 8, 50>}, {pipeline_mode = #tpu.pipeline_mode<synchronous>, transform_indices = @transform_4, window_bounds = array<i64: 1, 50>}, {pipeline_mode = #tpu.pipeline_mode<synchronous>, transform_indices = @transform_5, window_bounds = array<i64: 50, 50>}, {pipeline_mode = #tpu.pipeline_mode<synchronous>, transform_indices = @transform_6, window_bounds = array<i64: 8, 50>}, {pipeline_mode = #tpu.pipeline_mode<synchronous>, transform_indices = @transform_7, window_bounds = array<i64: 1, 50>}, {pipeline_mode = #tpu.pipeline_mode<synchronous>, transform_indices = @transform_8, window_bounds = array<i64: 50, 50>}, {pipeline_mode = #tpu.pipeline_mode<synchronous>, transform_indices = @transform_9, window_bounds = array<i64: 1, 50>}, {pipeline_mode = #tpu.pipeline_mode<synchronous>, transform_indices = @transform_10, window_bounds = array<i64: 50, 1>}, {pipeline_mode = #tpu.pipeline_mode<synchronous>, transform_indices = @transform_11, window_bounds = array<i64: 1, 1>}, {transform_indices = @transform_12, window_bounds = array<i64: 128, 1>}]} {
    %c0 = arith.constant 0 : index
    %c0_0 = arith.constant 0 : index
    %0 = vector.load %arg6[%c0, %c0_0] : memref<50x50xf32, #tpu.memory_space<vmem>>, vector<50x50xf32>
    %c0_1 = arith.constant 0 : index
    %c0_2 = arith.constant 0 : index
    %1 = vector.load %arg9[%c0_1, %c0_2] : memref<50x50xf32, #tpu.memory_space<vmem>>, vector<50x50xf32>
    %c0_3 = arith.constant 0 : index
    %c0_4 = arith.constant 0 : index
    %2 = vector.load %arg7[%c0_3, %c0_4] : memref<8x50xf32, #tpu.memory_space<vmem>>, vector<8x50xf32>
    %c0_5 = arith.constant 0 : index
    %c0_6 = arith.constant 0 : index
    %3 = vector.load %arg8[%c0_5, %c0_6] : memref<1x50xf32, #tpu.memory_space<vmem>>, vector<1x50xf32>
    %4 = vector.shape_cast %3 : vector<1x50xf32> to vector<1x50xf32>
    %5 = vector.broadcast %4 : vector<1x50xf32> to vector<128x50xf32>
    %c0_7 = arith.constant 0 : index
    %c0_8 = arith.constant 0 : index
    %6 = vector.load %arg10[%c0_7, %c0_8] : memref<1x50xf32, #tpu.memory_space<vmem>>, vector<1x50xf32>
    %7 = vector.shape_cast %6 : vector<1x50xf32> to vector<1x50xf32>
    %8 = vector.broadcast %7 : vector<1x50xf32> to vector<128x50xf32>
    %c0_9 = arith.constant 0 : index
    %c0_10 = arith.constant 0 : index
    %c0_11 = arith.constant 0 : index
    %9 = vector.load %arg3[%c0_9, %c0_10, %c0_11] : memref<1x3200x8xf32, #tpu.memory_space<vmem>>, vector<1x128x8xf32>
    %10 = vector.shape_cast %9 : vector<1x128x8xf32> to vector<128x8xf32>
    %cst = arith.constant dense<0.000000e+00> : vector<128x50xf32>
    %11 = tpu.matmul %10, %2, %cst {dimension_numbers = #tpu.dot_dimension_numbers<[1], [0], [0], [1], [0, 0, 1, 1], [], []>} : vector<128x8xf32>, vector<8x50xf32>, vector<128x50xf32> -> vector<128x50xf32>
    %12 = arith.addf %11, %5 : vector<128x50xf32>
    %c0_12 = arith.constant 0 : index
    %c0_13 = arith.constant 0 : index
    %13 = vector.load %arg14[%c0_12, %c0_13] : memref<3200x50xf32, #tpu.memory_space<vmem>>, vector<128x50xf32>
    tpu.vector_store %arg14[%c0_12, %c0_13], %12 {strides = array<i32>} : memref<3200x50xf32, #tpu.memory_space<vmem>>, vector<128x50xf32>,
    %c0_14 = arith.constant 0 : index
    %c128 = arith.constant 128 : index
    %c0_15 = arith.constant 0 : index
    %14 = vector.load %arg3[%c0_14, %c128, %c0_15] : memref<1x3200x8xf32, #tpu.memory_space<vmem>>, vector<1x128x8xf32>
    %15 = vector.shape_cast %14 : vector<1x128x8xf32> to vector<128x8xf32>
    %cst_16 = arith.constant dense<0.000000e+00> : vector<128x50xf32>
    %16 = tpu.matmul %15, %2, %cst_16 {dimension_numbers = #tpu.dot_dimension_numbers<[1], [0], [0], [1], [0, 0, 1, 1], [], []>} : vector<128x8xf32>, vector<8x50xf32>, vector<128x50xf32> -> vector<128x50xf32>
    %17 = arith.addf %16, %5 : vector<128x50xf32>
    %c128_17 = arith.constant 128 : index
    %c0_18 = arith.constant 0 : index
    %18 = vector.load %arg14[%c128_17, %c0_18] : memref<3200x50xf32, #tpu.memory_space<vmem>>, vector<128x50xf32>
    tpu.vector_store %arg14[%c128_17, %c0_18], %17 {strides = array<i32>} : memref<3200x50xf32, #tpu.memory_space<vmem>>, vector<128x50xf32>,
    %c0_19 = arith.constant 0 : index
    %c256 = arith.constant 256 : index
    %c0_20 = arith.constant 0 : index
    %19 = vector.load %arg3[%c0_19, %c256, %c0_20] : memref<1x3200x8xf32, #tpu.memory_space<vmem>>, vector<1x128x8xf32>
    %20 = vector.shape_cast %19 : vector<1x128x8xf32> to vector<128x8xf32>
    %cst_21 = arith.constant dense<0.000000e+00> : vector<128x50xf32>
    %21 = tpu.matmul %20, %2, %cst_21 {dimension_numbers = #tpu.dot_dimension_numbers<[1], [0], [0], [1], [0, 0, 1, 1], [], []>} : vector<128x8xf32>, vector<8x50xf32>, vector<128x50xf32> -> vector<128x50xf32>
    %22 = arith.addf %21, %5 : vector<128x50xf32>
    %c256_22 = arith.constant 256 : index
    %c0_23 = arith.constant 0 : index
    %23 = vector.load %arg14[%c256_22, %c0_23] : memref<3200x50xf32, #tpu.memory_space<vmem>>, vector<128x50xf32>
    tpu.vector_store %arg14[%c256_22, %c0_23], %22 {strides = array<i32>} : memref<3200x50xf32, #tpu.memory_space<vmem>>, vector<128x50xf32>,
    %c0_24 = arith.constant 0 : index
    %c384 = arith.constant 384 : index
    %c0_25 = arith.constant 0 : index
    %24 = vector.load %arg3[%c0_24, %c384, %c0_25] : memref<1x3200x8xf32, #tpu.memory_space<vmem>>, vector<1x128x8xf32>
    %25 = vector.shape_cast %24 : vector<1x128x8xf32> to vector<128x8xf32>
    %cst_26 = arith.constant dense<0.000000e+00> : vector<128x50xf32>
    %26 = tpu.matmul %25, %2, %cst_26 {dimension_numbers = #tpu.dot_dimension_numbers<[1], [0], [0], [1], [0, 0, 1, 1], [], []>} : vector<128x8xf32>, vector<8x50xf32>, vector<128x50xf32> -> vector<128x50xf32>
    %27 = arith.addf %26, %5 : vector<128x50xf32>
    %c384_27 = arith.constant 384 : index
    %c0_28 = arith.constant 0 : index
    %28 = vector.load %arg14[%c384_27, %c0_28] : memref<3200x50xf32, #tpu.memory_space<vmem>>, vector<128x50xf32>
    tpu.vector_store %arg14[%c384_27, %c0_28], %27 {strides = array<i32>} : memref<3200x50xf32, #tpu.memory_space<vmem>>, vector<128x50xf32>,
    %c0_29 = arith.constant 0 : index
    %c512 = arith.constant 512 : index
    %c0_30 = arith.constant 0 : index
    %29 = vector.load %arg3[%c0_29, %c512, %c0_30] : memref<1x3200x8xf32, #tpu.memory_space<vmem>>, vector<1x128x8xf32>
    %30 = vector.shape_cast %29 : vector<1x128x8xf32> to vector<128x8xf32>
    %cst_31 = arith.constant dense<0.000000e+00> : vector<128x50xf32>
    %31 = tpu.matmul %30, %2, %cst_31 {dimension_numbers = #tpu.dot_dimension_numbers<[1], [0], [0], [1], [0, 0, 1, 1], [], []>} : vector<128x8xf32>, vector<8x50xf32>, vector<128x50xf32> -> vector<128x50xf32>
    %32 = arith.addf %31, %5 : vector<128x50xf32>
    %c512_32 = arith.constant 512 : index
    %c0_33 = arith.constant 0 : index
    %33 = vector.load %arg14[%c512_32, %c0_33] : memref<3200x50xf32, #tpu.memory_space<vmem>>, vector<128x50xf32>
    tpu.vector_store %arg14[%c512_32, %c0_33], %32 {strides = array<i32>} : memref<3200x50xf32, #tpu.memory_space<vmem>>, vector<128x50xf32>,
    %c0_34 = arith.constant 0 : index
    %c640 = arith.constant 640 : index
    %c0_35 = arith.constant 0 : index
    %34 = vector.load %arg3[%c0_34, %c640, %c0_35] : memref<1x3200x8xf32, #tpu.memory_space<vmem>>, vector<1x128x8xf32>
    %35 = vector.shape_cast %34 : vector<1x128x8xf32> to vector<128x8xf32>
    %cst_36 = arith.constant dense<0.000000e+00> : vector<128x50xf32>
    %36 = tpu.matmul %35, %2, %cst_36 {dimension_numbers = #tpu.dot_dimension_numbers<[1], [0], [0], [1], [0, 0, 1, 1], [], []>} : vector<128x8xf32>, vector<8x50xf32>, vector<128x50xf32> -> vector<128x50xf32>
    %37 = arith.addf %36, %5 : vector<128x50xf32>
    %c640_37 = arith.constant 640 : index
    %c0_38 = arith.constant 0 : index
    %38 = vector.load %arg14[%c640_37, %c0_38] : memref<3200x50xf32, #tpu.memory_space<vmem>>, vector<128x50xf32>
    tpu.vector_store %arg14[%c640_37, %c0_38], %37 {strides = array<i32>} : memref<3200x50xf32, #tpu.memory_space<vmem>>, vector<128x50xf32>,
    %c0_39 = arith.constant 0 : index
    %c768 = arith.constant 768 : index
    %c0_40 = arith.constant 0 : index
    %39 = vector.load %arg3[%c0_39, %c768, %c0_40] : memref<1x3200x8xf32, #tpu.memory_space<vmem>>, vector<1x128x8xf32>
    %40 = vector.shape_cast %39 : vector<1x128x8xf32> to vector<128x8xf32>
    %cst_41 = arith.constant dense<0.000000e+00> : vector<128x50xf32>
    %41 = tpu.matmul %40, %2, %cst_41 {dimension_numbers = #tpu.dot_dimension_numbers<[1], [0], [0], [1], [0, 0, 1, 1], [], []>} : vector<128x8xf32>, vector<8x50xf32>, vector<128x50xf32> -> vector<128x50xf32>
    %42 = arith.addf %41, %5 : vector<128x50xf32>
    %c768_42 = arith.constant 768 : index
    %c0_43 = arith.constant 0 : index
    %43 = vector.load %arg14[%c768_42, %c0_43] : memref<3200x50xf32, #tpu.memory_space<vmem>>, vector<128x50xf32>
    tpu.vector_store %arg14[%c768_42, %c0_43], %42 {strides = array<i32>} : memref<3200x50xf32, #tpu.memory_space<vmem>>, vector<128x50xf32>,
    %c0_44 = arith.constant 0 : index
    %c896 = arith.constant 896 : index
    %c0_45 = arith.constant 0 : index
    %44 = vector.load %arg3[%c0_44, %c896, %c0_45] : memref<1x3200x8xf32, #tpu.memory_space<vmem>>, vector<1x128x8xf32>
    %45 = vector.shape_cast %44 : vector<1x128x8xf32> to vector<128x8xf32>
    %cst_46 = arith.constant dense<0.000000e+00> : vector<128x50xf32>
    %46 = tpu.matmul %45, %2, %cst_46 {dimension_numbers = #tpu.dot_dimension_numbers<[1], [0], [0], [1], [0, 0, 1, 1], [], []>} : vector<128x8xf32>, vector<8x50xf32>, vector<128x50xf32> -> vector<128x50xf32>
    %47 = arith.addf %46, %5 : vector<128x50xf32>
    %c896_47 = arith.constant 896 : index
    %c0_48 = arith.constant 0 : index
    %48 = vector.load %arg14[%c896_47, %c0_48] : memref<3200x50xf32, #tpu.memory_space<vmem>>, vector<128x50xf32>
    tpu.vector_store %arg14[%c896_47, %c0_48], %47 {strides = array<i32>} : memref<3200x50xf32, #tpu.memory_space<vmem>>, vector<128x50xf32>,
    %c0_49 = arith.constant 0 : index
    %c1024 = arith.constant 1024 : index
    %c0_50 = arith.constant 0 : index
    %49 = vector.load %arg3[%c0_49, %c1024, %c0_50] : memref<1x3200x8xf32, #tpu.memory_space<vmem>>, vector<1x128x8xf32>
    %50 = vector.shape_cast %49 : vector<1x128x8xf32> to vector<128x8xf32>
    %cst_51 = arith.constant dense<0.000000e+00> : vector<128x50xf32>
    %51 = tpu.matmul %50, %2, %cst_51 {dimension_numbers = #tpu.dot_dimension_numbers<[1], [0], [0], [1], [0, 0, 1, 1], [], []>} : vector<128x8xf32>, vector<8x50xf32>, vector<128x50xf32> -> vector<128x50xf32>
    %52 = arith.addf %51, %5 : vector<128x50xf32>
    %c1024_52 = arith.constant 1024 : index
    %c0_53 = arith.constant 0 : index
    %53 = vector.load %arg14[%c1024_52, %c0_53] : memref<3200x50xf32, #tpu.memory_space<vmem>>, vector<128x50xf32>
    tpu.vector_store %arg14[%c1024_52, %c0_53], %52 {strides = array<i32>} : memref<3200x50xf32, #tpu.memory_space<vmem>>, vector<128x50xf32>,
    %c0_54 = arith.constant 0 : index
    %c1152 = arith.constant 1152 : index
    %c0_55 = arith.constant 0 : index
    %54 = vector.load %arg3[%c0_54, %c1152, %c0_55] : memref<1x3200x8xf32, #tpu.memory_space<vmem>>, vector<1x128x8xf32>
    %55 = vector.shape_cast %54 : vector<1x128x8xf32> to vector<128x8xf32>
    %cst_56 = arith.constant dense<0.000000e+00> : vector<128x50xf32>
    %56 = tpu.matmul %55, %2, %cst_56 {dimension_numbers = #tpu.dot_dimension_numbers<[1], [0], [0], [1], [0, 0, 1, 1], [], []>} : vector<128x8xf32>, vector<8x50xf32>, vector<128x50xf32> -> vector<128x50xf32>
    %57 = arith.addf %56, %5 : vector<128x50xf32>
    %c1152_57 = arith.constant 1152 : index
    %c0_58 = arith.constant 0 : index
    %58 = vector.load %arg14[%c1152_57, %c0_58] : memref<3200x50xf32, #tpu.memory_space<vmem>>, vector<128x50xf32>
    tpu.vector_store %arg14[%c1152_57, %c0_58], %57 {strides = array<i32>} : memref<3200x50xf32, #tpu.memory_space<vmem>>, vector<128x50xf32>,
    %c0_59 = arith.constant 0 : index
    %c1280 = arith.constant 1280 : index
    %c0_60 = arith.constant 0 : index
    %59 = vector.load %arg3[%c0_59, %c1280, %c0_60] : memref<1x3200x8xf32, #tpu.memory_space<vmem>>, vector<1x128x8xf32>
    %60 = vector.shape_cast %59 : vector<1x128x8xf32> to vector<128x8xf32>
    %cst_61 = arith.constant dense<0.000000e+00> : vector<128x50xf32>
    %61 = tpu.matmul %60, %2, %cst_61 {dimension_numbers = #tpu.dot_dimension_numbers<[1], [0], [0], [1], [0, 0, 1, 1], [], []>} : vector<128x8xf32>, vector<8x50xf32>, vector<128x50xf32> -> vector<128x50xf32>
    %62 = arith.addf %61, %5 : vector<128x50xf32>
    %c1280_62 = arith.constant 1280 : index
    %c0_63 = arith.constant 0 : index
    %63 = vector.load %arg14[%c1280_62, %c0_63] : memref<3200x50xf32, #tpu.memory_space<vmem>>, vector<128x50xf32>
    tpu.vector_store %arg14[%c1280_62, %c0_63], %62 {strides = array<i32>} : memref<3200x50xf32, #tpu.memory_space<vmem>>, vector<128x50xf32>,
    %c0_64 = arith.constant 0 : index
    %c1408 = arith.constant 1408 : index
    %c0_65 = arith.constant 0 : index
    %64 = vector.load %arg3[%c0_64, %c1408, %c0_65] : memref<1x3200x8xf32, #tpu.memory_space<vmem>>, vector<1x128x8xf32>
    %65 = vector.shape_cast %64 : vector<1x128x8xf32> to vector<128x8xf32>
    %cst_66 = arith.constant dense<0.000000e+00> : vector<128x50xf32>
    %66 = tpu.matmul %65, %2, %cst_66 {dimension_numbers = #tpu.dot_dimension_numbers<[1], [0], [0], [1], [0, 0, 1, 1], [], []>} : vector<128x8xf32>, vector<8x50xf32>, vector<128x50xf32> -> vector<128x50xf32>
    %67 = arith.addf %66, %5 : vector<128x50xf32>
    %c1408_67 = arith.constant 1408 : index
    %c0_68 = arith.constant 0 : index
    %68 = vector.load %arg14[%c1408_67, %c0_68] : memref<3200x50xf32, #tpu.memory_space<vmem>>, vector<128x50xf32>
    tpu.vector_store %arg14[%c1408_67, %c0_68], %67 {strides = array<i32>} : memref<3200x50xf32, #tpu.memory_space<vmem>>, vector<128x50xf32>,
    %c0_69 = arith.constant 0 : index
    %c1536 = arith.constant 1536 : index
    %c0_70 = arith.constant 0 : index
    %69 = vector.load %arg3[%c0_69, %c1536, %c0_70] : memref<1x3200x8xf32, #tpu.memory_space<vmem>>, vector<1x128x8xf32>
    %70 = vector.shape_cast %69 : vector<1x128x8xf32> to vector<128x8xf32>
    %cst_71 = arith.constant dense<0.000000e+00> : vector<128x50xf32>
    %71 = tpu.matmul %70, %2, %cst_71 {dimension_numbers = #tpu.dot_dimension_numbers<[1], [0], [0], [1], [0, 0, 1, 1], [], []>} : vector<128x8xf32>, vector<8x50xf32>, vector<128x50xf32> -> vector<128x50xf32>
    %72 = arith.addf %71, %5 : vector<128x50xf32>
    %c1536_72 = arith.constant 1536 : index
    %c0_73 = arith.constant 0 : index
    %73 = vector.load %arg14[%c1536_72, %c0_73] : memref<3200x50xf32, #tpu.memory_space<vmem>>, vector<128x50xf32>
    tpu.vector_store %arg14[%c1536_72, %c0_73], %72 {strides = array<i32>} : memref<3200x50xf32, #tpu.memory_space<vmem>>, vector<128x50xf32>,
    %c0_74 = arith.constant 0 : index
    %c1664 = arith.constant 1664 : index
    %c0_75 = arith.constant 0 : index
    %74 = vector.load %arg3[%c0_74, %c1664, %c0_75] : memref<1x3200x8xf32, #tpu.memory_space<vmem>>, vector<1x128x8xf32>
    %75 = vector.shape_cast %74 : vector<1x128x8xf32> to vector<128x8xf32>
    %cst_76 = arith.constant dense<0.000000e+00> : vector<128x50xf32>
    %76 = tpu.matmul %75, %2, %cst_76 {dimension_numbers = #tpu.dot_dimension_numbers<[1], [0], [0], [1], [0, 0, 1, 1], [], []>} : vector<128x8xf32>, vector<8x50xf32>, vector<128x50xf32> -> vector<128x50xf32>
    %77 = arith.addf %76, %5 : vector<128x50xf32>
    %c1664_77 = arith.constant 1664 : index
    %c0_78 = arith.constant 0 : index
    %78 = vector.load %arg14[%c1664_77, %c0_78] : memref<3200x50xf32, #tpu.memory_space<vmem>>, vector<128x50xf32>
    tpu.vector_store %arg14[%c1664_77, %c0_78], %77 {strides = array<i32>} : memref<3200x50xf32, #tpu.memory_space<vmem>>, vector<128x50xf32>,
    %c0_79 = arith.constant 0 : index
    %c1792 = arith.constant 1792 : index
    %c0_80 = arith.constant 0 : index
    %79 = vector.load %arg3[%c0_79, %c1792, %c0_80] : memref<1x3200x8xf32, #tpu.memory_space<vmem>>, vector<1x128x8xf32>
    %80 = vector.shape_cast %79 : vector<1x128x8xf32> to vector<128x8xf32>
    %cst_81 = arith.constant dense<0.000000e+00> : vector<128x50xf32>
    %81 = tpu.matmul %80, %2, %cst_81 {dimension_numbers = #tpu.dot_dimension_numbers<[1], [0], [0], [1], [0, 0, 1, 1], [], []>} : vector<128x8xf32>, vector<8x50xf32>, vector<128x50xf32> -> vector<128x50xf32>
    %82 = arith.addf %81, %5 : vector<128x50xf32>
    %c1792_82 = arith.constant 1792 : index
    %c0_83 = arith.constant 0 : index
    %83 = vector.load %arg14[%c1792_82, %c0_83] : memref<3200x50xf32, #tpu.memory_space<vmem>>, vector<128x50xf32>
    tpu.vector_store %arg14[%c1792_82, %c0_83], %82 {strides = array<i32>} : memref<3200x50xf32, #tpu.memory_space<vmem>>, vector<128x50xf32>,
    %c0_84 = arith.constant 0 : index
    %c1920 = arith.constant 1920 : index
    %c0_85 = arith.constant 0 : index
    %84 = vector.load %arg3[%c0_84, %c1920, %c0_85] : memref<1x3200x8xf32, #tpu.memory_space<vmem>>, vector<1x128x8xf32>
    %85 = vector.shape_cast %84 : vector<1x128x8xf32> to vector<128x8xf32>
    %cst_86 = arith.constant dense<0.000000e+00> : vector<128x50xf32>
    %86 = tpu.matmul %85, %2, %cst_86 {dimension_numbers = #tpu.dot_dimension_numbers<[1], [0], [0], [1], [0, 0, 1, 1], [], []>} : vector<128x8xf32>, vector<8x50xf32>, vector<128x50xf32> -> vector<128x50xf32>
    %87 = arith.addf %86, %5 : vector<128x50xf32>
    %c1920_87 = arith.constant 1920 : index
    %c0_88 = arith.constant 0 : index
    %88 = vector.load %arg14[%c1920_87, %c0_88] : memref<3200x50xf32, #tpu.memory_space<vmem>>, vector<128x50xf32>
    tpu.vector_store %arg14[%c1920_87, %c0_88], %87 {strides = array<i32>} : memref<3200x50xf32, #tpu.memory_space<vmem>>, vector<128x50xf32>,
    %c0_89 = arith.constant 0 : index
    %c2048 = arith.constant 2048 : index
    %c0_90 = arith.constant 0 : index
    %89 = vector.load %arg3[%c0_89, %c2048, %c0_90] : memref<1x3200x8xf32, #tpu.memory_space<vmem>>, vector<1x128x8xf32>
    %90 = vector.shape_cast %89 : vector<1x128x8xf32> to vector<128x8xf32>
    %cst_91 = arith.constant dense<0.000000e+00> : vector<128x50xf32>
    %91 = tpu.matmul %90, %2, %cst_91 {dimension_numbers = #tpu.dot_dimension_numbers<[1], [0], [0], [1], [0, 0, 1, 1], [], []>} : vector<128x8xf32>, vector<8x50xf32>, vector<128x50xf32> -> vector<128x50xf32>
    %92 = arith.addf %91, %5 : vector<128x50xf32>
    %c2048_92 = arith.constant 2048 : index
    %c0_93 = arith.constant 0 : index
    %93 = vector.load %arg14[%c2048_92, %c0_93] : memref<3200x50xf32, #tpu.memory_space<vmem>>, vector<128x50xf32>
    tpu.vector_store %arg14[%c2048_92, %c0_93], %92 {strides = array<i32>} : memref<3200x50xf32, #tpu.memory_space<vmem>>, vector<128x50xf32>,
    %c0_94 = arith.constant 0 : index
    %c2176 = arith.constant 2176 : index
    %c0_95 = arith.constant 0 : index
    %94 = vector.load %arg3[%c0_94, %c2176, %c0_95] : memref<1x3200x8xf32, #tpu.memory_space<vmem>>, vector<1x128x8xf32>
    %95 = vector.shape_cast %94 : vector<1x128x8xf32> to vector<128x8xf32>
    %cst_96 = arith.constant dense<0.000000e+00> : vector<128x50xf32>
    %96 = tpu.matmul %95, %2, %cst_96 {dimension_numbers = #tpu.dot_dimension_numbers<[1], [0], [0], [1], [0, 0, 1, 1], [], []>} : vector<128x8xf32>, vector<8x50xf32>, vector<128x50xf32> -> vector<128x50xf32>
    %97 = arith.addf %96, %5 : vector<128x50xf32>
    %c2176_97 = arith.constant 2176 : index
    %c0_98 = arith.constant 0 : index
    %98 = vector.load %arg14[%c2176_97, %c0_98] : memref<3200x50xf32, #tpu.memory_space<vmem>>, vector<128x50xf32>
    tpu.vector_store %arg14[%c2176_97, %c0_98], %97 {strides = array<i32>} : memref<3200x50xf32, #tpu.memory_space<vmem>>, vector<128x50xf32>,
    %c0_99 = arith.constant 0 : index
    %c2304 = arith.constant 2304 : index
    %c0_100 = arith.constant 0 : index
    %99 = vector.load %arg3[%c0_99, %c2304, %c0_100] : memref<1x3200x8xf32, #tpu.memory_space<vmem>>, vector<1x128x8xf32>
    %100 = vector.shape_cast %99 : vector<1x128x8xf32> to vector<128x8xf32>
    %cst_101 = arith.constant dense<0.000000e+00> : vector<128x50xf32>
    %101 = tpu.matmul %100, %2, %cst_101 {dimension_numbers = #tpu.dot_dimension_numbers<[1], [0], [0], [1], [0, 0, 1, 1], [], []>} : vector<128x8xf32>, vector<8x50xf32>, vector<128x50xf32> -> vector<128x50xf32>
    %102 = arith.addf %101, %5 : vector<128x50xf32>
    %c2304_102 = arith.constant 2304 : index
    %c0_103 = arith.constant 0 : index
    %103 = vector.load %arg14[%c2304_102, %c0_103] : memref<3200x50xf32, #tpu.memory_space<vmem>>, vector<128x50xf32>
    tpu.vector_store %arg14[%c2304_102, %c0_103], %102 {strides = array<i32>} : memref<3200x50xf32, #tpu.memory_space<vmem>>, vector<128x50xf32>,
    %c0_104 = arith.constant 0 : index
    %c2432 = arith.constant 2432 : index
    %c0_105 = arith.constant 0 : index
    %104 = vector.load %arg3[%c0_104, %c2432, %c0_105] : memref<1x3200x8xf32, #tpu.memory_space<vmem>>, vector<1x128x8xf32>
    %105 = vector.shape_cast %104 : vector<1x128x8xf32> to vector<128x8xf32>
    %cst_106 = arith.constant dense<0.000000e+00> : vector<128x50xf32>
    %106 = tpu.matmul %105, %2, %cst_106 {dimension_numbers = #tpu.dot_dimension_numbers<[1], [0], [0], [1], [0, 0, 1, 1], [], []>} : vector<128x8xf32>, vector<8x50xf32>, vector<128x50xf32> -> vector<128x50xf32>
    %107 = arith.addf %106, %5 : vector<128x50xf32>
    %c2432_107 = arith.constant 2432 : index
    %c0_108 = arith.constant 0 : index
    %108 = vector.load %arg14[%c2432_107, %c0_108] : memref<3200x50xf32, #tpu.memory_space<vmem>>, vector<128x50xf32>
    tpu.vector_store %arg14[%c2432_107, %c0_108], %107 {strides = array<i32>} : memref<3200x50xf32, #tpu.memory_space<vmem>>, vector<128x50xf32>,
    %c0_109 = arith.constant 0 : index
    %c2560 = arith.constant 2560 : index
    %c0_110 = arith.constant 0 : index
    %109 = vector.load %arg3[%c0_109, %c2560, %c0_110] : memref<1x3200x8xf32, #tpu.memory_space<vmem>>, vector<1x128x8xf32>
    %110 = vector.shape_cast %109 : vector<1x128x8xf32> to vector<128x8xf32>
    %cst_111 = arith.constant dense<0.000000e+00> : vector<128x50xf32>
    %111 = tpu.matmul %110, %2, %cst_111 {dimension_numbers = #tpu.dot_dimension_numbers<[1], [0], [0], [1], [0, 0, 1, 1], [], []>} : vector<128x8xf32>, vector<8x50xf32>, vector<128x50xf32> -> vector<128x50xf32>
    %112 = arith.addf %111, %5 : vector<128x50xf32>
    %c2560_112 = arith.constant 2560 : index
    %c0_113 = arith.constant 0 : index
    %113 = vector.load %arg14[%c2560_112, %c0_113] : memref<3200x50xf32, #tpu.memory_space<vmem>>, vector<128x50xf32>
    tpu.vector_store %arg14[%c2560_112, %c0_113], %112 {strides = array<i32>} : memref<3200x50xf32, #tpu.memory_space<vmem>>, vector<128x50xf32>,
    %c0_114 = arith.constant 0 : index
    %c2688 = arith.constant 2688 : index
    %c0_115 = arith.constant 0 : index
    %114 = vector.load %arg3[%c0_114, %c2688, %c0_115] : memref<1x3200x8xf32, #tpu.memory_space<vmem>>, vector<1x128x8xf32>
    %115 = vector.shape_cast %114 : vector<1x128x8xf32> to vector<128x8xf32>
    %cst_116 = arith.constant dense<0.000000e+00> : vector<128x50xf32>
    %116 = tpu.matmul %115, %2, %cst_116 {dimension_numbers = #tpu.dot_dimension_numbers<[1], [0], [0], [1], [0, 0, 1, 1], [], []>} : vector<128x8xf32>, vector<8x50xf32>, vector<128x50xf32> -> vector<128x50xf32>
    %117 = arith.addf %116, %5 : vector<128x50xf32>
    %c2688_117 = arith.constant 2688 : index
    %c0_118 = arith.constant 0 : index
    %118 = vector.load %arg14[%c2688_117, %c0_118] : memref<3200x50xf32, #tpu.memory_space<vmem>>, vector<128x50xf32>
    tpu.vector_store %arg14[%c2688_117, %c0_118], %117 {strides = array<i32>} : memref<3200x50xf32, #tpu.memory_space<vmem>>, vector<128x50xf32>,
    %c0_119 = arith.constant 0 : index
    %c2816 = arith.constant 2816 : index
    %c0_120 = arith.constant 0 : index
    %119 = vector.load %arg3[%c0_119, %c2816, %c0_120] : memref<1x3200x8xf32, #tpu.memory_space<vmem>>, vector<1x128x8xf32>
    %120 = vector.shape_cast %119 : vector<1x128x8xf32> to vector<128x8xf32>
    %cst_121 = arith.constant dense<0.000000e+00> : vector<128x50xf32>
    %121 = tpu.matmul %120, %2, %cst_121 {dimension_numbers = #tpu.dot_dimension_numbers<[1], [0], [0], [1], [0, 0, 1, 1], [], []>} : vector<128x8xf32>, vector<8x50xf32>, vector<128x50xf32> -> vector<128x50xf32>
    %122 = arith.addf %121, %5 : vector<128x50xf32>
    %c2816_122 = arith.constant 2816 : index
    %c0_123 = arith.constant 0 : index
    %123 = vector.load %arg14[%c2816_122, %c0_123] : memref<3200x50xf32, #tpu.memory_space<vmem>>, vector<128x50xf32>
    tpu.vector_store %arg14[%c2816_122, %c0_123], %122 {strides = array<i32>} : memref<3200x50xf32, #tpu.memory_space<vmem>>, vector<128x50xf32>,
    %c0_124 = arith.constant 0 : index
    %c2944 = arith.constant 2944 : index
    %c0_125 = arith.constant 0 : index
    %124 = vector.load %arg3[%c0_124, %c2944, %c0_125] : memref<1x3200x8xf32, #tpu.memory_space<vmem>>, vector<1x128x8xf32>
    %125 = vector.shape_cast %124 : vector<1x128x8xf32> to vector<128x8xf32>
    %cst_126 = arith.constant dense<0.000000e+00> : vector<128x50xf32>
    %126 = tpu.matmul %125, %2, %cst_126 {dimension_numbers = #tpu.dot_dimension_numbers<[1], [0], [0], [1], [0, 0, 1, 1], [], []>} : vector<128x8xf32>, vector<8x50xf32>, vector<128x50xf32> -> vector<128x50xf32>
    %127 = arith.addf %126, %5 : vector<128x50xf32>
    %c2944_127 = arith.constant 2944 : index
    %c0_128 = arith.constant 0 : index
    %128 = vector.load %arg14[%c2944_127, %c0_128] : memref<3200x50xf32, #tpu.memory_space<vmem>>, vector<128x50xf32>
    tpu.vector_store %arg14[%c2944_127, %c0_128], %127 {strides = array<i32>} : memref<3200x50xf32, #tpu.memory_space<vmem>>, vector<128x50xf32>,
    %c0_129 = arith.constant 0 : index
    %c3072 = arith.constant 3072 : index
    %c0_130 = arith.constant 0 : index
    %129 = vector.load %arg3[%c0_129, %c3072, %c0_130] : memref<1x3200x8xf32, #tpu.memory_space<vmem>>, vector<1x128x8xf32>
    %130 = vector.shape_cast %129 : vector<1x128x8xf32> to vector<128x8xf32>
    %cst_131 = arith.constant dense<0.000000e+00> : vector<128x50xf32>
    %131 = tpu.matmul %130, %2, %cst_131 {dimension_numbers = #tpu.dot_dimension_numbers<[1], [0], [0], [1], [0, 0, 1, 1], [], []>} : vector<128x8xf32>, vector<8x50xf32>, vector<128x50xf32> -> vector<128x50xf32>
    %132 = arith.addf %131, %5 : vector<128x50xf32>
    %c3072_132 = arith.constant 3072 : index
    %c0_133 = arith.constant 0 : index
    %133 = vector.load %arg14[%c3072_132, %c0_133] : memref<3200x50xf32, #tpu.memory_space<vmem>>, vector<128x50xf32>
    tpu.vector_store %arg14[%c3072_132, %c0_133], %132 {strides = array<i32>} : memref<3200x50xf32, #tpu.memory_space<vmem>>, vector<128x50xf32>,
    %c0_134 = arith.constant 0 : index
    %c0_135 = arith.constant 0 : index
    %c0_136 = arith.constant 0 : index
    %134 = vector.load %arg3[%c0_134, %c0_135, %c0_136] : memref<1x3200x8xf32, #tpu.memory_space<vmem>>, vector<1x128x8xf32>
    %135 = vector.shape_cast %134 : vector<1x128x8xf32> to vector<128x8xf32>
    %c0_137 = arith.constant 0 : index
    %c0_138 = arith.constant 0 : index
    %136 = vector.load %arg4[%c0_137, %c0_138] : memref<8x50xf32, #tpu.memory_space<vmem>>, vector<8x50xf32>
    %cst_139 = arith.constant dense<0.000000e+00> : vector<128x50xf32>
    %137 = tpu.matmul %135, %136, %cst_139 {dimension_numbers = #tpu.dot_dimension_numbers<[1], [0], [0], [1], [0, 0, 1, 1], [], []>} : vector<128x8xf32>, vector<8x50xf32>, vector<128x50xf32> -> vector<128x50xf32>
    %c0_140 = arith.constant 0 : index
    %c0_141 = arith.constant 0 : index
    %138 = vector.load %arg5[%c0_140, %c0_141] : memref<1x50xf32, #tpu.memory_space<vmem>>, vector<1x50xf32>
    %139 = vector.shape_cast %138 : vector<1x50xf32> to vector<1x50xf32>
    %140 = vector.broadcast %139 : vector<1x50xf32> to vector<128x50xf32>
    %141 = arith.addf %137, %140 : vector<128x50xf32>
    %c0_i32 = arith.constant 0 : i32
    %c24_i32 = arith.constant 24 : i32
    %142 = arith.addi %c0_i32, %c24_i32 : i32
    %c1_i32 = arith.constant 1 : i32
    %143 = scf.for %arg15 = %c0_i32 to %142 step %c1_i32 iter_args(%arg16 = %141) -> (vector<128x50xf32>)  : i32 {
      %c4_i32 = arith.constant 4 : i32
      %150 = arith.muli %c4_i32, %arg15 : i32
      %151 = arith.index_cast %150 : i32 to index
      %152 = memref.load %arg1[%151] : memref<96xi32, #tpu.memory_space<smem>>
      %c1_i32_150 = arith.constant 1 : i32
      %153 = arith.addi %150, %c1_i32_150 : i32
      %154 = arith.index_cast %153 : i32 to index
      %155 = memref.load %arg1[%154] : memref<96xi32, #tpu.memory_space<smem>>
      %c2_i32 = arith.constant 2 : i32
      %156 = arith.addi %150, %c2_i32 : i32
      %157 = arith.index_cast %156 : i32 to index
      %158 = memref.load %arg1[%157] : memref<96xi32, #tpu.memory_space<smem>>
      %c3_i32 = arith.constant 3 : i32
      %159 = arith.addi %150, %c3_i32 : i32
      %160 = arith.index_cast %159 : i32 to index
      %161 = memref.load %arg1[%160] : memref<96xi32, #tpu.memory_space<smem>>
      %162 = arith.index_cast %arg15 : i32 to index
      %163 = memref.load %arg2[%162] : memref<24xf32, #tpu.memory_space<smem>>
      %c128_i32 = arith.constant 128 : i32
      %164 = arith.muli %152, %c128_i32 : i32
      %165 = tpu.assume_multiple %164, 128 : i32
      %166 = arith.index_cast %165 : i32 to index
      %c0_151 = arith.constant 0 : index
      %167 = vector.load %arg14[%166, %c0_151] : memref<3200x50xf32, #tpu.memory_space<vmem>>, vector<128x50xf32>
      %cst_152 = arith.constant dense<0.000000e+00> : vector<128x50xf32>
      %168 = tpu.matmul %arg16, %0, %cst_152 {dimension_numbers = #tpu.dot_dimension_numbers<[1], [0], [0], [1], [0, 0, 1, 1], [], []>} : vector<128x50xf32>, vector<50x50xf32>, vector<128x50xf32> -> vector<128x50xf32>
      %169 = arith.addf %168, %167 : vector<128x50xf32>
      %170 = math.tanh %169 : vector<128x50xf32>
      %cst_153 = arith.constant dense<0.000000e+00> : vector<128x50xf32>
      %171 = tpu.matmul %170, %1, %cst_153 {dimension_numbers = #tpu.dot_dimension_numbers<[1], [0], [0], [1], [0, 0, 1, 1], [], []>} : vector<128x50xf32>, vector<50x50xf32>, vector<128x50xf32> -> vector<128x50xf32>
      %172 = arith.addf %171, %8 : vector<128x50xf32>
      %c128_i32_154 = arith.constant 128 : i32
      %173 = arith.muli %155, %c128_i32_154 : i32
      %174 = tpu.assume_multiple %173, 128 : i32
      %175 = arith.index_cast %174 : i32 to index
      %c0_155 = arith.constant 0 : index
      %176 = vector.load %arg14[%175, %c0_155] : memref<3200x50xf32, #tpu.memory_space<vmem>>, vector<128x50xf32>
      %cst_156 = arith.constant 0.333333343 : f32
      %177 = arith.mulf %163, %cst_156 : f32
      %178 = vector.broadcast %177 : f32 to vector<128x50xf32>
      %179 = arith.mulf %178, %172 : vector<128x50xf32>
      %180 = arith.addf %arg16, %179 : vector<128x50xf32>
      %cst_157 = arith.constant dense<0.000000e+00> : vector<128x50xf32>
      %181 = tpu.matmul %180, %0, %cst_157 {dimension_numbers = #tpu.dot_dimension_numbers<[1], [0], [0], [1], [0, 0, 1, 1], [], []>} : vector<128x50xf32>, vector<50x50xf32>, vector<128x50xf32> -> vector<128x50xf32>
      %182 = arith.addf %181, %176 : vector<128x50xf32>
      %183 = math.tanh %182 : vector<128x50xf32>
      %cst_158 = arith.constant dense<0.000000e+00> : vector<128x50xf32>
      %184 = tpu.matmul %183, %1, %cst_158 {dimension_numbers = #tpu.dot_dimension_numbers<[1], [0], [0], [1], [0, 0, 1, 1], [], []>} : vector<128x50xf32>, vector<50x50xf32>, vector<128x50xf32> -> vector<128x50xf32>
      %185 = arith.addf %184, %8 : vector<128x50xf32>
      %cst_159 = arith.constant 3.000000e+00 : f32
      %186 = vector.broadcast %cst_159 : f32 to vector<128x50xf32>
      %187 = arith.mulf %186, %185 : vector<128x50xf32>
      %188 = arith.addf %172, %187 : vector<128x50xf32>
      %189 = arith.subf %172, %185 : vector<128x50xf32>
      %c128_i32_160 = arith.constant 128 : i32
      %190 = arith.muli %158, %c128_i32_160 : i32
      %191 = tpu.assume_multiple %190, 128 : i32
      %192 = arith.index_cast %191 : i32 to index
      %c0_161 = arith.constant 0 : index
      %193 = vector.load %arg14[%192, %c0_161] : memref<3200x50xf32, #tpu.memory_space<vmem>>, vector<128x50xf32>
      %cst_162 = arith.constant 0.333333343 : f32
      %194 = vector.broadcast %cst_162 : f32 to vector<128x50xf32>
      %195 = arith.mulf %194, %172 : vector<128x50xf32>
      %196 = arith.subf %185, %195 : vector<128x50xf32>
      %197 = vector.broadcast %163 : f32 to vector<128x50xf32>
      %198 = arith.mulf %197, %196 : vector<128x50xf32>
      %199 = arith.addf %arg16, %198 : vector<128x50xf32>
      %cst_163 = arith.constant dense<0.000000e+00> : vector<128x50xf32>
      %200 = tpu.matmul %199, %0, %cst_163 {dimension_numbers = #tpu.dot_dimension_numbers<[1], [0], [0], [1], [0, 0, 1, 1], [], []>} : vector<128x50xf32>, vector<50x50xf32>, vector<128x50xf32> -> vector<128x50xf32>
      %201 = arith.addf %200, %193 : vector<128x50xf32>
      %202 = math.tanh %201 : vector<128x50xf32>
      %cst_164 = arith.constant dense<0.000000e+00> : vector<128x50xf32>
      %203 = tpu.matmul %202, %1, %cst_164 {dimension_numbers = #tpu.dot_dimension_numbers<[1], [0], [0], [1], [0, 0, 1, 1], [], []>} : vector<128x50xf32>, vector<50x50xf32>, vector<128x50xf32> -> vector<128x50xf32>
      %204 = arith.addf %203, %8 : vector<128x50xf32>
      %cst_165 = arith.constant 3.000000e+00 : f32
      %205 = vector.broadcast %cst_165 : f32 to vector<128x50xf32>
      %206 = arith.mulf %205, %204 : vector<128x50xf32>
      %207 = arith.addf %188, %206 : vector<128x50xf32>
      %c128_i32_166 = arith.constant 128 : i32
      %208 = arith.muli %161, %c128_i32_166 : i32
      %209 = tpu.assume_multiple %208, 128 : i32
      %210 = arith.index_cast %209 : i32 to index
      %c0_167 = arith.constant 0 : index
      %211 = vector.load %arg14[%210, %c0_167] : memref<3200x50xf32, #tpu.memory_space<vmem>>, vector<128x50xf32>
      %212 = arith.addf %189, %204 : vector<128x50xf32>
      %213 = vector.broadcast %163 : f32 to vector<128x50xf32>
      %214 = arith.mulf %213, %212 : vector<128x50xf32>
      %215 = arith.addf %arg16, %214 : vector<128x50xf32>
      %cst_168 = arith.constant dense<0.000000e+00> : vector<128x50xf32>
      %216 = tpu.matmul %215, %0, %cst_168 {dimension_numbers = #tpu.dot_dimension_numbers<[1], [0], [0], [1], [0, 0, 1, 1], [], []>} : vector<128x50xf32>, vector<50x50xf32>, vector<128x50xf32> -> vector<128x50xf32>
      %217 = arith.addf %216, %211 : vector<128x50xf32>
      %218 = math.tanh %217 : vector<128x50xf32>
      %cst_169 = arith.constant dense<0.000000e+00> : vector<128x50xf32>
      %219 = tpu.matmul %218, %1, %cst_169 {dimension_numbers = #tpu.dot_dimension_numbers<[1], [0], [0], [1], [0, 0, 1, 1], [], []>} : vector<128x50xf32>, vector<50x50xf32>, vector<128x50xf32> -> vector<128x50xf32>
      %220 = arith.addf %219, %8 : vector<128x50xf32>
      %cst_170 = arith.constant 1.250000e-01 : f32
      %221 = arith.mulf %163, %cst_170 : f32
      %222 = arith.addf %207, %220 : vector<128x50xf32>
      %223 = vector.broadcast %221 : f32 to vector<128x50xf32>
      %224 = arith.mulf %223, %222 : vector<128x50xf32>
      %225 = arith.addf %arg16, %224 : vector<128x50xf32>
      scf.yield %225 : vector<128x50xf32>
    }
    %c24_i32_142 = arith.constant 24 : i32
    %c0_143 = arith.constant 0 : index
    %c0_144 = arith.constant 0 : index
    %144 = vector.load %arg11[%c0_143, %c0_144] : memref<50x1xf32, #tpu.memory_space<vmem>>, vector<50x1xf32>
    %cst_145 = arith.constant dense<0.000000e+00> : vector<128x1xf32>
    %145 = tpu.matmul %143, %144, %cst_145 {dimension_numbers = #tpu.dot_dimension_numbers<[1], [0], [0], [1], [0, 0, 1, 1], [], []>} : vector<128x50xf32>, vector<50x1xf32>, vector<128x1xf32> -> vector<128x1xf32>
    %c0_146 = arith.constant 0 : index
    %c0_147 = arith.constant 0 : index
    %146 = vector.load %arg12[%c0_146, %c0_147] : memref<1x1xf32, #tpu.memory_space<vmem>>, vector<1x1xf32>
    %147 = vector.broadcast %146 : vector<1x1xf32> to vector<128x1xf32>
    %148 = arith.addf %145, %147 : vector<128x1xf32>
    %c0_148 = arith.constant 0 : index
    %c0_149 = arith.constant 0 : index
    %149 = vector.load %arg13[%c0_148, %c0_149] : memref<128x1xf32, #tpu.memory_space<vmem>>, vector<128x1xf32>
    tpu.vector_store %arg13[%c0_148, %c0_149], %148 {strides = array<i32>} : memref<128x1xf32, #tpu.memory_space<vmem>>, vector<128x1xf32>,
    return
  }
  func.func @transform_0(%arg0: i32) -> i32 {
    %c0_i32 = arith.constant 0 : i32
    %c0_i32_0 = arith.constant 0 : i32
    return %c0_i32 : i32
  }
  func.func @transform_1(%arg0: i32) -> i32 {
    %c0_i32 = arith.constant 0 : i32
    %c0_i32_0 = arith.constant 0 : i32
    return %c0_i32 : i32
  }
  func.func @transform_2(%arg0: i32) -> (i32, i32, i32) {
    %c0_i32 = arith.constant 0 : i32
    %c0_i32_0 = arith.constant 0 : i32
    %c0_i32_1 = arith.constant 0 : i32
    return %arg0, %c0_i32, %c0_i32_0 : i32, i32, i32
  }
  func.func @transform_3(%arg0: i32) -> (i32, i32) {
    %c0_i32 = arith.constant 0 : i32
    %c0_i32_0 = arith.constant 0 : i32
    %c0_i32_1 = arith.constant 0 : i32
    return %c0_i32, %c0_i32_0 : i32, i32
  }
  func.func @transform_4(%arg0: i32) -> (i32, i32) {
    %c0_i32 = arith.constant 0 : i32
    %c0_i32_0 = arith.constant 0 : i32
    %c0_i32_1 = arith.constant 0 : i32
    return %c0_i32, %c0_i32_0 : i32, i32
  }
  func.func @transform_5(%arg0: i32) -> (i32, i32) {
    %c0_i32 = arith.constant 0 : i32
    %c0_i32_0 = arith.constant 0 : i32
    %c0_i32_1 = arith.constant 0 : i32
    return %c0_i32, %c0_i32_0 : i32, i32
  }
  func.func @transform_6(%arg0: i32) -> (i32, i32) {
    %c0_i32 = arith.constant 0 : i32
    %c0_i32_0 = arith.constant 0 : i32
    %c0_i32_1 = arith.constant 0 : i32
    return %c0_i32, %c0_i32_0 : i32, i32
  }
  func.func @transform_7(%arg0: i32) -> (i32, i32) {
    %c0_i32 = arith.constant 0 : i32
    %c0_i32_0 = arith.constant 0 : i32
    %c0_i32_1 = arith.constant 0 : i32
    return %c0_i32, %c0_i32_0 : i32, i32
  }
  func.func @transform_8(%arg0: i32) -> (i32, i32) {
    %c0_i32 = arith.constant 0 : i32
    %c0_i32_0 = arith.constant 0 : i32
    %c0_i32_1 = arith.constant 0 : i32
    return %c0_i32, %c0_i32_0 : i32, i32
  }
  func.func @transform_9(%arg0: i32) -> (i32, i32) {
    %c0_i32 = arith.constant 0 : i32
    %c0_i32_0 = arith.constant 0 : i32
    %c0_i32_1 = arith.constant 0 : i32
    return %c0_i32, %c0_i32_0 : i32, i32
  }
  func.func @transform_10(%arg0: i32) -> (i32, i32) {
    %c0_i32 = arith.constant 0 : i32
    %c0_i32_0 = arith.constant 0 : i32
    %c0_i32_1 = arith.constant 0 : i32
    return %c0_i32, %c0_i32_0 : i32, i32
  }
  func.func @transform_11(%arg0: i32) -> (i32, i32) {
    %c0_i32 = arith.constant 0 : i32
    %c0_i32_0 = arith.constant 0 : i32
    %c0_i32_1 = arith.constant 0 : i32
    return %c0_i32, %c0_i32_0 : i32, i32
  }
  func.func @transform_12(%arg0: i32) -> (i32, i32) {
    %c0_i32 = arith.constant 0 : i32
    %c0_i32_0 = arith.constant 0 : i32
    return %arg0, %c0_i32 : i32, i32
  }
}

</mosaic_0001>

<bundles_post_ra>
// kernel: tpu_custom_call.1
= control target key start
LH: loop header
LB: loop body
LE: loop exit
PB: predicated region body
PF: predicated region fallthrough
CT: control target
= control target key end

     0   :  { %s14805_s0 = inlined_call_operand.vmem [shape: s32[96], index: 0, kind: input, shape index: {}]   ;;  %s14806_s1 = inlined_call_operand.vmem [shape: f32[24], index: 1, kind: input, shape index: {}]   ;;  %s14807_s2 = inlined_call_operand.vmem [shape: f32[1,3200,8], index: 2, kind: input, shape index: {}]   ;;  %s14808_s3 = inlined_call_operand.vmem [shape: f32[8,50], index: 3, kind: input, shape index: {}]   ;;  %s14809_s4 = inlined_call_operand.vmem [shape: f32[1,50], index: 4, kind: input, shape index: {}]   ;;  %s14810_s5 = inlined_call_operand.vmem [shape: f32[50,50], index: 5, kind: input, shape index: {}]   ;;  %s14811_s6 = inlined_call_operand.vmem [shape: f32[8,50], index: 6, kind: input, shape index: {}]   ;;  %s14812_s7 = inlined_call_operand.vmem [shape: f32[1,50], index: 7, kind: input, shape index: {}]   ;;  %s14813_s8 = inlined_call_operand.vmem [shape: f32[50,50], index: 8, kind: input, shape index: {}]   ;;  %s14814_s9 = inlined_call_operand.vmem [shape: f32[1,50], index: 9, kind: input, shape index: {}]   ;;  %s14815_s10 = inlined_call_operand.vmem [shape: f32[50,1], index: 10, kind: input, shape index: {}]   ;;  %s14816_s11 = inlined_call_operand.<no memory space> [shape: f32[1,1], index: 11, kind: input, shape index: {}]   ;;  %s14817_s12 = inlined_call_operand.vmem [shape: f32[128,1], index: 12, kind: output, shape index: {}]  }
   0x1   :  { %v17_v0 = vstv %s14816_s11 }
   0x2   :  { %18 = vst [vmem:[#allocation3] sm:$0x1] %v17_v0 }
   0x3   :  { %19 = vsyncpa [#allocation5], 0  ;;  %s27_s25 = sshll.u32 %s14805_s0, 4  ;;  %s28_s25 = int_to_ptr.vmem [resolvable:$true] %s27_s25 }
   0x4   :  { %20 = vsyncpa [#allocation7], 0  ;;  %s37_s28 = sshll.u32 %s14806_s1, 4  ;;  %s10863_s29 = scalar_lea.vmem %s28_s25, 16  ;;  %s38_s28 = int_to_ptr.vmem [resolvable:$true] %s37_s28 }
   0x5   :  { %p10864_p0 = scmp.ne.s32.totalorder %s28_s25, %s10863_s29  ;;  %p10868_p1 = scmp.lt.s32.totalorder %s28_s25, %s28_s25 }
   0x6   :  { %p10869_p2 = scmp.lt.s32.totalorder %s10863_s29, %s10863_s29 }
   0x8   :  { %p10870_p3 = por %p10869_p2, %p10868_p1 }
   0xa   :  { %p10871_p4 = pnand %p10870_p3, %p10864_p0 }
   0xc   :  { %10874 = shalt.err (!%p10871_p4)
}
   0xd   :  { %s11027_s11 = smov [#allocation4]   ;;  %s10875_s30 = scalar_lea.vmem %s38_s28, 16 }
   0xe   :  { %30 = dma.vmem_to_smem %s28_s25, 16, %s11027_s11, [#allocation5]  }
   0xf   :  { %p10876_p5 = scmp.ne.s32.totalorder %s38_s28, %s10875_s30  ;;  %p10880_p6 = scmp.lt.s32.totalorder %s38_s28, %s38_s28 }
  0x10   :  { %p10881_p7 = scmp.lt.s32.totalorder %s10875_s30, %s10875_s30 }
  0x12   :  { %p10882_p8 = por %p10881_p7, %p10880_p6 }
  0x14   :  { %p10883_p9 = pnand %p10882_p8, %p10876_p5 }
  0x16   :  { %10886 = shalt.err (!%p10883_p9)
}
  0x17   :  { %s11028_s0 = smov [#allocation6]  }
  0x18   :  { %40 = dma.vmem_to_smem %s38_s28, 16, %s11028_s0, [#allocation7]  }
  0x19   :  { %10955 = dma.done.wait [#allocation5], 16  }
  0x1a   :  { %10956 = vsyncadd [#allocation5], 4294967280 }
  0x1b   :  { %10957 = dma.done.wait [#allocation7], 16  }
  0x1c   :  { %10958 = vsyncadd [#allocation7], 4294967280 }
  0x1d   :  { %67 = sfence }
  0x1e   :  { %v11106_v1 = vld [vmem:[%s14810_s5] sm:$0xff]  ;;  %v11111_v2 = vld [vmem:[%s14810_s5 + $0x8] sm:$0xff]  ;;  %v11116_v3 = vld [vmem:[%s14810_s5 + $0x10] sm:$0xff]  ;;  %vm113_vm0 = vcmask 64512   ;;  %vm307_vm1 = vcmask 408576  }
  0x1f   :  { %14833 = vst [vmem:[#allocation10_spill] sm:$0xff] %v11106_v1  ;;  %14834 = vst [vmem:[#allocation11_spill] sm:$0xff] %v11111_v2  ;;  %v11121_v4 = vld [vmem:[%s14810_s5 + $0x18] sm:$0xff]  ;;  %v11126_v5 = vld [vmem:[%s14810_s5 + $0x20] sm:$0xff] }
  0x20   :  { %14835 = vst [vmem:[#allocation12_spill] sm:$0xff] %v11116_v3  ;;  %14836 = vst [vmem:[#allocation13_spill] sm:$0xff] %v11121_v4  ;;  %v11131_v6 = vld [vmem:[%s14810_s5 + $0x28] sm:$0xff]  ;;  %v11136_v7 = vld [vmem:[%s14810_s5 + $0x30] sm:$0x3] }
  0x21   :  { %14837 = vst [vmem:[#allocation14_spill] sm:$0xff] %v11126_v5  ;;  %14838 = vst [vmem:[#allocation15_spill] sm:$0xff] %v11131_v6  ;;  %v11141_v8 = vld [vmem:[%s14813_s8] sm:$0xff]  ;;  %v11146_v9 = vld [vmem:[%s14813_s8 + $0x8] sm:$0xff] }
  0x22   :  { %14839 = vst [vmem:[#allocation16_spill] sm:$0xff] %v11136_v7  ;;  %14840 = vst [vmem:[#allocation17_spill] sm:$0xff] %v11141_v8  ;;  %v11151_v10 = vld [vmem:[%s14813_s8 + $0x10] sm:$0xff]  ;;  %v11156_v11 = vld [vmem:[%s14813_s8 + $0x18] sm:$0xff] }
  0x23   :  { %14841 = vst [vmem:[#allocation18_spill] sm:$0xff] %v11146_v9  ;;  %14842 = vst [vmem:[#allocation19_spill] sm:$0xff] %v11151_v10  ;;  %v11161_v12 = vld [vmem:[%s14813_s8 + $0x20] sm:$0xff]  ;;  %v11166_v13 = vld [vmem:[%s14813_s8 + $0x28] sm:$0xff] }
  0x24   :  { %14843 = vst [vmem:[#allocation20_spill] sm:$0xff] %v11156_v11  ;;  %14844 = vst [vmem:[#allocation21_spill] sm:$0xff] %v11161_v12  ;;  %v11171_v14 = vld [vmem:[%s14813_s8 + $0x30] sm:$0x3]  ;;  %v11176_v15 = vld [vmem:[%s14811_s6] sm:$0xff] }
  0x25   :  { %14845 = vst [vmem:[#allocation22_spill] sm:$0xff] %v11166_v13  ;;  %v11181_v16 = vld [vmem:[%s14814_s9] ss:$0 sm:$0xff]  ;;  %9458 = vmatprep.subr.mxu0 %v11176_v15  ;;  %v98_v18 = vld [vmem:[%s14807_s2 + $0x8] sm:$0xff]  ;;  %9484 = vmatprep.subr.mxu1 %v11176_v15  ;;  %v99_v21 = vld [vmem:[%s14807_s2 + $0x10] sm:$0xff] }
  0x26   :  { %v97_v17 = vld [vmem:[%s14807_s2] sm:$0xff]  ;;  %9459 = vmatpush3.msra.mxu0 %v11176_v15  ;;  %v325_v20 = vld [vmem:[%s14807_s2 + $0x88] sm:$0xff]  ;;  %9485 = vmatpush3.msra.mxu1 %v11176_v15  ;;  %v100_v22 = vld [vmem:[%s14807_s2 + $0x18] sm:$0xff] }
  0x27   :  { %9460 = vmatprep.mubr.msk.f32.mxu0 %vm113_vm0, %v97_v17  ;;  %v324_v19 = vld [vmem:[%s14807_s2 + $0x80] sm:$0xff]  ;;  %9510 = vmatprep.subr.mxu0 %v11176_v15  ;;  %v326_v23 = vld [vmem:[%s14807_s2 + $0x90] sm:$0xff]  ;;  %v327_v25 = vld [vmem:[%s14807_s2 + $0x98] sm:$0xff] }
  0x28   :  { %9461 = vmatmul.mubr.msk.f32.vlgmr.msra.gmra.mrb[0].mxu0 %vm113_vm0, %v98_v18  ;;  %9486 = vmatprep.mubr.msk.f32.mxu1 %vm113_vm0, %v324_v19  ;;  %v101_v24 = vld [vmem:[%s14807_s2 + $0x20] sm:$0xff]  ;;  %v102_v27 = vld [vmem:[%s14807_s2 + $0x28] sm:$0xff]  ;;  %v103_v28 = vld [vmem:[%s14807_s2 + $0x30] sm:$0xff] }
  0x29   :  { %9511 = vmatpush3.msra.mxu0 %v11176_v15  ;;  %9487 = vmatmul.mubr.msk.f32.vlgmr.msra.gmra.mrb[0].mxu1 %vm113_vm0, %v325_v20  ;;  %v328_v26 = vld [vmem:[%s14807_s2 + $0xa0] sm:$0xff]  ;;  %v329_v29 = vld [vmem:[%s14807_s2 + $0xa8] sm:$0xff]  ;;  %v330_v30 = vld [vmem:[%s14807_s2 + $0xb0] sm:$0xff] }
  0x2a   :  { %9536 = vmatprep.subr.mxu1 %v11176_v15  ;;  %9463 = vmatprep.mubr.msk.f32.mxu0 %vm113_vm0, %v99_v21  ;;  %v104_v31 = vld [vmem:[%s14807_s2 + $0x38] sm:$0xff]  ;;  %v105_v32 = vld [vmem:[%s14807_s2 + $0x40] sm:$0xff]  ;;  %v106_v35 = vld [vmem:[%s14807_s2 + $0x48] sm:$0xff] }
  0x2b   :  { %9537 = vmatpush3.msra.mxu1 %v11176_v15  ;;  %9489 = vmatprep.mubr.msk.f32.mxu1 %vm113_vm0, %v326_v23  ;;  %v331_v33 = vld [vmem:[%s14807_s2 + $0xb8] sm:$0xff]  ;;  %v332_v34 = vld [vmem:[%s14807_s2 + $0xc0] sm:$0xff]  ;;  %v107_v36 = vld [vmem:[%s14807_s2 + $0x50] sm:$0xff] }
  0x2c   :  { %9464 = vmatmul.mubr.msk.f32.gmra.mrb[2].mxu0 %vm113_vm0, %v100_v22  ;;  %9562 = vmatprep.subr.mxu0 %v11176_v15  ;;  %v333_v37 = vld [vmem:[%s14807_s2 + $0xc8] sm:$0xff]  ;;  %v334_v38 = vld [vmem:[%s14807_s2 + $0xd0] sm:$0xff]  ;;  %v108_v39 = vld [vmem:[%s14807_s2 + $0x58] sm:$0xff] }
  0x2d   :  { %9466 = vmatprep.mubr.msk.f32.mxu0 %vm113_vm0, %v101_v24  ;;  %9490 = vmatmul.mubr.msk.f32.gmra.mrb[2].mxu1 %vm113_vm0, %v327_v25  ;;  %v109_v40 = vld [vmem:[%s14807_s2 + $0x60] sm:$0xff]  ;;  %v335_v41 = vld [vmem:[%s14807_s2 + $0xd8] sm:$0xff]  ;;  %v110_v43 = vld [vmem:[%s14807_s2 + $0x68] sm:$0xff] }
  0x2e   :  { %9492 = vmatprep.mubr.msk.f32.mxu1 %vm113_vm0, %v328_v26  ;;  %9588 = vmatprep.subr.mxu1 %v11176_v15  ;;  %v336_v42 = vld [vmem:[%s14807_s2 + $0xe0] sm:$0xff]  ;;  %v111_v44 = vld [vmem:[%s14807_s2 + $0x70] sm:$0xff]  ;;  %v337_v45 = vld [vmem:[%s14807_s2 + $0xe8] sm:$0xff] }
  0x2f   :  { %v338_v46 = vld [vmem:[%s14807_s2 + $0xf0] sm:$0xff]  ;;  %v112_v47 = vld [vmem:[%s14807_s2 + $0x78] sm:$0xff]  ;;  %v549_v48 = vld [vmem:[%s14807_s2 + $0x100] sm:$0xff] }
  0x30   :  { %9467 = vmatmul.mubr.msk.f32.gmra.mrb[4].mxu0 %vm113_vm0, %v102_v27  ;;  %v339_v49 = vld [vmem:[%s14807_s2 + $0xf8] sm:$0xff]  ;;  %v774_v50 = vld [vmem:[%s14807_s2 + $0x180] sm:$0xff]  ;;  %v550_v51 = vld [vmem:[%s14807_s2 + $0x108] sm:$0xff] }
  0x31   :  { %9469 = vmatprep.mubr.msk.f32.mxu0 %vm113_vm0, %v103_v28  ;;  %9493 = vmatmul.mubr.msk.f32.gmra.mrb[4].mxu1 %vm113_vm0, %v329_v29  ;;  %v551_v52 = vld [vmem:[%s14807_s2 + $0x110] sm:$0xff]  ;;  %v775_v53 = vld [vmem:[%s14807_s2 + $0x188] sm:$0xff]  ;;  %v552_v55 = vld [vmem:[%s14807_s2 + $0x118] sm:$0xff] }
  0x32   :  { %9495 = vmatprep.mubr.msk.f32.mxu1 %vm113_vm0, %v330_v30  ;;  %v776_v54 = vld [vmem:[%s14807_s2 + $0x190] sm:$0xff]  ;;  %v553_v56 = vld [vmem:[%s14807_s2 + $0x120] sm:$0xff]  ;;  %v777_v57 = vld [vmem:[%s14807_s2 + $0x198] sm:$0xff] }
  0x33   :  { %v778_v58 = vld [vmem:[%s14807_s2 + $0x1a0] sm:$0xff]  ;;  %v554_v59 = vld [vmem:[%s14807_s2 + $0x128] sm:$0xff]  ;;  %v555_v60 = vld [vmem:[%s14807_s2 + $0x130] sm:$0xff] }
  0x34   :  { %9470 = vmatmul.mubr.msk.f32.gmra.mrb[6].mxu0 %vm113_vm0, %v104_v31  ;;  %v779_v61 = vld [vmem:[%s14807_s2 + $0x1a8] sm:$0xff]  ;;  %v780_v62 = vld [vmem:[%s14807_s2 + $0x1b0] sm:$0xff]  ;;  %v556_v63 = vld [vmem:[%s14807_s2 + $0x138] sm:$0xff] }
  0x35   :  { %9472 = vmatprep.mubr.msk.f32.mxu0 %vm113_vm0, %v105_v32  ;;  %9496 = vmatmul.mubr.msk.f32.gmra.mrb[6].mxu1 %vm113_vm0, %v331_v33  ;;  %v557_v0 = vld [vmem:[%s14807_s2 + $0x140] sm:$0xff]  ;;  %v781_v17 = vld [vmem:[%s14807_s2 + $0x1b8] sm:$0xff]  ;;  %v558_v19 = vld [vmem:[%s14807_s2 + $0x148] sm:$0xff] }
  0x36   :  { %9498 = vmatprep.mubr.msk.f32.mxu1 %vm113_vm0, %v332_v34  ;;  %v782_v18 = vld [vmem:[%s14807_s2 + $0x1c0] sm:$0xff]  ;;  %v559_v20 = vld [vmem:[%s14807_s2 + $0x150] sm:$0xff]  ;;  %v783_v21 = vld [vmem:[%s14807_s2 + $0x1c8] sm:$0xff] }
  0x37   :  { %v784_v22 = vld [vmem:[%s14807_s2 + $0x1d0] sm:$0xff]  ;;  %v560_v23 = vld [vmem:[%s14807_s2 + $0x158] sm:$0xff]  ;;  %v561_v24 = vld [vmem:[%s14807_s2 + $0x160] sm:$0xff] }
  0x38   :  { %9473 = vmatmul.mubr.msk.f32.gmra.mrb[8].mxu0 %vm113_vm0, %v106_v35  ;;  %v785_v25 = vld [vmem:[%s14807_s2 + $0x1d8] sm:$0xff]  ;;  %v786_v26 = vld [vmem:[%s14807_s2 + $0x1e0] sm:$0xff]  ;;  %v562_v27 = vld [vmem:[%s14807_s2 + $0x168] sm:$0xff] }
  0x39   :  { %9475 = vmatprep.mubr.msk.f32.mxu0 %vm113_vm0, %v107_v36  ;;  %9499 = vmatmul.mubr.msk.f32.gmra.mrb[8].mxu1 %vm113_vm0, %v333_v37  ;;  %v563_v28 = vld [vmem:[%s14807_s2 + $0x170] sm:$0xff]  ;;  %v787_v29 = vld [vmem:[%s14807_s2 + $0x1e8] sm:$0xff]  ;;  %v564_v31 = vld [vmem:[%s14807_s2 + $0x178] sm:$0xff] }
  0x3a   :  { %9501 = vmatprep.mubr.msk.f32.mxu1 %vm113_vm0, %v334_v38  ;;  %v788_v30 = vld [vmem:[%s14807_s2 + $0x1f0] sm:$0xff]  ;;  %v999_v32 = vld [vmem:[%s14807_s2 + $0x200] sm:$0xff]  ;;  %v789_v33 = vld [vmem:[%s14807_s2 + $0x1f8] sm:$0xff] }
  0x3b   :  { %v1224_v34 = vld [vmem:[%s14807_s2 + $0x280] sm:$0xff]  ;;  %v1000_v35 = vld [vmem:[%s14807_s2 + $0x208] sm:$0xff]  ;;  %v1001_v36 = vld [vmem:[%s14807_s2 + $0x210] sm:$0xff] }
  0x3c   :  { %9476 = vmatmul.mubr.msk.f32.gmra.mrb[10].mxu0 %vm113_vm0, %v108_v39  ;;  %v1225_v37 = vld [vmem:[%s14807_s2 + $0x288] sm:$0xff]  ;;  %v1226_v38 = vld [vmem:[%s14807_s2 + $0x290] sm:$0xff]  ;;  %v1002_v39 = vld [vmem:[%s14807_s2 + $0x218] sm:$0xff] }
  0x3d   :  { %9478 = vmatprep.mubr.msk.f32.mxu0 %vm113_vm0, %v109_v40  ;;  %9502 = vmatmul.mubr.msk.f32.gmra.mrb[10].mxu1 %vm113_vm0, %v335_v41  ;;  %v1003_v40 = vld [vmem:[%s14807_s2 + $0x220] sm:$0xff]  ;;  %v1227_v41 = vld [vmem:[%s14807_s2 + $0x298] sm:$0xff] }
  0x3e   :  { %9504 = vmatprep.mubr.msk.f32.mxu1 %vm113_vm0, %v336_v42  ;;  %v1228_v42 = vld [vmem:[%s14807_s2 + $0x2a0] sm:$0xff] }
  0x40   :  { %9479 = vmatmul.mubr.msk.f32.gmra.mrb[12].mxu0 %vm113_vm0, %v110_v43  ;;  %v1004_v43 = vld [vmem:[%s14807_s2 + $0x228] sm:$0xff] }
  0x41   :  { %9481 = vmatprep.mubr.msk.f32.mxu0 %vm113_vm0, %v111_v44  ;;  %9505 = vmatmul.mubr.msk.f32.gmra.mrb[12].mxu1 %vm113_vm0, %v337_v45  ;;  %v1005_v44 = vld [vmem:[%s14807_s2 + $0x230] sm:$0xff]  ;;  %v1229_v45 = vld [vmem:[%s14807_s2 + $0x2a8] sm:$0xff] }
  0x42   :  { %9507 = vmatprep.mubr.msk.f32.mxu1 %vm113_vm0, %v338_v46  ;;  %v1230_v46 = vld [vmem:[%s14807_s2 + $0x2b0] sm:$0xff] }
  0x44   :  { %9482 = vmatmul.mubr.msk.f32.gmra.mrb[14].mxu0 %vm113_vm0, %v112_v47  ;;  %v1006_v47 = vld [vmem:[%s14807_s2 + $0x238] sm:$0xff] }
  0x45   :  { %9512 = vmatprep.mubr.msk.f32.mxu0 %vm113_vm0, %v549_v48  ;;  %9508 = vmatmul.mubr.msk.f32.gmra.mrb[14].mxu1 %vm113_vm0, %v339_v49  ;;  %v1007_v48 = vld [vmem:[%s14807_s2 + $0x240] sm:$0xff]  ;;  %v1231_v49 = vld [vmem:[%s14807_s2 + $0x2b8] sm:$0xff] }
  0x46   :  { %9538 = vmatprep.mubr.msk.f32.mxu1 %vm113_vm0, %v774_v50  ;;  %v1232_v50 = vld [vmem:[%s14807_s2 + $0x2c0] sm:$0xff] }
  0x48   :  { %9513 = vmatmul.mubr.msk.f32.vlgmr.msra.gmra.mrb[16].mxu0 %vm113_vm0, %v550_v51  ;;  %v1008_v51 = vld [vmem:[%s14807_s2 + $0x248] sm:$0xff] }
  0x49   :  { %9563 = vmatpush3.msra.mxu0 %v11176_v15  ;;  %9515 = vmatprep.mubr.msk.f32.mxu0 %vm113_vm0, %v551_v52  ;;  %v1009_v52 = vld [vmem:[%s14807_s2 + $0x250] sm:$0xff] }
  0x4a   :  { %9539 = vmatmul.mubr.msk.f32.vlgmr.msra.gmra.mrb[16].mxu1 %vm113_vm0, %v775_v53  ;;  %9614 = vmatprep.subr.mxu0 %v11176_v15  ;;  %v1233_v53 = vld [vmem:[%s14807_s2 + $0x2c8] sm:$0xff] }
  0x4b   :  { %9589 = vmatpush3.msra.mxu1 %v11176_v15  ;;  %9541 = vmatprep.mubr.msk.f32.mxu1 %vm113_vm0, %v776_v54  ;;  %v1234_v54 = vld [vmem:[%s14807_s2 + $0x2d0] sm:$0xff] }
  0x4c   :  { %9516 = vmatmul.mubr.msk.f32.gmra.mrb[18].mxu0 %vm113_vm0, %v552_v55  ;;  %9640 = vmatprep.subr.mxu1 %v11176_v15  ;;  %v1010_v55 = vld [vmem:[%s14807_s2 + $0x258] sm:$0xff] }
  0x4d   :  { %9518 = vmatprep.mubr.msk.f32.mxu0 %vm113_vm0, %v553_v56  ;;  %v1011_v56 = vld [vmem:[%s14807_s2 + $0x260] sm:$0xff] }
  0x4e   :  { %9542 = vmatmul.mubr.msk.f32.gmra.mrb[18].mxu1 %vm113_vm0, %v777_v57  ;;  %v1235_v57 = vld [vmem:[%s14807_s2 + $0x2d8] sm:$0xff] }
  0x4f   :  { %9544 = vmatprep.mubr.msk.f32.mxu1 %vm113_vm0, %v778_v58  ;;  %v1236_v58 = vld [vmem:[%s14807_s2 + $0x2e0] sm:$0xff] }
  0x50   :  { %9519 = vmatmul.mubr.msk.f32.gmra.mrb[20].mxu0 %vm113_vm0, %v554_v59  ;;  %v1012_v59 = vld [vmem:[%s14807_s2 + $0x268] sm:$0xff] }
  0x51   :  { %9521 = vmatprep.mubr.msk.f32.mxu0 %vm113_vm0, %v555_v60  ;;  %v1013_v60 = vld [vmem:[%s14807_s2 + $0x270] sm:$0xff] }
  0x52   :  { %9545 = vmatmul.mubr.msk.f32.gmra.mrb[20].mxu1 %vm113_vm0, %v779_v61  ;;  %v1237_v61 = vld [vmem:[%s14807_s2 + $0x2e8] sm:$0xff] }
  0x53   :  { %9547 = vmatprep.mubr.msk.f32.mxu1 %vm113_vm0, %v780_v62  ;;  %v1238_v62 = vld [vmem:[%s14807_s2 + $0x2f0] sm:$0xff] }
  0x54   :  { %9522 = vmatmul.mubr.msk.f32.gmra.mrb[22].mxu0 %vm113_vm0, %v556_v63  ;;  %v1014_v63 = vld [vmem:[%s14807_s2 + $0x278] sm:$0xff] }
  0x55   :  { %9524 = vmatprep.mubr.msk.f32.mxu0 %vm113_vm0, %v557_v0  ;;  %v1449_v0 = vld [vmem:[%s14807_s2 + $0x300] sm:$0xff] }
  0x56   :  { %9548 = vmatmul.mubr.msk.f32.gmra.mrb[22].mxu1 %vm113_vm0, %v781_v17  ;;  %v1239_v17 = vld [vmem:[%s14807_s2 + $0x2f8] sm:$0xff] }
  0x57   :  { %9550 = vmatprep.mubr.msk.f32.mxu1 %vm113_vm0, %v782_v18  ;;  %v1674_v18 = vld [vmem:[%s14807_s2 + $0x380] sm:$0xff] }
  0x58   :  { %9525 = vmatmul.mubr.msk.f32.gmra.mrb[24].mxu0 %vm113_vm0, %v558_v19  ;;  %v1450_v19 = vld [vmem:[%s14807_s2 + $0x308] sm:$0xff] }
  0x59   :  { %9527 = vmatprep.mubr.msk.f32.mxu0 %vm113_vm0, %v559_v20  ;;  %v1451_v20 = vld [vmem:[%s14807_s2 + $0x310] sm:$0xff] }
  0x5a   :  { %9551 = vmatmul.mubr.msk.f32.gmra.mrb[24].mxu1 %vm113_vm0, %v783_v21  ;;  %v1675_v21 = vld [vmem:[%s14807_s2 + $0x388] sm:$0xff] }
  0x5b   :  { %9553 = vmatprep.mubr.msk.f32.mxu1 %vm113_vm0, %v784_v22  ;;  %v1676_v22 = vld [vmem:[%s14807_s2 + $0x390] sm:$0xff] }
  0x5c   :  { %9528 = vmatmul.mubr.msk.f32.gmra.mrb[26].mxu0 %vm113_vm0, %v560_v23  ;;  %v1452_v23 = vld [vmem:[%s14807_s2 + $0x318] sm:$0xff] }
  0x5d   :  { %9530 = vmatprep.mubr.msk.f32.mxu0 %vm113_vm0, %v561_v24  ;;  %v1453_v24 = vld [vmem:[%s14807_s2 + $0x320] sm:$0xff] }
  0x5e   :  { %9554 = vmatmul.mubr.msk.f32.gmra.mrb[26].mxu1 %vm113_vm0, %v785_v25  ;;  %v1677_v25 = vld [vmem:[%s14807_s2 + $0x398] sm:$0xff] }
  0x5f   :  { %9556 = vmatprep.mubr.msk.f32.mxu1 %vm113_vm0, %v786_v26  ;;  %v1678_v26 = vld [vmem:[%s14807_s2 + $0x3a0] sm:$0xff] }
  0x60   :  { %9531 = vmatmul.mubr.msk.f32.gmra.mrb[28].mxu0 %vm113_vm0, %v562_v27  ;;  %v1454_v27 = vld [vmem:[%s14807_s2 + $0x328] sm:$0xff] }
  0x61   :  { %9533 = vmatprep.mubr.msk.f32.mxu0 %vm113_vm0, %v563_v28  ;;  %v1455_v28 = vld [vmem:[%s14807_s2 + $0x330] sm:$0xff] }
  0x62   :  { %9557 = vmatmul.mubr.msk.f32.gmra.mrb[28].mxu1 %vm113_vm0, %v787_v29  ;;  %v1679_v29 = vld [vmem:[%s14807_s2 + $0x3a8] sm:$0xff] }
  0x63   :  { %9559 = vmatprep.mubr.msk.f32.mxu1 %vm113_vm0, %v788_v30  ;;  %v1680_v30 = vld [vmem:[%s14807_s2 + $0x3b0] sm:$0xff] }
  0x64   :  { %9534 = vmatmul.mubr.msk.f32.gmra.mrb[30].mxu0 %vm113_vm0, %v564_v31  ;;  %v1456_v31 = vld [vmem:[%s14807_s2 + $0x338] sm:$0xff] }
  0x65   :  { %9564 = vmatprep.mubr.msk.f32.mxu0 %vm113_vm0, %v999_v32  ;;  %v1457_v32 = vld [vmem:[%s14807_s2 + $0x340] sm:$0xff] }
  0x66   :  { %9560 = vmatmul.mubr.msk.f32.gmra.mrb[30].mxu1 %vm113_vm0, %v789_v33  ;;  %v1681_v33 = vld [vmem:[%s14807_s2 + $0x3b8] sm:$0xff] }
  0x67   :  { %9590 = vmatprep.mubr.msk.f32.mxu1 %vm113_vm0, %v1224_v34  ;;  %v1682_v34 = vld [vmem:[%s14807_s2 + $0x3c0] sm:$0xff] }
  0x68   :  { %9565 = vmatmul.mubr.msk.f32.vlgmr.msra.gmra.mrb[32].mxu0 %vm113_vm0, %v1000_v35  ;;  %v1458_v35 = vld [vmem:[%s14807_s2 + $0x348] sm:$0xff] }
  0x69   :  { %9615 = vmatpush3.msra.mxu0 %v11176_v15  ;;  %9567 = vmatprep.mubr.msk.f32.mxu0 %vm113_vm0, %v1001_v36  ;;  %v1459_v36 = vld [vmem:[%s14807_s2 + $0x350] sm:$0xff] }
  0x6a   :  { %9591 = vmatmul.mubr.msk.f32.vlgmr.msra.gmra.mrb[32].mxu1 %vm113_vm0, %v1225_v37  ;;  %9666 = vmatprep.subr.mxu0 %v11176_v15  ;;  %v1683_v37 = vld [vmem:[%s14807_s2 + $0x3c8] sm:$0xff] }
  0x6b   :  { %9641 = vmatpush3.msra.mxu1 %v11176_v15  ;;  %9593 = vmatprep.mubr.msk.f32.mxu1 %vm113_vm0, %v1226_v38  ;;  %v1684_v38 = vld [vmem:[%s14807_s2 + $0x3d0] sm:$0xff] }
  0x6c   :  { %9568 = vmatmul.mubr.msk.f32.gmra.mrb[34].mxu0 %vm113_vm0, %v1002_v39  ;;  %9692 = vmatprep.subr.mxu1 %v11176_v15  ;;  %v1460_v39 = vld [vmem:[%s14807_s2 + $0x358] sm:$0xff] }
  0x6d   :  { %9570 = vmatprep.mubr.msk.f32.mxu0 %vm113_vm0, %v1003_v40  ;;  %v1461_v40 = vld [vmem:[%s14807_s2 + $0x360] sm:$0xff] }
  0x6e   :  { %9594 = vmatmul.mubr.msk.f32.gmra.mrb[34].mxu1 %vm113_vm0, %v1227_v41  ;;  %v1685_v41 = vld [vmem:[%s14807_s2 + $0x3d8] sm:$0xff] }
  0x6f   :  { %9596 = vmatprep.mubr.msk.f32.mxu1 %vm113_vm0, %v1228_v42  ;;  %v1686_v42 = vld [vmem:[%s14807_s2 + $0x3e0] sm:$0xff] }
  0x70   :  { %9571 = vmatmul.mubr.msk.f32.gmra.mrb[36].mxu0 %vm113_vm0, %v1004_v43  ;;  %v1462_v43 = vld [vmem:[%s14807_s2 + $0x368] sm:$0xff] }
  0x71   :  { %9573 = vmatprep.mubr.msk.f32.mxu0 %vm113_vm0, %v1005_v44  ;;  %v1463_v44 = vld [vmem:[%s14807_s2 + $0x370] sm:$0xff] }
  0x72   :  { %9597 = vmatmul.mubr.msk.f32.gmra.mrb[36].mxu1 %vm113_vm0, %v1229_v45  ;;  %v1687_v45 = vld [vmem:[%s14807_s2 + $0x3e8] sm:$0xff] }
  0x73   :  { %9599 = vmatprep.mubr.msk.f32.mxu1 %vm113_vm0, %v1230_v46  ;;  %v1688_v46 = vld [vmem:[%s14807_s2 + $0x3f0] sm:$0xff] }
  0x74   :  { %9574 = vmatmul.mubr.msk.f32.gmra.mrb[38].mxu0 %vm113_vm0, %v1006_v47  ;;  %v1464_v47 = vld [vmem:[%s14807_s2 + $0x378] sm:$0xff] }
  0x75   :  { %9576 = vmatprep.mubr.msk.f32.mxu0 %vm113_vm0, %v1007_v48  ;;  %v1899_v48 = vld [vmem:[%s14807_s2 + $0x400] sm:$0xff] }
  0x76   :  { %9600 = vmatmul.mubr.msk.f32.gmra.mrb[38].mxu1 %vm113_vm0, %v1231_v49  ;;  %v1689_v49 = vld [vmem:[%s14807_s2 + $0x3f8] sm:$0xff] }
  0x77   :  { %9602 = vmatprep.mubr.msk.f32.mxu1 %vm113_vm0, %v1232_v50  ;;  %v2124_v50 = vld [vmem:[%s14807_s2 + $0x480] sm:$0xff] }
  0x78   :  { %9577 = vmatmul.mubr.msk.f32.gmra.mrb[40].mxu0 %vm113_vm0, %v1008_v51  ;;  %v1900_v51 = vld [vmem:[%s14807_s2 + $0x408] sm:$0xff] }
  0x79   :  { %9579 = vmatprep.mubr.msk.f32.mxu0 %vm113_vm0, %v1009_v52  ;;  %v1901_v52 = vld [vmem:[%s14807_s2 + $0x410] sm:$0xff] }
  0x7a   :  { %9603 = vmatmul.mubr.msk.f32.gmra.mrb[40].mxu1 %vm113_vm0, %v1233_v53  ;;  %v2125_v53 = vld [vmem:[%s14807_s2 + $0x488] sm:$0xff] }
  0x7b   :  { %9605 = vmatprep.mubr.msk.f32.mxu1 %vm113_vm0, %v1234_v54  ;;  %v2126_v54 = vld [vmem:[%s14807_s2 + $0x490] sm:$0xff] }
  0x7c   :  { %9580 = vmatmul.mubr.msk.f32.gmra.mrb[42].mxu0 %vm113_vm0, %v1010_v55  ;;  %v1902_v55 = vld [vmem:[%s14807_s2 + $0x418] sm:$0xff] }
  0x7d   :  { %9582 = vmatprep.mubr.msk.f32.mxu0 %vm113_vm0, %v1011_v56  ;;  %v1903_v56 = vld [vmem:[%s14807_s2 + $0x420] sm:$0xff] }
  0x7e   :  { %9606 = vmatmul.mubr.msk.f32.gmra.mrb[42].mxu1 %vm113_vm0, %v1235_v57  ;;  %v2127_v57 = vld [vmem:[%s14807_s2 + $0x498] sm:$0xff] }
  0x7f   :  { %9608 = vmatprep.mubr.msk.f32.mxu1 %vm113_vm0, %v1236_v58  ;;  %v2128_v58 = vld [vmem:[%s14807_s2 + $0x4a0] sm:$0xff] }
  0x80   :  { %9583 = vmatmul.mubr.msk.f32.gmra.mrb[44].mxu0 %vm113_vm0, %v1012_v59  ;;  %v1904_v59 = vld [vmem:[%s14807_s2 + $0x428] sm:$0xff] }
  0x81   :  { %9585 = vmatprep.mubr.msk.f32.mxu0 %vm113_vm0, %v1013_v60  ;;  %v1905_v60 = vld [vmem:[%s14807_s2 + $0x430] sm:$0xff] }
  0x82   :  { %9609 = vmatmul.mubr.msk.f32.gmra.mrb[44].mxu1 %vm113_vm0, %v1237_v61  ;;  %v2129_v61 = vld [vmem:[%s14807_s2 + $0x4a8] sm:$0xff] }
  0x83   :  { %9611 = vmatprep.mubr.msk.f32.mxu1 %vm113_vm0, %v1238_v62  ;;  %v2130_v62 = vld [vmem:[%s14807_s2 + $0x4b0] sm:$0xff] }
  0x84   :  { %9586 = vmatmul.mubr.msk.f32.gmra.mrb[46].mxu0 %vm113_vm0, %v1014_v63  ;;  %v1906_v63 = vld [vmem:[%s14807_s2 + $0x438] sm:$0xff] }
  0x85   :  { %9616 = vmatprep.mubr.msk.f32.mxu0 %vm113_vm0, %v1449_v0  ;;  %v1907_v0 = vld [vmem:[%s14807_s2 + $0x440] sm:$0xff] }
  0x86   :  { %9612 = vmatmul.mubr.msk.f32.gmra.mrb[46].mxu1 %vm113_vm0, %v1239_v17  ;;  %v2131_v17 = vld [vmem:[%s14807_s2 + $0x4b8] sm:$0xff] }
  0x87   :  { %9642 = vmatprep.mubr.msk.f32.mxu1 %vm113_vm0, %v1674_v18  ;;  %v2132_v18 = vld [vmem:[%s14807_s2 + $0x4c0] sm:$0xff] }
  0x88   :  { %9617 = vmatmul.mubr.msk.f32.vlgmr.msra.gmra.mrb[48].mxu0 %vm113_vm0, %v1450_v19  ;;  %v1908_v19 = vld [vmem:[%s14807_s2 + $0x448] sm:$0xff] }
  0x89   :  { %9667 = vmatpush3.msra.mxu0 %v11176_v15  ;;  %9619 = vmatprep.mubr.msk.f32.mxu0 %vm113_vm0, %v1451_v20  ;;  %v1909_v20 = vld [vmem:[%s14807_s2 + $0x450] sm:$0xff] }
  0x8a   :  { %9643 = vmatmul.mubr.msk.f32.vlgmr.msra.gmra.mrb[48].mxu1 %vm113_vm0, %v1675_v21  ;;  %9718 = vmatprep.subr.mxu0 %v11176_v15  ;;  %v2133_v21 = vld [vmem:[%s14807_s2 + $0x4c8] sm:$0xff] }
  0x8b   :  { %9693 = vmatpush3.msra.mxu1 %v11176_v15  ;;  %9645 = vmatprep.mubr.msk.f32.mxu1 %vm113_vm0, %v1676_v22  ;;  %v2134_v22 = vld [vmem:[%s14807_s2 + $0x4d0] sm:$0xff] }
  0x8c   :  { %9620 = vmatmul.mubr.msk.f32.gmra.mrb[50].mxu0 %vm113_vm0, %v1452_v23  ;;  %9744 = vmatprep.subr.mxu1 %v11176_v15  ;;  %v1910_v23 = vld [vmem:[%s14807_s2 + $0x458] sm:$0xff] }
  0x8d   :  { %9622 = vmatprep.mubr.msk.f32.mxu0 %vm113_vm0, %v1453_v24  ;;  %v1911_v24 = vld [vmem:[%s14807_s2 + $0x460] sm:$0xff] }
  0x8e   :  { %9646 = vmatmul.mubr.msk.f32.gmra.mrb[50].mxu1 %vm113_vm0, %v1677_v25  ;;  %v2135_v25 = vld [vmem:[%s14807_s2 + $0x4d8] sm:$0xff] }
  0x8f   :  { %9648 = vmatprep.mubr.msk.f32.mxu1 %vm113_vm0, %v1678_v26  ;;  %v2136_v26 = vld [vmem:[%s14807_s2 + $0x4e0] sm:$0xff] }
  0x90   :  { %9623 = vmatmul.mubr.msk.f32.gmra.mrb[52].mxu0 %vm113_vm0, %v1454_v27  ;;  %v1912_v27 = vld [vmem:[%s14807_s2 + $0x468] sm:$0xff] }
  0x91   :  { %9625 = vmatprep.mubr.msk.f32.mxu0 %vm113_vm0, %v1455_v28  ;;  %v1913_v28 = vld [vmem:[%s14807_s2 + $0x470] sm:$0xff] }
  0x92   :  { %9649 = vmatmul.mubr.msk.f32.gmra.mrb[52].mxu1 %vm113_vm0, %v1679_v29  ;;  %v2137_v29 = vld [vmem:[%s14807_s2 + $0x4e8] sm:$0xff] }
  0x93   :  { %9651 = vmatprep.mubr.msk.f32.mxu1 %vm113_vm0, %v1680_v30  ;;  %v2138_v30 = vld [vmem:[%s14807_s2 + $0x4f0] sm:$0xff] }
  0x94   :  { %9626 = vmatmul.mubr.msk.f32.gmra.mrb[54].mxu0 %vm113_vm0, %v1456_v31  ;;  %v1914_v31 = vld [vmem:[%s14807_s2 + $0x478] sm:$0xff] }
  0x95   :  { %9628 = vmatprep.mubr.msk.f32.mxu0 %vm113_vm0, %v1457_v32  ;;  %v2349_v32 = vld [vmem:[%s14807_s2 + $0x500] sm:$0xff] }
  0x96   :  { %9652 = vmatmul.mubr.msk.f32.gmra.mrb[54].mxu1 %vm113_vm0, %v1681_v33  ;;  %v2139_v33 = vld [vmem:[%s14807_s2 + $0x4f8] sm:$0xff] }
  0x97   :  { %9654 = vmatprep.mubr.msk.f32.mxu1 %vm113_vm0, %v1682_v34  ;;  %v2574_v34 = vld [vmem:[%s14807_s2 + $0x580] sm:$0xff] }
  0x98   :  { %9629 = vmatmul.mubr.msk.f32.gmra.mrb[56].mxu0 %vm113_vm0, %v1458_v35  ;;  %v2350_v35 = vld [vmem:[%s14807_s2 + $0x508] sm:$0xff] }
  0x99   :  { %9631 = vmatprep.mubr.msk.f32.mxu0 %vm113_vm0, %v1459_v36  ;;  %v2351_v36 = vld [vmem:[%s14807_s2 + $0x510] sm:$0xff] }
  0x9a   :  { %9655 = vmatmul.mubr.msk.f32.gmra.mrb[56].mxu1 %vm113_vm0, %v1683_v37  ;;  %v2575_v37 = vld [vmem:[%s14807_s2 + $0x588] sm:$0xff] }
  0x9b   :  { %9657 = vmatprep.mubr.msk.f32.mxu1 %vm113_vm0, %v1684_v38  ;;  %v2576_v38 = vld [vmem:[%s14807_s2 + $0x590] sm:$0xff] }
  0x9c   :  { %9632 = vmatmul.mubr.msk.f32.gmra.mrb[58].mxu0 %vm113_vm0, %v1460_v39  ;;  %v2352_v39 = vld [vmem:[%s14807_s2 + $0x518] sm:$0xff] }
  0x9d   :  { %9634 = vmatprep.mubr.msk.f32.mxu0 %vm113_vm0, %v1461_v40  ;;  %v2353_v40 = vld [vmem:[%s14807_s2 + $0x520] sm:$0xff] }
  0x9e   :  { %9658 = vmatmul.mubr.msk.f32.gmra.mrb[58].mxu1 %vm113_vm0, %v1685_v41  ;;  %v2577_v41 = vld [vmem:[%s14807_s2 + $0x598] sm:$0xff] }
  0x9f   :  { %9660 = vmatprep.mubr.msk.f32.mxu1 %vm113_vm0, %v1686_v42  ;;  %v2578_v42 = vld [vmem:[%s14807_s2 + $0x5a0] sm:$0xff] }
  0xa0   :  { %9635 = vmatmul.mubr.msk.f32.gmra.mrb[60].mxu0 %vm113_vm0, %v1462_v43  ;;  %v2354_v43 = vld [vmem:[%s14807_s2 + $0x528] sm:$0xff] }
  0xa1   :  { %9637 = vmatprep.mubr.msk.f32.mxu0 %vm113_vm0, %v1463_v44  ;;  %v2355_v44 = vld [vmem:[%s14807_s2 + $0x530] sm:$0xff] }
  0xa2   :  { %9661 = vmatmul.mubr.msk.f32.gmra.mrb[60].mxu1 %vm113_vm0, %v1687_v45  ;;  %v2579_v45 = vld [vmem:[%s14807_s2 + $0x5a8] sm:$0xff] }
  0xa3   :  { %9663 = vmatprep.mubr.msk.f32.mxu1 %vm113_vm0, %v1688_v46  ;;  %v2580_v46 = vld [vmem:[%s14807_s2 + $0x5b0] sm:$0xff] }
  0xa4   :  { %9638 = vmatmul.mubr.msk.f32.gmra.mrb[62].mxu0 %vm113_vm0, %v1464_v47  ;;  %v2356_v47 = vld [vmem:[%s14807_s2 + $0x538] sm:$0xff] }
  0xa5   :  { %9668 = vmatprep.mubr.msk.f32.mxu0 %vm113_vm0, %v1899_v48  ;;  %v2357_v48 = vld [vmem:[%s14807_s2 + $0x540] sm:$0xff] }
  0xa6   :  { %9664 = vmatmul.mubr.msk.f32.gmra.mrb[62].mxu1 %vm113_vm0, %v1689_v49  ;;  %v2581_v49 = vld [vmem:[%s14807_s2 + $0x5b8] sm:$0xff] }
  0xa7   :  { %9694 = vmatprep.mubr.msk.f32.mxu1 %vm113_vm0, %v2124_v50  ;;  %v2582_v50 = vld [vmem:[%s14807_s2 + $0x5c0] sm:$0xff] }
  0xa8   :  { %9669 = vmatmul.mubr.msk.f32.vlgmr.msra.gmra.mrb[64].mxu0 %vm113_vm0, %v1900_v51  ;;  %v2358_v51 = vld [vmem:[%s14807_s2 + $0x548] sm:$0xff] }
  0xa9   :  { %9719 = vmatpush3.msra.mxu0 %v11176_v15  ;;  %9671 = vmatprep.mubr.msk.f32.mxu0 %vm113_vm0, %v1901_v52  ;;  %v2359_v52 = vld [vmem:[%s14807_s2 + $0x550] sm:$0xff] }
  0xaa   :  { %9695 = vmatmul.mubr.msk.f32.vlgmr.msra.gmra.mrb[64].mxu1 %vm113_vm0, %v2125_v53  ;;  %9770 = vmatprep.subr.mxu0 %v11176_v15  ;;  %v2583_v53 = vld [vmem:[%s14807_s2 + $0x5c8] sm:$0xff] }
  0xab   :  { %9745 = vmatpush3.msra.mxu1 %v11176_v15  ;;  %9697 = vmatprep.mubr.msk.f32.mxu1 %vm113_vm0, %v2126_v54  ;;  %v2584_v54 = vld [vmem:[%s14807_s2 + $0x5d0] sm:$0xff] }
  0xac   :  { %9672 = vmatmul.mubr.msk.f32.gmra.mrb[66].mxu0 %vm113_vm0, %v1902_v55  ;;  %9796 = vmatprep.subr.mxu1 %v11176_v15  ;;  %v2360_v55 = vld [vmem:[%s14807_s2 + $0x558] sm:$0xff] }
  0xad   :  { %9674 = vmatprep.mubr.msk.f32.mxu0 %vm113_vm0, %v1903_v56  ;;  %v2361_v56 = vld [vmem:[%s14807_s2 + $0x560] sm:$0xff] }
  0xae   :  { %9698 = vmatmul.mubr.msk.f32.gmra.mrb[66].mxu1 %vm113_vm0, %v2127_v57  ;;  %v2585_v57 = vld [vmem:[%s14807_s2 + $0x5d8] sm:$0xff] }
  0xaf   :  { %9700 = vmatprep.mubr.msk.f32.mxu1 %vm113_vm0, %v2128_v58  ;;  %v2586_v58 = vld [vmem:[%s14807_s2 + $0x5e0] sm:$0xff] }
  0xb0   :  { %9675 = vmatmul.mubr.msk.f32.gmra.mrb[68].mxu0 %vm113_vm0, %v1904_v59  ;;  %v2362_v59 = vld [vmem:[%s14807_s2 + $0x568] sm:$0xff] }
  0xb1   :  { %9677 = vmatprep.mubr.msk.f32.mxu0 %vm113_vm0, %v1905_v60  ;;  %v2363_v60 = vld [vmem:[%s14807_s2 + $0x570] sm:$0xff] }
  0xb2   :  { %9701 = vmatmul.mubr.msk.f32.gmra.mrb[68].mxu1 %vm113_vm0, %v2129_v61  ;;  %v2587_v61 = vld [vmem:[%s14807_s2 + $0x5e8] sm:$0xff] }
  0xb3   :  { %9703 = vmatprep.mubr.msk.f32.mxu1 %vm113_vm0, %v2130_v62  ;;  %v2588_v62 = vld [vmem:[%s14807_s2 + $0x5f0] sm:$0xff] }
  0xb4   :  { %9678 = vmatmul.mubr.msk.f32.gmra.mrb[70].mxu0 %vm113_vm0, %v1906_v63  ;;  %v2364_v63 = vld [vmem:[%s14807_s2 + $0x578] sm:$0xff] }
  0xb5   :  { %9680 = vmatprep.mubr.msk.f32.mxu0 %vm113_vm0, %v1907_v0  ;;  %v2799_v0 = vld [vmem:[%s14807_s2 + $0x600] sm:$0xff] }
  0xb6   :  { %9704 = vmatmul.mubr.msk.f32.gmra.mrb[70].mxu1 %vm113_vm0, %v2131_v17  ;;  %v2589_v17 = vld [vmem:[%s14807_s2 + $0x5f8] sm:$0xff] }
  0xb7   :  { %9706 = vmatprep.mubr.msk.f32.mxu1 %vm113_vm0, %v2132_v18  ;;  %v3024_v18 = vld [vmem:[%s14807_s2 + $0x680] sm:$0xff] }
  0xb8   :  { %9681 = vmatmul.mubr.msk.f32.gmra.mrb[72].mxu0 %vm113_vm0, %v1908_v19  ;;  %v2800_v19 = vld [vmem:[%s14807_s2 + $0x608] sm:$0xff] }
  0xb9   :  { %9683 = vmatprep.mubr.msk.f32.mxu0 %vm113_vm0, %v1909_v20  ;;  %v2801_v20 = vld [vmem:[%s14807_s2 + $0x610] sm:$0xff] }
  0xba   :  { %9707 = vmatmul.mubr.msk.f32.gmra.mrb[72].mxu1 %vm113_vm0, %v2133_v21  ;;  %v3025_v21 = vld [vmem:[%s14807_s2 + $0x688] sm:$0xff] }
  0xbb   :  { %9709 = vmatprep.mubr.msk.f32.mxu1 %vm113_vm0, %v2134_v22  ;;  %v3026_v22 = vld [vmem:[%s14807_s2 + $0x690] sm:$0xff] }
  0xbc   :  { %9684 = vmatmul.mubr.msk.f32.gmra.mrb[74].mxu0 %vm113_vm0, %v1910_v23  ;;  %v2802_v23 = vld [vmem:[%s14807_s2 + $0x618] sm:$0xff] }
  0xbd   :  { %9686 = vmatprep.mubr.msk.f32.mxu0 %vm113_vm0, %v1911_v24  ;;  %v2803_v24 = vld [vmem:[%s14807_s2 + $0x620] sm:$0xff] }
  0xbe   :  { %9710 = vmatmul.mubr.msk.f32.gmra.mrb[74].mxu1 %vm113_vm0, %v2135_v25  ;;  %v3027_v25 = vld [vmem:[%s14807_s2 + $0x698] sm:$0xff] }
  0xbf   :  { %9712 = vmatprep.mubr.msk.f32.mxu1 %vm113_vm0, %v2136_v26  ;;  %v3028_v26 = vld [vmem:[%s14807_s2 + $0x6a0] sm:$0xff] }
  0xc0   :  { %9687 = vmatmul.mubr.msk.f32.gmra.mrb[76].mxu0 %vm113_vm0, %v1912_v27  ;;  %v2804_v27 = vld [vmem:[%s14807_s2 + $0x628] sm:$0xff] }
  0xc1   :  { %9689 = vmatprep.mubr.msk.f32.mxu0 %vm113_vm0, %v1913_v28  ;;  %v2805_v28 = vld [vmem:[%s14807_s2 + $0x630] sm:$0xff] }
  0xc2   :  { %9713 = vmatmul.mubr.msk.f32.gmra.mrb[76].mxu1 %vm113_vm0, %v2137_v29  ;;  %v3029_v29 = vld [vmem:[%s14807_s2 + $0x6a8] sm:$0xff] }
  0xc3   :  { %9715 = vmatprep.mubr.msk.f32.mxu1 %vm113_vm0, %v2138_v30  ;;  %v2806_v30 = vld [vmem:[%s14807_s2 + $0x638] sm:$0xff] }
  0xc4   :  { %9690 = vmatmul.mubr.msk.f32.gmra.mrb[78].mxu0 %vm113_vm0, %v1914_v31  ;;  %v2807_v31 = vld [vmem:[%s14807_s2 + $0x640] sm:$0xff] }
  0xc5   :  { %9720 = vmatprep.mubr.msk.f32.mxu0 %vm113_vm0, %v2349_v32  ;;  %v3031_v32 = vld [vmem:[%s14807_s2 + $0x6b8] sm:$0xff] }
  0xc6   :  { %9716 = vmatmul.mubr.msk.f32.gmra.mrb[78].mxu1 %vm113_vm0, %v2139_v33  ;;  %v3032_v33 = vld [vmem:[%s14807_s2 + $0x6c0] sm:$0xff] }
  0xc7   :  { %9746 = vmatprep.mubr.msk.f32.mxu1 %vm113_vm0, %v2574_v34  ;;  %v2808_v34 = vld [vmem:[%s14807_s2 + $0x648] sm:$0xff] }
  0xc8   :  { %9721 = vmatmul.mubr.msk.f32.vlgmr.msra.gmra.mrb[80].mxu0 %vm113_vm0, %v2350_v35  ;;  %v2809_v35 = vld [vmem:[%s14807_s2 + $0x650] sm:$0xff] }
  0xc9   :  { %9771 = vmatpush3.msra.mxu0 %v11176_v15  ;;  %9723 = vmatprep.mubr.msk.f32.mxu0 %vm113_vm0, %v2351_v36  ;;  %v3033_v36 = vld [vmem:[%s14807_s2 + $0x6c8] sm:$0xff] }
  0xca   :  { %9747 = vmatmul.mubr.msk.f32.vlgmr.msra.gmra.mrb[80].mxu1 %vm113_vm0, %v2575_v37  ;;  %9822 = vmatprep.subr.mxu0 %v11176_v15  ;;  %v3034_v37 = vld [vmem:[%s14807_s2 + $0x6d0] sm:$0xff] }
  0xcb   :  { %9797 = vmatpush3.msra.mxu1 %v11176_v15  ;;  %9749 = vmatprep.mubr.msk.f32.mxu1 %vm113_vm0, %v2576_v38  ;;  %v12073_v38 = vld [vmem:[%s14812_s7] ss:$0 sm:$0xff] }
  0xcc   :  { %9724 = vmatmul.mubr.msk.f32.gmra.mrb[82].mxu0 %vm113_vm0, %v2352_v39  ;;  %9848 = vmatprep.subr.mxu1 %v11176_v15  ;;  %v2810_v39 = vld [vmem:[%s14807_s2 + $0x658] sm:$0xff] }
  0xcd   :  { %9726 = vmatprep.mubr.msk.f32.mxu0 %vm113_vm0, %v2353_v40  ;;  %v2811_v40 = vld [vmem:[%s14807_s2 + $0x660] sm:$0xff] }
  0xce   :  { %9750 = vmatmul.mubr.msk.f32.gmra.mrb[82].mxu1 %vm113_vm0, %v2577_v41 }
  0xcf   :  { %9752 = vmatprep.mubr.msk.f32.mxu1 %vm113_vm0, %v2578_v42  ;;  %v3035_v42 = vld [vmem:[%s14807_s2 + $0x6d8] sm:$0xff] }
  0xd0   :  { %9727 = vmatmul.mubr.msk.f32.gmra.mrb[84].mxu0 %vm113_vm0, %v2354_v43 }
  0xd1   :  { %9729 = vmatprep.mubr.msk.f32.mxu0 %vm113_vm0, %v2355_v44 }
  0xd2   :  { %9753 = vmatmul.mubr.msk.f32.gmra.mrb[84].mxu1 %vm113_vm0, %v2579_v45  ;;  %v3036_v45 = vld [vmem:[%s14807_s2 + $0x6e0] sm:$0xff] }
  0xd3   :  { %9755 = vmatprep.mubr.msk.f32.mxu1 %vm113_vm0, %v2580_v46 }
  0xd4   :  { %9730 = vmatmul.mubr.msk.f32.gmra.mrb[86].mxu0 %vm113_vm0, %v2356_v47 }
  0xd5   :  { %9732 = vmatprep.mubr.msk.f32.mxu0 %vm113_vm0, %v2357_v48  ;;  %v2812_v48 = vld [vmem:[%s14807_s2 + $0x668] sm:$0xff] }
  0xd6   :  { %9756 = vmatmul.mubr.msk.f32.gmra.mrb[86].mxu1 %vm113_vm0, %v2581_v49 }
  0xd7   :  { %9758 = vmatprep.mubr.msk.f32.mxu1 %vm113_vm0, %v2582_v50 }
  0xd8   :  { %9733 = vmatmul.mubr.msk.f32.gmra.mrb[88].mxu0 %vm113_vm0, %v2358_v51  ;;  %v2813_v51 = vld [vmem:[%s14807_s2 + $0x670] sm:$0xff] }
  0xd9   :  { %9735 = vmatprep.mubr.msk.f32.mxu0 %vm113_vm0, %v2359_v52 }
  0xda   :  { %9759 = vmatmul.mubr.msk.f32.gmra.mrb[88].mxu1 %vm113_vm0, %v2583_v53 }
  0xdb   :  { %9761 = vmatprep.mubr.msk.f32.mxu1 %vm113_vm0, %v2584_v54  ;;  %v3037_v54 = vld [vmem:[%s14807_s2 + $0x6e8] sm:$0xff] }
  0xdc   :  { %9736 = vmatmul.mubr.msk.f32.gmra.mrb[90].mxu0 %vm113_vm0, %v2360_v55 }
  0xdd   :  { %9738 = vmatprep.mubr.msk.f32.mxu0 %vm113_vm0, %v2361_v56 }
  0xde   :  { %9762 = vmatmul.mubr.msk.f32.gmra.mrb[90].mxu1 %vm113_vm0, %v2585_v57  ;;  %v3038_v57 = vld [vmem:[%s14807_s2 + $0x6f0] sm:$0xff] }
  0xdf   :  { %9764 = vmatprep.mubr.msk.f32.mxu1 %vm113_vm0, %v2586_v58 }
  0xe0   :  { %9739 = vmatmul.mubr.msk.f32.gmra.mrb[92].mxu0 %vm113_vm0, %v2362_v59 }
  0xe1   :  { %9741 = vmatprep.mubr.msk.f32.mxu0 %vm113_vm0, %v2363_v60  ;;  %v2814_v60 = vld [vmem:[%s14807_s2 + $0x678] sm:$0xff] }
  0xe2   :  { %9765 = vmatmul.mubr.msk.f32.gmra.mrb[92].mxu1 %vm113_vm0, %v2587_v61 }
  0xe3   :  { %9767 = vmatprep.mubr.msk.f32.mxu1 %vm113_vm0, %v2588_v62 }
  0xe4   :  { %9742 = vmatmul.mubr.msk.f32.gmra.mrb[94].mxu0 %vm113_vm0, %v2364_v63  ;;  %v3249_v63 = vld [vmem:[%s14807_s2 + $0x700] sm:$0xff] }
  0xe5   :  { %9772 = vmatprep.mubr.msk.f32.mxu0 %vm113_vm0, %v2799_v0 }
  0xe6   :  { %9768 = vmatmul.mubr.msk.f32.gmra.mrb[94].mxu1 %vm113_vm0, %v2589_v17 }
  0xe7   :  { %9798 = vmatprep.mubr.msk.f32.mxu1 %vm113_vm0, %v3024_v18  ;;  %v3039_v18 = vld [vmem:[%s14807_s2 + $0x6f8] sm:$0xff] }
  0xe8   :  { %9773 = vmatmul.mubr.msk.f32.vlgmr.msra.gmra.mrb[96].mxu0 %vm113_vm0, %v2800_v19 }
  0xe9   :  { %9823 = vmatpush3.msra.mxu0 %v11176_v15  ;;  %9775 = vmatprep.mubr.msk.f32.mxu0 %vm113_vm0, %v2801_v20 }
  0xea   :  { %9799 = vmatmul.mubr.msk.f32.vlgmr.msra.gmra.mrb[96].mxu1 %vm113_vm0, %v3025_v21  ;;  %9874 = vmatprep.subr.mxu0 %v11176_v15  ;;  %v3474_v21 = vld [vmem:[%s14807_s2 + $0x780] sm:$0xff] }
  0xeb   :  { %9849 = vmatpush3.msra.mxu1 %v11176_v15  ;;  %9801 = vmatprep.mubr.msk.f32.mxu1 %vm113_vm0, %v3026_v22 }
  0xec   :  { %9776 = vmatmul.mubr.msk.f32.gmra.mrb[98].mxu0 %vm113_vm0, %v2802_v23  ;;  %9900 = vmatprep.subr.mxu1 %v11176_v15  ;;  %v3030_v15 = vld [vmem:[%s14807_s2 + $0x6b0] sm:$0xff] }
  0xed   :  { %9778 = vmatprep.mubr.msk.f32.mxu0 %vm113_vm0, %v2803_v24  ;;  %v3250_v24 = vld [vmem:[%s14807_s2 + $0x708] sm:$0xff] }
  0xee   :  { %9802 = vmatmul.mubr.msk.f32.gmra.mrb[98].mxu1 %vm113_vm0, %v3027_v25 }
  0xef   :  { %9804 = vmatprep.mubr.msk.f32.mxu1 %vm113_vm0, %v3028_v26 }
  0xf0   :  { %9779 = vmatmul.mubr.msk.f32.gmra.mrb[100].mxu0 %vm113_vm0, %v2804_v27  ;;  %v3251_v27 = vld [vmem:[%s14807_s2 + $0x710] sm:$0xff] }
  0xf1   :  { %9781 = vmatprep.mubr.msk.f32.mxu0 %vm113_vm0, %v2805_v28 }
  0xf2   :  { %9805 = vmatmul.mubr.msk.f32.gmra.mrb[100].mxu1 %vm113_vm0, %v3029_v29 }
  0xf3   :  { %9807 = vmatprep.mubr.msk.f32.mxu1 %vm113_vm0, %v3030_v15  ;;  %v3475_v15 = vld [vmem:[%s14807_s2 + $0x788] sm:$0xff] }
  0xf4   :  { %9782 = vmatmul.mubr.msk.f32.gmra.mrb[102].mxu0 %vm113_vm0, %v2806_v30 }
  0xf5   :  { %9784 = vmatprep.mubr.msk.f32.mxu0 %vm113_vm0, %v2807_v31 }
  0xf6   :  { %9808 = vmatmul.mubr.msk.f32.gmra.mrb[102].mxu1 %vm113_vm0, %v3031_v32  ;;  %v3476_v32 = vld [vmem:[%s14807_s2 + $0x790] sm:$0xff] }
  0xf7   :  { %9810 = vmatprep.mubr.msk.f32.mxu1 %vm113_vm0, %v3032_v33 }
  0xf8   :  { %9785 = vmatmul.mubr.msk.f32.gmra.mrb[104].mxu0 %vm113_vm0, %v2808_v34 }
  0xf9   :  { %9787 = vmatprep.mubr.msk.f32.mxu0 %vm113_vm0, %v2809_v35  ;;  %v12168_v35 = vld [vmem:[%s14811_s6] sm:$0xff] }
  0xfa   :  { %9811 = vmatmul.mubr.msk.f32.gmra.mrb[104].mxu1 %vm113_vm0, %v3033_v36  ;;  %v3252_v36 = vld [vmem:[%s14807_s2 + $0x718] sm:$0xff] }
  0xfb   :  { %v9462_v41 = vpop.f32.mrb[0].mxu0  ;;  %9813 = vmatprep.mubr.msk.f32.mxu1 %vm113_vm0, %v3034_v37 }
  0xfc   :  { %v234_v43 = vadd.f32 %v9462_v41, %v12073_v38  ;;  %v228_v44 = vpop.f32.mrb[1].mxu0  ;;  %9788 = vmatmul.mubr.msk.f32.gmra.mrb[106].mxu0 %vm113_vm0, %v2810_v39  ;;  %v9488_v47 = vpop.f32.mrb[0].mxu1 }
  0xfd   :  { %v229_v46 = vadd.f32 %v12073_v38, %v228_v44  ;;  %9790 = vmatprep.mubr.msk.f32.mxu0 %vm113_vm0, %v2811_v40  ;;  %v460_v49 = vadd.f32 %v9488_v47, %v12073_v38  ;;  %v454_v50 = vpop.f32.mrb[1].mxu1  ;;  %v3253_v40 = vld [vmem:[%s14807_s2 + $0x720] sm:$0xff] }
  0xfe   :  { %309 = vst.msk [vmem:[#allocation2 + $0x8] sm:$0xff] %vm307_vm1, %v234_v43  ;;  %9814 = vmatmul.mubr.msk.f32.gmra.mrb[106].mxu1 %vm113_vm0, %v3035_v42  ;;  %v455_v52 = vadd.f32 %v12073_v38, %v454_v50  ;;  %v3477_v43 = vld [vmem:[%s14807_s2 + $0x798] sm:$0xff] }
  0xff   :  { %308 = vst.msk [vmem:[#allocation2] sm:$0xff] %vm307_vm1, %v229_v46  ;;  %v9465_v53 = vpop.f32.mrb[2].mxu0  ;;  %9816 = vmatprep.mubr.msk.f32.mxu1 %vm113_vm0, %v3036_v45  ;;  %534 = vst.msk [vmem:[#allocation2 + $0x88] sm:$0xff] %vm307_vm1, %v460_v49  ;;  %v3478_v46 = vld [vmem:[%s14807_s2 + $0x7a0] sm:$0xff]  ;;  %v3254_v49 = vld [vmem:[%s14807_s2 + $0x728] sm:$0xff] }
 0x100   :  { %v244_v55 = vadd.f32 %v9465_v53, %v12073_v38  ;;  %v238_v56 = vpop.f32.mrb[3].mxu0  ;;  %9791 = vmatmul.mubr.msk.f32.gmra.mrb[108].mxu0 %vm113_vm0, %v2812_v48  ;;  %533 = vst.msk [vmem:[#allocation2 + $0x80] sm:$0xff] %vm307_vm1, %v455_v52  ;;  %v9491_v59 = vpop.f32.mrb[2].mxu1  ;;  %v3255_v52 = vld [vmem:[%s14807_s2 + $0x730] sm:$0xff] }
 0x101   :  { %v239_v58 = vadd.f32 %v12073_v38, %v238_v56  ;;  %9793 = vmatprep.mubr.msk.f32.mxu0 %vm113_vm0, %v2813_v51  ;;  %v470_v61 = vadd.f32 %v9491_v59, %v12073_v38  ;;  %v464_v62 = vpop.f32.mrb[3].mxu1 }
 0x102   :  { %311 = vst.msk [vmem:[#allocation2 + $0x18] sm:$0xff] %vm307_vm1, %v244_v55  ;;  %9817 = vmatmul.mubr.msk.f32.gmra.mrb[108].mxu1 %vm113_vm0, %v3037_v54  ;;  %v465_v0 = vadd.f32 %v12073_v38, %v464_v62  ;;  %v3479_v55 = vld [vmem:[%s14807_s2 + $0x7a8] sm:$0xff] }
 0x103   :  { %310 = vst.msk [vmem:[#allocation2 + $0x10] sm:$0xff] %vm307_vm1, %v239_v58  ;;  %v9468_v17 = vpop.f32.mrb[4].mxu0  ;;  %9819 = vmatprep.mubr.msk.f32.mxu1 %vm113_vm0, %v3038_v57  ;;  %536 = vst.msk [vmem:[#allocation2 + $0x98] sm:$0xff] %vm307_vm1, %v470_v61  ;;  %v3480_v58 = vld [vmem:[%s14807_s2 + $0x7b0] sm:$0xff]  ;;  %v3256_v61 = vld [vmem:[%s14807_s2 + $0x738] sm:$0xff] }
 0x104   :  { %v254_v19 = vadd.f32 %v9468_v17, %v12073_v38  ;;  %v248_v20 = vpop.f32.mrb[5].mxu0  ;;  %9794 = vmatmul.mubr.msk.f32.gmra.mrb[110].mxu0 %vm113_vm0, %v2814_v60  ;;  %535 = vst.msk [vmem:[#allocation2 + $0x90] sm:$0xff] %vm307_vm1, %v465_v0  ;;  %v9494_v23 = vpop.f32.mrb[4].mxu1  ;;  %v3257_v0 = vld [vmem:[%s14807_s2 + $0x740] sm:$0xff] }
 0x105   :  { %v249_v22 = vadd.f32 %v12073_v38, %v248_v20  ;;  %9824 = vmatprep.mubr.msk.f32.mxu0 %vm113_vm0, %v3249_v63  ;;  %v480_v25 = vadd.f32 %v9494_v23, %v12073_v38  ;;  %v474_v26 = vpop.f32.mrb[5].mxu1 }
 0x106   :  { %313 = vst.msk [vmem:[#allocation2 + $0x28] sm:$0xff] %vm307_vm1, %v254_v19  ;;  %9820 = vmatmul.mubr.msk.f32.gmra.mrb[110].mxu1 %vm113_vm0, %v3039_v18  ;;  %v475_v28 = vadd.f32 %v12073_v38, %v474_v26  ;;  %v3481_v19 = vld [vmem:[%s14807_s2 + $0x7b8] sm:$0xff] }
 0x107   :  { %312 = vst.msk [vmem:[#allocation2 + $0x20] sm:$0xff] %vm307_vm1, %v249_v22  ;;  %v9471_v29 = vpop.f32.mrb[6].mxu0  ;;  %9850 = vmatprep.mubr.msk.f32.mxu1 %vm113_vm0, %v3474_v21  ;;  %538 = vst.msk [vmem:[#allocation2 + $0xa8] sm:$0xff] %vm307_vm1, %v480_v25  ;;  %v3482_v22 = vld [vmem:[%s14807_s2 + $0x7c0] sm:$0xff]  ;;  %v3258_v25 = vld [vmem:[%s14807_s2 + $0x748] sm:$0xff] }
 0x108   :  { %v264_v30 = vadd.f32 %v9471_v29, %v12073_v38  ;;  %v258_v31 = vpop.f32.mrb[7].mxu0  ;;  %9825 = vmatmul.mubr.msk.f32.vlgmr.msra.gmra.mrb[112].mxu0 %vm113_vm0, %v3250_v24  ;;  %537 = vst.msk [vmem:[#allocation2 + $0xa0] sm:$0xff] %vm307_vm1, %v475_v28  ;;  %v9497_v34 = vpop.f32.mrb[6].mxu1  ;;  %v3259_v28 = vld [vmem:[%s14807_s2 + $0x750] sm:$0xff] }
 0x109   :  { %v259_v33 = vadd.f32 %v12073_v38, %v258_v31  ;;  %9875 = vmatpush3.msra.mxu0 %v12168_v35  ;;  %9827 = vmatprep.mubr.msk.f32.mxu0 %vm113_vm0, %v3251_v27  ;;  %v490_v37 = vadd.f32 %v9497_v34, %v12073_v38  ;;  %v484_v39 = vpop.f32.mrb[7].mxu1 }
 0x10a   :  { %315 = vst.msk [vmem:[#allocation2 + $0x38] sm:$0xff] %vm307_vm1, %v264_v30  ;;  %9851 = vmatmul.mubr.msk.f32.vlgmr.msra.gmra.mrb[112].mxu1 %vm113_vm0, %v3475_v15  ;;  %9926 = vmatprep.subr.mxu0 %v12168_v35  ;;  %v485_v41 = vadd.f32 %v12073_v38, %v484_v39  ;;  %v3483_v30 = vld [vmem:[%s14807_s2 + $0x7c8] sm:$0xff] }
 0x10b   :  { %314 = vst.msk [vmem:[#allocation2 + $0x30] sm:$0xff] %vm307_vm1, %v259_v33  ;;  %v9474_v42 = vpop.f32.mrb[8].mxu0  ;;  %9901 = vmatpush3.msra.mxu1 %v12168_v35  ;;  %9853 = vmatprep.mubr.msk.f32.mxu1 %vm113_vm0, %v3476_v32  ;;  %540 = vst.msk [vmem:[#allocation2 + $0xb8] sm:$0xff] %vm307_vm1, %v490_v37  ;;  %v3484_v33 = vld [vmem:[%s14807_s2 + $0x7d0] sm:$0xff]  ;;  %v3260_v37 = vld [vmem:[%s14807_s2 + $0x758] sm:$0xff] }
 0x10c   :  { %v274_v44 = vadd.f32 %v9474_v42, %v12073_v38  ;;  %v268_v45 = vpop.f32.mrb[9].mxu0  ;;  %9828 = vmatmul.mubr.msk.f32.gmra.mrb[114].mxu0 %vm113_vm0, %v3252_v36  ;;  %9952 = vmatprep.subr.mxu1 %v12168_v35  ;;  %539 = vst.msk [vmem:[#allocation2 + $0xb0] sm:$0xff] %vm307_vm1, %v485_v41  ;;  %v9500_v48 = vpop.f32.mrb[8].mxu1  ;;  %v3261_v41 = vld [vmem:[%s14807_s2 + $0x760] sm:$0xff] }
 0x10d   :  { %v269_v47 = vadd.f32 %v12073_v38, %v268_v45  ;;  %9830 = vmatprep.mubr.msk.f32.mxu0 %vm113_vm0, %v3253_v40  ;;  %v500_v50 = vadd.f32 %v9500_v48, %v12073_v38  ;;  %v494_v51 = vpop.f32.mrb[9].mxu1 }
 0x10e   :  { %317 = vst.msk [vmem:[#allocation2 + $0x48] sm:$0xff] %vm307_vm1, %v274_v44  ;;  %9854 = vmatmul.mubr.msk.f32.gmra.mrb[114].mxu1 %vm113_vm0, %v3477_v43  ;;  %v495_v53 = vadd.f32 %v12073_v38, %v494_v51  ;;  %v3485_v44 = vld [vmem:[%s14807_s2 + $0x7d8] sm:$0xff] }
 0x10f   :  { %316 = vst.msk [vmem:[#allocation2 + $0x40] sm:$0xff] %vm307_vm1, %v269_v47  ;;  %v9477_v54 = vpop.f32.mrb[10].mxu0  ;;  %9856 = vmatprep.mubr.msk.f32.mxu1 %vm113_vm0, %v3478_v46  ;;  %542 = vst.msk [vmem:[#allocation2 + $0xc8] sm:$0xff] %vm307_vm1, %v500_v50  ;;  %v3486_v47 = vld [vmem:[%s14807_s2 + $0x7e0] sm:$0xff]  ;;  %v3262_v50 = vld [vmem:[%s14807_s2 + $0x768] sm:$0xff] }
 0x110   :  { %v284_v56 = vadd.f32 %v9477_v54, %v12073_v38  ;;  %v278_v57 = vpop.f32.mrb[11].mxu0  ;;  %9831 = vmatmul.mubr.msk.f32.gmra.mrb[116].mxu0 %vm113_vm0, %v3254_v49  ;;  %541 = vst.msk [vmem:[#allocation2 + $0xc0] sm:$0xff] %vm307_vm1, %v495_v53  ;;  %v9503_v60 = vpop.f32.mrb[10].mxu1  ;;  %v3263_v53 = vld [vmem:[%s14807_s2 + $0x770] sm:$0xff] }
 0x111   :  { %v279_v59 = vadd.f32 %v12073_v38, %v278_v57  ;;  %9833 = vmatprep.mubr.msk.f32.mxu0 %vm113_vm0, %v3255_v52  ;;  %v510_v62 = vadd.f32 %v9503_v60, %v12073_v38  ;;  %v504_v63 = vpop.f32.mrb[11].mxu1 }
 0x112   :  { %319 = vst.msk [vmem:[#allocation2 + $0x58] sm:$0xff] %vm307_vm1, %v284_v56  ;;  %9857 = vmatmul.mubr.msk.f32.gmra.mrb[116].mxu1 %vm113_vm0, %v3479_v55  ;;  %v505_v17 = vadd.f32 %v12073_v38, %v504_v63  ;;  %v3487_v56 = vld [vmem:[%s14807_s2 + $0x7e8] sm:$0xff] }
 0x113   :  { %318 = vst.msk [vmem:[#allocation2 + $0x50] sm:$0xff] %vm307_vm1, %v279_v59  ;;  %v9480_v18 = vpop.f32.mrb[12].mxu0  ;;  %9859 = vmatprep.mubr.msk.f32.mxu1 %vm113_vm0, %v3480_v58  ;;  %544 = vst.msk [vmem:[#allocation2 + $0xd8] sm:$0xff] %vm307_vm1, %v510_v62  ;;  %v3488_v59 = vld [vmem:[%s14807_s2 + $0x7f0] sm:$0xff]  ;;  %v3264_v62 = vld [vmem:[%s14807_s2 + $0x778] sm:$0xff] }
 0x114   :  { %v294_v20 = vadd.f32 %v9480_v18, %v12073_v38  ;;  %v288_v21 = vpop.f32.mrb[13].mxu0  ;;  %9834 = vmatmul.mubr.msk.f32.gmra.mrb[118].mxu0 %vm113_vm0, %v3256_v61  ;;  %543 = vst.msk [vmem:[#allocation2 + $0xd0] sm:$0xff] %vm307_vm1, %v505_v17  ;;  %v9506_v24 = vpop.f32.mrb[12].mxu1  ;;  %v3699_v17 = vld [vmem:[%s14807_s2 + $0x800] sm:$0xff] }
 0x115   :  { %v289_v23 = vadd.f32 %v12073_v38, %v288_v21  ;;  %9836 = vmatprep.mubr.msk.f32.mxu0 %vm113_vm0, %v3257_v0  ;;  %v520_v26 = vadd.f32 %v9506_v24, %v12073_v38  ;;  %v514_v27 = vpop.f32.mrb[13].mxu1 }
 0x116   :  { %321 = vst.msk [vmem:[#allocation2 + $0x68] sm:$0xff] %vm307_vm1, %v294_v20  ;;  %9860 = vmatmul.mubr.msk.f32.gmra.mrb[118].mxu1 %vm113_vm0, %v3481_v19  ;;  %v515_v29 = vadd.f32 %v12073_v38, %v514_v27  ;;  %v3489_v20 = vld [vmem:[%s14807_s2 + $0x7f8] sm:$0xff] }
 0x117   :  { %320 = vst.msk [vmem:[#allocation2 + $0x60] sm:$0xff] %vm307_vm1, %v289_v23  ;;  %v9483_v15 = vpop.f32.mrb[14].mxu0  ;;  %9862 = vmatprep.mubr.msk.f32.mxu1 %vm113_vm0, %v3482_v22  ;;  %546 = vst.msk [vmem:[#allocation2 + $0xe8] sm:$0xff] %vm307_vm1, %v520_v26  ;;  %v3924_v23 = vld [vmem:[%s14807_s2 + $0x880] sm:$0xff]  ;;  %v3700_v26 = vld [vmem:[%s14807_s2 + $0x808] sm:$0xff] }
 0x118   :  { %v304_v31 = vadd.f32 %v9483_v15, %v12073_v38  ;;  %v298_v32 = vpop.f32.mrb[15].mxu0  ;;  %9837 = vmatmul.mubr.msk.f32.gmra.mrb[120].mxu0 %vm113_vm0, %v3258_v25  ;;  %545 = vst.msk [vmem:[#allocation2 + $0xe0] sm:$0xff] %vm307_vm1, %v515_v29  ;;  %v9509_v36 = vpop.f32.mrb[14].mxu1  ;;  %v3701_v29 = vld [vmem:[%s14807_s2 + $0x810] sm:$0xff] }
 0x119   :  { %v299_v34 = vadd.f32 %v12073_v38, %v298_v32  ;;  %9839 = vmatprep.mubr.msk.f32.mxu0 %vm113_vm0, %v3259_v28  ;;  %v530_v39 = vadd.f32 %v9509_v36, %v12073_v38  ;;  %v524_v40 = vpop.f32.mrb[15].mxu1 }
 0x11a   :  { %323 = vst.msk [vmem:[#allocation2 + $0x78] sm:$0xff] %vm307_vm1, %v304_v31  ;;  %9863 = vmatmul.mubr.msk.f32.gmra.mrb[120].mxu1 %vm113_vm0, %v3483_v30  ;;  %v525_v42 = vadd.f32 %v12073_v38, %v524_v40  ;;  %v3925_v31 = vld [vmem:[%s14807_s2 + $0x888] sm:$0xff] }
 0x11b   :  { %322 = vst.msk [vmem:[#allocation2 + $0x70] sm:$0xff] %vm307_vm1, %v299_v34  ;;  %v9514_v43 = vpop.f32.mrb[16].mxu0  ;;  %9865 = vmatprep.mubr.msk.f32.mxu1 %vm113_vm0, %v3484_v33  ;;  %548 = vst.msk [vmem:[#allocation2 + $0xf8] sm:$0xff] %vm307_vm1, %v530_v39  ;;  %v3926_v34 = vld [vmem:[%s14807_s2 + $0x890] sm:$0xff]  ;;  %v3702_v39 = vld [vmem:[%s14807_s2 + $0x818] sm:$0xff] }
 0x11c   :  { %v685_v45 = vadd.f32 %v9514_v43, %v12073_v38  ;;  %v679_v46 = vpop.f32.mrb[17].mxu0  ;;  %9840 = vmatmul.mubr.msk.f32.gmra.mrb[122].mxu0 %vm113_vm0, %v3260_v37  ;;  %547 = vst.msk [vmem:[#allocation2 + $0xf0] sm:$0xff] %vm307_vm1, %v525_v42  ;;  %v3703_v42 = vld [vmem:[%s14807_s2 + $0x820] sm:$0xff] }
 0x11d   :  { %v680_v48 = vadd.f32 %v12073_v38, %v679_v46  ;;  %v9540_v49 = vpop.f32.mrb[16].mxu1  ;;  %9842 = vmatprep.mubr.msk.f32.mxu0 %vm113_vm0, %v3261_v41 }
 0x11e   :  { %759 = vst.msk [vmem:[#allocation2 + $0x108] sm:$0xff] %vm307_vm1, %v685_v45  ;;  %v910_v51 = vadd.f32 %v9540_v49, %v12073_v38  ;;  %v904_v52 = vpop.f32.mrb[17].mxu1  ;;  %9866 = vmatmul.mubr.msk.f32.gmra.mrb[122].mxu1 %vm113_vm0, %v3485_v44  ;;  %v3927_v45 = vld [vmem:[%s14807_s2 + $0x898] sm:$0xff] }
 0x11f   :  { %758 = vst.msk [vmem:[#allocation2 + $0x100] sm:$0xff] %vm307_vm1, %v680_v48  ;;  %v905_v54 = vadd.f32 %v12073_v38, %v904_v52  ;;  %v9517_v55 = vpop.f32.mrb[18].mxu0  ;;  %9868 = vmatprep.mubr.msk.f32.mxu1 %vm113_vm0, %v3486_v47  ;;  %v3928_v48 = vld [vmem:[%s14807_s2 + $0x8a0] sm:$0xff] }
 0x120   :  { %984 = vst.msk [vmem:[#allocation2 + $0x188] sm:$0xff] %vm307_vm1, %v910_v51  ;;  %v695_v57 = vadd.f32 %v9517_v55, %v12073_v38  ;;  %v689_v58 = vpop.f32.mrb[19].mxu0  ;;  %9843 = vmatmul.mubr.msk.f32.gmra.mrb[124].mxu0 %vm113_vm0, %v3262_v50  ;;  %v3704_v51 = vld [vmem:[%s14807_s2 + $0x828] sm:$0xff] }
 0x121   :  { %983 = vst.msk [vmem:[#allocation2 + $0x180] sm:$0xff] %vm307_vm1, %v905_v54  ;;  %v690_v60 = vadd.f32 %v12073_v38, %v689_v58  ;;  %v9543_v61 = vpop.f32.mrb[18].mxu1  ;;  %9845 = vmatprep.mubr.msk.f32.mxu0 %vm113_vm0, %v3263_v53  ;;  %v3705_v54 = vld [vmem:[%s14807_s2 + $0x830] sm:$0xff] }
 0x122   :  { %761 = vst.msk [vmem:[#allocation2 + $0x118] sm:$0xff] %vm307_vm1, %v695_v57  ;;  %v920_v63 = vadd.f32 %v9543_v61, %v12073_v38  ;;  %v914_v0 = vpop.f32.mrb[19].mxu1  ;;  %9869 = vmatmul.mubr.msk.f32.gmra.mrb[124].mxu1 %vm113_vm0, %v3487_v56  ;;  %v3929_v57 = vld [vmem:[%s14807_s2 + $0x8a8] sm:$0xff] }
 0x123   :  { %760 = vst.msk [vmem:[#allocation2 + $0x110] sm:$0xff] %vm307_vm1, %v690_v60  ;;  %v915_v18 = vadd.f32 %v12073_v38, %v914_v0  ;;  %v9520_v19 = vpop.f32.mrb[20].mxu0  ;;  %9871 = vmatprep.mubr.msk.f32.mxu1 %vm113_vm0, %v3488_v59  ;;  %v3930_v60 = vld [vmem:[%s14807_s2 + $0x8b0] sm:$0xff] }
 0x124   :  { %986 = vst.msk [vmem:[#allocation2 + $0x198] sm:$0xff] %vm307_vm1, %v920_v63  ;;  %v705_v21 = vadd.f32 %v9520_v19, %v12073_v38  ;;  %v699_v22 = vpop.f32.mrb[21].mxu0  ;;  %9846 = vmatmul.mubr.msk.f32.gmra.mrb[126].mxu0 %vm113_vm0, %v3264_v62  ;;  %v3706_v63 = vld [vmem:[%s14807_s2 + $0x838] sm:$0xff] }
 0x125   :  { %985 = vst.msk [vmem:[#allocation2 + $0x190] sm:$0xff] %vm307_vm1, %v915_v18  ;;  %v700_v24 = vadd.f32 %v12073_v38, %v699_v22  ;;  %v9546_v25 = vpop.f32.mrb[20].mxu1  ;;  %9876 = vmatprep.mubr.msk.f32.mxu0 %vm113_vm0, %v3699_v17  ;;  %v3707_v18 = vld [vmem:[%s14807_s2 + $0x840] sm:$0xff] }
 0x126   :  { %763 = vst.msk [vmem:[#allocation2 + $0x128] sm:$0xff] %vm307_vm1, %v705_v21  ;;  %v930_v27 = vadd.f32 %v9546_v25, %v12073_v38  ;;  %v924_v28 = vpop.f32.mrb[21].mxu1  ;;  %9872 = vmatmul.mubr.msk.f32.gmra.mrb[126].mxu1 %vm113_vm0, %v3489_v20  ;;  %v3931_v21 = vld [vmem:[%s14807_s2 + $0x8b8] sm:$0xff] }
 0x127   :  { %762 = vst.msk [vmem:[#allocation2 + $0x120] sm:$0xff] %vm307_vm1, %v700_v24  ;;  %v925_v15 = vadd.f32 %v12073_v38, %v924_v28  ;;  %v9523_v30 = vpop.f32.mrb[22].mxu0  ;;  %9902 = vmatprep.mubr.msk.f32.mxu1 %vm113_vm0, %v3924_v23  ;;  %v3932_v24 = vld [vmem:[%s14807_s2 + $0x8c0] sm:$0xff] }
 0x128   :  { %988 = vst.msk [vmem:[#allocation2 + $0x1a8] sm:$0xff] %vm307_vm1, %v930_v27  ;;  %v715_v32 = vadd.f32 %v9523_v30, %v12073_v38  ;;  %v709_v33 = vpop.f32.mrb[23].mxu0  ;;  %9877 = vmatmul.mubr.msk.f32.vlgmr.msra.gmra.mrb[128].mxu0 %vm113_vm0, %v3700_v26  ;;  %v3708_v27 = vld [vmem:[%s14807_s2 + $0x848] sm:$0xff] }
 0x129   :  { %987 = vst.msk [vmem:[#allocation2 + $0x1a0] sm:$0xff] %vm307_vm1, %v925_v15  ;;  %v710_v36 = vadd.f32 %v12073_v38, %v709_v33  ;;  %v9549_v37 = vpop.f32.mrb[22].mxu1  ;;  %9927 = vmatpush3.msra.mxu0 %v12168_v35  ;;  %9879 = vmatprep.mubr.msk.f32.mxu0 %vm113_vm0, %v3701_v29  ;;  %v3709_v15 = vld [vmem:[%s14807_s2 + $0x850] sm:$0xff] }
 0x12a   :  { %765 = vst.msk [vmem:[#allocation2 + $0x138] sm:$0xff] %vm307_vm1, %v715_v32  ;;  %v940_v40 = vadd.f32 %v9549_v37, %v12073_v38  ;;  %v934_v41 = vpop.f32.mrb[23].mxu1  ;;  %9903 = vmatmul.mubr.msk.f32.vlgmr.msra.gmra.mrb[128].mxu1 %vm113_vm0, %v3925_v31  ;;  %9978 = vmatprep.subr.mxu0 %v12168_v35  ;;  %v3933_v32 = vld [vmem:[%s14807_s2 + $0x8c8] sm:$0xff] }
 0x12b   :  { %764 = vst.msk [vmem:[#allocation2 + $0x130] sm:$0xff] %vm307_vm1, %v710_v36  ;;  %v935_v43 = vadd.f32 %v12073_v38, %v934_v41  ;;  %v9526_v44 = vpop.f32.mrb[24].mxu0  ;;  %9953 = vmatpush3.msra.mxu1 %v12168_v35  ;;  %9905 = vmatprep.mubr.msk.f32.mxu1 %vm113_vm0, %v3926_v34  ;;  %v3934_v36 = vld [vmem:[%s14807_s2 + $0x8d0] sm:$0xff] }
 0x12c   :  { %990 = vst.msk [vmem:[#allocation2 + $0x1b8] sm:$0xff] %vm307_vm1, %v940_v40  ;;  %v725_v46 = vadd.f32 %v9526_v44, %v12073_v38  ;;  %v719_v47 = vpop.f32.mrb[25].mxu0  ;;  %9880 = vmatmul.mubr.msk.f32.gmra.mrb[130].mxu0 %vm113_vm0, %v3702_v39  ;;  %10004 = vmatprep.subr.mxu1 %v12168_v35  ;;  %v3710_v40 = vld [vmem:[%s14807_s2 + $0x858] sm:$0xff] }
 0x12d   :  { %989 = vst.msk [vmem:[#allocation2 + $0x1b0] sm:$0xff] %vm307_vm1, %v935_v43  ;;  %v720_v49 = vadd.f32 %v12073_v38, %v719_v47  ;;  %v9552_v50 = vpop.f32.mrb[24].mxu1  ;;  %9882 = vmatprep.mubr.msk.f32.mxu0 %vm113_vm0, %v3703_v42  ;;  %v3711_v43 = vld [vmem:[%s14807_s2 + $0x860] sm:$0xff] }
 0x12e   :  { %767 = vst.msk [vmem:[#allocation2 + $0x148] sm:$0xff] %vm307_vm1, %v725_v46  ;;  %v950_v52 = vadd.f32 %v9552_v50, %v12073_v38  ;;  %v944_v53 = vpop.f32.mrb[25].mxu1  ;;  %9906 = vmatmul.mubr.msk.f32.gmra.mrb[130].mxu1 %vm113_vm0, %v3927_v45  ;;  %v3935_v46 = vld [vmem:[%s14807_s2 + $0x8d8] sm:$0xff] }
 0x12f   :  { %766 = vst.msk [vmem:[#allocation2 + $0x140] sm:$0xff] %vm307_vm1, %v720_v49  ;;  %v945_v55 = vadd.f32 %v12073_v38, %v944_v53  ;;  %v9529_v56 = vpop.f32.mrb[26].mxu0  ;;  %9908 = vmatprep.mubr.msk.f32.mxu1 %vm113_vm0, %v3928_v48  ;;  %v3936_v49 = vld [vmem:[%s14807_s2 + $0x8e0] sm:$0xff] }
 0x130   :  { %992 = vst.msk [vmem:[#allocation2 + $0x1c8] sm:$0xff] %vm307_vm1, %v950_v52  ;;  %v735_v58 = vadd.f32 %v9529_v56, %v12073_v38  ;;  %v729_v59 = vpop.f32.mrb[27].mxu0  ;;  %9883 = vmatmul.mubr.msk.f32.gmra.mrb[132].mxu0 %vm113_vm0, %v3704_v51  ;;  %v3712_v52 = vld [vmem:[%s14807_s2 + $0x868] sm:$0xff] }
 0x131   :  { %991 = vst.msk [vmem:[#allocation2 + $0x1c0] sm:$0xff] %vm307_vm1, %v945_v55  ;;  %v730_v61 = vadd.f32 %v12073_v38, %v729_v59  ;;  %v9555_v62 = vpop.f32.mrb[26].mxu1  ;;  %9885 = vmatprep.mubr.msk.f32.mxu0 %vm113_vm0, %v3705_v54  ;;  %v3713_v55 = vld [vmem:[%s14807_s2 + $0x870] sm:$0xff] }
 0x132   :  { %769 = vst.msk [vmem:[#allocation2 + $0x158] sm:$0xff] %vm307_vm1, %v735_v58  ;;  %v960_v0 = vadd.f32 %v9555_v62, %v12073_v38  ;;  %v954_v17 = vpop.f32.mrb[27].mxu1  ;;  %9909 = vmatmul.mubr.msk.f32.gmra.mrb[132].mxu1 %vm113_vm0, %v3929_v57  ;;  %v3937_v58 = vld [vmem:[%s14807_s2 + $0x8e8] sm:$0xff] }
 0x133   :  { %768 = vst.msk [vmem:[#allocation2 + $0x150] sm:$0xff] %vm307_vm1, %v730_v61  ;;  %v955_v19 = vadd.f32 %v12073_v38, %v954_v17  ;;  %v9532_v20 = vpop.f32.mrb[28].mxu0  ;;  %9911 = vmatprep.mubr.msk.f32.mxu1 %vm113_vm0, %v3930_v60  ;;  %v3938_v61 = vld [vmem:[%s14807_s2 + $0x8f0] sm:$0xff] }
 0x134   :  { %994 = vst.msk [vmem:[#allocation2 + $0x1d8] sm:$0xff] %vm307_vm1, %v960_v0  ;;  %v745_v22 = vadd.f32 %v9532_v20, %v12073_v38  ;;  %v739_v23 = vpop.f32.mrb[29].mxu0  ;;  %9886 = vmatmul.mubr.msk.f32.gmra.mrb[134].mxu0 %vm113_vm0, %v3706_v63  ;;  %v3714_v0 = vld [vmem:[%s14807_s2 + $0x878] sm:$0xff] }
 0x135   :  { %993 = vst.msk [vmem:[#allocation2 + $0x1d0] sm:$0xff] %vm307_vm1, %v955_v19  ;;  %v740_v25 = vadd.f32 %v12073_v38, %v739_v23  ;;  %v9558_v26 = vpop.f32.mrb[28].mxu1  ;;  %9888 = vmatprep.mubr.msk.f32.mxu0 %vm113_vm0, %v3707_v18  ;;  %v4149_v19 = vld [vmem:[%s14807_s2 + $0x900] sm:$0xff] }
 0x136   :  { %771 = vst.msk [vmem:[#allocation2 + $0x168] sm:$0xff] %vm307_vm1, %v745_v22  ;;  %v970_v28 = vadd.f32 %v9558_v26, %v12073_v38  ;;  %v964_v29 = vpop.f32.mrb[29].mxu1  ;;  %9912 = vmatmul.mubr.msk.f32.gmra.mrb[134].mxu1 %vm113_vm0, %v3931_v21  ;;  %v3939_v22 = vld [vmem:[%s14807_s2 + $0x8f8] sm:$0xff] }
 0x137   :  { %770 = vst.msk [vmem:[#allocation2 + $0x160] sm:$0xff] %vm307_vm1, %v740_v25  ;;  %v965_v30 = vadd.f32 %v12073_v38, %v964_v29  ;;  %v9535_v31 = vpop.f32.mrb[30].mxu0  ;;  %9914 = vmatprep.mubr.msk.f32.mxu1 %vm113_vm0, %v3932_v24  ;;  %v4374_v25 = vld [vmem:[%s14807_s2 + $0x980] sm:$0xff] }
 0x138   :  { %996 = vst.msk [vmem:[#allocation2 + $0x1e8] sm:$0xff] %vm307_vm1, %v970_v28  ;;  %v755_v33 = vadd.f32 %v9535_v31, %v12073_v38  ;;  %v749_v34 = vpop.f32.mrb[31].mxu0  ;;  %9889 = vmatmul.mubr.msk.f32.gmra.mrb[136].mxu0 %vm113_vm0, %v3708_v27  ;;  %v4150_v28 = vld [vmem:[%s14807_s2 + $0x908] sm:$0xff] }
 0x139   :  { %995 = vst.msk [vmem:[#allocation2 + $0x1e0] sm:$0xff] %vm307_vm1, %v965_v30  ;;  %v750_v37 = vadd.f32 %v12073_v38, %v749_v34  ;;  %v9561_v39 = vpop.f32.mrb[30].mxu1  ;;  %9891 = vmatprep.mubr.msk.f32.mxu0 %vm113_vm0, %v3709_v15  ;;  %v4151_v30 = vld [vmem:[%s14807_s2 + $0x910] sm:$0xff] }
 0x13a   :  { %773 = vst.msk [vmem:[#allocation2 + $0x178] sm:$0xff] %vm307_vm1, %v755_v33  ;;  %v980_v41 = vadd.f32 %v9561_v39, %v12073_v38  ;;  %v974_v42 = vpop.f32.mrb[31].mxu1  ;;  %9915 = vmatmul.mubr.msk.f32.gmra.mrb[136].mxu1 %vm113_vm0, %v3933_v32  ;;  %v4375_v33 = vld [vmem:[%s14807_s2 + $0x988] sm:$0xff] }
 0x13b   :  { %772 = vst.msk [vmem:[#allocation2 + $0x170] sm:$0xff] %vm307_vm1, %v750_v37  ;;  %v975_v44 = vadd.f32 %v12073_v38, %v974_v42  ;;  %v9566_v45 = vpop.f32.mrb[32].mxu0  ;;  %9917 = vmatprep.mubr.msk.f32.mxu1 %vm113_vm0, %v3934_v36  ;;  %v4376_v37 = vld [vmem:[%s14807_s2 + $0x990] sm:$0xff] }
 0x13c   :  { %998 = vst.msk [vmem:[#allocation2 + $0x1f8] sm:$0xff] %vm307_vm1, %v980_v41  ;;  %v1135_v47 = vadd.f32 %v9566_v45, %v12073_v38  ;;  %v1129_v48 = vpop.f32.mrb[33].mxu0  ;;  %9892 = vmatmul.mubr.msk.f32.gmra.mrb[138].mxu0 %vm113_vm0, %v3710_v40  ;;  %v4152_v41 = vld [vmem:[%s14807_s2 + $0x918] sm:$0xff] }
 0x13d   :  { %997 = vst.msk [vmem:[#allocation2 + $0x1f0] sm:$0xff] %vm307_vm1, %v975_v44  ;;  %v1130_v50 = vadd.f32 %v12073_v38, %v1129_v48  ;;  %v9592_v51 = vpop.f32.mrb[32].mxu1  ;;  %9894 = vmatprep.mubr.msk.f32.mxu0 %vm113_vm0, %v3711_v43  ;;  %v4153_v44 = vld [vmem:[%s14807_s2 + $0x920] sm:$0xff] }
 0x13e   :  { %1209 = vst.msk [vmem:[#allocation2 + $0x208] sm:$0xff] %vm307_vm1, %v1135_v47  ;;  %v1360_v53 = vadd.f32 %v9592_v51, %v12073_v38  ;;  %v1354_v54 = vpop.f32.mrb[33].mxu1  ;;  %9918 = vmatmul.mubr.msk.f32.gmra.mrb[138].mxu1 %vm113_vm0, %v3935_v46  ;;  %v4377_v47 = vld [vmem:[%s14807_s2 + $0x998] sm:$0xff] }
 0x13f   :  { %1208 = vst.msk [vmem:[#allocation2 + $0x200] sm:$0xff] %vm307_vm1, %v1130_v50  ;;  %v1355_v56 = vadd.f32 %v12073_v38, %v1354_v54  ;;  %v9569_v57 = vpop.f32.mrb[34].mxu0  ;;  %9920 = vmatprep.mubr.msk.f32.mxu1 %vm113_vm0, %v3936_v49  ;;  %v4378_v50 = vld [vmem:[%s14807_s2 + $0x9a0] sm:$0xff] }
 0x140   :  { %1434 = vst.msk [vmem:[#allocation2 + $0x288] sm:$0xff] %vm307_vm1, %v1360_v53  ;;  %v1145_v59 = vadd.f32 %v9569_v57, %v12073_v38  ;;  %v1139_v60 = vpop.f32.mrb[35].mxu0  ;;  %9895 = vmatmul.mubr.msk.f32.gmra.mrb[140].mxu0 %vm113_vm0, %v3712_v52  ;;  %v4154_v53 = vld [vmem:[%s14807_s2 + $0x928] sm:$0xff] }
 0x141   :  { %1433 = vst.msk [vmem:[#allocation2 + $0x280] sm:$0xff] %vm307_vm1, %v1355_v56  ;;  %v1140_v62 = vadd.f32 %v12073_v38, %v1139_v60  ;;  %v9595_v63 = vpop.f32.mrb[34].mxu1  ;;  %9897 = vmatprep.mubr.msk.f32.mxu0 %vm113_vm0, %v3713_v55  ;;  %v4155_v56 = vld [vmem:[%s14807_s2 + $0x930] sm:$0xff] }
 0x142   :  { %1211 = vst.msk [vmem:[#allocation2 + $0x218] sm:$0xff] %vm307_vm1, %v1145_v59  ;;  %v1370_v17 = vadd.f32 %v9595_v63, %v12073_v38  ;;  %v1364_v18 = vpop.f32.mrb[35].mxu1  ;;  %9921 = vmatmul.mubr.msk.f32.gmra.mrb[140].mxu1 %vm113_vm0, %v3937_v58  ;;  %v4379_v59 = vld [vmem:[%s14807_s2 + $0x9a8] sm:$0xff] }
 0x143   :  { %1210 = vst.msk [vmem:[#allocation2 + $0x210] sm:$0xff] %vm307_vm1, %v1140_v62  ;;  %v1365_v20 = vadd.f32 %v12073_v38, %v1364_v18  ;;  %v9572_v21 = vpop.f32.mrb[36].mxu0  ;;  %9923 = vmatprep.mubr.msk.f32.mxu1 %vm113_vm0, %v3938_v61  ;;  %v4380_v62 = vld [vmem:[%s14807_s2 + $0x9b0] sm:$0xff] }
 0x144   :  { %1436 = vst.msk [vmem:[#allocation2 + $0x298] sm:$0xff] %vm307_vm1, %v1370_v17  ;;  %v1155_v23 = vadd.f32 %v9572_v21, %v12073_v38  ;;  %v1149_v24 = vpop.f32.mrb[37].mxu0  ;;  %9898 = vmatmul.mubr.msk.f32.gmra.mrb[142].mxu0 %vm113_vm0, %v3714_v0  ;;  %v4156_v17 = vld [vmem:[%s14807_s2 + $0x938] sm:$0xff] }
 0x145   :  { %1435 = vst.msk [vmem:[#allocation2 + $0x290] sm:$0xff] %vm307_vm1, %v1365_v20  ;;  %v1150_v26 = vadd.f32 %v12073_v38, %v1149_v24  ;;  %v9598_v27 = vpop.f32.mrb[36].mxu1  ;;  %9928 = vmatprep.mubr.msk.f32.mxu0 %vm113_vm0, %v4149_v19  ;;  %v4157_v20 = vld [vmem:[%s14807_s2 + $0x940] sm:$0xff] }
 0x146   :  { %1213 = vst.msk [vmem:[#allocation2 + $0x228] sm:$0xff] %vm307_vm1, %v1155_v23  ;;  %v1380_v29 = vadd.f32 %v9598_v27, %v12073_v38  ;;  %v1374_v15 = vpop.f32.mrb[37].mxu1  ;;  %9924 = vmatmul.mubr.msk.f32.gmra.mrb[142].mxu1 %vm113_vm0, %v3939_v22  ;;  %v4381_v23 = vld [vmem:[%s14807_s2 + $0x9b8] sm:$0xff] }
 0x147   :  { %1212 = vst.msk [vmem:[#allocation2 + $0x220] sm:$0xff] %vm307_vm1, %v1150_v26  ;;  %v1375_v31 = vadd.f32 %v12073_v38, %v1374_v15  ;;  %v9575_v32 = vpop.f32.mrb[38].mxu0  ;;  %9954 = vmatprep.mubr.msk.f32.mxu1 %vm113_vm0, %v4374_v25  ;;  %v4382_v26 = vld [vmem:[%s14807_s2 + $0x9c0] sm:$0xff] }
 0x148   :  { %1438 = vst.msk [vmem:[#allocation2 + $0x2a8] sm:$0xff] %vm307_vm1, %v1380_v29  ;;  %v1165_v34 = vadd.f32 %v9575_v32, %v12073_v38  ;;  %v1159_v36 = vpop.f32.mrb[39].mxu0  ;;  %9929 = vmatmul.mubr.msk.f32.vlgmr.msra.gmra.mrb[144].mxu0 %vm113_vm0, %v4150_v28  ;;  %v4158_v29 = vld [vmem:[%s14807_s2 + $0x948] sm:$0xff] }
 0x149   :  { %1437 = vst.msk [vmem:[#allocation2 + $0x2a0] sm:$0xff] %vm307_vm1, %v1375_v31  ;;  %v1160_v39 = vadd.f32 %v12073_v38, %v1159_v36  ;;  %v9601_v40 = vpop.f32.mrb[38].mxu1  ;;  %9979 = vmatpush3.msra.mxu0 %v12168_v35  ;;  %9931 = vmatprep.mubr.msk.f32.mxu0 %vm113_vm0, %v4151_v30  ;;  %v4159_v31 = vld [vmem:[%s14807_s2 + $0x950] sm:$0xff] }
 0x14a   :  { %1215 = vst.msk [vmem:[#allocation2 + $0x238] sm:$0xff] %vm307_vm1, %v1165_v34  ;;  %v1390_v42 = vadd.f32 %v9601_v40, %v12073_v38  ;;  %v1384_v43 = vpop.f32.mrb[39].mxu1  ;;  %9955 = vmatmul.mubr.msk.f32.vlgmr.msra.gmra.mrb[144].mxu1 %vm113_vm0, %v4375_v33  ;;  %10030 = vmatprep.subr.mxu0 %v12168_v35  ;;  %v4383_v34 = vld [vmem:[%s14807_s2 + $0x9c8] sm:$0xff] }
 0x14b   :  { %1214 = vst.msk [vmem:[#allocation2 + $0x230] sm:$0xff] %vm307_vm1, %v1160_v39  ;;  %v1385_v45 = vadd.f32 %v12073_v38, %v1384_v43  ;;  %v9578_v46 = vpop.f32.mrb[40].mxu0  ;;  %10005 = vmatpush3.msra.mxu1 %v12168_v35  ;;  %9957 = vmatprep.mubr.msk.f32.mxu1 %vm113_vm0, %v4376_v37  ;;  %v4384_v39 = vld [vmem:[%s14807_s2 + $0x9d0] sm:$0xff] }
 0x14c   :  { %1440 = vst.msk [vmem:[#allocation2 + $0x2b8] sm:$0xff] %vm307_vm1, %v1390_v42  ;;  %v1175_v48 = vadd.f32 %v9578_v46, %v12073_v38  ;;  %v1169_v49 = vpop.f32.mrb[41].mxu0  ;;  %9932 = vmatmul.mubr.msk.f32.gmra.mrb[146].mxu0 %vm113_vm0, %v4152_v41  ;;  %10056 = vmatprep.subr.mxu1 %v12168_v35  ;;  %v4160_v42 = vld [vmem:[%s14807_s2 + $0x958] sm:$0xff] }
 0x14d   :  { %1439 = vst.msk [vmem:[#allocation2 + $0x2b0] sm:$0xff] %vm307_vm1, %v1385_v45  ;;  %v1170_v51 = vadd.f32 %v12073_v38, %v1169_v49  ;;  %v9604_v52 = vpop.f32.mrb[40].mxu1  ;;  %9934 = vmatprep.mubr.msk.f32.mxu0 %vm113_vm0, %v4153_v44  ;;  %v4161_v45 = vld [vmem:[%s14807_s2 + $0x960] sm:$0xff] }
 0x14e   :  { %1217 = vst.msk [vmem:[#allocation2 + $0x248] sm:$0xff] %vm307_vm1, %v1175_v48  ;;  %v1400_v54 = vadd.f32 %v9604_v52, %v12073_v38  ;;  %v1394_v55 = vpop.f32.mrb[41].mxu1  ;;  %9958 = vmatmul.mubr.msk.f32.gmra.mrb[146].mxu1 %vm113_vm0, %v4377_v47  ;;  %v4385_v48 = vld [vmem:[%s14807_s2 + $0x9d8] sm:$0xff] }
 0x14f   :  { %1216 = vst.msk [vmem:[#allocation2 + $0x240] sm:$0xff] %vm307_vm1, %v1170_v51  ;;  %v1395_v57 = vadd.f32 %v12073_v38, %v1394_v55  ;;  %v9581_v58 = vpop.f32.mrb[42].mxu0  ;;  %9960 = vmatprep.mubr.msk.f32.mxu1 %vm113_vm0, %v4378_v50  ;;  %v4386_v51 = vld [vmem:[%s14807_s2 + $0x9e0] sm:$0xff] }
 0x150   :  { %1442 = vst.msk [vmem:[#allocation2 + $0x2c8] sm:$0xff] %vm307_vm1, %v1400_v54  ;;  %v1185_v60 = vadd.f32 %v9581_v58, %v12073_v38  ;;  %v1179_v61 = vpop.f32.mrb[43].mxu0  ;;  %9935 = vmatmul.mubr.msk.f32.gmra.mrb[148].mxu0 %vm113_vm0, %v4154_v53  ;;  %v4162_v54 = vld [vmem:[%s14807_s2 + $0x968] sm:$0xff]  ;;  %v12700_v58 = vld [vmem:[%s14812_s7] ss:$0 sm:$0xff] }
 0x151   :  { %1441 = vst.msk [vmem:[#allocation2 + $0x2c0] sm:$0xff] %vm307_vm1, %v1395_v57  ;;  %v1180_v63 = vadd.f32 %v12073_v38, %v1179_v61  ;;  %v9607_v0 = vpop.f32.mrb[42].mxu1  ;;  %9937 = vmatprep.mubr.msk.f32.mxu0 %vm113_vm0, %v4155_v56  ;;  %v4163_v57 = vld [vmem:[%s14807_s2 + $0x970] sm:$0xff] }
 0x152   :  { %1219 = vst.msk [vmem:[#allocation2 + $0x258] sm:$0xff] %vm307_vm1, %v1185_v60  ;;  %v1410_v18 = vadd.f32 %v9607_v0, %v12073_v38  ;;  %v1404_v19 = vpop.f32.mrb[43].mxu1  ;;  %9961 = vmatmul.mubr.msk.f32.gmra.mrb[148].mxu1 %vm113_vm0, %v4379_v59 }
 0x153   :  { %1218 = vst.msk [vmem:[#allocation2 + $0x250] sm:$0xff] %vm307_vm1, %v1180_v63  ;;  %v1405_v21 = vadd.f32 %v12073_v38, %v1404_v19  ;;  %v9584_v22 = vpop.f32.mrb[44].mxu0  ;;  %9963 = vmatprep.mubr.msk.f32.mxu1 %vm113_vm0, %v4380_v62  ;;  %v4388_v63 = vld [vmem:[%s14807_s2 + $0x9f0] sm:$0xff] }
 0x154   :  { %1444 = vst.msk [vmem:[#allocation2 + $0x2d8] sm:$0xff] %vm307_vm1, %v1410_v18  ;;  %v1195_v24 = vadd.f32 %v9584_v22, %v12073_v38  ;;  %v1189_v25 = vpop.f32.mrb[45].mxu0  ;;  %9938 = vmatmul.mubr.msk.f32.gmra.mrb[150].mxu0 %vm113_vm0, %v4156_v17  ;;  %v4164_v18 = vld [vmem:[%s14807_s2 + $0x978] sm:$0xff] }
 0x155   :  { %1443 = vst.msk [vmem:[#allocation2 + $0x2d0] sm:$0xff] %vm307_vm1, %v1405_v21  ;;  %v1190_v27 = vadd.f32 %v12073_v38, %v1189_v25  ;;  %v9610_v28 = vpop.f32.mrb[44].mxu1  ;;  %9940 = vmatprep.mubr.msk.f32.mxu0 %vm113_vm0, %v4157_v20  ;;  %v4599_v21 = vld [vmem:[%s14807_s2 + $0xa00] sm:$0xff] }
 0x156   :  { %1221 = vst.msk [vmem:[#allocation2 + $0x268] sm:$0xff] %vm307_vm1, %v1195_v24  ;;  %v1420_v15 = vadd.f32 %v9610_v28, %v12073_v38  ;;  %v1414_v30 = vpop.f32.mrb[45].mxu1  ;;  %9964 = vmatmul.mubr.msk.f32.gmra.mrb[150].mxu1 %vm113_vm0, %v4381_v23  ;;  %v4389_v24 = vld [vmem:[%s14807_s2 + $0x9f8] sm:$0xff] }
 0x157   :  { %1220 = vst.msk [vmem:[#allocation2 + $0x260] sm:$0xff] %vm307_vm1, %v1190_v27  ;;  %v1415_v32 = vadd.f32 %v12073_v38, %v1414_v30  ;;  %v9587_v33 = vpop.f32.mrb[46].mxu0  ;;  %9966 = vmatprep.mubr.msk.f32.mxu1 %vm113_vm0, %v4382_v26  ;;  %v4824_v27 = vld [vmem:[%s14807_s2 + $0xa80] sm:$0xff] }
 0x158   :  { %1446 = vst.msk [vmem:[#allocation2 + $0x2e8] sm:$0xff] %vm307_vm1, %v1420_v15  ;;  %v1205_v36 = vadd.f32 %v9587_v33, %v12073_v38  ;;  %v1199_v37 = vpop.f32.mrb[47].mxu0  ;;  %9941 = vmatmul.mubr.msk.f32.gmra.mrb[152].mxu0 %vm113_vm0, %v4158_v29  ;;  %v4600_v15 = vld [vmem:[%s14807_s2 + $0xa08] sm:$0xff] }
 0x159   :  { %1445 = vst.msk [vmem:[#allocation2 + $0x2e0] sm:$0xff] %vm307_vm1, %v1415_v32  ;;  %v1200_v40 = vadd.f32 %v12073_v38, %v1199_v37  ;;  %v9613_v41 = vpop.f32.mrb[46].mxu1  ;;  %9943 = vmatprep.mubr.msk.f32.mxu0 %vm113_vm0, %v4159_v31  ;;  %v4601_v32 = vld [vmem:[%s14807_s2 + $0xa10] sm:$0xff] }
 0x15a   :  { %1223 = vst.msk [vmem:[#allocation2 + $0x278] sm:$0xff] %vm307_vm1, %v1205_v36  ;;  %v1430_v43 = vadd.f32 %v9613_v41, %v12073_v38  ;;  %v1424_v44 = vpop.f32.mrb[47].mxu1  ;;  %9967 = vmatmul.mubr.msk.f32.gmra.mrb[152].mxu1 %vm113_vm0, %v4383_v34  ;;  %v4825_v36 = vld [vmem:[%s14807_s2 + $0xa88] sm:$0xff] }
 0x15b   :  { %1222 = vst.msk [vmem:[#allocation2 + $0x270] sm:$0xff] %vm307_vm1, %v1200_v40  ;;  %v1425_v46 = vadd.f32 %v12073_v38, %v1424_v44  ;;  %v9618_v47 = vpop.f32.mrb[48].mxu0  ;;  %9969 = vmatprep.mubr.msk.f32.mxu1 %vm113_vm0, %v4384_v39  ;;  %v4826_v40 = vld [vmem:[%s14807_s2 + $0xa90] sm:$0xff]  ;;  %v12771_v44 = vld [vmem:[%s14808_s3] sm:$0xff] }
 0x15c   :  { %1448 = vst.msk [vmem:[#allocation2 + $0x2f8] sm:$0xff] %vm307_vm1, %v1430_v43  ;;  %v1585_v49 = vadd.f32 %v9618_v47, %v12073_v38  ;;  %v1579_v50 = vpop.f32.mrb[49].mxu0  ;;  %9944 = vmatmul.mubr.msk.f32.gmra.mrb[154].mxu0 %vm113_vm0, %v4160_v42  ;;  %v4602_v43 = vld [vmem:[%s14807_s2 + $0xa18] sm:$0xff]  ;;  %v4603_v47 = vld [vmem:[%s14807_s2 + $0xa20] sm:$0xff] }
 0x15d   :  { %1447 = vst.msk [vmem:[#allocation2 + $0x2f0] sm:$0xff] %vm307_vm1, %v1425_v46  ;;  %v1580_v52 = vadd.f32 %v12073_v38, %v1579_v50  ;;  %v9644_v53 = vpop.f32.mrb[48].mxu1  ;;  %9946 = vmatprep.mubr.msk.f32.mxu0 %vm113_vm0, %v4161_v45  ;;  %v4827_v50 = vld [vmem:[%s14807_s2 + $0xa98] sm:$0xff] }
 0x15e   :  { %1659 = vst.msk [vmem:[#allocation2 + $0x308] sm:$0xff] %vm307_vm1, %v1585_v49  ;;  %v1810_v55 = vadd.f32 %v9644_v53, %v12073_v38  ;;  %v1804_v56 = vpop.f32.mrb[49].mxu1  ;;  %9970 = vmatmul.mubr.msk.f32.gmra.mrb[154].mxu1 %vm113_vm0, %v4385_v48  ;;  %v4387_v38 = vld [vmem:[%s14807_s2 + $0x9e8] sm:$0xff]  ;;  %v4828_v53 = vld [vmem:[%s14807_s2 + $0xaa0] sm:$0xff] }
 0x15f   :  { %1658 = vst.msk [vmem:[#allocation2 + $0x300] sm:$0xff] %vm307_vm1, %v1580_v52  ;;  %v1805_v59 = vadd.f32 %v12700_v58, %v1804_v56  ;;  %v9621_v60 = vpop.f32.mrb[50].mxu0  ;;  %9972 = vmatprep.mubr.msk.f32.mxu1 %vm113_vm0, %v4386_v51 }
 0x160   :  { %1884 = vst.msk [vmem:[#allocation2 + $0x388] sm:$0xff] %vm307_vm1, %v1810_v55  ;;  %v1595_v61 = vadd.f32 %v12700_v58, %v9621_v60  ;;  %v1589_v62 = vpop.f32.mrb[51].mxu0  ;;  %9947 = vmatmul.mubr.msk.f32.gmra.mrb[156].mxu0 %vm113_vm0, %v4162_v54  ;;  %v4604_v55 = vld [vmem:[%s14807_s2 + $0xa28] sm:$0xff] }
 0x161   :  { %1883 = vst.msk [vmem:[#allocation2 + $0x380] sm:$0xff] %vm307_vm1, %v1805_v59  ;;  %v1590_v0 = vadd.f32 %v12700_v58, %v1589_v62  ;;  %v9647_v17 = vpop.f32.mrb[50].mxu1  ;;  %9949 = vmatprep.mubr.msk.f32.mxu0 %vm113_vm0, %v4163_v57  ;;  %v4605_v59 = vld [vmem:[%s14807_s2 + $0xa30] sm:$0xff] }
 0x162   :  { %1661 = vst.msk [vmem:[#allocation2 + $0x318] sm:$0xff] %vm307_vm1, %v1595_v61  ;;  %v1820_v19 = vadd.f32 %v12700_v58, %v9647_v17  ;;  %v1814_v20 = vpop.f32.mrb[51].mxu1  ;;  %9973 = vmatmul.mubr.msk.f32.gmra.mrb[156].mxu1 %vm113_vm0, %v4387_v38  ;;  %v4829_v61 = vld [vmem:[%s14807_s2 + $0xaa8] sm:$0xff] }
 0x163   :  { %1660 = vst.msk [vmem:[#allocation2 + $0x310] sm:$0xff] %vm307_vm1, %v1590_v0  ;;  %v1815_v22 = vadd.f32 %v12700_v58, %v1814_v20  ;;  %v9624_v23 = vpop.f32.mrb[52].mxu0  ;;  %9975 = vmatprep.mubr.msk.f32.mxu1 %vm113_vm0, %v4388_v63  ;;  %v4830_v0 = vld [vmem:[%s14807_s2 + $0xab0] sm:$0xff] }
 0x164   :  { %1886 = vst.msk [vmem:[#allocation2 + $0x398] sm:$0xff] %vm307_vm1, %v1820_v19  ;;  %v1605_v25 = vadd.f32 %v12700_v58, %v9624_v23  ;;  %v1599_v26 = vpop.f32.mrb[53].mxu0  ;;  %9950 = vmatmul.mubr.msk.f32.gmra.mrb[158].mxu0 %vm113_vm0, %v4164_v18  ;;  %v4606_v19 = vld [vmem:[%s14807_s2 + $0xa38] sm:$0xff] }
 0x165   :  { %1885 = vst.msk [vmem:[#allocation2 + $0x390] sm:$0xff] %vm307_vm1, %v1815_v22  ;;  %v1600_v28 = vadd.f32 %v12700_v58, %v1599_v26  ;;  %v9650_v29 = vpop.f32.mrb[52].mxu1  ;;  %9980 = vmatprep.mubr.msk.f32.mxu0 %vm113_vm0, %v4599_v21  ;;  %v4607_v22 = vld [vmem:[%s14807_s2 + $0xa40] sm:$0xff] }
 0x166   :  { %1663 = vst.msk [vmem:[#allocation2 + $0x328] sm:$0xff] %vm307_vm1, %v1605_v25  ;;  %v1830_v30 = vadd.f32 %v12700_v58, %v9650_v29  ;;  %v1824_v31 = vpop.f32.mrb[53].mxu1  ;;  %9976 = vmatmul.mubr.msk.f32.gmra.mrb[158].mxu1 %vm113_vm0, %v4389_v24  ;;  %v4831_v25 = vld [vmem:[%s14807_s2 + $0xab8] sm:$0xff] }
 0x167   :  { %1662 = vst.msk [vmem:[#allocation2 + $0x320] sm:$0xff] %vm307_vm1, %v1600_v28  ;;  %v1825_v33 = vadd.f32 %v12700_v58, %v1824_v31  ;;  %v9627_v34 = vpop.f32.mrb[54].mxu0  ;;  %10006 = vmatprep.mubr.msk.f32.mxu1 %vm113_vm0, %v4824_v27  ;;  %v4832_v28 = vld [vmem:[%s14807_s2 + $0xac0] sm:$0xff] }
 0x168   :  { %1888 = vst.msk [vmem:[#allocation2 + $0x3a8] sm:$0xff] %vm307_vm1, %v1830_v30  ;;  %v1615_v37 = vadd.f32 %v12700_v58, %v9627_v34  ;;  %v1609_v39 = vpop.f32.mrb[55].mxu0  ;;  %9981 = vmatmul.mubr.msk.f32.vlgmr.msra.gmra.mrb[160].mxu0 %vm113_vm0, %v4600_v15  ;;  %v4608_v30 = vld [vmem:[%s14807_s2 + $0xa48] sm:$0xff] }
 0x169   :  { %1887 = vst.msk [vmem:[#allocation2 + $0x3a0] sm:$0xff] %vm307_vm1, %v1825_v33  ;;  %v1610_v41 = vadd.f32 %v12700_v58, %v1609_v39  ;;  %v9653_v42 = vpop.f32.mrb[54].mxu1  ;;  %10031 = vmatpush3.msra.mxu0 %v12168_v35  ;;  %9983 = vmatprep.mubr.msk.f32.mxu0 %vm113_vm0, %v4601_v32  ;;  %v4609_v33 = vld [vmem:[%s14807_s2 + $0xa50] sm:$0xff] }
 0x16a   :  { %1665 = vst.msk [vmem:[#allocation2 + $0x338] sm:$0xff] %vm307_vm1, %v1615_v37  ;;  %v1840_v45 = vadd.f32 %v12700_v58, %v9653_v42  ;;  %v1834_v46 = vpop.f32.mrb[55].mxu1  ;;  %10007 = vmatmul.mubr.msk.f32.vlgmr.msra.gmra.mrb[160].mxu1 %vm113_vm0, %v4825_v36  ;;  %10082 = vmatprep.subr.mxu0 %v12168_v35  ;;  %v4833_v37 = vld [vmem:[%s14807_s2 + $0xac8] sm:$0xff] }
 0x16b   :  { %1664 = vst.msk [vmem:[#allocation2 + $0x330] sm:$0xff] %vm307_vm1, %v1610_v41  ;;  %v1835_v48 = vadd.f32 %v12700_v58, %v1834_v46  ;;  %v9630_v49 = vpop.f32.mrb[56].mxu0  ;;  %10057 = vmatpush3.msra.mxu1 %v12168_v35  ;;  %10009 = vmatprep.mubr.msk.f32.mxu1 %vm113_vm0, %v4826_v40  ;;  %v4834_v41 = vld [vmem:[%s14807_s2 + $0xad0] sm:$0xff] }
 0x16c   :  { %1890 = vst.msk [vmem:[#allocation2 + $0x3b8] sm:$0xff] %vm307_vm1, %v1840_v45  ;;  %v1625_v51 = vadd.f32 %v12700_v58, %v9630_v49  ;;  %v1619_v52 = vpop.f32.mrb[57].mxu0  ;;  %9984 = vmatmul.mubr.msk.f32.gmra.mrb[162].mxu0 %vm113_vm0, %v4602_v43  ;;  %10108 = vmatprep.subr.mxu1 %v12771_v44  ;;  %v4610_v45 = vld [vmem:[%s14807_s2 + $0xa58] sm:$0xff] }
 0x16d   :  { %1889 = vst.msk [vmem:[#allocation2 + $0x3b0] sm:$0xff] %vm307_vm1, %v1835_v48  ;;  %v1620_v35 = vadd.f32 %v12700_v58, %v1619_v52  ;;  %v9656_v54 = vpop.f32.mrb[56].mxu1  ;;  %9986 = vmatprep.mubr.msk.f32.mxu0 %vm113_vm0, %v4603_v47  ;;  %v4611_v48 = vld [vmem:[%s14807_s2 + $0xa60] sm:$0xff] }
 0x16e   :  { %1667 = vst.msk [vmem:[#allocation2 + $0x348] sm:$0xff] %vm307_vm1, %v1625_v51  ;;  %v1850_v56 = vadd.f32 %v12700_v58, %v9656_v54  ;;  %v1844_v57 = vpop.f32.mrb[57].mxu1  ;;  %10010 = vmatmul.mubr.msk.f32.gmra.mrb[162].mxu1 %vm113_vm0, %v4827_v50  ;;  %v4835_v51 = vld [vmem:[%s14807_s2 + $0xad8] sm:$0xff] }
 0x16f   :  { %1666 = vst.msk [vmem:[#allocation2 + $0x340] sm:$0xff] %vm307_vm1, %v1620_v35  ;;  %v1845_v60 = vadd.f32 %v12700_v58, %v1844_v57  ;;  %v9633_v38 = vpop.f32.mrb[58].mxu0  ;;  %10012 = vmatprep.mubr.msk.f32.mxu1 %vm113_vm0, %v4828_v53  ;;  %v4836_v35 = vld [vmem:[%s14807_s2 + $0xae0] sm:$0xff] }
 0x170   :  { %1892 = vst.msk [vmem:[#allocation2 + $0x3c8] sm:$0xff] %vm307_vm1, %v1850_v56  ;;  %v1635_v62 = vadd.f32 %v12700_v58, %v9633_v38  ;;  %v1629_v63 = vpop.f32.mrb[59].mxu0  ;;  %9987 = vmatmul.mubr.msk.f32.gmra.mrb[164].mxu0 %vm113_vm0, %v4604_v55  ;;  %v4612_v56 = vld [vmem:[%s14807_s2 + $0xa68] sm:$0xff] }
 0x171   :  { %1891 = vst.msk [vmem:[#allocation2 + $0x3c0] sm:$0xff] %vm307_vm1, %v1845_v60  ;;  %v1630_v17 = vadd.f32 %v12700_v58, %v1629_v63  ;;  %v9659_v18 = vpop.f32.mrb[58].mxu1  ;;  %9989 = vmatprep.mubr.msk.f32.mxu0 %vm113_vm0, %v4605_v59  ;;  %v4613_v60 = vld [vmem:[%s14807_s2 + $0xa70] sm:$0xff] }
 0x172   :  { %1669 = vst.msk [vmem:[#allocation2 + $0x358] sm:$0xff] %vm307_vm1, %v1635_v62  ;;  %v1860_v20 = vadd.f32 %v12700_v58, %v9659_v18  ;;  %v1854_v21 = vpop.f32.mrb[59].mxu1  ;;  %10013 = vmatmul.mubr.msk.f32.gmra.mrb[164].mxu1 %vm113_vm0, %v4829_v61  ;;  %v4837_v62 = vld [vmem:[%s14807_s2 + $0xae8] sm:$0xff] }
 0x173   :  { %1668 = vst.msk [vmem:[#allocation2 + $0x350] sm:$0xff] %vm307_vm1, %v1630_v17  ;;  %v1855_v23 = vadd.f32 %v12700_v58, %v1854_v21  ;;  %v9636_v24 = vpop.f32.mrb[60].mxu0  ;;  %10015 = vmatprep.mubr.msk.f32.mxu1 %vm113_vm0, %v4830_v0  ;;  %v4838_v17 = vld [vmem:[%s14807_s2 + $0xaf0] sm:$0xff] }
 0x174   :  { %1894 = vst.msk [vmem:[#allocation2 + $0x3d8] sm:$0xff] %vm307_vm1, %v1860_v20  ;;  %v1645_v26 = vadd.f32 %v12700_v58, %v9636_v24  ;;  %v1639_v27 = vpop.f32.mrb[61].mxu0  ;;  %9990 = vmatmul.mubr.msk.f32.gmra.mrb[166].mxu0 %vm113_vm0, %v4606_v19  ;;  %v4614_v20 = vld [vmem:[%s14807_s2 + $0xa78] sm:$0xff] }
 0x175   :  { %1893 = vst.msk [vmem:[#allocation2 + $0x3d0] sm:$0xff] %vm307_vm1, %v1855_v23  ;;  %v1640_v29 = vadd.f32 %v12700_v58, %v1639_v27  ;;  %v9662_v15 = vpop.f32.mrb[60].mxu1  ;;  %9992 = vmatprep.mubr.msk.f32.mxu0 %vm113_vm0, %v4607_v22  ;;  %v5049_v23 = vld [vmem:[%s14807_s2 + $0xb00] sm:$0xff] }
 0x176   :  { %1671 = vst.msk [vmem:[#allocation2 + $0x368] sm:$0xff] %vm307_vm1, %v1645_v26  ;;  %v1870_v31 = vadd.f32 %v12700_v58, %v9662_v15  ;;  %v1864_v32 = vpop.f32.mrb[61].mxu1  ;;  %10016 = vmatmul.mubr.msk.f32.gmra.mrb[166].mxu1 %vm113_vm0, %v4831_v25  ;;  %v4839_v26 = vld [vmem:[%s14807_s2 + $0xaf8] sm:$0xff] }
 0x177   :  { %1670 = vst.msk [vmem:[#allocation2 + $0x360] sm:$0xff] %vm307_vm1, %v1640_v29  ;;  %v1865_v34 = vadd.f32 %v12700_v58, %v1864_v32  ;;  %v9639_v36 = vpop.f32.mrb[62].mxu0  ;;  %10018 = vmatprep.mubr.msk.f32.mxu1 %vm113_vm0, %v4832_v28  ;;  %v5274_v29 = vld [vmem:[%s14807_s2 + $0xb80] sm:$0xff] }
 0x178   :  { %1896 = vst.msk [vmem:[#allocation2 + $0x3e8] sm:$0xff] %vm307_vm1, %v1870_v31  ;;  %v1655_v39 = vadd.f32 %v12700_v58, %v9639_v36  ;;  %v1649_v40 = vpop.f32.mrb[63].mxu0  ;;  %9993 = vmatmul.mubr.msk.f32.gmra.mrb[168].mxu0 %vm113_vm0, %v4608_v30  ;;  %v5050_v31 = vld [vmem:[%s14807_s2 + $0xb08] sm:$0xff] }
 0x179   :  { %1895 = vst.msk [vmem:[#allocation2 + $0x3e0] sm:$0xff] %vm307_vm1, %v1865_v34  ;;  %v1650_v42 = vadd.f32 %v12700_v58, %v1649_v40  ;;  %v9665_v43 = vpop.f32.mrb[62].mxu1  ;;  %9995 = vmatprep.mubr.msk.f32.mxu0 %vm113_vm0, %v4609_v33  ;;  %v5051_v34 = vld [vmem:[%s14807_s2 + $0xb10] sm:$0xff] }
 0x17a   :  { %1673 = vst.msk [vmem:[#allocation2 + $0x378] sm:$0xff] %vm307_vm1, %v1655_v39  ;;  %v1880_v46 = vadd.f32 %v12700_v58, %v9665_v43  ;;  %v1874_v47 = vpop.f32.mrb[63].mxu1  ;;  %10019 = vmatmul.mubr.msk.f32.gmra.mrb[168].mxu1 %vm113_vm0, %v4833_v37  ;;  %v5275_v39 = vld [vmem:[%s14807_s2 + $0xb88] sm:$0xff] }
 0x17b   :  { %1672 = vst.msk [vmem:[#allocation2 + $0x370] sm:$0xff] %vm307_vm1, %v1650_v42  ;;  %v1875_v49 = vadd.f32 %v12700_v58, %v1874_v47  ;;  %v9670_v50 = vpop.f32.mrb[64].mxu0  ;;  %10021 = vmatprep.mubr.msk.f32.mxu1 %vm113_vm0, %v4834_v41  ;;  %v5276_v42 = vld [vmem:[%s14807_s2 + $0xb90] sm:$0xff]  ;;  %v5052_v47 = vld [vmem:[%s14807_s2 + $0xb18] sm:$0xff] }
 0x17c   :  { %1898 = vst.msk [vmem:[#allocation2 + $0x3f8] sm:$0xff] %vm307_vm1, %v1880_v46  ;;  %v2035_v52 = vadd.f32 %v12700_v58, %v9670_v50  ;;  %v2029_v53 = vpop.f32.mrb[65].mxu0  ;;  %9996 = vmatmul.mubr.msk.f32.gmra.mrb[170].mxu0 %vm113_vm0, %v4610_v45  ;;  %v10732_v46 = vld [vmem:[%s14811_s6] sm:$0xff] }
 0x17d   :  { %1897 = vst.msk [vmem:[#allocation2 + $0x3f0] sm:$0xff] %vm307_vm1, %v1875_v49  ;;  %v2030_v54 = vadd.f32 %v12700_v58, %v2029_v53  ;;  %v9696_v55 = vpop.f32.mrb[64].mxu1  ;;  %9998 = vmatprep.mubr.msk.f32.mxu0 %vm113_vm0, %v4611_v48  ;;  %v5053_v50 = vld [vmem:[%s14807_s2 + $0xb20] sm:$0xff]  ;;  %v5277_v53 = vld [vmem:[%s14807_s2 + $0xb98] sm:$0xff] }
 0x17e   :  { %2109 = vst.msk [vmem:[#allocation2 + $0x408] sm:$0xff] %vm307_vm1, %v2035_v52  ;;  %v2260_v57 = vadd.f32 %v12700_v58, %v9696_v55  ;;  %v2254_v59 = vpop.f32.mrb[65].mxu1  ;;  %10022 = vmatmul.mubr.msk.f32.gmra.mrb[170].mxu1 %vm113_vm0, %v4835_v51  ;;  %v5278_v55 = vld [vmem:[%s14807_s2 + $0xba0] sm:$0xff] }
 0x17f   :  { %2108 = vst.msk [vmem:[#allocation2 + $0x400] sm:$0xff] %vm307_vm1, %v2030_v54  ;;  %v2255_v38 = vadd.f32 %v12700_v58, %v2254_v59  ;;  %v9673_v61 = vpop.f32.mrb[66].mxu0  ;;  %10024 = vmatprep.mubr.msk.f32.mxu1 %vm113_vm0, %v4836_v35 }
 0x180   :  { %2334 = vst.msk [vmem:[#allocation2 + $0x488] sm:$0xff] %vm307_vm1, %v2260_v57  ;;  %v2045_v63 = vadd.f32 %v12700_v58, %v9673_v61  ;;  %v2039_v0 = vpop.f32.mrb[67].mxu0  ;;  %9999 = vmatmul.mubr.msk.f32.gmra.mrb[172].mxu0 %vm113_vm0, %v4612_v56  ;;  %v5054_v57 = vld [vmem:[%s14807_s2 + $0xb28] sm:$0xff] }
 0x181   :  { %2333 = vst.msk [vmem:[#allocation2 + $0x480] sm:$0xff] %vm307_vm1, %v2255_v38  ;;  %v2040_v18 = vadd.f32 %v12700_v58, %v2039_v0  ;;  %v9699_v19 = vpop.f32.mrb[66].mxu1  ;;  %10001 = vmatprep.mubr.msk.f32.mxu0 %vm113_vm0, %v4613_v60  ;;  %v5055_v38 = vld [vmem:[%s14807_s2 + $0xb30] sm:$0xff] }
 0x182   :  { %2111 = vst.msk [vmem:[#allocation2 + $0x418] sm:$0xff] %vm307_vm1, %v2045_v63  ;;  %v2270_v21 = vadd.f32 %v12700_v58, %v9699_v19  ;;  %v2264_v22 = vpop.f32.mrb[67].mxu1  ;;  %10025 = vmatmul.mubr.msk.f32.gmra.mrb[172].mxu1 %vm113_vm0, %v4837_v62  ;;  %v5279_v63 = vld [vmem:[%s14807_s2 + $0xba8] sm:$0xff] }
 0x183   :  { %2110 = vst.msk [vmem:[#allocation2 + $0x410] sm:$0xff] %vm307_vm1, %v2040_v18  ;;  %v2265_v24 = vadd.f32 %v12700_v58, %v2264_v22  ;;  %v9676_v25 = vpop.f32.mrb[68].mxu0  ;;  %10027 = vmatprep.mubr.msk.f32.mxu1 %vm113_vm0, %v4838_v17  ;;  %v5280_v18 = vld [vmem:[%s14807_s2 + $0xbb0] sm:$0xff] }
 0x184   :  { %2336 = vst.msk [vmem:[#allocation2 + $0x498] sm:$0xff] %vm307_vm1, %v2270_v21  ;;  %v2055_v27 = vadd.f32 %v12700_v58, %v9676_v25  ;;  %v2049_v28 = vpop.f32.mrb[69].mxu0  ;;  %10002 = vmatmul.mubr.msk.f32.gmra.mrb[174].mxu0 %vm113_vm0, %v4614_v20  ;;  %v5056_v21 = vld [vmem:[%s14807_s2 + $0xb38] sm:$0xff] }
 0x185   :  { %2335 = vst.msk [vmem:[#allocation2 + $0x490] sm:$0xff] %vm307_vm1, %v2265_v24  ;;  %v2050_v15 = vadd.f32 %v12700_v58, %v2049_v28  ;;  %v9702_v30 = vpop.f32.mrb[68].mxu1  ;;  %10032 = vmatprep.mubr.msk.f32.mxu0 %vm113_vm0, %v5049_v23  ;;  %v5057_v24 = vld [vmem:[%s14807_s2 + $0xb40] sm:$0xff] }
 0x186   :  { %2113 = vst.msk [vmem:[#allocation2 + $0x428] sm:$0xff] %vm307_vm1, %v2055_v27  ;;  %v2280_v32 = vadd.f32 %v12700_v58, %v9702_v30  ;;  %v2274_v33 = vpop.f32.mrb[69].mxu1  ;;  %10028 = vmatmul.mubr.msk.f32.gmra.mrb[174].mxu1 %vm113_vm0, %v4839_v26  ;;  %v5281_v27 = vld [vmem:[%s14807_s2 + $0xbb8] sm:$0xff] }
 0x187   :  { %2112 = vst.msk [vmem:[#allocation2 + $0x420] sm:$0xff] %vm307_vm1, %v2050_v15  ;;  %v2275_v36 = vadd.f32 %v12700_v58, %v2274_v33  ;;  %v9679_v37 = vpop.f32.mrb[70].mxu0  ;;  %10058 = vmatprep.mubr.msk.f32.mxu1 %vm113_vm0, %v5274_v29  ;;  %v5282_v15 = vld [vmem:[%s14807_s2 + $0xbc0] sm:$0xff] }
 0x188   :  { %2338 = vst.msk [vmem:[#allocation2 + $0x4a8] sm:$0xff] %vm307_vm1, %v2280_v32  ;;  %v2065_v40 = vadd.f32 %v12700_v58, %v9679_v37  ;;  %v2059_v41 = vpop.f32.mrb[71].mxu0  ;;  %10033 = vmatmul.mubr.msk.f32.vlgmr.msra.gmra.mrb[176].mxu0 %vm113_vm0, %v5050_v31  ;;  %v5058_v32 = vld [vmem:[%s14807_s2 + $0xb48] sm:$0xff] }
 0x189   :  { %2337 = vst.msk [vmem:[#allocation2 + $0x4a0] sm:$0xff] %vm307_vm1, %v2275_v36  ;;  %v2060_v43 = vadd.f32 %v12700_v58, %v2059_v41  ;;  %v9705_v45 = vpop.f32.mrb[70].mxu1  ;;  %10083 = vmatpush3.msra.mxu0 %v10732_v46  ;;  %10035 = vmatprep.mubr.msk.f32.mxu0 %vm113_vm0, %v5051_v34  ;;  %v5059_v36 = vld [vmem:[%s14807_s2 + $0xb50] sm:$0xff] }
 0x18a   :  { %2115 = vst.msk [vmem:[#allocation2 + $0x438] sm:$0xff] %vm307_vm1, %v2065_v40  ;;  %v2290_v48 = vadd.f32 %v12700_v58, %v9705_v45  ;;  %v2284_v49 = vpop.f32.mrb[71].mxu1  ;;  %10059 = vmatmul.mubr.msk.f32.vlgmr.msra.gmra.mrb[176].mxu1 %vm113_vm0, %v5275_v39  ;;  %v5283_v40 = vld [vmem:[%s14807_s2 + $0xbc8] sm:$0xff] }
 0x18b   :  { %2114 = vst.msk [vmem:[#allocation2 + $0x430] sm:$0xff] %vm307_vm1, %v2060_v43  ;;  %v2285_v51 = vadd.f32 %v12700_v58, %v2284_v49  ;;  %v9682_v52 = vpop.f32.mrb[72].mxu0  ;;  %10109 = vmatpush3.msra.mxu1 %v12771_v44  ;;  %10061 = vmatprep.mubr.msk.f32.mxu1 %vm113_vm0, %v5276_v42  ;;  %v5284_v43 = vld [vmem:[%s14807_s2 + $0xbd0] sm:$0xff] }
 0x18c   :  { %2340 = vst.msk [vmem:[#allocation2 + $0x4b8] sm:$0xff] %vm307_vm1, %v2290_v48  ;;  %v2075_v35 = vadd.f32 %v12700_v58, %v9682_v52  ;;  %v2069_v54 = vpop.f32.mrb[73].mxu0  ;;  %10036 = vmatmul.mubr.msk.f32.gmra.mrb[178].mxu0 %vm113_vm0, %v5052_v47  ;;  %v5060_v47 = vld [vmem:[%s14807_s2 + $0xb58] sm:$0xff] }
 0x18d   :  { %2339 = vst.msk [vmem:[#allocation2 + $0x4b0] sm:$0xff] %vm307_vm1, %v2285_v51  ;;  %v2070_v44 = vadd.f32 %v12700_v58, %v2069_v54  ;;  %v9708_v56 = vpop.f32.mrb[72].mxu1  ;;  %10038 = vmatprep.mubr.msk.f32.mxu0 %vm113_vm0, %v5053_v50  ;;  %v5061_v50 = vld [vmem:[%s14807_s2 + $0xb60] sm:$0xff] }
 0x18e   :  { %2117 = vst.msk [vmem:[#allocation2 + $0x448] sm:$0xff] %vm307_vm1, %v2075_v35  ;;  %v2300_v59 = vadd.f32 %v12700_v58, %v9708_v56  ;;  %v2294_v60 = vpop.f32.mrb[73].mxu1  ;;  %10062 = vmatmul.mubr.msk.f32.gmra.mrb[178].mxu1 %vm113_vm0, %v5277_v53  ;;  %v5285_v53 = vld [vmem:[%s14807_s2 + $0xbd8] sm:$0xff] }
 0x18f   :  { %2116 = vst.msk [vmem:[#allocation2 + $0x440] sm:$0xff] %vm307_vm1, %v2070_v44  ;;  %v2295_v61 = vadd.f32 %v12700_v58, %v2294_v60  ;;  %v9685_v62 = vpop.f32.mrb[74].mxu0  ;;  %10064 = vmatprep.mubr.msk.f32.mxu1 %vm113_vm0, %v5278_v55  ;;  %v5286_v55 = vld [vmem:[%s14807_s2 + $0xbe0] sm:$0xff] }
 0x190   :  { %2342 = vst.msk [vmem:[#allocation2 + $0x4c8] sm:$0xff] %vm307_vm1, %v2300_v59  ;;  %v2085_v0 = vadd.f32 %v12700_v58, %v9685_v62  ;;  %v2079_v17 = vpop.f32.mrb[75].mxu0  ;;  %10039 = vmatmul.mubr.msk.f32.gmra.mrb[180].mxu0 %vm113_vm0, %v5054_v57  ;;  %v5062_v57 = vld [vmem:[%s14807_s2 + $0xb68] sm:$0xff] }
 0x191   :  { %2341 = vst.msk [vmem:[#allocation2 + $0x4c0] sm:$0xff] %vm307_vm1, %v2295_v61  ;;  %v2080_v19 = vadd.f32 %v12700_v58, %v2079_v17  ;;  %v9711_v20 = vpop.f32.mrb[74].mxu1  ;;  %10041 = vmatprep.mubr.msk.f32.mxu0 %vm113_vm0, %v5055_v38  ;;  %v5063_v38 = vld [vmem:[%s14807_s2 + $0xb70] sm:$0xff] }
 0x192   :  { %2119 = vst.msk [vmem:[#allocation2 + $0x458] sm:$0xff] %vm307_vm1, %v2085_v0  ;;  %v2310_v22 = vadd.f32 %v12700_v58, %v9711_v20  ;;  %v2304_v23 = vpop.f32.mrb[75].mxu1  ;;  %10065 = vmatmul.mubr.msk.f32.gmra.mrb[180].mxu1 %vm113_vm0, %v5279_v63  ;;  %v5287_v63 = vld [vmem:[%s14807_s2 + $0xbe8] sm:$0xff] }
 0x193   :  { %2118 = vst.msk [vmem:[#allocation2 + $0x450] sm:$0xff] %vm307_vm1, %v2080_v19  ;;  %v2305_v25 = vadd.f32 %v12700_v58, %v2304_v23  ;;  %v9688_v26 = vpop.f32.mrb[76].mxu0  ;;  %10067 = vmatprep.mubr.msk.f32.mxu1 %vm113_vm0, %v5280_v18  ;;  %v5288_v18 = vld [vmem:[%s14807_s2 + $0xbf0] sm:$0xff] }
 0x194   :  { %2344 = vst.msk [vmem:[#allocation2 + $0x4d8] sm:$0xff] %vm307_vm1, %v2310_v22  ;;  %v2095_v28 = vadd.f32 %v12700_v58, %v9688_v26  ;;  %v2089_v29 = vpop.f32.mrb[77].mxu0  ;;  %10042 = vmatmul.mubr.msk.f32.gmra.mrb[182].mxu0 %vm113_vm0, %v5056_v21  ;;  %v5064_v21 = vld [vmem:[%s14807_s2 + $0xb78] sm:$0xff] }
 0x195   :  { %2343 = vst.msk [vmem:[#allocation2 + $0x4d0] sm:$0xff] %vm307_vm1, %v2305_v25  ;;  %v2090_v30 = vadd.f32 %v12700_v58, %v2089_v29  ;;  %v9714_v31 = vpop.f32.mrb[76].mxu1  ;;  %10044 = vmatprep.mubr.msk.f32.mxu0 %vm113_vm0, %v5057_v24  ;;  %v5499_v24 = vld [vmem:[%s14807_s2 + $0xc00] sm:$0xff] }
 0x196   :  { %2121 = vst.msk [vmem:[#allocation2 + $0x468] sm:$0xff] %vm307_vm1, %v2095_v28  ;;  %v2320_v33 = vadd.f32 %v12700_v58, %v9714_v31  ;;  %v2314_v34 = vpop.f32.mrb[77].mxu1  ;;  %10068 = vmatmul.mubr.msk.f32.gmra.mrb[182].mxu1 %vm113_vm0, %v5281_v27  ;;  %v5289_v27 = vld [vmem:[%s14807_s2 + $0xbf8] sm:$0xff] }
 0x197   :  { %2120 = vst.msk [vmem:[#allocation2 + $0x460] sm:$0xff] %vm307_vm1, %v2090_v30  ;;  %v2315_v37 = vadd.f32 %v12700_v58, %v2314_v34  ;;  %v9691_v39 = vpop.f32.mrb[78].mxu0  ;;  %10070 = vmatprep.mubr.msk.f32.mxu1 %vm113_vm0, %v5282_v15  ;;  %v5724_v15 = vld [vmem:[%s14807_s2] sm:$0xff] }
 0x198   :  { %2346 = vst.msk [vmem:[#allocation2 + $0x4e8] sm:$0xff] %vm307_vm1, %v2320_v33  ;;  %v2105_v41 = vadd.f32 %v12700_v58, %v9691_v39  ;;  %v2099_v42 = vpop.f32.mrb[79].mxu0  ;;  %10045 = vmatmul.mubr.msk.f32.gmra.mrb[184].mxu0 %vm113_vm0, %v5058_v32  ;;  %v5500_v32 = vld [vmem:[%s14807_s2 + $0xc08] sm:$0xff] }
 0x199   :  { %2345 = vst.msk [vmem:[#allocation2 + $0x4e0] sm:$0xff] %vm307_vm1, %v2315_v37  ;;  %v2100_v45 = vadd.f32 %v12700_v58, %v2099_v42  ;;  %v9717_v46 = vpop.f32.mrb[78].mxu1  ;;  %10047 = vmatprep.mubr.msk.f32.mxu0 %vm113_vm0, %v5059_v36  ;;  %v5501_v36 = vld [vmem:[%s14807_s2 + $0xc10] sm:$0xff] }
 0x19a   :  { %2123 = vst.msk [vmem:[#allocation2 + $0x478] sm:$0xff] %vm307_vm1, %v2105_v41  ;;  %v2330_v48 = vadd.f32 %v12700_v58, %v9717_v46  ;;  %v2324_v49 = vpop.f32.mrb[79].mxu1  ;;  %10071 = vmatmul.mubr.msk.f32.gmra.mrb[184].mxu1 %vm113_vm0, %v5283_v40  ;;  %v5725_v40 = vld [vmem:[%s14807_s2 + $0x8] sm:$0xff] }
 0x19b   :  { %2122 = vst.msk [vmem:[#allocation2 + $0x470] sm:$0xff] %vm307_vm1, %v2100_v45  ;;  %v2325_v51 = vadd.f32 %v12700_v58, %v2324_v49  ;;  %v9722_v52 = vpop.f32.mrb[80].mxu0  ;;  %10073 = vmatprep.mubr.msk.f32.mxu1 %vm113_vm0, %v5284_v43  ;;  %v5726_v43 = vld [vmem:[%s14807_s2 + $0x10] sm:$0xff] }
 0x19c   :  { %2348 = vst.msk [vmem:[#allocation2 + $0x4f8] sm:$0xff] %vm307_vm1, %v2330_v48  ;;  %v2485_v35 = vadd.f32 %v12700_v58, %v9722_v52  ;;  %v2479_v54 = vpop.f32.mrb[81].mxu0  ;;  %10048 = vmatmul.mubr.msk.f32.gmra.mrb[186].mxu0 %vm113_vm0, %v5060_v47  ;;  %v5502_v47 = vld [vmem:[%s14807_s2 + $0xc18] sm:$0xff] }
 0x19d   :  { %2347 = vst.msk [vmem:[#allocation2 + $0x4f0] sm:$0xff] %vm307_vm1, %v2325_v51  ;;  %v2480_v44 = vadd.f32 %v12700_v58, %v2479_v54  ;;  %v9748_v56 = vpop.f32.mrb[80].mxu1  ;;  %10050 = vmatprep.mubr.msk.f32.mxu0 %vm113_vm0, %v5061_v50  ;;  %v5503_v50 = vld [vmem:[%s14807_s2 + $0xc20] sm:$0xff] }
 0x19e   :  { %2559 = vst.msk [vmem:[#allocation2 + $0x508] sm:$0xff] %vm307_vm1, %v2485_v35  ;;  %v2710_v59 = vadd.f32 %v12700_v58, %v9748_v56  ;;  %v2704_v60 = vpop.f32.mrb[81].mxu1  ;;  %10074 = vmatmul.mubr.msk.f32.gmra.mrb[186].mxu1 %vm113_vm0, %v5285_v53  ;;  %v5727_v53 = vld [vmem:[%s14807_s2 + $0x18] sm:$0xff] }
 0x19f   :  { %2558 = vst.msk [vmem:[#allocation2 + $0x500] sm:$0xff] %vm307_vm1, %v2480_v44  ;;  %v2705_v61 = vadd.f32 %v12700_v58, %v2704_v60  ;;  %v9725_v62 = vpop.f32.mrb[82].mxu0  ;;  %10076 = vmatprep.mubr.msk.f32.mxu1 %vm113_vm0, %v5286_v55  ;;  %v5728_v55 = vld [vmem:[%s14807_s2 + $0x20] sm:$0xff] }
 0x1a0   :  { %2784 = vst.msk [vmem:[#allocation2 + $0x588] sm:$0xff] %vm307_vm1, %v2710_v59  ;;  %v2495_v0 = vadd.f32 %v12700_v58, %v9725_v62  ;;  %v2489_v17 = vpop.f32.mrb[83].mxu0  ;;  %10051 = vmatmul.mubr.msk.f32.gmra.mrb[188].mxu0 %vm113_vm0, %v5062_v57  ;;  %v5504_v57 = vld [vmem:[%s14807_s2 + $0xc28] sm:$0xff] }
 0x1a1   :  { %2783 = vst.msk [vmem:[#allocation2 + $0x580] sm:$0xff] %vm307_vm1, %v2705_v61  ;;  %v2490_v19 = vadd.f32 %v12700_v58, %v2489_v17  ;;  %v9751_v20 = vpop.f32.mrb[82].mxu1  ;;  %10053 = vmatprep.mubr.msk.f32.mxu0 %vm113_vm0, %v5063_v38  ;;  %v5505_v38 = vld [vmem:[%s14807_s2 + $0xc30] sm:$0xff] }
 0x1a2   :  { %2561 = vst.msk [vmem:[#allocation2 + $0x518] sm:$0xff] %vm307_vm1, %v2495_v0  ;;  %v2720_v22 = vadd.f32 %v12700_v58, %v9751_v20  ;;  %v2714_v23 = vpop.f32.mrb[83].mxu1  ;;  %10077 = vmatmul.mubr.msk.f32.gmra.mrb[188].mxu1 %vm113_vm0, %v5287_v63  ;;  %v5729_v63 = vld [vmem:[%s14807_s2 + $0x28] sm:$0xff] }
 0x1a3   :  { %2560 = vst.msk [vmem:[#allocation2 + $0x510] sm:$0xff] %vm307_vm1, %v2490_v19  ;;  %v2715_v25 = vadd.f32 %v12700_v58, %v2714_v23  ;;  %v9728_v26 = vpop.f32.mrb[84].mxu0  ;;  %10079 = vmatprep.mubr.msk.f32.mxu1 %vm113_vm0, %v5288_v18  ;;  %v5730_v18 = vld [vmem:[%s14807_s2 + $0x30] sm:$0xff] }
 0x1a4   :  { %2786 = vst.msk [vmem:[#allocation2 + $0x598] sm:$0xff] %vm307_vm1, %v2720_v22  ;;  %v2505_v28 = vadd.f32 %v12700_v58, %v9728_v26  ;;  %v2499_v29 = vpop.f32.mrb[85].mxu0  ;;  %10054 = vmatmul.mubr.msk.f32.gmra.mrb[190].mxu0 %vm113_vm0, %v5064_v21  ;;  %v5506_v21 = vld [vmem:[%s14807_s2 + $0xc38] sm:$0xff] }
 0x1a5   :  { %2785 = vst.msk [vmem:[#allocation2 + $0x590] sm:$0xff] %vm307_vm1, %v2715_v25  ;;  %v2500_v30 = vadd.f32 %v12700_v58, %v2499_v29  ;;  %v9754_v31 = vpop.f32.mrb[84].mxu1  ;;  %10084 = vmatprep.mubr.msk.f32.mxu0 %vm113_vm0, %v5499_v24  ;;  %v5507_v24 = vld [vmem:[%s14807_s2 + $0xc40] sm:$0xff] }
 0x1a6   :  { %2563 = vst.msk [vmem:[#allocation2 + $0x528] sm:$0xff] %vm307_vm1, %v2505_v28  ;;  %v2730_v33 = vadd.f32 %v12700_v58, %v9754_v31  ;;  %v2724_v34 = vpop.f32.mrb[85].mxu1  ;;  %10080 = vmatmul.mubr.msk.f32.gmra.mrb[190].mxu1 %vm113_vm0, %v5289_v27  ;;  %v5731_v27 = vld [vmem:[%s14807_s2 + $0x38] sm:$0xff] }
 0x1a7   :  { %2562 = vst.msk [vmem:[#allocation2 + $0x520] sm:$0xff] %vm307_vm1, %v2500_v30  ;;  %v2725_v37 = vadd.f32 %v12700_v58, %v2724_v34  ;;  %v9731_v39 = vpop.f32.mrb[86].mxu0  ;;  %10110 = vmatprep.mubr.msk.f32.mxu1 %vm113_vm0, %v5724_v15  ;;  %v5732_v15 = vld [vmem:[%s14807_s2 + $0x40] sm:$0xff] }
 0x1a8   :  { %2788 = vst.msk [vmem:[#allocation2 + $0x5a8] sm:$0xff] %vm307_vm1, %v2730_v33  ;;  %v2515_v41 = vadd.f32 %v12700_v58, %v9731_v39  ;;  %v2509_v42 = vpop.f32.mrb[87].mxu0  ;;  %10085 = vmatmul.mubr.msk.f32.vlgmr.msra.gmra.mrb[192].mxu0 %vm113_vm0, %v5500_v32  ;;  %v5508_v32 = vld [vmem:[%s14807_s2 + $0xc48] sm:$0xff] }
 0x1a9   :  { %2787 = vst.msk [vmem:[#allocation2 + $0x5a0] sm:$0xff] %vm307_vm1, %v2725_v37  ;;  %v2510_v45 = vadd.f32 %v12700_v58, %v2509_v42  ;;  %v9757_v46 = vpop.f32.mrb[86].mxu1  ;;  %10087 = vmatprep.mubr.msk.f32.mxu0 %vm113_vm0, %v5501_v36  ;;  %v5509_v36 = vld [vmem:[%s14807_s2 + $0xc50] sm:$0xff] }
 0x1aa   :  { %2565 = vst.msk [vmem:[#allocation2 + $0x538] sm:$0xff] %vm307_vm1, %v2515_v41  ;;  %v2740_v48 = vadd.f32 %v12700_v58, %v9757_v46  ;;  %v2734_v49 = vpop.f32.mrb[87].mxu1  ;;  %10111 = vmatmul.mubr.msk.f32.vlgmr.msra.gmra.mrb[192].mxu1 %vm113_vm0, %v5725_v40  ;;  %v5733_v40 = vld [vmem:[%s14807_s2 + $0x48] sm:$0xff] }
 0x1ab   :  { %2564 = vst.msk [vmem:[#allocation2 + $0x530] sm:$0xff] %vm307_vm1, %v2510_v45  ;;  %v2735_v51 = vadd.f32 %v12700_v58, %v2734_v49  ;;  %v9734_v52 = vpop.f32.mrb[88].mxu0  ;;  %10113 = vmatprep.mubr.msk.f32.mxu1 %vm113_vm0, %v5726_v43  ;;  %v5734_v43 = vld [vmem:[%s14807_s2 + $0x50] sm:$0xff] }
 0x1ac   :  { %2790 = vst.msk [vmem:[#allocation2 + $0x5b8] sm:$0xff] %vm307_vm1, %v2740_v48  ;;  %v2525_v35 = vadd.f32 %v12700_v58, %v9734_v52  ;;  %v2519_v54 = vpop.f32.mrb[89].mxu0  ;;  %10088 = vmatmul.mubr.msk.f32.gmra.mrb[194].mxu0 %vm113_vm0, %v5502_v47  ;;  %v5510_v47 = vld [vmem:[%s14807_s2 + $0xc58] sm:$0xff] }
 0x1ad   :  { %2789 = vst.msk [vmem:[#allocation2 + $0x5b0] sm:$0xff] %vm307_vm1, %v2735_v51  ;;  %v2520_v44 = vadd.f32 %v12700_v58, %v2519_v54  ;;  %v9760_v56 = vpop.f32.mrb[88].mxu1  ;;  %10090 = vmatprep.mubr.msk.f32.mxu0 %vm113_vm0, %v5503_v50  ;;  %v5511_v50 = vld [vmem:[%s14807_s2 + $0xc60] sm:$0xff] }
 0x1ae   :  { %2567 = vst.msk [vmem:[#allocation2 + $0x548] sm:$0xff] %vm307_vm1, %v2525_v35  ;;  %v2750_v59 = vadd.f32 %v12700_v58, %v9760_v56  ;;  %v2744_v60 = vpop.f32.mrb[89].mxu1  ;;  %10114 = vmatmul.mubr.msk.f32.gmra.mrb[194].mxu1 %vm113_vm0, %v5727_v53  ;;  %v5735_v53 = vld [vmem:[%s14807_s2 + $0x58] sm:$0xff] }
 0x1af   :  { %2566 = vst.msk [vmem:[#allocation2 + $0x540] sm:$0xff] %vm307_vm1, %v2520_v44  ;;  %v2745_v61 = vadd.f32 %v12700_v58, %v2744_v60  ;;  %v9737_v62 = vpop.f32.mrb[90].mxu0  ;;  %10116 = vmatprep.mubr.msk.f32.mxu1 %vm113_vm0, %v5728_v55  ;;  %v5736_v55 = vld [vmem:[%s14807_s2 + $0x60] sm:$0xff] }
 0x1b0   :  { %2792 = vst.msk [vmem:[#allocation2 + $0x5c8] sm:$0xff] %vm307_vm1, %v2750_v59  ;;  %v2535_v0 = vadd.f32 %v12700_v58, %v9737_v62  ;;  %v2529_v17 = vpop.f32.mrb[91].mxu0  ;;  %10091 = vmatmul.mubr.msk.f32.gmra.mrb[196].mxu0 %vm113_vm0, %v5504_v57  ;;  %v5512_v57 = vld [vmem:[%s14807_s2 + $0xc68] sm:$0xff] }
 0x1b1   :  { %2791 = vst.msk [vmem:[#allocation2 + $0x5c0] sm:$0xff] %vm307_vm1, %v2745_v61  ;;  %v2530_v19 = vadd.f32 %v12700_v58, %v2529_v17  ;;  %v9763_v20 = vpop.f32.mrb[90].mxu1  ;;  %10093 = vmatprep.mubr.msk.f32.mxu0 %vm113_vm0, %v5505_v38  ;;  %v5513_v38 = vld [vmem:[%s14807_s2 + $0xc70] sm:$0xff] }
 0x1b2   :  { %2569 = vst.msk [vmem:[#allocation2 + $0x558] sm:$0xff] %vm307_vm1, %v2535_v0  ;;  %v2760_v22 = vadd.f32 %v12700_v58, %v9763_v20  ;;  %v2754_v23 = vpop.f32.mrb[91].mxu1  ;;  %10117 = vmatmul.mubr.msk.f32.gmra.mrb[196].mxu1 %vm113_vm0, %v5729_v63  ;;  %v5737_v63 = vld [vmem:[%s14807_s2 + $0x68] sm:$0xff] }
 0x1b3   :  { %2568 = vst.msk [vmem:[#allocation2 + $0x550] sm:$0xff] %vm307_vm1, %v2530_v19  ;;  %v2755_v25 = vadd.f32 %v12700_v58, %v2754_v23  ;;  %v9740_v26 = vpop.f32.mrb[92].mxu0  ;;  %10119 = vmatprep.mubr.msk.f32.mxu1 %vm113_vm0, %v5730_v18  ;;  %v5738_v18 = vld [vmem:[%s14807_s2 + $0x70] sm:$0xff] }
 0x1b4   :  { %2794 = vst.msk [vmem:[#allocation2 + $0x5d8] sm:$0xff] %vm307_vm1, %v2760_v22  ;;  %v2545_v28 = vadd.f32 %v12700_v58, %v9740_v26  ;;  %v2539_v29 = vpop.f32.mrb[93].mxu0  ;;  %10094 = vmatmul.mubr.msk.f32.gmra.mrb[198].mxu0 %vm113_vm0, %v5506_v21  ;;  %v5514_v21 = vld [vmem:[%s14807_s2 + $0xc78] sm:$0xff] }
 0x1b5   :  { %2793 = vst.msk [vmem:[#allocation2 + $0x5d0] sm:$0xff] %vm307_vm1, %v2755_v25  ;;  %v2540_v30 = vadd.f32 %v12700_v58, %v2539_v29  ;;  %v9766_v31 = vpop.f32.mrb[92].mxu1  ;;  %10096 = vmatprep.mubr.msk.f32.mxu0 %vm113_vm0, %v5507_v24  ;;  %v5739_v26 = vld [vmem:[%s14807_s2 + $0x78] sm:$0xff]  ;;  %v13324_v29 = vld [vmem:[%s14812_s7] ss:$0 sm:$0xff] }
 0x1b6   :  { %2571 = vst.msk [vmem:[#allocation2 + $0x568] sm:$0xff] %vm307_vm1, %v2545_v28  ;;  %v2770_v33 = vadd.f32 %v12700_v58, %v9766_v31  ;;  %v2764_v34 = vpop.f32.mrb[93].mxu1  ;;  %10120 = vmatmul.mubr.msk.f32.gmra.mrb[198].mxu1 %vm113_vm0, %v5731_v27 }
 0x1b7   :  { %2570 = vst.msk [vmem:[#allocation2 + $0x560] sm:$0xff] %vm307_vm1, %v2540_v30  ;;  %v2765_v37 = vadd.f32 %v12700_v58, %v2764_v34  ;;  %v9743_v39 = vpop.f32.mrb[94].mxu0  ;;  %10122 = vmatprep.mubr.msk.f32.mxu1 %vm113_vm0, %v5732_v15 }
 0x1b8   :  { %2796 = vst.msk [vmem:[#allocation2 + $0x5e8] sm:$0xff] %vm307_vm1, %v2770_v33  ;;  %v2555_v41 = vadd.f32 %v12700_v58, %v9743_v39  ;;  %v2549_v42 = vpop.f32.mrb[95].mxu0  ;;  %10097 = vmatmul.mubr.msk.f32.gmra.mrb[200].mxu0 %vm113_vm0, %v5508_v32 }
 0x1b9   :  { %2795 = vst.msk [vmem:[#allocation2 + $0x5e0] sm:$0xff] %vm307_vm1, %v2765_v37  ;;  %v2550_v45 = vadd.f32 %v12700_v58, %v2549_v42  ;;  %v9769_v46 = vpop.f32.mrb[94].mxu1  ;;  %10099 = vmatprep.mubr.msk.f32.mxu0 %vm113_vm0, %v5509_v36 }
 0x1ba   :  { %2573 = vst.msk [vmem:[#allocation2 + $0x578] sm:$0xff] %vm307_vm1, %v2555_v41  ;;  %v2780_v48 = vadd.f32 %v12700_v58, %v9769_v46  ;;  %v2774_v49 = vpop.f32.mrb[95].mxu1  ;;  %10123 = vmatmul.mubr.msk.f32.gmra.mrb[200].mxu1 %vm113_vm0, %v5733_v40 }
 0x1bb   :  { %2572 = vst.msk [vmem:[#allocation2 + $0x570] sm:$0xff] %vm307_vm1, %v2550_v45  ;;  %v2775_v51 = vadd.f32 %v12700_v58, %v2774_v49  ;;  %v9774_v52 = vpop.f32.mrb[96].mxu0  ;;  %10125 = vmatprep.mubr.msk.f32.mxu1 %vm113_vm0, %v5734_v43 }
 0x1bc   :  { %2798 = vst.msk [vmem:[#allocation2 + $0x5f8] sm:$0xff] %vm307_vm1, %v2780_v48  ;;  %v2935_v35 = vadd.f32 %v12700_v58, %v9774_v52  ;;  %v2929_v54 = vpop.f32.mrb[97].mxu0  ;;  %10100 = vmatmul.mubr.msk.f32.gmra.mrb[202].mxu0 %vm113_vm0, %v5510_v47 }
 0x1bd   :  { %2797 = vst.msk [vmem:[#allocation2 + $0x5f0] sm:$0xff] %vm307_vm1, %v2775_v51  ;;  %v2930_v44 = vadd.f32 %v12700_v58, %v2929_v54  ;;  %v9800_v56 = vpop.f32.mrb[96].mxu1  ;;  %10102 = vmatprep.mubr.msk.f32.mxu0 %vm113_vm0, %v5511_v50 }
 0x1be   :  { %3009 = vst.msk [vmem:[#allocation2 + $0x608] sm:$0xff] %vm307_vm1, %v2935_v35  ;;  %v3160_v59 = vadd.f32 %v12700_v58, %v9800_v56  ;;  %v3154_v60 = vpop.f32.mrb[97].mxu1  ;;  %10126 = vmatmul.mubr.msk.f32.gmra.mrb[202].mxu1 %vm113_vm0, %v5735_v53 }
 0x1bf   :  { %3008 = vst.msk [vmem:[#allocation2 + $0x600] sm:$0xff] %vm307_vm1, %v2930_v44  ;;  %v3155_v61 = vadd.f32 %v12700_v58, %v3154_v60  ;;  %v9777_v62 = vpop.f32.mrb[98].mxu0  ;;  %10128 = vmatprep.mubr.msk.f32.mxu1 %vm113_vm0, %v5736_v55 }
 0x1c0   :  { %3234 = vst.msk [vmem:[#allocation2 + $0x688] sm:$0xff] %vm307_vm1, %v3160_v59  ;;  %v2945_v0 = vadd.f32 %v12700_v58, %v9777_v62  ;;  %v2939_v17 = vpop.f32.mrb[99].mxu0  ;;  %10103 = vmatmul.mubr.msk.f32.gmra.mrb[204].mxu0 %vm113_vm0, %v5512_v57 }
 0x1c1   :  { %3233 = vst.msk [vmem:[#allocation2 + $0x680] sm:$0xff] %vm307_vm1, %v3155_v61  ;;  %v2940_v19 = vadd.f32 %v12700_v58, %v2939_v17  ;;  %v9803_v20 = vpop.f32.mrb[98].mxu1  ;;  %10105 = vmatprep.mubr.msk.f32.mxu0 %vm113_vm0, %v5513_v38 }
 0x1c2   :  { %3011 = vst.msk [vmem:[#allocation2 + $0x618] sm:$0xff] %vm307_vm1, %v2945_v0  ;;  %v3170_v22 = vadd.f32 %v12700_v58, %v9803_v20  ;;  %v3164_v23 = vpop.f32.mrb[99].mxu1  ;;  %10129 = vmatmul.mubr.msk.f32.gmra.mrb[204].mxu1 %vm113_vm0, %v5737_v63 }
 0x1c3   :  { %3010 = vst.msk [vmem:[#allocation2 + $0x610] sm:$0xff] %vm307_vm1, %v2940_v19  ;;  %v3165_v24 = vadd.f32 %v12700_v58, %v3164_v23  ;;  %v9780_v25 = vpop.f32.mrb[100].mxu0  ;;  %10131 = vmatprep.mubr.msk.f32.mxu1 %vm113_vm0, %v5738_v18 }
 0x1c4   :  { %3236 = vst.msk [vmem:[#allocation2 + $0x698] sm:$0xff] %vm307_vm1, %v3170_v22  ;;  %v2955_v27 = vadd.f32 %v12700_v58, %v9780_v25  ;;  %v2949_v28 = vpop.f32.mrb[101].mxu0  ;;  %10106 = vmatmul.mubr.msk.f32.gmra.mrb[206].mxu0 %vm113_vm0, %v5514_v21 }
 0x1c5   :  { %3235 = vst.msk [vmem:[#allocation2 + $0x690] sm:$0xff] %vm307_vm1, %v3165_v24  ;;  %v2950_v15 = vadd.f32 %v13324_v29, %v2949_v28  ;;  %v9806_v30 = vpop.f32.mrb[100].mxu1 }
 0x1c6   :  { %3013 = vst.msk [vmem:[#allocation2 + $0x628] sm:$0xff] %vm307_vm1, %v2955_v27  ;;  %v3180_v31 = vadd.f32 %v13324_v29, %v9806_v30  ;;  %v3174_v32 = vpop.f32.mrb[101].mxu1  ;;  %10132 = vmatmul.mubr.msk.f32.gmra.mrb[206].mxu1 %vm113_vm0, %v5739_v26 }
 0x1c7   :  { %3012 = vst.msk [vmem:[#allocation2 + $0x620] sm:$0xff] %vm307_vm1, %v2950_v15  ;;  %v3175_v58 = vadd.f32 %v13324_v29, %v3174_v32  ;;  %v9783_v33 = vpop.f32.mrb[102].mxu0 }
 0x1c8   :  { %3238 = vst.msk [vmem:[#allocation2 + $0x6a8] sm:$0xff] %vm307_vm1, %v3180_v31  ;;  %v2965_v34 = vadd.f32 %v13324_v29, %v9783_v33  ;;  %v2959_v36 = vpop.f32.mrb[103].mxu0 }
 0x1c9   :  { %3237 = vst.msk [vmem:[#allocation2 + $0x6a0] sm:$0xff] %vm307_vm1, %v3175_v58  ;;  %v2960_v37 = vadd.f32 %v13324_v29, %v2959_v36  ;;  %v9809_v39 = vpop.f32.mrb[102].mxu1 }
 0x1ca   :  { %3015 = vst.msk [vmem:[#allocation2 + $0x638] sm:$0xff] %vm307_vm1, %v2965_v34  ;;  %v3190_v40 = vadd.f32 %v13324_v29, %v9809_v39  ;;  %v3184_v41 = vpop.f32.mrb[103].mxu1 }
 0x1cb   :  { %3014 = vst.msk [vmem:[#allocation2 + $0x630] sm:$0xff] %vm307_vm1, %v2960_v37  ;;  %v3185_v42 = vadd.f32 %v13324_v29, %v3184_v41  ;;  %v9786_v43 = vpop.f32.mrb[104].mxu0 }
 0x1cc   :  { %3240 = vst.msk [vmem:[#allocation2 + $0x6b8] sm:$0xff] %vm307_vm1, %v3190_v40  ;;  %v2975_v45 = vadd.f32 %v13324_v29, %v9786_v43  ;;  %v2969_v46 = vpop.f32.mrb[105].mxu0 }
 0x1cd   :  { %3239 = vst.msk [vmem:[#allocation2 + $0x6b0] sm:$0xff] %vm307_vm1, %v3185_v42  ;;  %v2970_v47 = vadd.f32 %v13324_v29, %v2969_v46  ;;  %v9812_v48 = vpop.f32.mrb[104].mxu1 }
 0x1ce   :  { %3017 = vst.msk [vmem:[#allocation2 + $0x648] sm:$0xff] %vm307_vm1, %v2975_v45  ;;  %v3200_v49 = vadd.f32 %v13324_v29, %v9812_v48  ;;  %v3194_v50 = vpop.f32.mrb[105].mxu1 }
 0x1cf   :  { %3016 = vst.msk [vmem:[#allocation2 + $0x640] sm:$0xff] %vm307_vm1, %v2970_v47  ;;  %v3195_v51 = vadd.f32 %v13324_v29, %v3194_v50  ;;  %v9789_v52 = vpop.f32.mrb[106].mxu0 }
 0x1d0   :  { %3242 = vst.msk [vmem:[#allocation2 + $0x6c8] sm:$0xff] %vm307_vm1, %v3200_v49  ;;  %v2985_v53 = vadd.f32 %v13324_v29, %v9789_v52  ;;  %v2979_v35 = vpop.f32.mrb[107].mxu0 }
 0x1d1   :  { %3241 = vst.msk [vmem:[#allocation2 + $0x6c0] sm:$0xff] %vm307_vm1, %v3195_v51  ;;  %v2980_v54 = vadd.f32 %v13324_v29, %v2979_v35  ;;  %v9815_v55 = vpop.f32.mrb[106].mxu1 }
 0x1d2   :  { %3019 = vst.msk [vmem:[#allocation2 + $0x658] sm:$0xff] %vm307_vm1, %v2985_v53  ;;  %v3210_v44 = vadd.f32 %v13324_v29, %v9815_v55  ;;  %v3204_v56 = vpop.f32.mrb[107].mxu1 }
 0x1d3   :  { %3018 = vst.msk [vmem:[#allocation2 + $0x650] sm:$0xff] %vm307_vm1, %v2980_v54  ;;  %v3205_v57 = vadd.f32 %v13324_v29, %v3204_v56  ;;  %v9792_v59 = vpop.f32.mrb[108].mxu0 }
 0x1d4   :  { %3244 = vst.msk [vmem:[#allocation2 + $0x6d8] sm:$0xff] %vm307_vm1, %v3210_v44  ;;  %v2995_v60 = vadd.f32 %v13324_v29, %v9792_v59  ;;  %v2989_v38 = vpop.f32.mrb[109].mxu0 }
 0x1d5   :  { %3243 = vst.msk [vmem:[#allocation2 + $0x6d0] sm:$0xff] %vm307_vm1, %v3205_v57  ;;  %v2990_v61 = vadd.f32 %v13324_v29, %v2989_v38  ;;  %v9818_v62 = vpop.f32.mrb[108].mxu1 }
 0x1d6   :  { %3021 = vst.msk [vmem:[#allocation2 + $0x668] sm:$0xff] %vm307_vm1, %v2995_v60  ;;  %v3220_v63 = vadd.f32 %v13324_v29, %v9818_v62  ;;  %v3214_v0 = vpop.f32.mrb[109].mxu1 }
 0x1d7   :  { %3020 = vst.msk [vmem:[#allocation2 + $0x660] sm:$0xff] %vm307_vm1, %v2990_v61  ;;  %v3215_v17 = vadd.f32 %v13324_v29, %v3214_v0  ;;  %v9795_v18 = vpop.f32.mrb[110].mxu0 }
 0x1d8   :  { %3246 = vst.msk [vmem:[#allocation2 + $0x6e8] sm:$0xff] %vm307_vm1, %v3220_v63  ;;  %v3005_v19 = vadd.f32 %v13324_v29, %v9795_v18  ;;  %v2999_v20 = vpop.f32.mrb[111].mxu0 }
 0x1d9   :  { %3245 = vst.msk [vmem:[#allocation2 + $0x6e0] sm:$0xff] %vm307_vm1, %v3215_v17  ;;  %v3000_v21 = vadd.f32 %v13324_v29, %v2999_v20  ;;  %v9821_v22 = vpop.f32.mrb[110].mxu1 }
 0x1da   :  { %3023 = vst.msk [vmem:[#allocation2 + $0x678] sm:$0xff] %vm307_vm1, %v3005_v19  ;;  %v3230_v23 = vadd.f32 %v13324_v29, %v9821_v22  ;;  %v3224_v24 = vpop.f32.mrb[111].mxu1 }
 0x1db   :  { %3022 = vst.msk [vmem:[#allocation2 + $0x670] sm:$0xff] %vm307_vm1, %v3000_v21  ;;  %v3225_v25 = vadd.f32 %v13324_v29, %v3224_v24  ;;  %v9826_v26 = vpop.f32.mrb[112].mxu0 }
 0x1dc   :  { %3248 = vst.msk [vmem:[#allocation2 + $0x6f8] sm:$0xff] %vm307_vm1, %v3230_v23  ;;  %v3385_v27 = vadd.f32 %v13324_v29, %v9826_v26  ;;  %v3379_v28 = vpop.f32.mrb[113].mxu0 }
 0x1dd   :  { %3247 = vst.msk [vmem:[#allocation2 + $0x6f0] sm:$0xff] %vm307_vm1, %v3225_v25  ;;  %v3380_v15 = vadd.f32 %v13324_v29, %v3379_v28  ;;  %v9852_v30 = vpop.f32.mrb[112].mxu1 }
 0x1de   :  { %3459 = vst.msk [vmem:[#allocation2 + $0x708] sm:$0xff] %vm307_vm1, %v3385_v27  ;;  %v3610_v31 = vadd.f32 %v13324_v29, %v9852_v30  ;;  %v3604_v32 = vpop.f32.mrb[113].mxu1 }
 0x1df   :  { %3458 = vst.msk [vmem:[#allocation2 + $0x700] sm:$0xff] %vm307_vm1, %v3380_v15  ;;  %v3605_v58 = vadd.f32 %v13324_v29, %v3604_v32  ;;  %v9829_v33 = vpop.f32.mrb[114].mxu0 }
 0x1e0   :  { %3684 = vst.msk [vmem:[#allocation2 + $0x788] sm:$0xff] %vm307_vm1, %v3610_v31  ;;  %v3395_v34 = vadd.f32 %v13324_v29, %v9829_v33  ;;  %v3389_v36 = vpop.f32.mrb[115].mxu0 }
 0x1e1   :  { %3683 = vst.msk [vmem:[#allocation2 + $0x780] sm:$0xff] %vm307_vm1, %v3605_v58  ;;  %v3390_v37 = vadd.f32 %v13324_v29, %v3389_v36  ;;  %v9855_v39 = vpop.f32.mrb[114].mxu1 }
 0x1e2   :  { %3461 = vst.msk [vmem:[#allocation2 + $0x718] sm:$0xff] %vm307_vm1, %v3395_v34  ;;  %v3620_v40 = vadd.f32 %v13324_v29, %v9855_v39  ;;  %v3614_v41 = vpop.f32.mrb[115].mxu1 }
 0x1e3   :  { %3460 = vst.msk [vmem:[#allocation2 + $0x710] sm:$0xff] %vm307_vm1, %v3390_v37  ;;  %v3615_v42 = vadd.f32 %v13324_v29, %v3614_v41  ;;  %v9832_v43 = vpop.f32.mrb[116].mxu0 }
 0x1e4   :  { %3686 = vst.msk [vmem:[#allocation2 + $0x798] sm:$0xff] %vm307_vm1, %v3620_v40  ;;  %v3405_v45 = vadd.f32 %v13324_v29, %v9832_v43  ;;  %v3399_v46 = vpop.f32.mrb[117].mxu0 }
 0x1e5   :  { %3685 = vst.msk [vmem:[#allocation2 + $0x790] sm:$0xff] %vm307_vm1, %v3615_v42  ;;  %v3400_v47 = vadd.f32 %v13324_v29, %v3399_v46  ;;  %v9858_v48 = vpop.f32.mrb[116].mxu1 }
 0x1e6   :  { %3463 = vst.msk [vmem:[#allocation2 + $0x728] sm:$0xff] %vm307_vm1, %v3405_v45  ;;  %v3630_v49 = vadd.f32 %v13324_v29, %v9858_v48  ;;  %v3624_v50 = vpop.f32.mrb[117].mxu1 }
 0x1e7   :  { %3462 = vst.msk [vmem:[#allocation2 + $0x720] sm:$0xff] %vm307_vm1, %v3400_v47  ;;  %v3625_v51 = vadd.f32 %v13324_v29, %v3624_v50  ;;  %v9835_v52 = vpop.f32.mrb[118].mxu0 }
 0x1e8   :  { %3688 = vst.msk [vmem:[#allocation2 + $0x7a8] sm:$0xff] %vm307_vm1, %v3630_v49  ;;  %v3415_v53 = vadd.f32 %v13324_v29, %v9835_v52  ;;  %v3409_v35 = vpop.f32.mrb[119].mxu0 }
 0x1e9   :  { %3687 = vst.msk [vmem:[#allocation2 + $0x7a0] sm:$0xff] %vm307_vm1, %v3625_v51  ;;  %v3410_v54 = vadd.f32 %v13324_v29, %v3409_v35  ;;  %v9861_v55 = vpop.f32.mrb[118].mxu1 }
 0x1ea   :  { %3465 = vst.msk [vmem:[#allocation2 + $0x738] sm:$0xff] %vm307_vm1, %v3415_v53  ;;  %v3640_v44 = vadd.f32 %v13324_v29, %v9861_v55  ;;  %v3634_v56 = vpop.f32.mrb[119].mxu1 }
 0x1eb   :  { %3464 = vst.msk [vmem:[#allocation2 + $0x730] sm:$0xff] %vm307_vm1, %v3410_v54  ;;  %v3635_v57 = vadd.f32 %v13324_v29, %v3634_v56  ;;  %v9838_v59 = vpop.f32.mrb[120].mxu0 }
 0x1ec   :  { %3690 = vst.msk [vmem:[#allocation2 + $0x7b8] sm:$0xff] %vm307_vm1, %v3640_v44  ;;  %v3425_v60 = vadd.f32 %v13324_v29, %v9838_v59  ;;  %v3419_v38 = vpop.f32.mrb[121].mxu0 }
 0x1ed   :  { %3689 = vst.msk [vmem:[#allocation2 + $0x7b0] sm:$0xff] %vm307_vm1, %v3635_v57  ;;  %v3420_v61 = vadd.f32 %v13324_v29, %v3419_v38  ;;  %v9864_v62 = vpop.f32.mrb[120].mxu1 }
 0x1ee   :  { %3467 = vst.msk [vmem:[#allocation2 + $0x748] sm:$0xff] %vm307_vm1, %v3425_v60  ;;  %v3650_v63 = vadd.f32 %v13324_v29, %v9864_v62  ;;  %v3644_v0 = vpop.f32.mrb[121].mxu1 }
 0x1ef   :  { %3466 = vst.msk [vmem:[#allocation2 + $0x740] sm:$0xff] %vm307_vm1, %v3420_v61  ;;  %v3645_v17 = vadd.f32 %v13324_v29, %v3644_v0  ;;  %v9841_v18 = vpop.f32.mrb[122].mxu0 }
 0x1f0   :  { %3692 = vst.msk [vmem:[#allocation2 + $0x7c8] sm:$0xff] %vm307_vm1, %v3650_v63  ;;  %v3435_v19 = vadd.f32 %v13324_v29, %v9841_v18  ;;  %v3429_v20 = vpop.f32.mrb[123].mxu0 }
 0x1f1   :  { %3691 = vst.msk [vmem:[#allocation2 + $0x7c0] sm:$0xff] %vm307_vm1, %v3645_v17  ;;  %v3430_v21 = vadd.f32 %v13324_v29, %v3429_v20  ;;  %v9867_v22 = vpop.f32.mrb[122].mxu1 }
 0x1f2   :  { %3469 = vst.msk [vmem:[#allocation2 + $0x758] sm:$0xff] %vm307_vm1, %v3435_v19  ;;  %v3660_v23 = vadd.f32 %v13324_v29, %v9867_v22  ;;  %v3654_v24 = vpop.f32.mrb[123].mxu1 }
 0x1f3   :  { %3468 = vst.msk [vmem:[#allocation2 + $0x750] sm:$0xff] %vm307_vm1, %v3430_v21  ;;  %v3655_v25 = vadd.f32 %v13324_v29, %v3654_v24  ;;  %v9844_v26 = vpop.f32.mrb[124].mxu0 }
 0x1f4   :  { %3694 = vst.msk [vmem:[#allocation2 + $0x7d8] sm:$0xff] %vm307_vm1, %v3660_v23  ;;  %v3445_v27 = vadd.f32 %v13324_v29, %v9844_v26  ;;  %v3439_v28 = vpop.f32.mrb[125].mxu0 }
 0x1f5   :  { %3693 = vst.msk [vmem:[#allocation2 + $0x7d0] sm:$0xff] %vm307_vm1, %v3655_v25  ;;  %v3440_v15 = vadd.f32 %v13324_v29, %v3439_v28  ;;  %v9870_v30 = vpop.f32.mrb[124].mxu1 }
 0x1f6   :  { %3471 = vst.msk [vmem:[#allocation2 + $0x768] sm:$0xff] %vm307_vm1, %v3445_v27  ;;  %v3670_v31 = vadd.f32 %v13324_v29, %v9870_v30  ;;  %v3664_v32 = vpop.f32.mrb[125].mxu1 }
 0x1f7   :  { %3470 = vst.msk [vmem:[#allocation2 + $0x760] sm:$0xff] %vm307_vm1, %v3440_v15  ;;  %v3665_v58 = vadd.f32 %v13324_v29, %v3664_v32  ;;  %v9847_v33 = vpop.f32.mrb[126].mxu0 }
 0x1f8   :  { %3696 = vst.msk [vmem:[#allocation2 + $0x7e8] sm:$0xff] %vm307_vm1, %v3670_v31  ;;  %v3455_v34 = vadd.f32 %v13324_v29, %v9847_v33  ;;  %v3449_v36 = vpop.f32.mrb[127].mxu0 }
 0x1f9   :  { %3695 = vst.msk [vmem:[#allocation2 + $0x7e0] sm:$0xff] %vm307_vm1, %v3665_v58  ;;  %v3450_v37 = vadd.f32 %v13324_v29, %v3449_v36  ;;  %v9873_v39 = vpop.f32.mrb[126].mxu1 }
 0x1fa   :  { %3473 = vst.msk [vmem:[#allocation2 + $0x778] sm:$0xff] %vm307_vm1, %v3455_v34  ;;  %v3680_v40 = vadd.f32 %v13324_v29, %v9873_v39  ;;  %v3674_v41 = vpop.f32.mrb[127].mxu1 }
 0x1fb   :  { %3472 = vst.msk [vmem:[#allocation2 + $0x770] sm:$0xff] %vm307_vm1, %v3450_v37  ;;  %v3675_v42 = vadd.f32 %v13324_v29, %v3674_v41  ;;  %v9878_v43 = vpop.f32.mrb[128].mxu0 }
 0x1fc   :  { %3698 = vst.msk [vmem:[#allocation2 + $0x7f8] sm:$0xff] %vm307_vm1, %v3680_v40  ;;  %v3835_v45 = vadd.f32 %v13324_v29, %v9878_v43  ;;  %v3829_v46 = vpop.f32.mrb[129].mxu0 }
 0x1fd   :  { %3697 = vst.msk [vmem:[#allocation2 + $0x7f0] sm:$0xff] %vm307_vm1, %v3675_v42  ;;  %v3830_v47 = vadd.f32 %v13324_v29, %v3829_v46  ;;  %v9904_v48 = vpop.f32.mrb[128].mxu1 }
 0x1fe   :  { %3909 = vst.msk [vmem:[#allocation2 + $0x808] sm:$0xff] %vm307_vm1, %v3835_v45  ;;  %v4060_v49 = vadd.f32 %v13324_v29, %v9904_v48  ;;  %v4054_v50 = vpop.f32.mrb[129].mxu1 }
 0x1ff   :  { %3908 = vst.msk [vmem:[#allocation2 + $0x800] sm:$0xff] %vm307_vm1, %v3830_v47  ;;  %v4055_v51 = vadd.f32 %v13324_v29, %v4054_v50  ;;  %v9881_v52 = vpop.f32.mrb[130].mxu0 }
 0x200   :  { %4134 = vst.msk [vmem:[#allocation2 + $0x888] sm:$0xff] %vm307_vm1, %v4060_v49  ;;  %v3845_v53 = vadd.f32 %v13324_v29, %v9881_v52  ;;  %v3839_v35 = vpop.f32.mrb[131].mxu0 }
 0x201   :  { %4133 = vst.msk [vmem:[#allocation2 + $0x880] sm:$0xff] %vm307_vm1, %v4055_v51  ;;  %v3840_v54 = vadd.f32 %v13324_v29, %v3839_v35  ;;  %v9907_v55 = vpop.f32.mrb[130].mxu1 }
 0x202   :  { %3911 = vst.msk [vmem:[#allocation2 + $0x818] sm:$0xff] %vm307_vm1, %v3845_v53  ;;  %v4070_v44 = vadd.f32 %v13324_v29, %v9907_v55  ;;  %v4064_v56 = vpop.f32.mrb[131].mxu1 }
 0x203   :  { %3910 = vst.msk [vmem:[#allocation2 + $0x810] sm:$0xff] %vm307_vm1, %v3840_v54  ;;  %v4065_v57 = vadd.f32 %v13324_v29, %v4064_v56  ;;  %v9884_v59 = vpop.f32.mrb[132].mxu0 }
 0x204   :  { %4136 = vst.msk [vmem:[#allocation2 + $0x898] sm:$0xff] %vm307_vm1, %v4070_v44  ;;  %v3855_v60 = vadd.f32 %v13324_v29, %v9884_v59  ;;  %v3849_v38 = vpop.f32.mrb[133].mxu0 }
 0x205   :  { %4135 = vst.msk [vmem:[#allocation2 + $0x890] sm:$0xff] %vm307_vm1, %v4065_v57  ;;  %v3850_v61 = vadd.f32 %v13324_v29, %v3849_v38  ;;  %v9910_v62 = vpop.f32.mrb[132].mxu1 }
 0x206   :  { %3913 = vst.msk [vmem:[#allocation2 + $0x828] sm:$0xff] %vm307_vm1, %v3855_v60  ;;  %v4080_v63 = vadd.f32 %v13324_v29, %v9910_v62  ;;  %v4074_v0 = vpop.f32.mrb[133].mxu1 }
 0x207   :  { %3912 = vst.msk [vmem:[#allocation2 + $0x820] sm:$0xff] %vm307_vm1, %v3850_v61  ;;  %v4075_v17 = vadd.f32 %v13324_v29, %v4074_v0  ;;  %v9887_v18 = vpop.f32.mrb[134].mxu0 }
 0x208   :  { %4138 = vst.msk [vmem:[#allocation2 + $0x8a8] sm:$0xff] %vm307_vm1, %v4080_v63  ;;  %v3865_v19 = vadd.f32 %v13324_v29, %v9887_v18  ;;  %v3859_v20 = vpop.f32.mrb[135].mxu0 }
 0x209   :  { %4137 = vst.msk [vmem:[#allocation2 + $0x8a0] sm:$0xff] %vm307_vm1, %v4075_v17  ;;  %v3860_v21 = vadd.f32 %v13324_v29, %v3859_v20  ;;  %v9913_v22 = vpop.f32.mrb[134].mxu1 }
 0x20a   :  { %3915 = vst.msk [vmem:[#allocation2 + $0x838] sm:$0xff] %vm307_vm1, %v3865_v19  ;;  %v4090_v23 = vadd.f32 %v13324_v29, %v9913_v22  ;;  %v4084_v24 = vpop.f32.mrb[135].mxu1 }
 0x20b   :  { %3914 = vst.msk [vmem:[#allocation2 + $0x830] sm:$0xff] %vm307_vm1, %v3860_v21  ;;  %v4085_v25 = vadd.f32 %v13324_v29, %v4084_v24  ;;  %v9890_v26 = vpop.f32.mrb[136].mxu0 }
 0x20c   :  { %4140 = vst.msk [vmem:[#allocation2 + $0x8b8] sm:$0xff] %vm307_vm1, %v4090_v23  ;;  %v3875_v27 = vadd.f32 %v13324_v29, %v9890_v26  ;;  %v3869_v28 = vpop.f32.mrb[137].mxu0 }
 0x20d   :  { %4139 = vst.msk [vmem:[#allocation2 + $0x8b0] sm:$0xff] %vm307_vm1, %v4085_v25  ;;  %v3870_v15 = vadd.f32 %v13324_v29, %v3869_v28  ;;  %v9916_v30 = vpop.f32.mrb[136].mxu1 }
 0x20e   :  { %3917 = vst.msk [vmem:[#allocation2 + $0x848] sm:$0xff] %vm307_vm1, %v3875_v27  ;;  %v4100_v31 = vadd.f32 %v13324_v29, %v9916_v30  ;;  %v4094_v32 = vpop.f32.mrb[137].mxu1 }
 0x20f   :  { %3916 = vst.msk [vmem:[#allocation2 + $0x840] sm:$0xff] %vm307_vm1, %v3870_v15  ;;  %v4095_v58 = vadd.f32 %v13324_v29, %v4094_v32  ;;  %v9893_v33 = vpop.f32.mrb[138].mxu0 }
 0x210   :  { %4142 = vst.msk [vmem:[#allocation2 + $0x8c8] sm:$0xff] %vm307_vm1, %v4100_v31  ;;  %v3885_v34 = vadd.f32 %v13324_v29, %v9893_v33  ;;  %v3879_v36 = vpop.f32.mrb[139].mxu0 }
 0x211   :  { %4141 = vst.msk [vmem:[#allocation2 + $0x8c0] sm:$0xff] %vm307_vm1, %v4095_v58  ;;  %v3880_v37 = vadd.f32 %v13324_v29, %v3879_v36  ;;  %v9919_v39 = vpop.f32.mrb[138].mxu1 }
 0x212   :  { %3919 = vst.msk [vmem:[#allocation2 + $0x858] sm:$0xff] %vm307_vm1, %v3885_v34  ;;  %v4110_v40 = vadd.f32 %v13324_v29, %v9919_v39  ;;  %v4104_v41 = vpop.f32.mrb[139].mxu1 }
 0x213   :  { %3918 = vst.msk [vmem:[#allocation2 + $0x850] sm:$0xff] %vm307_vm1, %v3880_v37  ;;  %v4105_v42 = vadd.f32 %v13324_v29, %v4104_v41  ;;  %v9896_v43 = vpop.f32.mrb[140].mxu0 }
 0x214   :  { %4144 = vst.msk [vmem:[#allocation2 + $0x8d8] sm:$0xff] %vm307_vm1, %v4110_v40  ;;  %v3895_v45 = vadd.f32 %v13324_v29, %v9896_v43  ;;  %v3889_v46 = vpop.f32.mrb[141].mxu0 }
 0x215   :  { %4143 = vst.msk [vmem:[#allocation2 + $0x8d0] sm:$0xff] %vm307_vm1, %v4105_v42  ;;  %v3890_v47 = vadd.f32 %v13324_v29, %v3889_v46  ;;  %v9922_v48 = vpop.f32.mrb[140].mxu1 }
 0x216   :  { %3921 = vst.msk [vmem:[#allocation2 + $0x868] sm:$0xff] %vm307_vm1, %v3895_v45  ;;  %v4120_v49 = vadd.f32 %v13324_v29, %v9922_v48  ;;  %v4114_v50 = vpop.f32.mrb[141].mxu1 }
 0x217   :  { %3920 = vst.msk [vmem:[#allocation2 + $0x860] sm:$0xff] %vm307_vm1, %v3890_v47  ;;  %v4115_v51 = vadd.f32 %v13324_v29, %v4114_v50  ;;  %v9899_v52 = vpop.f32.mrb[142].mxu0 }
 0x218   :  { %4146 = vst.msk [vmem:[#allocation2 + $0x8e8] sm:$0xff] %vm307_vm1, %v4120_v49  ;;  %v3905_v53 = vadd.f32 %v13324_v29, %v9899_v52  ;;  %v3899_v35 = vpop.f32.mrb[143].mxu0 }
 0x219   :  { %4145 = vst.msk [vmem:[#allocation2 + $0x8e0] sm:$0xff] %vm307_vm1, %v4115_v51  ;;  %v3900_v54 = vadd.f32 %v13324_v29, %v3899_v35  ;;  %v9925_v55 = vpop.f32.mrb[142].mxu1 }
 0x21a   :  { %3923 = vst.msk [vmem:[#allocation2 + $0x878] sm:$0xff] %vm307_vm1, %v3905_v53  ;;  %v4130_v44 = vadd.f32 %v13324_v29, %v9925_v55  ;;  %v4124_v56 = vpop.f32.mrb[143].mxu1 }
 0x21b   :  { %3922 = vst.msk [vmem:[#allocation2 + $0x870] sm:$0xff] %vm307_vm1, %v3900_v54  ;;  %v4125_v57 = vadd.f32 %v13324_v29, %v4124_v56  ;;  %v9930_v59 = vpop.f32.mrb[144].mxu0 }
 0x21c   :  { %4148 = vst.msk [vmem:[#allocation2 + $0x8f8] sm:$0xff] %vm307_vm1, %v4130_v44  ;;  %v4285_v60 = vadd.f32 %v13324_v29, %v9930_v59  ;;  %v4279_v38 = vpop.f32.mrb[145].mxu0 }
 0x21d   :  { %4147 = vst.msk [vmem:[#allocation2 + $0x8f0] sm:$0xff] %vm307_vm1, %v4125_v57  ;;  %v4280_v61 = vadd.f32 %v13324_v29, %v4279_v38  ;;  %v9956_v62 = vpop.f32.mrb[144].mxu1 }
 0x21e   :  { %4359 = vst.msk [vmem:[#allocation2 + $0x908] sm:$0xff] %vm307_vm1, %v4285_v60  ;;  %v4510_v63 = vadd.f32 %v13324_v29, %v9956_v62  ;;  %v4504_v0 = vpop.f32.mrb[145].mxu1 }
 0x21f   :  { %4358 = vst.msk [vmem:[#allocation2 + $0x900] sm:$0xff] %vm307_vm1, %v4280_v61  ;;  %v4505_v17 = vadd.f32 %v13324_v29, %v4504_v0  ;;  %v9933_v18 = vpop.f32.mrb[146].mxu0 }
 0x220   :  { %4584 = vst.msk [vmem:[#allocation2 + $0x988] sm:$0xff] %vm307_vm1, %v4510_v63  ;;  %v4295_v19 = vadd.f32 %v13324_v29, %v9933_v18  ;;  %v4289_v20 = vpop.f32.mrb[147].mxu0 }
 0x221   :  { %4583 = vst.msk [vmem:[#allocation2 + $0x980] sm:$0xff] %vm307_vm1, %v4505_v17  ;;  %v4290_v21 = vadd.f32 %v13324_v29, %v4289_v20  ;;  %v9959_v22 = vpop.f32.mrb[146].mxu1 }
 0x222   :  { %4361 = vst.msk [vmem:[#allocation2 + $0x918] sm:$0xff] %vm307_vm1, %v4295_v19  ;;  %v4520_v23 = vadd.f32 %v13324_v29, %v9959_v22  ;;  %v4514_v24 = vpop.f32.mrb[147].mxu1 }
 0x223   :  { %4360 = vst.msk [vmem:[#allocation2 + $0x910] sm:$0xff] %vm307_vm1, %v4290_v21  ;;  %v4515_v25 = vadd.f32 %v13324_v29, %v4514_v24  ;;  %v9936_v26 = vpop.f32.mrb[148].mxu0 }
 0x224   :  { %4586 = vst.msk [vmem:[#allocation2 + $0x998] sm:$0xff] %vm307_vm1, %v4520_v23  ;;  %v4305_v27 = vadd.f32 %v13324_v29, %v9936_v26  ;;  %v4299_v28 = vpop.f32.mrb[149].mxu0 }
 0x225   :  { %4585 = vst.msk [vmem:[#allocation2 + $0x990] sm:$0xff] %vm307_vm1, %v4515_v25  ;;  %v4300_v15 = vadd.f32 %v13324_v29, %v4299_v28  ;;  %v9962_v30 = vpop.f32.mrb[148].mxu1 }
 0x226   :  { %4363 = vst.msk [vmem:[#allocation2 + $0x928] sm:$0xff] %vm307_vm1, %v4305_v27  ;;  %v4530_v31 = vadd.f32 %v13324_v29, %v9962_v30  ;;  %v4524_v32 = vpop.f32.mrb[149].mxu1 }
 0x227   :  { %4362 = vst.msk [vmem:[#allocation2 + $0x920] sm:$0xff] %vm307_vm1, %v4300_v15  ;;  %v4525_v58 = vadd.f32 %v13324_v29, %v4524_v32  ;;  %v9939_v33 = vpop.f32.mrb[150].mxu0 }
 0x228   :  { %4588 = vst.msk [vmem:[#allocation2 + $0x9a8] sm:$0xff] %vm307_vm1, %v4530_v31  ;;  %v4315_v34 = vadd.f32 %v13324_v29, %v9939_v33  ;;  %v4309_v36 = vpop.f32.mrb[151].mxu0 }
 0x229   :  { %4587 = vst.msk [vmem:[#allocation2 + $0x9a0] sm:$0xff] %vm307_vm1, %v4525_v58  ;;  %v4310_v37 = vadd.f32 %v13324_v29, %v4309_v36  ;;  %v9965_v39 = vpop.f32.mrb[150].mxu1 }
 0x22a   :  { %4365 = vst.msk [vmem:[#allocation2 + $0x938] sm:$0xff] %vm307_vm1, %v4315_v34  ;;  %v4540_v40 = vadd.f32 %v13324_v29, %v9965_v39  ;;  %v4534_v41 = vpop.f32.mrb[151].mxu1 }
 0x22b   :  { %4364 = vst.msk [vmem:[#allocation2 + $0x930] sm:$0xff] %vm307_vm1, %v4310_v37  ;;  %v4535_v42 = vadd.f32 %v13324_v29, %v4534_v41  ;;  %v9942_v43 = vpop.f32.mrb[152].mxu0 }
 0x22c   :  { %4590 = vst.msk [vmem:[#allocation2 + $0x9b8] sm:$0xff] %vm307_vm1, %v4540_v40  ;;  %v4325_v45 = vadd.f32 %v13324_v29, %v9942_v43  ;;  %v4319_v46 = vpop.f32.mrb[153].mxu0 }
 0x22d   :  { %4589 = vst.msk [vmem:[#allocation2 + $0x9b0] sm:$0xff] %vm307_vm1, %v4535_v42  ;;  %v4320_v47 = vadd.f32 %v13324_v29, %v4319_v46  ;;  %v9968_v48 = vpop.f32.mrb[152].mxu1 }
 0x22e   :  { %4367 = vst.msk [vmem:[#allocation2 + $0x948] sm:$0xff] %vm307_vm1, %v4325_v45  ;;  %v4550_v49 = vadd.f32 %v13324_v29, %v9968_v48  ;;  %v4544_v50 = vpop.f32.mrb[153].mxu1 }
 0x22f   :  { %4366 = vst.msk [vmem:[#allocation2 + $0x940] sm:$0xff] %vm307_vm1, %v4320_v47  ;;  %v4545_v51 = vadd.f32 %v13324_v29, %v4544_v50  ;;  %v9945_v52 = vpop.f32.mrb[154].mxu0 }
 0x230   :  { %4592 = vst.msk [vmem:[#allocation2 + $0x9c8] sm:$0xff] %vm307_vm1, %v4550_v49  ;;  %v4335_v53 = vadd.f32 %v13324_v29, %v9945_v52  ;;  %v4329_v35 = vpop.f32.mrb[155].mxu0 }
 0x231   :  { %4591 = vst.msk [vmem:[#allocation2 + $0x9c0] sm:$0xff] %vm307_vm1, %v4545_v51  ;;  %v4330_v54 = vadd.f32 %v13324_v29, %v4329_v35  ;;  %v9971_v55 = vpop.f32.mrb[154].mxu1 }
 0x232   :  { %4369 = vst.msk [vmem:[#allocation2 + $0x958] sm:$0xff] %vm307_vm1, %v4335_v53  ;;  %v4560_v44 = vadd.f32 %v13324_v29, %v9971_v55  ;;  %v4554_v56 = vpop.f32.mrb[155].mxu1 }
 0x233   :  { %4368 = vst.msk [vmem:[#allocation2 + $0x950] sm:$0xff] %vm307_vm1, %v4330_v54  ;;  %v4555_v57 = vadd.f32 %v13324_v29, %v4554_v56  ;;  %v9948_v59 = vpop.f32.mrb[156].mxu0 }
 0x234   :  { %4594 = vst.msk [vmem:[#allocation2 + $0x9d8] sm:$0xff] %vm307_vm1, %v4560_v44  ;;  %v4345_v60 = vadd.f32 %v13324_v29, %v9948_v59  ;;  %v4339_v38 = vpop.f32.mrb[157].mxu0 }
 0x235   :  { %4593 = vst.msk [vmem:[#allocation2 + $0x9d0] sm:$0xff] %vm307_vm1, %v4555_v57  ;;  %v4340_v61 = vadd.f32 %v13324_v29, %v4339_v38  ;;  %v9974_v62 = vpop.f32.mrb[156].mxu1 }
 0x236   :  { %4371 = vst.msk [vmem:[#allocation2 + $0x968] sm:$0xff] %vm307_vm1, %v4345_v60  ;;  %v4570_v63 = vadd.f32 %v13324_v29, %v9974_v62  ;;  %v4564_v0 = vpop.f32.mrb[157].mxu1 }
 0x237   :  { %4370 = vst.msk [vmem:[#allocation2 + $0x960] sm:$0xff] %vm307_vm1, %v4340_v61  ;;  %v4565_v17 = vadd.f32 %v13324_v29, %v4564_v0  ;;  %v9951_v18 = vpop.f32.mrb[158].mxu0 }
 0x238   :  { %4596 = vst.msk [vmem:[#allocation2 + $0x9e8] sm:$0xff] %vm307_vm1, %v4570_v63  ;;  %v4355_v19 = vadd.f32 %v13324_v29, %v9951_v18  ;;  %v4349_v20 = vpop.f32.mrb[159].mxu0 }
 0x239   :  { %4595 = vst.msk [vmem:[#allocation2 + $0x9e0] sm:$0xff] %vm307_vm1, %v4565_v17  ;;  %v4350_v21 = vadd.f32 %v13324_v29, %v4349_v20  ;;  %v9977_v22 = vpop.f32.mrb[158].mxu1 }
 0x23a   :  { %4373 = vst.msk [vmem:[#allocation2 + $0x978] sm:$0xff] %vm307_vm1, %v4355_v19  ;;  %v4580_v23 = vadd.f32 %v13324_v29, %v9977_v22  ;;  %v4574_v24 = vpop.f32.mrb[159].mxu1 }
 0x23b   :  { %4372 = vst.msk [vmem:[#allocation2 + $0x970] sm:$0xff] %vm307_vm1, %v4350_v21  ;;  %v4575_v25 = vadd.f32 %v13324_v29, %v4574_v24  ;;  %v9982_v26 = vpop.f32.mrb[160].mxu0 }
 0x23c   :  { %4598 = vst.msk [vmem:[#allocation2 + $0x9f8] sm:$0xff] %vm307_vm1, %v4580_v23  ;;  %v4735_v27 = vadd.f32 %v13324_v29, %v9982_v26  ;;  %v4729_v28 = vpop.f32.mrb[161].mxu0 }
 0x23d   :  { %4597 = vst.msk [vmem:[#allocation2 + $0x9f0] sm:$0xff] %vm307_vm1, %v4575_v25  ;;  %v4730_v15 = vadd.f32 %v13324_v29, %v4729_v28  ;;  %v10008_v30 = vpop.f32.mrb[160].mxu1 }
 0x23e   :  { %4809 = vst.msk [vmem:[#allocation2 + $0xa08] sm:$0xff] %vm307_vm1, %v4735_v27  ;;  %v4960_v31 = vadd.f32 %v13324_v29, %v10008_v30  ;;  %v4954_v32 = vpop.f32.mrb[161].mxu1 }
 0x23f   :  { %4808 = vst.msk [vmem:[#allocation2 + $0xa00] sm:$0xff] %vm307_vm1, %v4730_v15  ;;  %v4955_v58 = vadd.f32 %v13324_v29, %v4954_v32  ;;  %v9985_v33 = vpop.f32.mrb[162].mxu0 }
 0x240   :  { %5034 = vst.msk [vmem:[#allocation2 + $0xa88] sm:$0xff] %vm307_vm1, %v4960_v31  ;;  %v4745_v34 = vadd.f32 %v13324_v29, %v9985_v33  ;;  %v4739_v36 = vpop.f32.mrb[163].mxu0 }
 0x241   :  { %5033 = vst.msk [vmem:[#allocation2 + $0xa80] sm:$0xff] %vm307_vm1, %v4955_v58  ;;  %v4740_v37 = vadd.f32 %v13324_v29, %v4739_v36  ;;  %v10011_v39 = vpop.f32.mrb[162].mxu1 }
 0x242   :  { %4811 = vst.msk [vmem:[#allocation2 + $0xa18] sm:$0xff] %vm307_vm1, %v4745_v34  ;;  %v4970_v40 = vadd.f32 %v13324_v29, %v10011_v39  ;;  %v4964_v41 = vpop.f32.mrb[163].mxu1 }
 0x243   :  { %4810 = vst.msk [vmem:[#allocation2 + $0xa10] sm:$0xff] %vm307_vm1, %v4740_v37  ;;  %v4965_v42 = vadd.f32 %v13324_v29, %v4964_v41  ;;  %v9988_v43 = vpop.f32.mrb[164].mxu0 }
 0x244   :  { %5036 = vst.msk [vmem:[#allocation2 + $0xa98] sm:$0xff] %vm307_vm1, %v4970_v40  ;;  %v4755_v45 = vadd.f32 %v13324_v29, %v9988_v43  ;;  %v4749_v46 = vpop.f32.mrb[165].mxu0 }
 0x245   :  { %5035 = vst.msk [vmem:[#allocation2 + $0xa90] sm:$0xff] %vm307_vm1, %v4965_v42  ;;  %v4750_v47 = vadd.f32 %v13324_v29, %v4749_v46  ;;  %v10014_v48 = vpop.f32.mrb[164].mxu1 }
 0x246   :  { %4813 = vst.msk [vmem:[#allocation2 + $0xa28] sm:$0xff] %vm307_vm1, %v4755_v45  ;;  %v4980_v49 = vadd.f32 %v13324_v29, %v10014_v48  ;;  %v4974_v50 = vpop.f32.mrb[165].mxu1 }
 0x247   :  { %4812 = vst.msk [vmem:[#allocation2 + $0xa20] sm:$0xff] %vm307_vm1, %v4750_v47  ;;  %v4975_v51 = vadd.f32 %v13324_v29, %v4974_v50  ;;  %v9991_v52 = vpop.f32.mrb[166].mxu0 }
 0x248   :  { %5038 = vst.msk [vmem:[#allocation2 + $0xaa8] sm:$0xff] %vm307_vm1, %v4980_v49  ;;  %v4765_v53 = vadd.f32 %v13324_v29, %v9991_v52  ;;  %v4759_v35 = vpop.f32.mrb[167].mxu0 }
 0x249   :  { %5037 = vst.msk [vmem:[#allocation2 + $0xaa0] sm:$0xff] %vm307_vm1, %v4975_v51  ;;  %v4760_v54 = vadd.f32 %v13324_v29, %v4759_v35  ;;  %v10017_v55 = vpop.f32.mrb[166].mxu1 }
 0x24a   :  { %4815 = vst.msk [vmem:[#allocation2 + $0xa38] sm:$0xff] %vm307_vm1, %v4765_v53  ;;  %v4990_v44 = vadd.f32 %v13324_v29, %v10017_v55  ;;  %v4984_v56 = vpop.f32.mrb[167].mxu1 }
 0x24b   :  { %4814 = vst.msk [vmem:[#allocation2 + $0xa30] sm:$0xff] %vm307_vm1, %v4760_v54  ;;  %v4985_v57 = vadd.f32 %v13324_v29, %v4984_v56  ;;  %v9994_v59 = vpop.f32.mrb[168].mxu0 }
 0x24c   :  { %5040 = vst.msk [vmem:[#allocation2 + $0xab8] sm:$0xff] %vm307_vm1, %v4990_v44  ;;  %v4775_v60 = vadd.f32 %v13324_v29, %v9994_v59  ;;  %v4769_v38 = vpop.f32.mrb[169].mxu0 }
 0x24d   :  { %5039 = vst.msk [vmem:[#allocation2 + $0xab0] sm:$0xff] %vm307_vm1, %v4985_v57  ;;  %v4770_v61 = vadd.f32 %v13324_v29, %v4769_v38  ;;  %v10020_v62 = vpop.f32.mrb[168].mxu1 }
 0x24e   :  { %4817 = vst.msk [vmem:[#allocation2 + $0xa48] sm:$0xff] %vm307_vm1, %v4775_v60  ;;  %v5000_v63 = vadd.f32 %v13324_v29, %v10020_v62  ;;  %v4994_v0 = vpop.f32.mrb[169].mxu1 }
 0x24f   :  { %4816 = vst.msk [vmem:[#allocation2 + $0xa40] sm:$0xff] %vm307_vm1, %v4770_v61  ;;  %v4995_v17 = vadd.f32 %v13324_v29, %v4994_v0  ;;  %v9997_v18 = vpop.f32.mrb[170].mxu0 }
 0x250   :  { %5042 = vst.msk [vmem:[#allocation2 + $0xac8] sm:$0xff] %vm307_vm1, %v5000_v63  ;;  %v4785_v19 = vadd.f32 %v13324_v29, %v9997_v18  ;;  %v4779_v20 = vpop.f32.mrb[171].mxu0 }
 0x251   :  { %5041 = vst.msk [vmem:[#allocation2 + $0xac0] sm:$0xff] %vm307_vm1, %v4995_v17  ;;  %v4780_v21 = vadd.f32 %v13324_v29, %v4779_v20  ;;  %v10023_v22 = vpop.f32.mrb[170].mxu1 }
 0x252   :  { %4819 = vst.msk [vmem:[#allocation2 + $0xa58] sm:$0xff] %vm307_vm1, %v4785_v19  ;;  %v5010_v23 = vadd.f32 %v13324_v29, %v10023_v22  ;;  %v5004_v24 = vpop.f32.mrb[171].mxu1 }
 0x253   :  { %4818 = vst.msk [vmem:[#allocation2 + $0xa50] sm:$0xff] %vm307_vm1, %v4780_v21  ;;  %v5005_v25 = vadd.f32 %v13324_v29, %v5004_v24  ;;  %v10000_v26 = vpop.f32.mrb[172].mxu0 }
 0x254   :  { %5044 = vst.msk [vmem:[#allocation2 + $0xad8] sm:$0xff] %vm307_vm1, %v5010_v23  ;;  %v4795_v27 = vadd.f32 %v13324_v29, %v10000_v26  ;;  %v4789_v28 = vpop.f32.mrb[173].mxu0 }
 0x255   :  { %5043 = vst.msk [vmem:[#allocation2 + $0xad0] sm:$0xff] %vm307_vm1, %v5005_v25  ;;  %v4790_v15 = vadd.f32 %v13324_v29, %v4789_v28  ;;  %v10026_v30 = vpop.f32.mrb[172].mxu1 }
 0x256   :  { %4821 = vst.msk [vmem:[#allocation2 + $0xa68] sm:$0xff] %vm307_vm1, %v4795_v27  ;;  %v5020_v31 = vadd.f32 %v13324_v29, %v10026_v30  ;;  %v5014_v32 = vpop.f32.mrb[173].mxu1 }
 0x257   :  { %4820 = vst.msk [vmem:[#allocation2 + $0xa60] sm:$0xff] %vm307_vm1, %v4790_v15  ;;  %v5015_v58 = vadd.f32 %v13324_v29, %v5014_v32  ;;  %v10003_v33 = vpop.f32.mrb[174].mxu0 }
 0x258   :  { %5046 = vst.msk [vmem:[#allocation2 + $0xae8] sm:$0xff] %vm307_vm1, %v5020_v31  ;;  %v4805_v34 = vadd.f32 %v13324_v29, %v10003_v33  ;;  %v4799_v36 = vpop.f32.mrb[175].mxu0 }
 0x259   :  { %5045 = vst.msk [vmem:[#allocation2 + $0xae0] sm:$0xff] %vm307_vm1, %v5015_v58  ;;  %v4800_v37 = vadd.f32 %v13324_v29, %v4799_v36  ;;  %v10029_v39 = vpop.f32.mrb[174].mxu1 }
 0x25a   :  { %4823 = vst.msk [vmem:[#allocation2 + $0xa78] sm:$0xff] %vm307_vm1, %v4805_v34  ;;  %v5030_v40 = vadd.f32 %v13324_v29, %v10029_v39  ;;  %v5024_v41 = vpop.f32.mrb[175].mxu1  ;;  %v13672_v34 = vld [vmem:[%s14812_s7] ss:$0 sm:$0xff] }
 0x25b   :  { %4822 = vst.msk [vmem:[#allocation2 + $0xa70] sm:$0xff] %vm307_vm1, %v4800_v37  ;;  %v5025_v42 = vadd.f32 %v13324_v29, %v5024_v41  ;;  %v10034_v43 = vpop.f32.mrb[176].mxu0 }
 0x25c   :  { %5048 = vst.msk [vmem:[#allocation2 + $0xaf8] sm:$0xff] %vm307_vm1, %v5030_v40  ;;  %v5185_v45 = vadd.f32 %v13324_v29, %v10034_v43  ;;  %v5179_v46 = vpop.f32.mrb[177].mxu0 }
 0x25d   :  { %5047 = vst.msk [vmem:[#allocation2 + $0xaf0] sm:$0xff] %vm307_vm1, %v5025_v42  ;;  %v5180_v47 = vadd.f32 %v13324_v29, %v5179_v46  ;;  %v10060_v48 = vpop.f32.mrb[176].mxu1 }
 0x25e   :  { %5259 = vst.msk [vmem:[#allocation2 + $0xb08] sm:$0xff] %vm307_vm1, %v5185_v45  ;;  %v5410_v49 = vadd.f32 %v13324_v29, %v10060_v48  ;;  %v5404_v50 = vpop.f32.mrb[177].mxu1 }
 0x25f   :  { %5258 = vst.msk [vmem:[#allocation2 + $0xb00] sm:$0xff] %vm307_vm1, %v5180_v47  ;;  %v5405_v51 = vadd.f32 %v13324_v29, %v5404_v50  ;;  %v10037_v52 = vpop.f32.mrb[178].mxu0 }
 0x260   :  { %5484 = vst.msk [vmem:[#allocation2 + $0xb88] sm:$0xff] %vm307_vm1, %v5410_v49  ;;  %v5195_v53 = vadd.f32 %v13324_v29, %v10037_v52  ;;  %v5189_v35 = vpop.f32.mrb[179].mxu0 }
 0x261   :  { %5483 = vst.msk [vmem:[#allocation2 + $0xb80] sm:$0xff] %vm307_vm1, %v5405_v51  ;;  %v5190_v54 = vadd.f32 %v13324_v29, %v5189_v35  ;;  %v10063_v55 = vpop.f32.mrb[178].mxu1 }
 0x262   :  { %5261 = vst.msk [vmem:[#allocation2 + $0xb18] sm:$0xff] %vm307_vm1, %v5195_v53  ;;  %v5420_v44 = vadd.f32 %v13324_v29, %v10063_v55  ;;  %v5414_v56 = vpop.f32.mrb[179].mxu1 }
 0x263   :  { %5260 = vst.msk [vmem:[#allocation2 + $0xb10] sm:$0xff] %vm307_vm1, %v5190_v54  ;;  %v5415_v57 = vadd.f32 %v13324_v29, %v5414_v56  ;;  %v10040_v59 = vpop.f32.mrb[180].mxu0 }
 0x264   :  { %5486 = vst.msk [vmem:[#allocation2 + $0xb98] sm:$0xff] %vm307_vm1, %v5420_v44  ;;  %v5205_v60 = vadd.f32 %v13324_v29, %v10040_v59  ;;  %v5199_v38 = vpop.f32.mrb[181].mxu0 }
 0x265   :  { %5485 = vst.msk [vmem:[#allocation2 + $0xb90] sm:$0xff] %vm307_vm1, %v5415_v57  ;;  %v5200_v61 = vadd.f32 %v13324_v29, %v5199_v38  ;;  %v10066_v62 = vpop.f32.mrb[180].mxu1 }
 0x266   :  { %5263 = vst.msk [vmem:[#allocation2 + $0xb28] sm:$0xff] %vm307_vm1, %v5205_v60  ;;  %v5430_v63 = vadd.f32 %v13324_v29, %v10066_v62  ;;  %v5424_v0 = vpop.f32.mrb[181].mxu1  ;;  %v13700_v60 = vld [vmem:[%s14809_s4] ss:$0 sm:$0xff]  ;;  %s13799_s4 = smov 0  }
 0x267   :  { %5262 = vst.msk [vmem:[#allocation2 + $0xb20] sm:$0xff] %vm307_vm1, %v5200_v61  ;;  %v5425_v17 = vadd.f32 %v13324_v29, %v5424_v0  ;;  %v10043_v18 = vpop.f32.mrb[182].mxu0 }
 0x268   :  { %5488 = vst.msk [vmem:[#allocation2 + $0xba8] sm:$0xff] %vm307_vm1, %v5430_v63  ;;  %v5215_v19 = vadd.f32 %v13324_v29, %v10043_v18  ;;  %v5209_v20 = vpop.f32.mrb[183].mxu0 }
 0x269   :  { %5487 = vst.msk [vmem:[#allocation2 + $0xba0] sm:$0xff] %vm307_vm1, %v5425_v17  ;;  %v5210_v21 = vadd.f32 %v13324_v29, %v5209_v20  ;;  %v10069_v22 = vpop.f32.mrb[182].mxu1 }
 0x26a   :  { %5265 = vst.msk [vmem:[#allocation2 + $0xb38] sm:$0xff] %vm307_vm1, %v5215_v19  ;;  %v5440_v23 = vadd.f32 %v13324_v29, %v10069_v22  ;;  %v5434_v24 = vpop.f32.mrb[183].mxu1 }
 0x26b   :  { %5264 = vst.msk [vmem:[#allocation2 + $0xb30] sm:$0xff] %vm307_vm1, %v5210_v21  ;;  %v5435_v25 = vadd.f32 %v13324_v29, %v5434_v24  ;;  %v10046_v26 = vpop.f32.mrb[184].mxu0 }
 0x26c   :  { %5490 = vst.msk [vmem:[#allocation2 + $0xbb8] sm:$0xff] %vm307_vm1, %v5440_v23  ;;  %v5225_v27 = vadd.f32 %v13324_v29, %v10046_v26  ;;  %v5219_v28 = vpop.f32.mrb[185].mxu0 }
 0x26d   :  { %5489 = vst.msk [vmem:[#allocation2 + $0xbb0] sm:$0xff] %vm307_vm1, %v5435_v25  ;;  %v5220_v15 = vadd.f32 %v13324_v29, %v5219_v28  ;;  %v10072_v30 = vpop.f32.mrb[184].mxu1 }
 0x26e   :  { %5267 = vst.msk [vmem:[#allocation2 + $0xb48] sm:$0xff] %vm307_vm1, %v5225_v27  ;;  %v5450_v31 = vadd.f32 %v13324_v29, %v10072_v30  ;;  %v5444_v32 = vpop.f32.mrb[185].mxu1 }
 0x26f   :  { %5266 = vst.msk [vmem:[#allocation2 + $0xb40] sm:$0xff] %vm307_vm1, %v5220_v15  ;;  %v5445_v58 = vadd.f32 %v13324_v29, %v5444_v32  ;;  %v10049_v33 = vpop.f32.mrb[186].mxu0 }
 0x270   :  { %5492 = vst.msk [vmem:[#allocation2 + $0xbc8] sm:$0xff] %vm307_vm1, %v5450_v31  ;;  %v5235_v36 = vadd.f32 %v13672_v34, %v10049_v33  ;;  %v5229_v37 = vpop.f32.mrb[187].mxu0 }
 0x271   :  { %5491 = vst.msk [vmem:[#allocation2 + $0xbc0] sm:$0xff] %vm307_vm1, %v5445_v58  ;;  %v5230_v39 = vadd.f32 %v13672_v34, %v5229_v37  ;;  %v10075_v40 = vpop.f32.mrb[186].mxu1 }
 0x272   :  { %5269 = vst.msk [vmem:[#allocation2 + $0xb58] sm:$0xff] %vm307_vm1, %v5235_v36  ;;  %v5460_v29 = vadd.f32 %v13672_v34, %v10075_v40  ;;  %v5454_v41 = vpop.f32.mrb[187].mxu1 }
 0x273   :  { %5268 = vst.msk [vmem:[#allocation2 + $0xb50] sm:$0xff] %vm307_vm1, %v5230_v39  ;;  %v5455_v42 = vadd.f32 %v13672_v34, %v5454_v41  ;;  %v10052_v43 = vpop.f32.mrb[188].mxu0 }
 0x274   :  { %5494 = vst.msk [vmem:[#allocation2 + $0xbd8] sm:$0xff] %vm307_vm1, %v5460_v29  ;;  %v5245_v45 = vadd.f32 %v13672_v34, %v10052_v43  ;;  %v5239_v46 = vpop.f32.mrb[189].mxu0 }
 0x275   :  { %5493 = vst.msk [vmem:[#allocation2 + $0xbd0] sm:$0xff] %vm307_vm1, %v5455_v42  ;;  %v5240_v47 = vadd.f32 %v13672_v34, %v5239_v46  ;;  %v10078_v48 = vpop.f32.mrb[188].mxu1 }
 0x276   :  { %5271 = vst.msk [vmem:[#allocation2 + $0xb68] sm:$0xff] %vm307_vm1, %v5245_v45  ;;  %v5470_v49 = vadd.f32 %v13672_v34, %v10078_v48  ;;  %v5464_v50 = vpop.f32.mrb[189].mxu1 }
 0x277   :  { %5270 = vst.msk [vmem:[#allocation2 + $0xb60] sm:$0xff] %vm307_vm1, %v5240_v47  ;;  %v5465_v51 = vadd.f32 %v13672_v34, %v5464_v50  ;;  %v10055_v52 = vpop.f32.mrb[190].mxu0 }
 0x278   :  { %5496 = vst.msk [vmem:[#allocation2 + $0xbe8] sm:$0xff] %vm307_vm1, %v5470_v49  ;;  %v5255_v53 = vadd.f32 %v13672_v34, %v10055_v52  ;;  %v5249_v35 = vpop.f32.mrb[191].mxu0 }
 0x279   :  { %5495 = vst.msk [vmem:[#allocation2 + $0xbe0] sm:$0xff] %vm307_vm1, %v5465_v51  ;;  %v5250_v54 = vadd.f32 %v13672_v34, %v5249_v35  ;;  %v10081_v55 = vpop.f32.mrb[190].mxu1 }
 0x27a   :  { %5273 = vst.msk [vmem:[#allocation2 + $0xb78] sm:$0xff] %vm307_vm1, %v5255_v53  ;;  %v5480_v44 = vadd.f32 %v13672_v34, %v10081_v55  ;;  %v5474_v56 = vpop.f32.mrb[191].mxu1 }
 0x27b   :  { %5272 = vst.msk [vmem:[#allocation2 + $0xb70] sm:$0xff] %vm307_vm1, %v5250_v54  ;;  %v5475_v57 = vadd.f32 %v13672_v34, %v5474_v56  ;;  %v10086_v59 = vpop.f32.mrb[192].mxu0 }
 0x27c   :  { %5498 = vst.msk [vmem:[#allocation2 + $0xbf8] sm:$0xff] %vm307_vm1, %v5480_v44  ;;  %v5635_v38 = vadd.f32 %v13672_v34, %v10086_v59  ;;  %v5629_v61 = vpop.f32.mrb[193].mxu0 }
 0x27d   :  { %5497 = vst.msk [vmem:[#allocation2 + $0xbf0] sm:$0xff] %vm307_vm1, %v5475_v57  ;;  %v5630_v62 = vadd.f32 %v13672_v34, %v5629_v61  ;;  %v10112_v63 = vpop.f32.mrb[192].mxu1 }
 0x27e   :  { %5709 = vst.msk [vmem:[#allocation2 + $0xc08] sm:$0xff] %vm307_vm1, %v5635_v38  ;;  %v13708_v0 = vadd.f32 %v10112_v63, %v13700_v60   ;;  %v5862_v17 = vpop.f32.mrb[193].mxu1 }
 0x27f   :  { %5708 = vst.msk [vmem:[#allocation2 + $0xc00] sm:$0xff] %vm307_vm1, %v5630_v62  ;;  %v13712_v18 = vadd.f32 %v13700_v60, %v5862_v17   ;;  %v10089_v19 = vpop.f32.mrb[194].mxu0 }
 0x280   :  { %v5645_v20 = vadd.f32 %v13672_v34, %v10089_v19  ;;  %v5639_v21 = vpop.f32.mrb[195].mxu0 }
 0x281   :  { %v5640_v22 = vadd.f32 %v13672_v34, %v5639_v21  ;;  %v10115_v23 = vpop.f32.mrb[194].mxu1 }
 0x282   :  { %5711 = vst.msk [vmem:[#allocation2 + $0xc18] sm:$0xff] %vm307_vm1, %v5645_v20  ;;  %v13718_v24 = vadd.f32 %v10115_v23, %v13700_v60   ;;  %v5872_v25 = vpop.f32.mrb[195].mxu1 }
 0x283   :  { %5710 = vst.msk [vmem:[#allocation2 + $0xc10] sm:$0xff] %vm307_vm1, %v5640_v22  ;;  %v13722_v26 = vadd.f32 %v13700_v60, %v5872_v25   ;;  %v10092_v27 = vpop.f32.mrb[196].mxu0 }
 0x284   :  { %v5655_v28 = vadd.f32 %v13672_v34, %v10092_v27  ;;  %v5649_v15 = vpop.f32.mrb[197].mxu0 }
 0x285   :  { %v5650_v30 = vadd.f32 %v13672_v34, %v5649_v15  ;;  %v10118_v31 = vpop.f32.mrb[196].mxu1 }
 0x286   :  { %5713 = vst.msk [vmem:[#allocation2 + $0xc28] sm:$0xff] %vm307_vm1, %v5655_v28  ;;  %v13728_v32 = vadd.f32 %v10118_v31, %v13700_v60   ;;  %v5882_v58 = vpop.f32.mrb[197].mxu1 }
 0x287   :  { %5712 = vst.msk [vmem:[#allocation2 + $0xc20] sm:$0xff] %vm307_vm1, %v5650_v30  ;;  %v5883_v33 = vadd.f32 %v13700_v60, %v5882_v58   ;;  %v10095_v36 = vpop.f32.mrb[198].mxu0 }
 0x288   :  { %v5665_v37 = vadd.f32 %v13672_v34, %v10095_v36  ;;  %v5659_v39 = vpop.f32.mrb[199].mxu0 }
 0x289   :  { %v5660_v40 = vadd.f32 %v13672_v34, %v5659_v39  ;;  %v10121_v29 = vpop.f32.mrb[198].mxu1 }
 0x28a   :  { %5715 = vst.msk [vmem:[#allocation2 + $0xc38] sm:$0xff] %vm307_vm1, %v5665_v37  ;;  %v5898_v41 = vadd.f32 %v10121_v29, %v13700_v60   ;;  %v5892_v42 = vpop.f32.mrb[199].mxu1 }
 0x28b   :  { %5714 = vst.msk [vmem:[#allocation2 + $0xc30] sm:$0xff] %vm307_vm1, %v5660_v40  ;;  %v5893_v43 = vadd.f32 %v13700_v60, %v5892_v42   ;;  %v10098_v45 = vpop.f32.mrb[200].mxu0 }
 0x28c   :  { %v5675_v46 = vadd.f32 %v13672_v34, %v10098_v45  ;;  %v5669_v47 = vpop.f32.mrb[201].mxu0 }
 0x28d   :  { %v5670_v48 = vadd.f32 %v13672_v34, %v5669_v47  ;;  %v10124_v49 = vpop.f32.mrb[200].mxu1 }
 0x28e   :  { %5717 = vst.msk [vmem:[#allocation2 + $0xc48] sm:$0xff] %vm307_vm1, %v5675_v46  ;;  %v5908_v50 = vadd.f32 %v10124_v49, %v13700_v60   ;;  %v5902_v51 = vpop.f32.mrb[201].mxu1 }
 0x28f   :  { %5716 = vst.msk [vmem:[#allocation2 + $0xc40] sm:$0xff] %vm307_vm1, %v5670_v48  ;;  %v5903_v52 = vadd.f32 %v13700_v60, %v5902_v51   ;;  %v10101_v53 = vpop.f32.mrb[202].mxu0 }
 0x290   :  { %v5685_v35 = vadd.f32 %v13672_v34, %v10101_v53  ;;  %v5679_v54 = vpop.f32.mrb[203].mxu0 }
 0x291   :  { %v5680_v55 = vadd.f32 %v13672_v34, %v5679_v54  ;;  %v10127_v44 = vpop.f32.mrb[202].mxu1 }
 0x292   :  { %5719 = vst.msk [vmem:[#allocation2 + $0xc58] sm:$0xff] %vm307_vm1, %v5685_v35  ;;  %v5918_v56 = vadd.f32 %v10127_v44, %v13700_v60   ;;  %v5912_v57 = vpop.f32.mrb[203].mxu1 }
 0x293   :  { %5718 = vst.msk [vmem:[#allocation2 + $0xc50] sm:$0xff] %vm307_vm1, %v5680_v55  ;;  %v5913_v59 = vadd.f32 %v13700_v60, %v5912_v57   ;;  %v10104_v38 = vpop.f32.mrb[204].mxu0 }
 0x294   :  { %v5695_v61 = vadd.f32 %v13672_v34, %v10104_v38  ;;  %v5689_v62 = vpop.f32.mrb[205].mxu0 }
 0x295   :  { %v5690_v63 = vadd.f32 %v13672_v34, %v5689_v62  ;;  %v10130_v17 = vpop.f32.mrb[204].mxu1 }
 0x296   :  { %5721 = vst.msk [vmem:[#allocation2 + $0xc68] sm:$0xff] %vm307_vm1, %v5695_v61  ;;  %v5928_v19 = vadd.f32 %v10130_v17, %v13700_v60   ;;  %v5922_v20 = vpop.f32.mrb[205].mxu1 }
 0x297   :  { %5720 = vst.msk [vmem:[#allocation2 + $0xc60] sm:$0xff] %vm307_vm1, %v5690_v63  ;;  %v5923_v21 = vadd.f32 %v13700_v60, %v5922_v20   ;;  %v10107_v22 = vpop.f32.mrb[206].mxu0 }
 0x298   :  { %v5705_v23 = vadd.f32 %v13672_v34, %v10107_v22  ;;  %v5699_v25 = vpop.f32.mrb[207].mxu0 }
 0x299   :  { %v5700_v27 = vadd.f32 %v13672_v34, %v5699_v25  ;;  %v10133_v28 = vpop.f32.mrb[206].mxu1 }
 0x29a   :  { %5723 = vst.msk [vmem:[#allocation2 + $0xc78] sm:$0xff] %vm307_vm1, %v5705_v23  ;;  %v5938_v15 = vadd.f32 %v10133_v28, %v13700_v60   ;;  %v5932_v30 = vpop.f32.mrb[207].mxu1 }
 0x29b   :  { %5722 = vst.msk [vmem:[#allocation2 + $0xc70] sm:$0xff] %vm307_vm1, %v5700_v27  ;;  %v5933_v31 = vadd.f32 %v13700_v60, %v5932_v30  }
 0x29c LB: > { %v14846_v7 = vld [vmem:[#allocation16_spill] sm:$0xff]  ;;  %14847 = vst [vmem:[#allocation23_spill] sm:$0xff] %v10961_v15  ;;  %14848 = vst [vmem:[#allocation24_spill] sm:$0xff] %v10965_v31  ;;  %v14853_v1 = vld [vmem:[#allocation10_spill] sm:$0xff]  ;;  %10148 = vmatprep.mubr.msk.f32.mxu0 %vm307_vm1, %v11021_v18  ;;  %vm6038_vm2 = vcmask 1041408   ;;  %s13941_s15 = sshll.u32 %s11025_s4, 2  ;;  %v10961_v15 = vphi %v5938_v15, %v14887_v15   ;;  %s11025_s4 = sphi %s13799_s4, %s5946_s4   ;;  %v11021_v18 = vphi %v13712_v18, %v14902_v18   ;;  %v11017_v0 = vphi %v13708_v0, %v14901_v0   ;;  %v11013_v26 = vphi %v13722_v26, %v14900_v26   ;;  %v11009_v24 = vphi %v13718_v24, %v14899_v24   ;;  %v11005_v33 = vphi %v5883_v33, %v14898_v33   ;;  %v11001_v32 = vphi %v13728_v32, %v14897_v32   ;;  %v10997_v43 = vphi %v5893_v43, %v14896_v43   ;;  %v10993_v41 = vphi %v5898_v41, %v14895_v41   ;;  %v10989_v52 = vphi %v5903_v52, %v14894_v52   ;;  %v10985_v50 = vphi %v5908_v50, %v14893_v50   ;;  %v10981_v59 = vphi %v5913_v59, %v14892_v59   ;;  %v10977_v56 = vphi %v5918_v56, %v14891_v56   ;;  %v10973_v21 = vphi %v5923_v21, %v14890_v21   ;;  %v10969_v19 = vphi %v5928_v19, %v14889_v19   ;;  %v10965_v31 = vphi %v5933_v31, %v14888_v31  }
 0x29d   : > { %14849 = vst [vmem:[#allocation25_spill] sm:$0xff] %v10969_v19  ;;  %14850 = vst [vmem:[#allocation26_spill] sm:$0xff] %v10973_v21  ;;  %v14854_v2 = vld [vmem:[#allocation11_spill] sm:$0xff]  ;;  %v14855_v3 = vld [vmem:[#allocation12_spill] sm:$0xff]  ;;  %s5964_s16 = sld [smem:[#allocation4 + %s13941_s15]]  ;;  %s5965_s21 = sadd.s32 1, %s13941_s15 }
 0x29e   : > { %14851 = vst [vmem:[#allocation27_spill] sm:$0xff] %v10985_v50  ;;  %14852 = vst [vmem:[#allocation28_spill] sm:$0xff] %v10989_v52  ;;  %v13854_v34 = vpack.c.bf16 %v14854_v2, %v14853_v1  ;;  %v14856_v4 = vld [vmem:[#allocation13_spill] sm:$0xff]  ;;  %v14857_v5 = vld [vmem:[#allocation14_spill] sm:$0xff]  ;;  %s13989_s19 = sld [smem:[#allocation6 + %s11025_s4]]  ;;  %s5967_s25 = sadd.s32 2, %s13941_s15 }
 0x29f   : > { %v13858_v60 = vpack.c.bf16 %v14856_v4, %v14855_v3  ;;  %v14858_v6 = vld [vmem:[#allocation15_spill] sm:$0xff]  ;;  %v14859_v8 = vld [vmem:[#allocation17_spill] sm:$0xff]  ;;  %v14860_v9 = vld [vmem:[#allocation18_spill] sm:$0xff]  ;;  %s5966_s22 = sld [smem:[#allocation4 + %s5965_s21]]  ;;  %s5969_s6 = sadd.s32 3, %s13941_s15 }
 0x2a0   : > { %10477 = vmatprep.subr.bf16.mxu0 %v13854_v34  ;;  %v13867_v58 = vpack.c.bf16 %v14858_v6, %v14857_v5  ;;  %v13919_v36 = vpack.c.bf16 %v14860_v9, %v14859_v8  ;;  %v14861_v10 = vld [vmem:[#allocation19_spill] sm:$0xff]  ;;  %v14862_v11 = vld [vmem:[#allocation20_spill] sm:$0xff]  ;;  %v14863_v12 = vld [vmem:[#allocation21_spill] sm:$0xff]  ;;  %s5968_s8 = sld [smem:[#allocation4 + %s5967_s25]]  ;;  %s5946_s4 = sadd.s32 1, %s11025_s4  }
 0x2a1   : > { %10479 = vmatpush3.bf16.msra.mxu0 %v13854_v34  ;;  %v13925_v37 = vpack.c.bf16 %v14862_v11, %v14861_v10  ;;  %v14864_v13 = vld [vmem:[#allocation22_spill] sm:$0xff]  ;;  %s5970_s27 = sld [smem:[#allocation4 + %s5969_s6]]  ;;  %p14634_p10 = scmp.ge.s32.totalorder %s5946_s4, 24  }
 0x2a2   : > { %10481 = vmatprep.subr.bf16.mxu0 %v13858_v60  ;;  %10489 = vmatprep.subr.bf16.mxu1 %v13919_v36  ;;  %v13931_v39 = vpack.c.bf16 %v14864_v13, %v14863_v12  ;;  %vm8147_vm3 = vcmask (%p14634_p10), 7168  }
 0x2a3   : > { %10491 = vmatpush3.bf16.msra.mxu1 %v13919_v36  ;;  %s8651_s17 = sshll.u32 %s5964_s16, 7 }
 0x2a4   : > { %10493 = vmatprep.subr.bf16.mxu1 %v13925_v37  ;;  %s13944_s18 = scalar_lea.vmem [#allocation2], %s8651_s17  ;;  %s6417_s20 = smul.f32 0.33333334, %s13989_s19 }
 0x2a5   : > { %10483 = vmatpush3.bf16.msra.mxu0 %v13858_v60  ;;  %v5975_v40 = vld [vmem:[%s13944_s18 + $0x8] sm:$0xff]  ;;  %v5974_v29 = vld [vmem:[%s13944_s18] sm:$0xff]  ;;  %v5977_v48 = vld [vmem:[%s13944_s18 + $0x18] sm:$0xff]  ;;  %s8686_s23 = sshll.u32 %s5966_s22, 7  ;;  %s7886_s11 = smul.f32 0.125, %s13989_s19 }
 0x2a6   : > { %10485 = vmatprep.subr.bf16.mxu0 %v13867_v58  ;;  %v5976_v49 = vld [vmem:[%s13944_s18 + $0x10] sm:$0xff]  ;;  %v5979_v55 = vld [vmem:[%s13944_s18 + $0x28] sm:$0xff]  ;;  %v5978_v44 = vld [vmem:[%s13944_s18 + $0x20] sm:$0xff]  ;;  %s14117_s24 = scalar_lea.vmem [#allocation2], %s8686_s23  ;;  %s8721_s26 = sshll.u32 %s5968_s8, 7 }
 0x2a7   : > { %10495 = vmatpush3.bf16.msra.mxu1 %v13925_v37  ;;  %v5981_v63 = vld [vmem:[%s13944_s18 + $0x38] sm:$0xff]  ;;  %v5980_v17 = vld [vmem:[%s13944_s18 + $0x30] sm:$0xff]  ;;  %v5983_v28 = vld [vmem:[%s13944_s18 + $0x48] sm:$0xff]  ;;  %s14302_s9 = scalar_lea.vmem [#allocation2], %s8721_s26  ;;  %s8756_s28 = sshll.u32 %s5970_s27, 7 }
 0x2a8   : > { %10497 = vmatprep.subr.bf16.mxu1 %v13931_v39  ;;  %v6406_v2 = vld [vmem:[%s14117_s24 + $0x28] sm:$0xff]  ;;  %v6405_v3 = vld [vmem:[%s14117_s24 + $0x20] sm:$0xff]  ;;  %v6407_v5 = vld [vmem:[%s14117_s24 + $0x30] sm:$0xff]  ;;  %s14506_s29 = scalar_lea.vmem [#allocation2], %s8756_s28 }
 0x2a9   : > { %10487 = vmatpush3.bf16.msra.mxu0 %v13867_v58 }
 0x2aa   : > { %10146 = vmatprep.subr.msk.mxu0 %vm6038_vm2, %v14846_v7 }
 0x2ab   : > { %10499 = vmatpush3.bf16.msra.mxu1 %v13931_v39 }
 0x2ac   : > { %10184 = vmatprep.subr.msk.mxu1 %vm6038_vm2, %v11171_v14 }
 0x2ad   : > { %10147 = vmatpush3.msk.msra.mxu0 %vm6038_vm2, %v14846_v7 }
 0x2ae   : > { %10149 = vmatmul.mubr.msk.f32.vlgmr.msra.gmra.mrb[0].mxu0 %vm307_vm1, %v11017_v0  ;;  %10501 = vmatprep.subr.bf16.mxu0 %v13854_v34 }
 0x2af   : > { %10151 = vmatprep.mubr.msk.f32.mxu0 %vm307_vm1, %v11013_v26  ;;  %10503 = vmatpush3.bf16.msra.mxu0 %v13854_v34 }
 0x2b0   : > { %10505 = vmatprep.subr.bf16.mxu0 %v13858_v60  ;;  %10185 = vmatpush3.msk.msra.mxu1 %vm6038_vm2, %v11171_v14 }
 0x2b1   : > { %10513 = vmatprep.subr.bf16.mxu1 %v13919_v36 }
 0x2b2   : > { %10152 = vmatmul.mubr.msk.f32.gmra.mrb[2].mxu0 %vm307_vm1, %v11009_v24 }
 0x2b3   : > { %10154 = vmatprep.mubr.msk.f32.mxu0 %vm307_vm1, %v11005_v33  ;;  %10507 = vmatpush3.bf16.msra.mxu0 %v13858_v60 }
 0x2b4   : > { %10509 = vmatprep.subr.bf16.mxu0 %v13867_v58 }
 0x2b6   : > { %10155 = vmatmul.mubr.msk.f32.gmra.mrb[4].mxu0 %vm307_vm1, %v11001_v32 }
 0x2b7   : > { %10157 = vmatprep.mubr.msk.f32.mxu0 %vm307_vm1, %v10997_v43  ;;  %10511 = vmatpush3.bf16.msra.mxu0 %v13867_v58 }
 0x2b8   : > { %10222 = vmatprep.subr.msk.mxu0 %vm6038_vm2, %v14846_v7 }
 0x2ba   : > { %10158 = vmatmul.mubr.msk.f32.gmra.mrb[6].mxu0 %vm307_vm1, %v10993_v41 }
 0x2bb   : > { %10160 = vmatprep.mubr.msk.f32.mxu0 %vm307_vm1, %v10989_v52  ;;  %10223 = vmatpush3.msk.msra.mxu0 %vm6038_vm2, %v14846_v7 }
 0x2bc   : > { %10525 = vmatprep.subr.bf16.mxu0 %v13854_v34 }
 0x2be   : > { %10161 = vmatmul.mubr.msk.f32.gmra.mrb[8].mxu0 %vm307_vm1, %v10985_v50 }
 0x2bf   : > { %10163 = vmatprep.mubr.msk.f32.mxu0 %vm307_vm1, %v10981_v59 }
 0x2c2   : > { %10164 = vmatmul.mubr.msk.f32.gmra.mrb[10].mxu0 %vm307_vm1, %v10977_v56 }
 0x2c3   : > { %10166 = vmatprep.mubr.msk.f32.mxu0 %vm307_vm1, %v10973_v21 }
 0x2c6   : > { %10167 = vmatmul.mubr.msk.f32.gmra.mrb[12].mxu0 %vm307_vm1, %v10969_v19 }
 0x2c7   : > { %10169 = vmatprep.mubr.msk.f32.mxu0 %vm307_vm1, %v10965_v31 }
 0x2ca   : > { %10170 = vmatmul.mubr.msk.f32.gmra.mrb[14].mxu0 %vm307_vm1, %v10961_v15 }
 0x381   : > { %v10150_v42 = vpop.f32.mrb[0].mxu0 }
 0x382   : > { %v6114_v45 = vadd.f32 %v10150_v42, %v5975_v40  ;;  %v6108_v46 = vpop.f32.mrb[1].mxu0  ;;  %v5982_v40 = vld [vmem:[%s13944_s18 + $0x40] sm:$0xff] }
 0x383   : > { %v6109_v47 = vadd.f32 %v6108_v46, %v5974_v29 }
 0x385   : > { %10735 = vtanh.f32 %v6109_v47  ;;  %v10153_v51 = vpop.f32.mrb[2].mxu0 }
 0x386   : > { %10737 = vtanh.f32 %v6114_v45  ;;  %v6124_v53 = vadd.f32 %v10153_v51, %v5977_v48  ;;  %v6118_v35 = vpop.f32.mrb[3].mxu0  ;;  %v5985_v48 = vld [vmem:[%s13944_s18 + $0x58] sm:$0xff]  ;;  %v5984_v51 = vld [vmem:[%s13944_s18 + $0x50] sm:$0xff] }
 0x387   : > { %v6119_v54 = vadd.f32 %v6118_v35, %v5976_v49 }
 0x389   : > { %10739 = vtanh.f32 %v6119_v54  ;;  %v10156_v57 = vpop.f32.mrb[4].mxu0 }
 0x38a   : > { %10741 = vtanh.f32 %v6124_v53  ;;  %v6134_v38 = vadd.f32 %v10156_v57, %v5979_v55  ;;  %v6128_v61 = vpop.f32.mrb[5].mxu0  ;;  %v5987_v57 = vld [vmem:[%s13944_s18 + $0x68] sm:$0xff] }
 0x38b   : > { %v6129_v62 = vadd.f32 %v6128_v61, %v5978_v44  ;;  %v5986_v61 = vld [vmem:[%s13944_s18 + $0x60] sm:$0xff] }
 0x38d   : > { %10743 = vtanh.f32 %v6129_v62  ;;  %v10159_v20 = vpop.f32.mrb[6].mxu0 }
 0x38e   : > { %10745 = vtanh.f32 %v6134_v38  ;;  %v6144_v22 = vadd.f32 %v10159_v20, %v5981_v63  ;;  %v6138_v23 = vpop.f32.mrb[7].mxu0 }
 0x38f   : > { %v10736_v25 = vpop.eup %10735  ;;  %v6139_v27 = vadd.f32 %v6138_v23, %v5980_v17  ;;  %v5989_v23 = vld [vmem:[%s13944_s18 + $0x78] sm:$0xff] }
 0x390   : > { %v10738_v30 = vpop.eup %10737  ;;  %10186 = vmatprep.mubr.msk.f32.mxu1 %vm307_vm1, %v10736_v25 }
 0x391   : > { %10747 = vtanh.f32 %v6139_v27  ;;  %v10162_v29 = vpop.f32.mrb[8].mxu0  ;;  %10187 = vmatmul.mubr.msk.f32.vlgmr.msra.gmra.mrb[0].mxu1 %vm307_vm1, %v10738_v30  ;;  %v5988_v27 = vld [vmem:[%s13944_s18 + $0x70] sm:$0xff] }
 0x392   : > { %10749 = vtanh.f32 %v6144_v22  ;;  %v6154_v42 = vadd.f32 %v10162_v29, %v5983_v28  ;;  %v6148_v45 = vpop.f32.mrb[9].mxu0  ;;  %10515 = vmatpush3.bf16.msra.mxu1 %v13919_v36 }
 0x393   : > { %v10740_v46 = vpop.eup %10739  ;;  %v6149_v47 = vadd.f32 %v6148_v45, %v5982_v40  ;;  %10517 = vmatprep.subr.bf16.mxu1 %v13925_v37 }
 0x394   : > { %v10742_v49 = vpop.eup %10741  ;;  %10189 = vmatprep.mubr.msk.f32.mxu1 %vm307_vm1, %v10740_v46 }
 0x395   : > { %10751 = vtanh.f32 %v6149_v47  ;;  %v10165_v53 = vpop.f32.mrb[10].mxu0  ;;  %10190 = vmatmul.mubr.msk.f32.gmra.mrb[2].mxu1 %vm307_vm1, %v10742_v49 }
 0x396   : > { %10753 = vtanh.f32 %v6154_v42  ;;  %v6164_v35 = vadd.f32 %v10165_v53, %v5985_v48  ;;  %v6158_v54 = vpop.f32.mrb[11].mxu0  ;;  %10519 = vmatpush3.bf16.msra.mxu1 %v13925_v37 }
 0x397   : > { %v10744_v55 = vpop.eup %10743  ;;  %v6159_v44 = vadd.f32 %v6158_v54, %v5984_v51  ;;  %10521 = vmatprep.subr.bf16.mxu1 %v13931_v39  ;;  %v13992_v54 = vstv %s6417_s20 }
 0x398   : > { %v10746_v38 = vpop.eup %10745  ;;  %10192 = vmatprep.mubr.msk.f32.mxu1 %vm307_vm1, %v10744_v55 }
 0x399   : > { %10755 = vtanh.f32 %v6159_v44  ;;  %v10168_v62 = vpop.f32.mrb[12].mxu0  ;;  %10193 = vmatmul.mubr.msk.f32.gmra.mrb[4].mxu1 %vm307_vm1, %v10746_v38 }
 0x39a   : > { %10757 = vtanh.f32 %v6164_v35  ;;  %v6174_v63 = vadd.f32 %v10168_v62, %v5987_v57  ;;  %v6168_v17 = vpop.f32.mrb[13].mxu0  ;;  %10523 = vmatpush3.bf16.msra.mxu1 %v13931_v39 }
 0x39b   : > { %v10748_v20 = vpop.eup %10747  ;;  %v6169_v22 = vadd.f32 %v6168_v17, %v5986_v61  ;;  %10260 = vmatprep.subr.msk.mxu1 %vm6038_vm2, %v11171_v14 }
 0x39c   : > { %v10750_v25 = vpop.eup %10749  ;;  %10195 = vmatprep.mubr.msk.f32.mxu1 %vm307_vm1, %v10748_v20 }
 0x39d   : > { %10759 = vtanh.f32 %v6169_v22  ;;  %v10171_v28 = vpop.f32.mrb[14].mxu0  ;;  %10196 = vmatmul.mubr.msk.f32.gmra.mrb[6].mxu1 %vm307_vm1, %v10750_v25 }
 0x39e   : > { %10761 = vtanh.f32 %v6174_v63  ;;  %v6184_v30 = vadd.f32 %v10171_v28, %v5989_v23  ;;  %v6178_v40 = vpop.f32.mrb[15].mxu0  ;;  %10261 = vmatpush3.msk.msra.mxu1 %vm6038_vm2, %v11171_v14 }
 0x39f   : > { %v10752_v29 = vpop.eup %10751  ;;  %v6179_v42 = vadd.f32 %v6178_v40, %v5988_v27  ;;  %10537 = vmatprep.subr.bf16.mxu1 %v13919_v36 }
 0x3a0   : > { %v10754_v45 = vpop.eup %10753  ;;  %10198 = vmatprep.mubr.msk.f32.mxu1 %vm307_vm1, %v10752_v29 }
 0x3a1   : > { %10763 = vtanh.f32 %v6179_v42  ;;  %10199 = vmatmul.mubr.msk.f32.gmra.mrb[8].mxu1 %vm307_vm1, %v10754_v45 }
 0x3a2   : > { %10765 = vtanh.f32 %v6184_v30 }
 0x3a3   : > { %v10756_v46 = vpop.eup %10755 }
 0x3a4   : > { %v10758_v47 = vpop.eup %10757  ;;  %10201 = vmatprep.mubr.msk.f32.mxu1 %vm307_vm1, %v10756_v46 }
 0x3a5   : > { %10202 = vmatmul.mubr.msk.f32.gmra.mrb[10].mxu1 %vm307_vm1, %v10758_v47 }
 0x3a7   : > { %v10760_v48 = vpop.eup %10759 }
 0x3a8   : > { %v10762_v49 = vpop.eup %10761  ;;  %10204 = vmatprep.mubr.msk.f32.mxu1 %vm307_vm1, %v10760_v48 }
 0x3a9   : > { %10205 = vmatmul.mubr.msk.f32.gmra.mrb[12].mxu1 %vm307_vm1, %v10762_v49 }
 0x3ab   : > { %v10764_v51 = vpop.eup %10763 }
 0x3ac   : > { %v10766_v53 = vpop.eup %10765  ;;  %10207 = vmatprep.mubr.msk.f32.mxu1 %vm307_vm1, %v10764_v51 }
 0x3ad   : > { %10208 = vmatmul.mubr.msk.f32.gmra.mrb[14].mxu1 %vm307_vm1, %v10766_v53 }
 0x464   : > { %v10188_v35 = vpop.f32.mrb[0].mxu1 }
 0x465   : > { %v13995_v55 = vadd.f32 %v10188_v35, %v11181_v16  ;;  %v6320_v44 = vpop.f32.mrb[1].mxu1 }
 0x466   : > { %v13998_v57 = vadd.f32 %v11181_v16, %v6320_v44 }
 0x467   : > { %v6420_v38 = vmul.f32 %v13992_v54, %v13995_v55 }
 0x468   : > { %v10191_v61 = vpop.f32.mrb[2].mxu1  ;;  %v6419_v62 = vmul.f32 %v13992_v54, %v13998_v57 }
 0x469   : > { %v14005_v63 = vadd.f32 %v10191_v61, %v11181_v16  ;;  %v6330_v17 = vpop.f32.mrb[3].mxu1  ;;  %v6436_v23 = vadd.f32 %v11017_v0, %v6420_v38 }
 0x46a   : > { %v14008_v20 = vadd.f32 %v11181_v16, %v6330_v17  ;;  %v6435_v22 = vadd.f32 %v11021_v18, %v6419_v62 }
 0x46b   : > { %v6422_v25 = vmul.f32 %v13992_v54, %v14005_v63 }
 0x46c   : > { %v10194_v27 = vpop.f32.mrb[4].mxu1  ;;  %10224 = vmatprep.mubr.msk.f32.mxu0 %vm307_vm1, %v6435_v22  ;;  %v6421_v28 = vmul.f32 %v13992_v54, %v14008_v20 }
 0x46d   : > { %v14018_v30 = vadd.f32 %v10194_v27, %v11181_v16  ;;  %v6340_v40 = vpop.f32.mrb[5].mxu1  ;;  %10225 = vmatmul.mubr.msk.f32.vlgmr.msra.gmra.mrb[16].mxu0 %vm307_vm1, %v6436_v23  ;;  %v6438_v45 = vadd.f32 %v11009_v24, %v6422_v25 }
 0x46e   : > { %v14022_v29 = vadd.f32 %v11181_v16, %v6340_v40  ;;  %v6437_v42 = vadd.f32 %v11013_v26, %v6421_v28  ;;  %10527 = vmatpush3.bf16.msra.mxu0 %v13854_v34 }
 0x46f   : > { %v6424_v46 = vmul.f32 %v13992_v54, %v14018_v30  ;;  %10529 = vmatprep.subr.bf16.mxu0 %v13858_v60  ;;  %v6924_v8 = vmul.f32 0.33333334, %v14018_v30 }
 0x470   : > { %v10197_v47 = vpop.f32.mrb[6].mxu1  ;;  %10227 = vmatprep.mubr.msk.f32.mxu0 %vm307_vm1, %v6437_v42  ;;  %v6423_v48 = vmul.f32 %v13992_v54, %v14022_v29 }
 0x471   : > { %v14034_v49 = vadd.f32 %v10197_v47, %v11181_v16  ;;  %v6350_v51 = vpop.f32.mrb[7].mxu1  ;;  %10228 = vmatmul.mubr.msk.f32.gmra.mrb[18].mxu0 %vm307_vm1, %v6438_v45  ;;  %v6440_v44 = vadd.f32 %v11001_v32, %v6424_v46 }
 0x472   : > { %v14038_v53 = vadd.f32 %v11181_v16, %v6350_v51  ;;  %v6439_v35 = vadd.f32 %v11005_v33, %v6423_v48  ;;  %10531 = vmatpush3.bf16.msra.mxu0 %v13858_v60 }
 0x473   : > { %v6426_v38 = vmul.f32 %v13992_v54, %v14034_v49  ;;  %10533 = vmatprep.subr.bf16.mxu0 %v13867_v58 }
 0x474   : > { %v10200_v61 = vpop.f32.mrb[8].mxu1  ;;  %10230 = vmatprep.mubr.msk.f32.mxu0 %vm307_vm1, %v6439_v35  ;;  %v6425_v62 = vmul.f32 %v13992_v54, %v14038_v53 }
 0x475   : > { %v14050_v17 = vadd.f32 %v10200_v61, %v11181_v16  ;;  %v6360_v22 = vpop.f32.mrb[9].mxu1  ;;  %10231 = vmatmul.mubr.msk.f32.gmra.mrb[20].mxu0 %vm307_vm1, %v6440_v44  ;;  %v6442_v27 = vadd.f32 %v10993_v41, %v6426_v38 }
 0x476   : > { %v14054_v23 = vadd.f32 %v11181_v16, %v6360_v22  ;;  %v6441_v25 = vadd.f32 %v10997_v43, %v6425_v62  ;;  %10535 = vmatpush3.bf16.msra.mxu0 %v13867_v58 }
 0x477   : > { %v6428_v28 = vmul.f32 %v13992_v54, %v14050_v17  ;;  %10298 = vmatprep.subr.msk.mxu0 %vm6038_vm2, %v14846_v7 }
 0x478   : > { %v10203_v40 = vpop.f32.mrb[10].mxu1  ;;  %10233 = vmatprep.mubr.msk.f32.mxu0 %vm307_vm1, %v6441_v25  ;;  %v6427_v42 = vmul.f32 %v13992_v54, %v14054_v23 }
 0x479   : > { %v14067_v45 = vadd.f32 %v10203_v40, %v11181_v16  ;;  %v6370_v46 = vpop.f32.mrb[11].mxu1  ;;  %10234 = vmatmul.mubr.msk.f32.gmra.mrb[22].mxu0 %vm307_vm1, %v6442_v27  ;;  %v6444_v51 = vadd.f32 %v10985_v50, %v6428_v28 }
 0x47a   : > { %v14071_v47 = vadd.f32 %v11181_v16, %v6370_v46  ;;  %v6443_v48 = vadd.f32 %v10989_v52, %v6427_v42  ;;  %10299 = vmatpush3.msk.msra.mxu0 %vm6038_vm2, %v14846_v7 }
 0x47b   : > { %v6430_v35 = vmul.f32 %v13992_v54, %v14067_v45  ;;  %10549 = vmatprep.subr.bf16.mxu0 %v13854_v34 }
 0x47c   : > { %v10206_v44 = vpop.f32.mrb[12].mxu1  ;;  %10236 = vmatprep.mubr.msk.f32.mxu0 %vm307_vm1, %v6443_v48  ;;  %v6429_v38 = vmul.f32 %v13992_v54, %v14071_v47 }
 0x47d   : > { %v14084_v61 = vadd.f32 %v10206_v44, %v11181_v16  ;;  %v6380_v62 = vpop.f32.mrb[13].mxu1  ;;  %10237 = vmatmul.mubr.msk.f32.gmra.mrb[24].mxu0 %vm307_vm1, %v6444_v51  ;;  %v6446_v27 = vadd.f32 %v10977_v56, %v6430_v35 }
 0x47e   : > { %v14088_v22 = vadd.f32 %v11181_v16, %v6380_v62  ;;  %v6445_v25 = vadd.f32 %v10981_v59, %v6429_v38 }
 0x47f   : > { %v6432_v28 = vmul.f32 %v13992_v54, %v14084_v61 }
 0x480   : > { %14865 = vst [vmem:[#allocation29_spill] sm:$0xff] %v14088_v22  ;;  %v10209_v40 = vpop.f32.mrb[14].mxu1  ;;  %10239 = vmatprep.mubr.msk.f32.mxu0 %vm307_vm1, %v6445_v25  ;;  %v6431_v42 = vmul.f32 %v13992_v54, %v14088_v22 }
 0x481   : > { %v14098_v46 = vadd.f32 %v10209_v40, %v11181_v16  ;;  %v6390_v48 = vpop.f32.mrb[15].mxu1  ;;  %10240 = vmatmul.mubr.msk.f32.gmra.mrb[26].mxu0 %vm307_vm1, %v6446_v27  ;;  %v6448_v44 = vadd.f32 %v10969_v19, %v6432_v28  ;;  %v6401_v28 = vld [vmem:[%s14117_s24] sm:$0xff] }
 0x482   : > { %v14102_v51 = vadd.f32 %v11181_v16, %v6390_v48  ;;  %v6447_v35 = vadd.f32 %v10973_v21, %v6431_v42 }
 0x483   : > { %v6434_v38 = vmul.f32 %v13992_v54, %v14098_v46 }
 0x484   : > { %10242 = vmatprep.mubr.msk.f32.mxu0 %vm307_vm1, %v6447_v35  ;;  %v6433_v62 = vmul.f32 %v13992_v54, %v14102_v51  ;;  %v6402_v54 = vld [vmem:[%s14117_s24 + $0x8] sm:$0xff] }
 0x485   : > { %10243 = vmatmul.mubr.msk.f32.gmra.mrb[28].mxu0 %vm307_vm1, %v6448_v44  ;;  %v6450_v27 = vadd.f32 %v10961_v15, %v6434_v38  ;;  %v6404_v44 = vld [vmem:[%s14117_s24 + $0x18] sm:$0xff]  ;;  %v6403_v38 = vld [vmem:[%s14117_s24 + $0x10] sm:$0xff] }
 0x486   : > { %v6449_v25 = vadd.f32 %v10965_v31, %v6433_v62 }
 0x488   : > { %10245 = vmatprep.mubr.msk.f32.mxu0 %vm307_vm1, %v6449_v25 }
 0x489   : > { %10246 = vmatmul.mubr.msk.f32.gmra.mrb[30].mxu0 %vm307_vm1, %v6450_v27 }
 0x540   : > { %v10226_v40 = vpop.f32.mrb[16].mxu0 }
 0x541   : > { %v6571_v42 = vadd.f32 %v10226_v40, %v6402_v54  ;;  %v6565_v48 = vpop.f32.mrb[17].mxu0 }
 0x542   : > { %v6566_v35 = vadd.f32 %v6565_v48, %v6401_v28  ;;  %v6408_v48 = vld [vmem:[%s14117_s24 + $0x38] sm:$0xff] }
 0x544   : > { %10767 = vtanh.f32 %v6566_v35  ;;  %v10229_v62 = vpop.f32.mrb[18].mxu0 }
 0x545   : > { %10769 = vtanh.f32 %v6571_v42  ;;  %v6581_v25 = vadd.f32 %v10229_v62, %v6404_v44  ;;  %v6575_v27 = vpop.f32.mrb[19].mxu0  ;;  %v6410_v62 = vld [vmem:[%s14117_s24 + $0x48] sm:$0xff] }
 0x546   : > { %v6576_v1 = vadd.f32 %v6575_v27, %v6403_v38 }
 0x548   : > { %10771 = vtanh.f32 %v6576_v1  ;;  %v10232_v4 = vpop.f32.mrb[20].mxu0  ;;  %v6409_v1 = vld [vmem:[%s14117_s24 + $0x40] sm:$0xff] }
 0x549   : > { %10773 = vtanh.f32 %v6581_v25  ;;  %v6591_v54 = vadd.f32 %v10232_v4, %v6406_v2  ;;  %v6585_v40 = vpop.f32.mrb[21].mxu0 }
 0x54a   : > { %v6586_v28 = vadd.f32 %v6585_v40, %v6405_v3  ;;  %v6411_v40 = vld [vmem:[%s14117_s24 + $0x50] sm:$0xff] }
 0x54c   : > { %10775 = vtanh.f32 %v6586_v28  ;;  %v10235_v6 = vpop.f32.mrb[22].mxu0 }
 0x54d   : > { %10777 = vtanh.f32 %v6591_v54  ;;  %v6601_v35 = vadd.f32 %v10235_v6, %v6408_v48  ;;  %v6595_v42 = vpop.f32.mrb[23].mxu0  ;;  %v6412_v54 = vld [vmem:[%s14117_s24 + $0x58] sm:$0xff] }
 0x54e   : > { %v10768_v44 = vpop.eup %10767  ;;  %v6596_v38 = vadd.f32 %v6595_v42, %v6407_v5 }
 0x54f   : > { %v10770_v27 = vpop.eup %10769  ;;  %10262 = vmatprep.mubr.msk.f32.mxu1 %vm307_vm1, %v10768_v44 }
 0x550   : > { %10779 = vtanh.f32 %v6596_v38  ;;  %v10238_v2 = vpop.f32.mrb[24].mxu0  ;;  %10263 = vmatmul.mubr.msk.f32.vlgmr.msra.gmra.mrb[16].mxu1 %vm307_vm1, %v10770_v27  ;;  %v6414_v38 = vld [vmem:[%s14117_s24 + $0x68] sm:$0xff]  ;;  %v6413_v27 = vld [vmem:[%s14117_s24 + $0x60] sm:$0xff] }
 0x551   : > { %10781 = vtanh.f32 %v6601_v35  ;;  %v6611_v3 = vadd.f32 %v10238_v2, %v6410_v62  ;;  %v6605_v4 = vpop.f32.mrb[25].mxu0  ;;  %10539 = vmatpush3.bf16.msra.mxu1 %v13919_v36 }
 0x552   : > { %v10772_v6 = vpop.eup %10771  ;;  %v6606_v25 = vadd.f32 %v6605_v4, %v6409_v1  ;;  %10541 = vmatprep.subr.bf16.mxu1 %v13925_v37 }
 0x553   : > { %v10774_v5 = vpop.eup %10773  ;;  %10265 = vmatprep.mubr.msk.f32.mxu1 %vm307_vm1, %v10772_v6 }
 0x554   : > { %10783 = vtanh.f32 %v6606_v25  ;;  %v10241_v28 = vpop.f32.mrb[26].mxu0  ;;  %10266 = vmatmul.mubr.msk.f32.gmra.mrb[18].mxu1 %vm307_vm1, %v10774_v5  ;;  %v6416_v25 = vld [vmem:[%s14117_s24 + $0x78] sm:$0xff]  ;;  %v6415_v5 = vld [vmem:[%s14117_s24 + $0x70] sm:$0xff] }
 0x555   : > { %10785 = vtanh.f32 %v6611_v3  ;;  %v6621_v48 = vadd.f32 %v10241_v28, %v6412_v54  ;;  %v6615_v35 = vpop.f32.mrb[27].mxu0  ;;  %10543 = vmatpush3.bf16.msra.mxu1 %v13925_v37 }
 0x556   : > { %v10776_v42 = vpop.eup %10775  ;;  %v6616_v44 = vadd.f32 %v6615_v35, %v6411_v40  ;;  %10545 = vmatprep.subr.bf16.mxu1 %v13931_v39 }
 0x557   : > { %v10778_v62 = vpop.eup %10777  ;;  %10268 = vmatprep.mubr.msk.f32.mxu1 %vm307_vm1, %v10776_v42 }
 0x558   : > { %10787 = vtanh.f32 %v6616_v44  ;;  %v10244_v1 = vpop.f32.mrb[28].mxu0  ;;  %10269 = vmatmul.mubr.msk.f32.gmra.mrb[20].mxu1 %vm307_vm1, %v10778_v62 }
 0x559   : > { %10789 = vtanh.f32 %v6621_v48  ;;  %v6631_v2 = vadd.f32 %v10244_v1, %v6414_v38  ;;  %v6625_v3 = vpop.f32.mrb[29].mxu0  ;;  %10547 = vmatpush3.bf16.msra.mxu1 %v13931_v39 }
 0x55a   : > { %v10780_v4 = vpop.eup %10779  ;;  %v6626_v6 = vadd.f32 %v6625_v3, %v6413_v27  ;;  %10336 = vmatprep.subr.msk.mxu1 %vm6038_vm2, %v11171_v14 }
 0x55b   : > { %v10782_v54 = vpop.eup %10781  ;;  %10271 = vmatprep.mubr.msk.f32.mxu1 %vm307_vm1, %v10780_v4 }
 0x55c   : > { %10791 = vtanh.f32 %v6626_v6  ;;  %v10247_v40 = vpop.f32.mrb[30].mxu0  ;;  %10272 = vmatmul.mubr.msk.f32.gmra.mrb[22].mxu1 %vm307_vm1, %v10782_v54 }
 0x55d   : > { %10793 = vtanh.f32 %v6631_v2  ;;  %v6641_v28 = vadd.f32 %v10247_v40, %v6416_v25  ;;  %v6635_v48 = vpop.f32.mrb[31].mxu0  ;;  %10337 = vmatpush3.msk.msra.mxu1 %vm6038_vm2, %v11171_v14  ;;  %v6920_v25 = vmul.f32 0.33333334, %v13995_v55 }
 0x55e   : > { %v10784_v35 = vpop.eup %10783  ;;  %v6636_v42 = vadd.f32 %v6635_v48, %v6415_v5  ;;  %10561 = vmatprep.subr.bf16.mxu1 %v13919_v36  ;;  %v14166_v5 = vstv %s13989_s19 }
 0x55f   : > { %v10786_v44 = vpop.eup %10785  ;;  %10274 = vmatprep.mubr.msk.f32.mxu1 %vm307_vm1, %v10784_v35 }
 0x560   : > { %10795 = vtanh.f32 %v6636_v42  ;;  %10275 = vmatmul.mubr.msk.f32.gmra.mrb[24].mxu1 %vm307_vm1, %v10786_v44 }
 0x561   : > { %10797 = vtanh.f32 %v6641_v28  ;;  %v6919_v28 = vmul.f32 0.33333334, %v13998_v57 }
 0x562   : > { %v10788_v38 = vpop.eup %10787 }
 0x563   : > { %v10790_v62 = vpop.eup %10789  ;;  %10277 = vmatprep.mubr.msk.f32.mxu1 %vm307_vm1, %v10788_v38 }
 0x564   : > { %10278 = vmatmul.mubr.msk.f32.gmra.mrb[26].mxu1 %vm307_vm1, %v10790_v62  ;;  %v6922_v62 = vmul.f32 0.33333334, %v14005_v63 }
 0x566   : > { %v10792_v27 = vpop.eup %10791 }
 0x567   : > { %v10794_v1 = vpop.eup %10793  ;;  %10280 = vmatprep.mubr.msk.f32.mxu1 %vm307_vm1, %v10792_v27 }
 0x568   : > { %10281 = vmatmul.mubr.msk.f32.gmra.mrb[28].mxu1 %vm307_vm1, %v10794_v1 }
 0x56a   : > { %v10796_v2 = vpop.eup %10795 }
 0x56b   : > { %v10798_v3 = vpop.eup %10797  ;;  %10283 = vmatprep.mubr.msk.f32.mxu1 %vm307_vm1, %v10796_v2  ;;  %v6921_v2 = vmul.f32 0.33333334, %v14008_v20 }
 0x56c   : > { %10284 = vmatmul.mubr.msk.f32.gmra.mrb[30].mxu1 %vm307_vm1, %v10798_v3 }
 0x623   : > { %v10264_v4 = vpop.f32.mrb[16].mxu1 }
 0x624   : > { %v14162_v6 = vadd.f32 %v10264_v4, %v11181_v16  ;;  %v6774_v54 = vpop.f32.mrb[17].mxu1 }
 0x625   : > { %v14169_v40 = vadd.f32 %v11181_v16, %v6774_v54 }
 0x626   : > { %v6936_v48 = vsub.f32 %v14162_v6, %v6920_v25 }
 0x627   : > { %v6935_v35 = vsub.f32 %v14169_v40, %v6919_v28  ;;  %v10267_v42 = vpop.f32.mrb[18].mxu1 }
 0x628   : > { %v6953_v44 = vmul.f32 %v14166_v5, %v6936_v48  ;;  %v14176_v38 = vadd.f32 %v10267_v42, %v11181_v16  ;;  %v6784_v27 = vpop.f32.mrb[19].mxu1 }
 0x629   : > { %v14180_v1 = vadd.f32 %v11181_v16, %v6784_v27  ;;  %v6952_v3 = vmul.f32 %v14166_v5, %v6935_v35  ;;  %v6923_v35 = vmul.f32 0.33333334, %v14022_v29 }
 0x62a   : > { %v6938_v4 = vsub.f32 %v14176_v38, %v6922_v62  ;;  %v6969_v48 = vadd.f32 %v11017_v0, %v6953_v44 }
 0x62b   : > { %v6937_v25 = vsub.f32 %v14180_v1, %v6921_v2  ;;  %v10270_v54 = vpop.f32.mrb[20].mxu1  ;;  %v6968_v28 = vadd.f32 %v11021_v18, %v6952_v3 }
 0x62c   : > { %v14189_v42 = vadd.f32 %v10270_v54, %v11181_v16  ;;  %v6794_v27 = vpop.f32.mrb[21].mxu1  ;;  %v6955_v9 = vmul.f32 %v14166_v5, %v6938_v4 }
 0x62d   : > { %v14194_v10 = vadd.f32 %v11181_v16, %v6794_v27  ;;  %10300 = vmatprep.mubr.msk.f32.mxu0 %vm307_vm1, %v6968_v28  ;;  %v6954_v62 = vmul.f32 %v14166_v5, %v6937_v25  ;;  %v6926_v27 = vmul.f32 0.33333334, %v14034_v49 }
 0x62e   : > { %v6940_v2 = vsub.f32 %v14189_v42, %v6924_v8  ;;  %10301 = vmatmul.mubr.msk.f32.vlgmr.msra.gmra.mrb[32].mxu0 %vm307_vm1, %v6969_v48  ;;  %v6971_v28 = vadd.f32 %v11009_v24, %v6955_v9  ;;  %v6925_v48 = vmul.f32 0.33333334, %v14038_v53 }
 0x62f   : > { %v6939_v44 = vsub.f32 %v14194_v10, %v6923_v35  ;;  %v10273_v3 = vpop.f32.mrb[22].mxu1  ;;  %v6970_v54 = vadd.f32 %v11013_v26, %v6954_v62  ;;  %10551 = vmatpush3.bf16.msra.mxu0 %v13854_v34 }
 0x630   : > { %v14205_v4 = vadd.f32 %v10273_v3, %v11181_v16  ;;  %v6804_v11 = vpop.f32.mrb[23].mxu1  ;;  %v6957_v25 = vmul.f32 %v14166_v5, %v6940_v2  ;;  %10553 = vmatprep.subr.bf16.mxu0 %v13858_v60  ;;  %v6928_v3 = vmul.f32 0.33333334, %v14050_v17 }
 0x631   : > { %v14212_v8 = vadd.f32 %v11181_v16, %v6804_v11  ;;  %10303 = vmatprep.mubr.msk.f32.mxu0 %vm307_vm1, %v6970_v54  ;;  %v6956_v34 = vmul.f32 %v14166_v5, %v6939_v44 }
 0x632   : > { %v6942_v35 = vsub.f32 %v14205_v4, %v6926_v27  ;;  %10304 = vmatmul.mubr.msk.f32.gmra.mrb[34].mxu0 %vm307_vm1, %v6971_v28  ;;  %v6973_v54 = vadd.f32 %v11001_v32, %v6957_v25  ;;  %v6927_v28 = vmul.f32 0.33333334, %v14054_v23 }
 0x633   : > { %v6941_v62 = vsub.f32 %v14212_v8, %v6925_v48  ;;  %v10276_v9 = vpop.f32.mrb[24].mxu1  ;;  %v6972_v2 = vadd.f32 %v11005_v33, %v6956_v34  ;;  %10555 = vmatpush3.bf16.msra.mxu0 %v13858_v60 }
 0x634   : > { %v14223_v11 = vadd.f32 %v10276_v9, %v11181_v16  ;;  %v6814_v12 = vpop.f32.mrb[25].mxu1  ;;  %v6959_v44 = vmul.f32 %v14166_v5, %v6942_v35  ;;  %10557 = vmatprep.subr.bf16.mxu0 %v13867_v58  ;;  %v6930_v9 = vmul.f32 0.33333334, %v14067_v45 }
 0x635   : > { %v14230_v27 = vadd.f32 %v11181_v16, %v6814_v12  ;;  %10306 = vmatprep.mubr.msk.f32.mxu0 %vm307_vm1, %v6972_v2  ;;  %v6958_v60 = vmul.f32 %v14166_v5, %v6941_v62 }
 0x636   : > { %v6944_v48 = vsub.f32 %v14223_v11, %v6928_v3  ;;  %10307 = vmatmul.mubr.msk.f32.gmra.mrb[36].mxu0 %vm307_vm1, %v6973_v54  ;;  %v6975_v2 = vadd.f32 %v10993_v41, %v6959_v44  ;;  %v6929_v54 = vmul.f32 0.33333334, %v14071_v47 }
 0x637   : > { %v6943_v34 = vsub.f32 %v14230_v27, %v6927_v28  ;;  %v10279_v25 = vpop.f32.mrb[26].mxu1  ;;  %v6974_v35 = vadd.f32 %v10997_v43, %v6958_v60  ;;  %10559 = vmatpush3.bf16.msra.mxu0 %v13867_v58 }
 0x638   : > { %v14241_v12 = vadd.f32 %v10279_v25, %v11181_v16  ;;  %v6824_v13 = vpop.f32.mrb[27].mxu1  ;;  %v6961_v62 = vmul.f32 %v14166_v5, %v6944_v48  ;;  %10374 = vmatprep.subr.msk.mxu0 %vm6038_vm2, %v14846_v7  ;;  %v6932_v25 = vmul.f32 0.33333334, %v14084_v61 }
 0x639   : > { %v14249_v3 = vadd.f32 %v11181_v16, %v6824_v13  ;;  %10309 = vmatprep.mubr.msk.f32.mxu0 %vm307_vm1, %v6974_v35  ;;  %v6960_v58 = vmul.f32 %v14166_v5, %v6943_v34 }
 0x63a   : > { %v6946_v28 = vsub.f32 %v14241_v12, %v6930_v9  ;;  %10310 = vmatmul.mubr.msk.f32.gmra.mrb[38].mxu0 %vm307_vm1, %v6975_v2  ;;  %v6977_v34 = vadd.f32 %v10985_v50, %v6961_v62 }
 0x63b   : > { %v6945_v44 = vsub.f32 %v14249_v3, %v6929_v54  ;;  %v10282_v60 = vpop.f32.mrb[28].mxu1  ;;  %v6976_v48 = vadd.f32 %v10989_v52, %v6960_v58  ;;  %10375 = vmatpush3.msk.msra.mxu0 %vm6038_vm2, %v14846_v7  ;;  %v6931_v54 = vmul.f32 0.33333334, %v14088_v22 }
 0x63c   : > { %v14261_v13 = vadd.f32 %v10282_v60, %v11181_v16  ;;  %v6834_v35 = vpop.f32.mrb[29].mxu1  ;;  %v6963_v9 = vmul.f32 %v14166_v5, %v6946_v28 }
 0x63d   : > { %v14267_v2 = vadd.f32 %v11181_v16, %v6834_v35  ;;  %10312 = vmatprep.mubr.msk.f32.mxu0 %vm307_vm1, %v6976_v48  ;;  %v6962_v58 = vmul.f32 %v14166_v5, %v6945_v44  ;;  %v6934_v35 = vmul.f32 0.33333334, %v14098_v46 }
 0x63e   : > { %v6948_v7 = vsub.f32 %v14261_v13, %v6932_v25  ;;  %10313 = vmatmul.mubr.msk.f32.gmra.mrb[40].mxu0 %vm307_vm1, %v6977_v34  ;;  %v6979_v22 = vadd.f32 %v10977_v56, %v6963_v9  ;;  %v6933_v25 = vmul.f32 0.33333334, %v14102_v51 }
 0x63f   : > { %v6947_v60 = vsub.f32 %v14267_v2, %v6931_v54  ;;  %v10285_v52 = vpop.f32.mrb[30].mxu1  ;;  %v6978_v62 = vadd.f32 %v10981_v59, %v6962_v58 }
 0x640   : > { %v14277_v28 = vadd.f32 %v10285_v52, %v11181_v16  ;;  %v6844_v50 = vpop.f32.mrb[31].mxu1  ;;  %v6965_v48 = vmul.f32 %v14166_v5, %v6948_v7 }
 0x641   : > { %v14283_v44 = vadd.f32 %v11181_v16, %v6844_v50  ;;  %10315 = vmatprep.mubr.msk.f32.mxu0 %vm307_vm1, %v6978_v62  ;;  %v6964_v34 = vmul.f32 %v14166_v5, %v6947_v60 }
 0x642   : > { %v6950_v52 = vsub.f32 %v14277_v28, %v6934_v35  ;;  %10316 = vmatmul.mubr.msk.f32.gmra.mrb[42].mxu0 %vm307_vm1, %v6979_v22  ;;  %v6981_v7 = vadd.f32 %v10969_v19, %v6965_v48  ;;  %v6904_v22 = vld [vmem:[%s14302_s9 + $0x8] sm:$0xff]  ;;  %v6903_v35 = vld [vmem:[%s14302_s9] sm:$0xff]  ;;  %v6909_v19 = vld [vmem:[%s14302_s9 + $0x30] sm:$0xff] }
 0x643   : > { %v6949_v54 = vsub.f32 %v14283_v44, %v6933_v25  ;;  %v6980_v9 = vadd.f32 %v10973_v21, %v6964_v34 }
 0x644   : > { %v6967_v50 = vmul.f32 %v14166_v5, %v6950_v52 }
 0x645   : > { %10318 = vmatprep.mubr.msk.f32.mxu0 %vm307_vm1, %v6980_v9  ;;  %v6966_v58 = vmul.f32 %v14166_v5, %v6949_v54  ;;  %v6906_v54 = vld [vmem:[%s14302_s9 + $0x18] sm:$0xff]  ;;  %v6905_v9 = vld [vmem:[%s14302_s9 + $0x10] sm:$0xff] }
 0x646   : > { %10319 = vmatmul.mubr.msk.f32.gmra.mrb[44].mxu0 %vm307_vm1, %v6981_v7  ;;  %v6983_v62 = vadd.f32 %v10961_v15, %v6967_v50  ;;  %v6907_v15 = vld [vmem:[%s14302_s9 + $0x20] sm:$0xff] }
 0x647   : > { %v6982_v60 = vadd.f32 %v10965_v31, %v6966_v58 }
 0x649   : > { %10321 = vmatprep.mubr.msk.f32.mxu0 %vm307_vm1, %v6982_v60 }
 0x64a   : > { %10322 = vmatmul.mubr.msk.f32.gmra.mrb[46].mxu0 %vm307_vm1, %v6983_v62  ;;  %v6908_v62 = vld [vmem:[%s14302_s9 + $0x28] sm:$0xff] }
 0x701   : > { %v10302_v48 = vpop.f32.mrb[32].mxu0 }
 0x702   : > { %v7104_v25 = vadd.f32 %v10302_v48, %v6904_v22  ;;  %v7098_v34 = vpop.f32.mrb[33].mxu0 }
 0x703   : > { %v7099_v52 = vadd.f32 %v7098_v34, %v6903_v35  ;;  %v6910_v34 = vld [vmem:[%s14302_s9 + $0x38] sm:$0xff] }
 0x705   : > { %10799 = vtanh.f32 %v7099_v52  ;;  %v10305_v7 = vpop.f32.mrb[34].mxu0 }
 0x706   : > { %10801 = vtanh.f32 %v7104_v25  ;;  %v7114_v50 = vadd.f32 %v10305_v7, %v6906_v54  ;;  %v7108_v58 = vpop.f32.mrb[35].mxu0  ;;  %v6912_v7 = vld [vmem:[%s14302_s9 + $0x48] sm:$0xff] }
 0x707   : > { %v7109_v60 = vadd.f32 %v7108_v58, %v6905_v9 }
 0x709   : > { %10803 = vtanh.f32 %v7109_v60  ;;  %v10308_v31 = vpop.f32.mrb[36].mxu0 }
 0x70a   : > { %10805 = vtanh.f32 %v7114_v50  ;;  %v7124_v22 = vadd.f32 %v10308_v31, %v6908_v62  ;;  %v7118_v48 = vpop.f32.mrb[37].mxu0  ;;  %v6911_v50 = vld [vmem:[%s14302_s9 + $0x40] sm:$0xff] }
 0x70b   : > { %v7119_v35 = vadd.f32 %v7118_v48, %v6907_v15  ;;  %v6913_v48 = vld [vmem:[%s14302_s9 + $0x50] sm:$0xff] }
 0x70d   : > { %10807 = vtanh.f32 %v7119_v35  ;;  %v10311_v21 = vpop.f32.mrb[38].mxu0 }
 0x70e   : > { %10809 = vtanh.f32 %v7124_v22  ;;  %v7134_v52 = vadd.f32 %v10311_v21, %v6910_v34  ;;  %v7128_v25 = vpop.f32.mrb[39].mxu0  ;;  %v6914_v22 = vld [vmem:[%s14302_s9 + $0x58] sm:$0xff] }
 0x70f   : > { %v10800_v54 = vpop.eup %10799  ;;  %v7129_v9 = vadd.f32 %v7128_v25, %v6909_v19 }
 0x710   : > { %v10802_v58 = vpop.eup %10801  ;;  %10338 = vmatprep.mubr.msk.f32.mxu1 %vm307_vm1, %v10800_v54  ;;  %v6916_v54 = vld [vmem:[%s14302_s9 + $0x68] sm:$0xff] }
 0x711   : > { %10811 = vtanh.f32 %v7129_v9  ;;  %v10314_v31 = vpop.f32.mrb[40].mxu0  ;;  %10339 = vmatmul.mubr.msk.f32.vlgmr.msra.gmra.mrb[32].mxu1 %vm307_vm1, %v10802_v58 }
 0x712   : > { %10813 = vtanh.f32 %v7134_v52  ;;  %v7144_v15 = vadd.f32 %v10314_v31, %v6912_v7  ;;  %v7138_v60 = vpop.f32.mrb[41].mxu0  ;;  %10563 = vmatpush3.bf16.msra.mxu1 %v13919_v36  ;;  %v6915_v7 = vld [vmem:[%s14302_s9 + $0x60] sm:$0xff] }
 0x713   : > { %v10804_v21 = vpop.eup %10803  ;;  %v7139_v62 = vadd.f32 %v7138_v60, %v6911_v50  ;;  %10565 = vmatprep.subr.bf16.mxu1 %v13925_v37  ;;  %v6918_v60 = vld [vmem:[%s14302_s9 + $0x78] sm:$0xff] }
 0x714   : > { %v10806_v19 = vpop.eup %10805  ;;  %10341 = vmatprep.mubr.msk.f32.mxu1 %vm307_vm1, %v10804_v21 }
 0x715   : > { %10815 = vtanh.f32 %v7139_v62  ;;  %v10317_v35 = vpop.f32.mrb[42].mxu0  ;;  %10342 = vmatmul.mubr.msk.f32.gmra.mrb[34].mxu1 %vm307_vm1, %v10806_v19  ;;  %v6917_v62 = vld [vmem:[%s14302_s9 + $0x70] sm:$0xff] }
 0x716   : > { %10817 = vtanh.f32 %v7144_v15  ;;  %v7154_v34 = vadd.f32 %v10317_v35, %v6914_v22  ;;  %v7148_v52 = vpop.f32.mrb[43].mxu0  ;;  %10567 = vmatpush3.bf16.msra.mxu1 %v13925_v37 }
 0x717   : > { %v10808_v36 = vpop.eup %10807  ;;  %v7149_v25 = vadd.f32 %v7148_v52, %v6913_v48  ;;  %10569 = vmatprep.subr.bf16.mxu1 %v13931_v39 }
 0x718   : > { %v10810_v9 = vpop.eup %10809  ;;  %10344 = vmatprep.mubr.msk.f32.mxu1 %vm307_vm1, %v10808_v36 }
 0x719   : > { %10819 = vtanh.f32 %v7149_v25  ;;  %v10320_v58 = vpop.f32.mrb[44].mxu0  ;;  %10345 = vmatmul.mubr.msk.f32.gmra.mrb[36].mxu1 %vm307_vm1, %v10810_v9 }
 0x71a   : > { %10821 = vtanh.f32 %v7154_v34  ;;  %v7164_v50 = vadd.f32 %v10320_v58, %v6916_v54  ;;  %v7158_v31 = vpop.f32.mrb[45].mxu0  ;;  %10571 = vmatpush3.bf16.msra.mxu1 %v13931_v39  ;;  %v6854_v58 = vmul.f32 3.0, %v14162_v6 }
 0x71b   : > { %v10812_v37 = vpop.eup %10811  ;;  %v7159_v15 = vadd.f32 %v7158_v31, %v6915_v7  ;;  %10412 = vmatprep.subr.msk.mxu1 %vm6038_vm2, %v11171_v14  ;;  %v6856_v31 = vmul.f32 3.0, %v14176_v38 }
 0x71c   : > { %v10814_v21 = vpop.eup %10813  ;;  %10347 = vmatprep.mubr.msk.f32.mxu1 %vm307_vm1, %v10812_v37  ;;  %v6855_v37 = vmul.f32 3.0, %v14180_v1 }
 0x71d   : > { %10823 = vtanh.f32 %v7159_v15  ;;  %v10323_v22 = vpop.f32.mrb[46].mxu0  ;;  %10348 = vmatmul.mubr.msk.f32.gmra.mrb[38].mxu1 %vm307_vm1, %v10814_v21  ;;  %v6886_v15 = vsub.f32 %v13995_v55, %v14162_v6  ;;  %v6858_v21 = vmul.f32 3.0, %v14189_v42  ;;  %v6887_v6 = vsub.f32 %v14008_v20, %v14180_v1 }
 0x71e   : > { %10825 = vtanh.f32 %v7164_v50  ;;  %v7174_v19 = vadd.f32 %v10323_v22, %v6918_v60  ;;  %v7168_v48 = vpop.f32.mrb[47].mxu0  ;;  %10413 = vmatpush3.msk.msra.mxu1 %vm6038_vm2, %v11171_v14  ;;  %v6853_v50 = vmul.f32 3.0, %v14169_v40  ;;  %v6885_v60 = vsub.f32 %v13998_v57, %v14169_v40  ;;  %v7939_v14 = vld [vmem:[%s14815_s10 + $0x18] sm:$0xff] (%p14634_p10) }
 0x71f   : > { %v10816_v39 = vpop.eup %10815  ;;  %v7169_v35 = vadd.f32 %v7168_v48, %v6917_v62  ;;  %v6857_v62 = vmul.f32 3.0, %v14194_v10  ;;  %v6872_v40 = vadd.f32 %v6856_v31, %v14005_v63 }
 0x720   : > { %v10818_v34 = vpop.eup %10817  ;;  %10350 = vmatprep.mubr.msk.f32.mxu1 %vm307_vm1, %v10816_v39  ;;  %v6869_v48 = vadd.f32 %v6853_v50, %v13998_v57  ;;  %v6871_v57 = vadd.f32 %v6855_v37, %v14008_v20  ;;  %v6892_v20 = vsub.f32 %v14034_v49, %v14205_v4 }
 0x721   : > { %10827 = vtanh.f32 %v7169_v35  ;;  %10351 = vmatmul.mubr.msk.f32.gmra.mrb[40].mxu1 %vm307_vm1, %v10818_v34  ;;  %v6888_v34 = vsub.f32 %v14005_v63, %v14176_v38  ;;  %v6874_v63 = vadd.f32 %v6858_v21, %v14018_v30  ;;  %v6873_v50 = vadd.f32 %v6857_v62, %v14022_v29 }
 0x722   : > { %10829 = vtanh.f32 %v7174_v19  ;;  %v6870_v19 = vadd.f32 %v6854_v58, %v13995_v55  ;;  %v6889_v55 = vsub.f32 %v14022_v29, %v14194_v10 }
 0x723   : > { %v10820_v52 = vpop.eup %10819 }
 0x724   : > { %v10822_v36 = vpop.eup %10821  ;;  %10353 = vmatprep.mubr.msk.f32.mxu1 %vm307_vm1, %v10820_v52 }
 0x725   : > { %10354 = vmatmul.mubr.msk.f32.gmra.mrb[42].mxu1 %vm307_vm1, %v10822_v36  ;;  %v6890_v36 = vsub.f32 %v14018_v30, %v14189_v42 }
 0x727   : > { %v10824_v25 = vpop.eup %10823 }
 0x728   : > { %v10826_v54 = vpop.eup %10825  ;;  %10356 = vmatprep.mubr.msk.f32.mxu1 %vm307_vm1, %v10824_v25  ;;  %v6860_v25 = vmul.f32 3.0, %v14205_v4 }
 0x729   : > { %10357 = vmatmul.mubr.msk.f32.gmra.mrb[44].mxu1 %vm307_vm1, %v10826_v54  ;;  %v6859_v54 = vmul.f32 3.0, %v14212_v8 }
 0x72a   : > { %v6876_v62 = vadd.f32 %v6860_v25, %v14034_v49  ;;  %v6861_v49 = vmul.f32 3.0, %v14230_v27 }
 0x72b   : > { %v10828_v9 = vpop.eup %10827 }
 0x72c   : > { %v10830_v7 = vpop.eup %10829  ;;  %10359 = vmatprep.mubr.msk.f32.mxu1 %vm307_vm1, %v10828_v9 }
 0x72d   : > { %10360 = vmatmul.mubr.msk.f32.gmra.mrb[46].mxu1 %vm307_vm1, %v10830_v7 }
 0x7e4   : > { %v10340_v22 = vpop.f32.mrb[32].mxu1 }
 0x7e5   : > { %v7313_v39 = vadd.f32 %v10340_v22, %v11181_v16  ;;  %v7307_v35 = vpop.f32.mrb[33].mxu1 }
 0x7e6   : > { %v7308_v52 = vadd.f32 %v11181_v16, %v7307_v35  ;;  %v6862_v35 = vmul.f32 3.0, %v14223_v11 }
 0x7e7   : > { %v7387_v38 = vmul.f32 3.0, %v7313_v39  ;;  %v7437_v9 = vadd.f32 %v7313_v39, %v6886_v15  ;;  %v6875_v39 = vadd.f32 %v6859_v54, %v14038_v53 }
 0x7e8   : > { %v7386_v7 = vmul.f32 3.0, %v7308_v52  ;;  %v7436_v1 = vadd.f32 %v7308_v52, %v6885_v60  ;;  %v10343_v58 = vpop.f32.mrb[34].mxu1  ;;  %v6891_v60 = vsub.f32 %v14038_v53, %v14212_v8 }
 0x7e9   : > { %v7453_v42 = vmul.f32 %v7437_v9, %v14166_v5  ;;  %v7323_v31 = vadd.f32 %v10343_v58, %v11181_v16  ;;  %v7317_v10 = vpop.f32.mrb[35].mxu1  ;;  %v14377_v37 = vadd.f32 %v7387_v38, %v6870_v19  ;;  %v6894_v58 = vsub.f32 %v14050_v17, %v14223_v11 }
 0x7ea   : > { %v7452_v22 = vmul.f32 %v7436_v1, %v14166_v5  ;;  %v7318_v15 = vadd.f32 %v11181_v16, %v7317_v10  ;;  %v14383_v30 = vadd.f32 %v7386_v7, %v6869_v48 }
 0x7eb   : > { %v7389_v29 = vmul.f32 3.0, %v7323_v31  ;;  %v7439_v21 = vadd.f32 %v7323_v31, %v6888_v34  ;;  %v7469_v9 = vadd.f32 %v11017_v0, %v7453_v42 }
 0x7ec   : > { %v7388_v4 = vmul.f32 3.0, %v7318_v15  ;;  %v7438_v19 = vadd.f32 %v7318_v15, %v6887_v6  ;;  %v10346_v52 = vpop.f32.mrb[36].mxu1  ;;  %v7468_v38 = vadd.f32 %v11021_v18, %v7452_v22  ;;  %v6878_v15 = vadd.f32 %v6862_v35, %v14050_v17 }
 0x7ed   : > { %v7455_v1 = vmul.f32 %v7439_v21, %v14166_v5  ;;  %v7333_v8 = vadd.f32 %v10346_v52, %v11181_v16  ;;  %v7327_v48 = vpop.f32.mrb[37].mxu1  ;;  %v14392_v7 = vadd.f32 %v7389_v29, %v6872_v40  ;;  %v6893_v40 = vsub.f32 %v14054_v23, %v14230_v27 }
 0x7ee   : > { %v7454_v53 = vmul.f32 %v7438_v19, %v14166_v5  ;;  %v7328_v34 = vadd.f32 %v11181_v16, %v7327_v48  ;;  %10376 = vmatprep.mubr.msk.f32.mxu0 %vm307_vm1, %v7468_v38  ;;  %v14398_v6 = vadd.f32 %v7388_v4, %v6871_v57  ;;  %v6877_v19 = vadd.f32 %v6861_v49, %v14054_v23 }
 0x7ef   : > { %v7391_v25 = vmul.f32 3.0, %v7333_v8  ;;  %v7441_v54 = vadd.f32 %v7333_v8, %v6890_v36  ;;  %10377 = vmatmul.mubr.msk.f32.vlgmr.msra.gmra.mrb[48].mxu0 %vm307_vm1, %v7469_v9  ;;  %v7471_v21 = vadd.f32 %v11009_v24, %v7455_v1  ;;  %v6864_v17 = vmul.f32 3.0, %v14241_v12 }
 0x7f0   : > { %v7390_v42 = vmul.f32 3.0, %v7328_v34  ;;  %v7440_v31 = vadd.f32 %v7328_v34, %v6889_v55  ;;  %v10349_v10 = vpop.f32.mrb[38].mxu1  ;;  %v7470_v22 = vadd.f32 %v11013_v26, %v7454_v53  ;;  %v6863_v35 = vmul.f32 3.0, %v14249_v3 }
 0x7f1   : > { %v7457_v57 = vmul.f32 %v7441_v54, %v14166_v5  ;;  %v7343_v29 = vadd.f32 %v10349_v10, %v11181_v16  ;;  %v7337_v36 = vpop.f32.mrb[39].mxu1  ;;  %v14410_v4 = vadd.f32 %v7391_v25, %v6874_v63  ;;  %v6896_v48 = vsub.f32 %v14067_v45, %v14241_v12 }
 0x7f2   : > { %v7456_v11 = vmul.f32 %v7440_v31, %v14166_v5  ;;  %v7338_v27 = vadd.f32 %v11181_v16, %v7337_v36  ;;  %10379 = vmatprep.mubr.msk.f32.mxu0 %vm307_vm1, %v7470_v22  ;;  %v14415_v55 = vadd.f32 %v7390_v42, %v6873_v50  ;;  %v6880_v31 = vadd.f32 %v6864_v17, %v14067_v45 }
 0x7f3   : > { %v7393_v52 = vmul.f32 3.0, %v7343_v29  ;;  %v7443_v38 = vadd.f32 %v7343_v29, %v6892_v20  ;;  %10380 = vmatmul.mubr.msk.f32.gmra.mrb[50].mxu0 %vm307_vm1, %v7471_v21  ;;  %v7473_v53 = vadd.f32 %v11001_v32, %v7457_v57  ;;  %v6866_v10 = vmul.f32 3.0, %v14261_v13 }
 0x7f4   : > { %v7392_v63 = vmul.f32 3.0, %v7338_v27  ;;  %v7442_v9 = vadd.f32 %v7338_v27, %v6891_v60  ;;  %v10352_v1 = vpop.f32.mrb[40].mxu1  ;;  %v7472_v8 = vadd.f32 %v11005_v33, %v7456_v11  ;;  %v6895_v60 = vsub.f32 %v14071_v47, %v14249_v3 }
 0x7f5   : > { %v7459_v50 = vmul.f32 %v7443_v38, %v14166_v5  ;;  %v7353_v23 = vadd.f32 %v10352_v1, %v11181_v16  ;;  %v7347_v49 = vpop.f32.mrb[41].mxu1  ;;  %v14427_v34 = vadd.f32 %v7393_v52, %v6876_v62  ;;  %v6879_v62 = vadd.f32 %v6863_v35, %v14071_v47 }
 0x7f6   : > { %v7458_v20 = vmul.f32 %v7442_v9, %v14166_v5  ;;  %v7348_v25 = vadd.f32 %v11181_v16, %v7347_v49  ;;  %10382 = vmatprep.mubr.msk.f32.mxu0 %vm307_vm1, %v7472_v8  ;;  %v14434_v54 = vadd.f32 %v7392_v63, %v6875_v39  ;;  %v6865_v45 = vmul.f32 3.0, %v14267_v2  ;;  %v14867_v8 = vld [vmem:[#allocation28_spill] sm:$0xff] }
 0x7f7   : > { %v7395_v12 = vmul.f32 3.0, %v7353_v23  ;;  %v7445_v42 = vadd.f32 %v7353_v23, %v6894_v58  ;;  %10383 = vmatmul.mubr.msk.f32.gmra.mrb[52].mxu0 %vm307_vm1, %v7473_v53  ;;  %v7475_v58 = vadd.f32 %v10993_v41, %v7459_v50  ;;  %v6898_v52 = vsub.f32 %v14084_v61, %v14261_v13  ;;  %v14868_v53 = vld [vmem:[#allocation27_spill] sm:$0xff] }
 0x7f8   : > { %v7394_v22 = vmul.f32 3.0, %v7348_v25  ;;  %v7444_v57 = vadd.f32 %v7348_v25, %v6893_v40  ;;  %v10355_v29 = vpop.f32.mrb[42].mxu1  ;;  %v7474_v36 = vadd.f32 %v10997_v43, %v7458_v20  ;;  %v6882_v23 = vadd.f32 %v6866_v10, %v14084_v61 }
 0x7f9   : > { %v7461_v21 = vmul.f32 %v7445_v42, %v14166_v5  ;;  %v7363_v3 = vadd.f32 %v10355_v29, %v11181_v16  ;;  %v7357_v39 = vpop.f32.mrb[43].mxu1  ;;  %v14444_v11 = vadd.f32 %v7395_v12, %v6878_v15  ;;  %v14866_v15 = vld [vmem:[#allocation29_spill] sm:$0xff]  ;;  %v6868_v61 = vmul.f32 3.0, %v14277_v28 }
 0x7fa   : > { %v7460_v47 = vmul.f32 %v7444_v57, %v14166_v5  ;;  %v7358_v27 = vadd.f32 %v11181_v16, %v7357_v39  ;;  %10385 = vmatprep.mubr.msk.f32.mxu0 %vm307_vm1, %v7474_v36  ;;  %v14450_v40 = vadd.f32 %v7394_v22, %v6877_v19  ;;  %v6897_v38 = vsub.f32 %v14866_v15, %v14267_v2 }
 0x7fb   : > { %v7397_v17 = vmul.f32 3.0, %v7363_v3  ;;  %v7447_v35 = vadd.f32 %v7363_v3, %v6896_v48  ;;  %10386 = vmatmul.mubr.msk.f32.gmra.mrb[54].mxu0 %vm307_vm1, %v7475_v58  ;;  %v7477_v20 = vadd.f32 %v14868_v53, %v7461_v21  ;;  %v6881_v12 = vadd.f32 %v6865_v45, %v14866_v15 }
 0x7fc   : > { %v7396_v63 = vmul.f32 3.0, %v7358_v27  ;;  %v7446_v9 = vadd.f32 %v7358_v27, %v6895_v60  ;;  %v10358_v1 = vpop.f32.mrb[44].mxu1  ;;  %v7476_v50 = vadd.f32 %v14867_v8, %v7460_v47  ;;  %v6867_v22 = vmul.f32 3.0, %v14283_v44 }
 0x7fd   : > { %v7463_v19 = vmul.f32 %v7447_v35, %v14166_v5  ;;  %v7373_v49 = vadd.f32 %v10358_v1, %v11181_v16  ;;  %v7367_v48 = vpop.f32.mrb[45].mxu1  ;;  %v14462_v25 = vadd.f32 %v7397_v17, %v6880_v31  ;;  %v6900_v31 = vsub.f32 %v14098_v46, %v14277_v28 }
 0x7fe   : > { %v7462_v13 = vmul.f32 %v7446_v9, %v14166_v5  ;;  %v7368_v2 = vadd.f32 %v11181_v16, %v7367_v48  ;;  %10388 = vmatprep.mubr.msk.f32.mxu0 %vm307_vm1, %v7476_v50  ;;  %v14467_v60 = vadd.f32 %v7396_v63, %v6879_v62  ;;  %v6899_v28 = vsub.f32 %v14102_v51, %v14283_v44  ;;  %v14869_v9 = vld [vmem:[#allocation26_spill] sm:$0xff] }
 0x7ff   : > { %v7399_v42 = vmul.f32 3.0, %v7373_v49  ;;  %v7449_v10 = vadd.f32 %v7373_v49, %v6898_v52  ;;  %10389 = vmatmul.mubr.msk.f32.gmra.mrb[56].mxu0 %vm307_vm1, %v7477_v20  ;;  %v7479_v58 = vadd.f32 %v10977_v56, %v7463_v19  ;;  %v6884_v15 = vadd.f32 %v6868_v61, %v14098_v46  ;;  %v14871_v46 = vld [vmem:[#allocation24_spill] sm:$0xff] }
 0x800   : > { %v7398_v57 = vmul.f32 3.0, %v7368_v2  ;;  %v7448_v29 = vadd.f32 %v7368_v2, %v6897_v38  ;;  %v10361_v36 = vpop.f32.mrb[46].mxu1  ;;  %v7478_v21 = vadd.f32 %v10981_v59, %v7462_v13  ;;  %v6883_v50 = vadd.f32 %v6867_v22, %v14102_v51  ;;  %v14872_v2 = vld [vmem:[#allocation23_spill] sm:$0xff]  ;;  %v7423_v22 = vld [vmem:[%s14506_s29 + $0x18] sm:$0xff] }
 0x801   : > { %v7465_v62 = vmul.f32 %v7449_v10, %v14166_v5  ;;  %v7383_v3 = vadd.f32 %v10361_v36, %v11181_v16  ;;  %v7377_v39 = vpop.f32.mrb[47].mxu1  ;;  %v14479_v45 = vadd.f32 %v7399_v42, %v6882_v23  ;;  %v14870_v23 = vld [vmem:[#allocation25_spill] sm:$0xff]  ;;  %v7421_v51 = vld [vmem:[%s14506_s29 + $0x8] sm:$0xff] }
 0x802   : > { %v7464_v47 = vmul.f32 %v7448_v29, %v14166_v5  ;;  %v7378_v27 = vadd.f32 %v11181_v16, %v7377_v39  ;;  %10391 = vmatprep.mubr.msk.f32.mxu0 %vm307_vm1, %v7478_v21  ;;  %v14486_v17 = vadd.f32 %v7398_v57, %v6881_v12  ;;  %v7422_v57 = vld [vmem:[%s14506_s29 + $0x10] sm:$0xff]  ;;  %v7424_v39 = vld [vmem:[%s14506_s29 + $0x20] sm:$0xff] }
 0x803   : > { %v7401_v35 = vmul.f32 3.0, %v7383_v3  ;;  %v7451_v52 = vadd.f32 %v7383_v3, %v6900_v31  ;;  %10392 = vmatmul.mubr.msk.f32.gmra.mrb[58].mxu0 %vm307_vm1, %v7479_v58  ;;  %v7481_v19 = vadd.f32 %v14870_v23, %v7465_v62  ;;  %v7425_v3 = vld [vmem:[%s14506_s29 + $0x28] sm:$0xff] }
 0x804   : > { %v7400_v38 = vmul.f32 3.0, %v7378_v27  ;;  %v7450_v63 = vadd.f32 %v7378_v27, %v6899_v28  ;;  %v7480_v1 = vadd.f32 %v14869_v9, %v7464_v47 }
 0x805   : > { %v7467_v44 = vmul.f32 %v7451_v52, %v14166_v5  ;;  %v14494_v49 = vadd.f32 %v7401_v35, %v6884_v15  ;;  %v7427_v35 = vld [vmem:[%s14506_s29 + $0x38] sm:$0xff]  ;;  %v7426_v52 = vld [vmem:[%s14506_s29 + $0x30] sm:$0xff] }
 0x806   : > { %v7466_v48 = vmul.f32 %v7450_v63, %v14166_v5  ;;  %10394 = vmatprep.mubr.msk.f32.mxu0 %vm307_vm1, %v7480_v1  ;;  %v14498_v20 = vadd.f32 %v7400_v38, %v6883_v50  ;;  %v7420_v5 = vld [vmem:[%s14506_s29] sm:$0xff] }
 0x807   : > { %10395 = vmatmul.mubr.msk.f32.gmra.mrb[60].mxu0 %vm307_vm1, %v7481_v19  ;;  %v7483_v12 = vadd.f32 %v14872_v2, %v7467_v44  ;;  %v7429_v44 = vld [vmem:[%s14506_s29 + $0x48] sm:$0xff] }
 0x808   : > { %v7482_v13 = vadd.f32 %v14871_v46, %v7466_v48  ;;  %v7428_v48 = vld [vmem:[%s14506_s29 + $0x40] sm:$0xff] }
 0x80a   : > { %10397 = vmatprep.mubr.msk.f32.mxu0 %vm307_vm1, %v7482_v13 }
 0x80b   : > { %10398 = vmatmul.mubr.msk.f32.gmra.mrb[62].mxu0 %vm307_vm1, %v7483_v12 }
 0x8c2   : > { %v10378_v61 = vpop.f32.mrb[48].mxu0 }
 0x8c3   : > { %v7604_v42 = vadd.f32 %v10378_v61, %v7421_v51  ;;  %v7598_v10 = vpop.f32.mrb[49].mxu0 }
 0x8c4   : > { %v7599_v31 = vadd.f32 %v7598_v10, %v7420_v5 }
 0x8c6   : > { %10831 = vtanh.f32 %v7599_v31  ;;  %v10381_v29 = vpop.f32.mrb[50].mxu0  ;;  %v7430_v31 = vld [vmem:[%s14506_s29 + $0x50] sm:$0xff] }
 0x8c7   : > { %10833 = vtanh.f32 %v7604_v42  ;;  %v7614_v36 = vadd.f32 %v10381_v29, %v7423_v22  ;;  %v7608_v21 = vpop.f32.mrb[51].mxu0  ;;  %v7431_v42 = vld [vmem:[%s14506_s29 + $0x58] sm:$0xff] }
 0x8c8   : > { %v7609_v62 = vadd.f32 %v7608_v21, %v7422_v57 }
 0x8ca   : > { %10835 = vtanh.f32 %v7609_v62  ;;  %v10384_v58 = vpop.f32.mrb[52].mxu0  ;;  %v7433_v62 = vld [vmem:[%s14506_s29 + $0x68] sm:$0xff] }
 0x8cb   : > { %10837 = vtanh.f32 %v7614_v36  ;;  %v7624_v47 = vadd.f32 %v10384_v58, %v7425_v3  ;;  %v7618_v28 = vpop.f32.mrb[53].mxu0 }
 0x8cc   : > { %v7619_v27 = vadd.f32 %v7618_v28, %v7424_v39  ;;  %v7432_v39 = vld [vmem:[%s14506_s29 + $0x60] sm:$0xff] }
 0x8ce   : > { %10839 = vtanh.f32 %v7619_v27  ;;  %v10387_v15 = vpop.f32.mrb[54].mxu0 }
 0x8cf   : > { %10841 = vtanh.f32 %v7624_v47  ;;  %v7634_v38 = vadd.f32 %v10387_v15, %v7427_v35  ;;  %v7628_v63 = vpop.f32.mrb[55].mxu0 }
 0x8d0   : > { %v10832_v1 = vpop.eup %10831  ;;  %v7629_v50 = vadd.f32 %v7628_v63, %v7426_v52  ;;  %v7435_v52 = vld [vmem:[%s14506_s29 + $0x78] sm:$0xff] }
 0x8d1   : > { %v10834_v19 = vpop.eup %10833  ;;  %10414 = vmatprep.mubr.msk.f32.mxu1 %vm307_vm1, %v10832_v1 }
 0x8d2   : > { %10843 = vtanh.f32 %v7629_v50  ;;  %v10390_v13 = vpop.f32.mrb[56].mxu0  ;;  %10415 = vmatmul.mubr.msk.f32.vlgmr.msra.gmra.mrb[48].mxu1 %vm307_vm1, %v10834_v19 }
 0x8d3   : > { %10845 = vtanh.f32 %v7634_v38  ;;  %v7644_v12 = vadd.f32 %v10390_v13, %v7429_v44  ;;  %v7638_v51 = vpop.f32.mrb[57].mxu0  ;;  %v7434_v38 = vld [vmem:[%s14506_s29 + $0x70] sm:$0xff] }
 0x8d4   : > { %v10836_v5 = vpop.eup %10835  ;;  %v7639_v61 = vadd.f32 %v7638_v51, %v7428_v48 }
 0x8d5   : > { %v10838_v10 = vpop.eup %10837  ;;  %10417 = vmatprep.mubr.msk.f32.mxu1 %vm307_vm1, %v10836_v5 }
 0x8d6   : > { %10847 = vtanh.f32 %v7639_v61  ;;  %v10393_v22 = vpop.f32.mrb[58].mxu0  ;;  %10418 = vmatmul.mubr.msk.f32.gmra.mrb[50].mxu1 %vm307_vm1, %v10838_v10 }
 0x8d7   : > { %10849 = vtanh.f32 %v7644_v12  ;;  %v7654_v57 = vadd.f32 %v10393_v22, %v7431_v42  ;;  %v7648_v29 = vpop.f32.mrb[59].mxu0 }
 0x8d8   : > { %v10840_v36 = vpop.eup %10839  ;;  %v7649_v21 = vadd.f32 %v7648_v29, %v7430_v31 }
 0x8d9   : > { %v10842_v3 = vpop.eup %10841  ;;  %10420 = vmatprep.mubr.msk.f32.mxu1 %vm307_vm1, %v10840_v36 }
 0x8da   : > { %10851 = vtanh.f32 %v7649_v21  ;;  %v10396_v58 = vpop.f32.mrb[60].mxu0  ;;  %10421 = vmatmul.mubr.msk.f32.gmra.mrb[52].mxu1 %vm307_vm1, %v10842_v3 }
 0x8db   : > { %10853 = vtanh.f32 %v7654_v57  ;;  %v7664_v47 = vadd.f32 %v10396_v58, %v7433_v62  ;;  %v7658_v28 = vpop.f32.mrb[61].mxu0  ;;  %v14542_v57 = vstv %s7886_s11 }
 0x8dc   : > { %v10844_v27 = vpop.eup %10843  ;;  %v7659_v35 = vadd.f32 %v7658_v28, %v7432_v39 }
 0x8dd   : > { %v10846_v15 = vpop.eup %10845  ;;  %10423 = vmatprep.mubr.msk.f32.mxu1 %vm307_vm1, %v10844_v27 }
 0x8de   : > { %10855 = vtanh.f32 %v7659_v35  ;;  %v10399_v63 = vpop.f32.mrb[62].mxu0  ;;  %10424 = vmatmul.mubr.msk.f32.gmra.mrb[54].mxu1 %vm307_vm1, %v10846_v15 }
 0x8df   : > { %10857 = vtanh.f32 %v7664_v47  ;;  %v7674_v1 = vadd.f32 %v10399_v63, %v7435_v52  ;;  %v7668_v50 = vpop.f32.mrb[63].mxu0 }
 0x8e0   : > { %v10848_v44 = vpop.eup %10847  ;;  %v7669_v19 = vadd.f32 %v7668_v50, %v7434_v38 }
 0x8e1   : > { %v10850_v48 = vpop.eup %10849  ;;  %10426 = vmatprep.mubr.msk.f32.mxu1 %vm307_vm1, %v10848_v44 }
 0x8e2   : > { %10859 = vtanh.f32 %v7669_v19  ;;  %10427 = vmatmul.mubr.msk.f32.gmra.mrb[56].mxu1 %vm307_vm1, %v10850_v48 }
 0x8e3   : > { %10861 = vtanh.f32 %v7674_v1 }
 0x8e4   : > { %v10852_v13 = vpop.eup %10851 }
 0x8e5   : > { %v10854_v12 = vpop.eup %10853  ;;  %10429 = vmatprep.mubr.msk.f32.mxu1 %vm307_vm1, %v10852_v13 }
 0x8e6   : > { %10430 = vmatmul.mubr.msk.f32.gmra.mrb[58].mxu1 %vm307_vm1, %v10854_v12 }
 0x8e8   : > { %v10856_v51 = vpop.eup %10855 }
 0x8e9   : > { %v10858_v5 = vpop.eup %10857  ;;  %10432 = vmatprep.mubr.msk.f32.mxu1 %vm307_vm1, %v10856_v51 }
 0x8ea   : > { %10433 = vmatmul.mubr.msk.f32.gmra.mrb[60].mxu1 %vm307_vm1, %v10858_v5 }
 0x8ec   : > { %v10860_v61 = vpop.eup %10859 }
 0x8ed   : > { %v10862_v42 = vpop.eup %10861  ;;  %10435 = vmatprep.mubr.msk.f32.mxu1 %vm307_vm1, %v10860_v61 }
 0x8ee   : > { %10436 = vmatmul.mubr.msk.f32.gmra.mrb[62].mxu1 %vm307_vm1, %v10862_v42 }
 0x9a5   : > { %v10416_v10 = vpop.f32.mrb[48].mxu1 }
 0x9a6   : > { %v7813_v31 = vadd.f32 %v10416_v10, %v11181_v16  ;;  %v7807_v22 = vpop.f32.mrb[49].mxu1 }
 0x9a7   : > { %v7808_v29 = vadd.f32 %v11181_v16, %v7807_v22 }
 0x9a8   : > { %v7888_v36 = vadd.f32 %v7813_v31, %v14377_v37 }
 0x9a9   : > { %v7887_v21 = vadd.f32 %v7808_v29, %v14383_v30  ;;  %v10419_v62 = vpop.f32.mrb[50].mxu1 }
 0x9aa   : > { %v7905_v3 = vmul.f32 %v14542_v57, %v7888_v36  ;;  %v7823_v39 = vadd.f32 %v10419_v62, %v11181_v16  ;;  %v7817_v58 = vpop.f32.mrb[51].mxu1 }
 0x9ab   : > { %v7904_v47 = vmul.f32 %v14542_v57, %v7887_v21  ;;  %v7818_v28 = vadd.f32 %v11181_v16, %v7817_v58 }
 0x9ac   : > { %v14552_v0 = vadd.f32 %v11017_v0, %v7905_v3   ;;  %v7890_v35 = vadd.f32 %v7823_v39, %v14392_v7 }
 0x9ad   : > { %v14556_v18 = vadd.f32 %v11021_v18, %v7904_v47   ;;  %v7889_v30 = vadd.f32 %v7818_v28, %v14398_v6  ;;  %v10422_v52 = vpop.f32.mrb[52].mxu1 }
 0x9ae   : > { %v14873_v27 = vmov %v14552_v0  ;;  %v7907_v15 = vmul.f32 %v14542_v57, %v7890_v35  ;;  %v7833_v38 = vadd.f32 %v10422_v52, %v11181_v16  ;;  %v7827_v63 = vpop.f32.mrb[53].mxu1 }
 0x9af   : > { %v14874_v37 = vmov %v14556_v18  ;;  %v7906_v1 = vmul.f32 %v14542_v57, %v7889_v30  ;;  %v7828_v50 = vadd.f32 %v11181_v16, %v7827_v63 }
 0x9b0   : > { %v14564_v24 = vadd.f32 %v11009_v24, %v7907_v15   ;;  %v7892_v0 = vadd.f32 %v7833_v38, %v14410_v4  ;;  %10452 = vmatprep.mubr.msk.f32.mxu0 (%p14634_p10), %vm307_vm1, %v14874_v37 }
 0x9b1   : > { %v14568_v26 = vadd.f32 %v11013_v26, %v7906_v1   ;;  %v7891_v18 = vadd.f32 %v7828_v50, %v14415_v55  ;;  %v10425_v6 = vpop.f32.mrb[54].mxu1 }
 0x9b2   : > { %v14875_v44 = vmov %v14564_v24  ;;  %v7909_v19 = vmul.f32 %v14542_v57, %v7892_v0  ;;  %v7843_v48 = vadd.f32 %v10425_v6, %v11181_v16  ;;  %v7837_v13 = vpop.f32.mrb[55].mxu1 }
 0x9b3   : > { %v14876_v7 = vmov %v14568_v26  ;;  %v7908_v12 = vmul.f32 %v14542_v57, %v7891_v18  ;;  %v7838_v51 = vadd.f32 %v11181_v16, %v7837_v13 }
 0x9b4   : > { %v14576_v32 = vadd.f32 %v11001_v32, %v7909_v19   ;;  %v7894_v24 = vadd.f32 %v7843_v48, %v14427_v34 }
 0x9b5   : > { %v14580_v33 = vadd.f32 %v11005_v33, %v7908_v12   ;;  %v7893_v26 = vadd.f32 %v7838_v51, %v14434_v54  ;;  %v10428_v55 = vpop.f32.mrb[56].mxu1 }
 0x9b6   : > { %v14877_v5 = vmov %v14576_v32  ;;  %v7911_v61 = vmul.f32 %v14542_v57, %v7894_v24  ;;  %v7853_v42 = vadd.f32 %v10428_v55, %v11181_v16  ;;  %v7847_v10 = vpop.f32.mrb[57].mxu1  ;;  %v14899_v24 = vmov %v14875_v44 }
 0x9b7   : > { %v14878_v4 = vmov %v14580_v33  ;;  %v7910_v31 = vmul.f32 %v14542_v57, %v7893_v26  ;;  %v7848_v22 = vadd.f32 %v11181_v16, %v7847_v10  ;;  %v14900_v26 = vmov %v14876_v7 }
 0x9b8   : > { %v14588_v41 = vadd.f32 %v10993_v41, %v7911_v61   ;;  %v7896_v32 = vadd.f32 %v7853_v42, %v14444_v11 }
 0x9b9   : > { %v14592_v43 = vadd.f32 %v10997_v43, %v7910_v31   ;;  %v7895_v33 = vadd.f32 %v7848_v22, %v14450_v40  ;;  %v10431_v54 = vpop.f32.mrb[58].mxu1 }
 0x9ba   : > { %v14879_v29 = vmov %v14588_v41  ;;  %v7913_v36 = vmul.f32 %v14542_v57, %v7896_v32  ;;  %v7863_v21 = vadd.f32 %v10431_v54, %v11181_v16  ;;  %v7857_v62 = vpop.f32.mrb[59].mxu1  ;;  %v14897_v32 = vmov %v14877_v5 }
 0x9bb   : > { %v14880_v34 = vmov %v14592_v43  ;;  %v7912_v3 = vmul.f32 %v14542_v57, %v7895_v33  ;;  %v7858_v39 = vadd.f32 %v11181_v16, %v7857_v62  ;;  %v14898_v33 = vmov %v14878_v4 }
 0x9bc   : > { %v14600_v50 = vadd.f32 %v14868_v53, %v7913_v36   ;;  %v7898_v41 = vadd.f32 %v7863_v21, %v14462_v25 }
 0x9bd   : > { %v7928_v11 = vadd.f32 %v14867_v8, %v7912_v3   ;;  %v7897_v43 = vadd.f32 %v7858_v39, %v14467_v60  ;;  %v10434_v40 = vpop.f32.mrb[60].mxu1 }
 0x9be   : > { %v14881_v58 = vmov %v14600_v50  ;;  %v7915_v47 = vmul.f32 %v14542_v57, %v7898_v41  ;;  %v7873_v28 = vadd.f32 %v10434_v40, %v11181_v16  ;;  %v7867_v35 = vpop.f32.mrb[61].mxu1  ;;  %v14895_v41 = vmov %v14879_v29 }
 0x9bf   : > { %v7914_v30 = vmul.f32 %v14542_v57, %v7897_v43  ;;  %v7868_v52 = vadd.f32 %v11181_v16, %v7867_v35  ;;  %v14896_v43 = vmov %v14880_v34  ;;  %10464 = vmatprep.mubr.msk.f32.mxu1 (%p14634_p10), %vm307_vm1, %v7928_v11 }
 0x9c0   : > { %v14610_v56 = vadd.f32 %v10977_v56, %v7915_v47   ;;  %v7900_v15 = vadd.f32 %v7873_v28, %v14479_v45 }
 0x9c1   : > { %v14614_v59 = vadd.f32 %v10981_v59, %v7914_v30   ;;  %v7899_v25 = vadd.f32 %v7868_v52, %v14486_v17  ;;  %v10437_v60 = vpop.f32.mrb[62].mxu1  ;;  %v14894_v52 = vmov %v7928_v11 }
 0x9c2   : > { %v14882_v53 = vmov %v14610_v56  ;;  %v7917_v38 = vmul.f32 %v14542_v57, %v7900_v15  ;;  %v7883_v63 = vadd.f32 %v10437_v60, %v11181_v16  ;;  %v7877_v1 = vpop.f32.mrb[63].mxu1 }
 0x9c3   : > { %v14883_v8 = vmov %v14614_v59  ;;  %v7916_v50 = vmul.f32 %v14542_v57, %v7899_v25  ;;  %v7878_v0 = vadd.f32 %v11181_v16, %v7877_v1 }
 0x9c4   : > { %v14622_v19 = vadd.f32 %v14870_v23, %v7917_v38   ;;  %v7902_v56 = vadd.f32 %v7883_v63, %v14494_v49  ;;  %v7937_v23 = vld [vmem:[%s14815_s10 + $0x8] sm:$0xff] (%p14634_p10)  ;;  %v7938_v49 = vld [vmem:[%s14815_s10 + $0x10] sm:$0xff] (%p14634_p10) }
 0x9c5   : > { %v7932_v45 = vadd.f32 %v14869_v9, %v7916_v50   ;;  %v7901_v59 = vadd.f32 %v7878_v0, %v14498_v20  ;;  %v14893_v50 = vmov %v14881_v58  ;;  %v14901_v0 = vmov %v14873_v27  ;;  %5945 = sbr.rel (!%p14634_p10) target bundleno = 668 (0x29c), region = 87  ;;  %v7936_v9 = vld [vmem:[%s14815_s10] sm:$0xff] (%p14634_p10) }
 0x9c6   : > { %v14884_v6 = vmov %v14622_v19  ;;  %v7919_v17 = vmul.f32 %v14542_v57, %v7902_v56  ;;  %v14891_v56 = vmov %v14882_v53  ;;  %v10572_v20 = vpack.c.bf16 (%p14634_p10), %v7937_v23, %v7936_v9 }
 0x9c7   : > { %v7918_v18 = vmul.f32 %v14542_v57, %v7901_v59  ;;  %v14889_v19 = vmov %v14884_v6  ;;  %v14890_v21 = vmov %v7932_v45  ;;  %v14892_v59 = vmov %v14883_v8 }
 0x9c8   : > { %v14630_v15 = vadd.f32 %v14872_v2, %v7919_v17   ;;  %v10576_v16 = vpack.c.bf16 (%p14634_p10), %v7939_v14, %v7938_v49  ;;  %v7941_v2 = vld [vmem:[%s14815_s10 + $0x28] sm:$0xff] (%p14634_p10)  ;;  %10573 = vmatprep.subr.bf16.mxu0 (%p14634_p10), %v10572_v20  ;;  %10584 = vmatprep.subr.bf16.mxu1 (%p14634_p10), %v10572_v20 }
 0x9c9   : > { %v7934_v13 = vadd.f32 %v14871_v46, %v7918_v18   ;;  %v14902_v18 = vmov %v14874_v37  ;;  %v7940_v46 = vld [vmem:[%s14815_s10 + $0x20] sm:$0xff] (%p14634_p10)  ;;  %10575 = vmatpush3.bf16.msra.mxu0 (%p14634_p10), %v10572_v20  ;;  %10588 = vmatpush3.bf16.msra.mxu1 (%p14634_p10), %v10572_v20  ;;  %v7942_v37 = vld [vmem:[%s14815_s10 + $0x30] sm:$0x3] (%p14634_p10) }
 0x9ca   : > { %v14885_v48 = vmov %v14630_v15  ;;  %10577 = vmatprep.subr.bf16.mxu0 (%p14634_p10), %v10576_v16  ;;  %10585 = vmatprep.subr.bf16.mxu1 (%p14634_p10), %v10576_v16  ;;  %v10580_v57 = vpack.c.bf16 (%p14634_p10), %v7941_v2, %v7940_v46 }
 0x9cb   : > { %v14887_v15 = vmov %v14885_v48  ;;  %v14888_v31 = vmov %v7934_v13 }
 0x9cd   :  { %10579 = vmatpush3.bf16.msra.mxu0 %v10576_v16  ;;  %10589 = vmatpush3.bf16.msra.mxu1 %v10576_v16 }
 0x9ce   :  { %10581 = vmatprep.subr.bf16.mxu0 %v10580_v57  ;;  %10586 = vmatprep.subr.bf16.mxu1 %v10580_v57 }
 0x9d1   :  { %10583 = vmatpush3.bf16.msra.mxu0 %v10580_v57  ;;  %10590 = vmatpush3.bf16.msra.mxu1 %v10580_v57 }
 0x9d2   :  { %10450 = vmatprep.subr.msk.mxu0 %vm6038_vm2, %v7942_v37  ;;  %10587 = vmatprep.subr.msk.mxu1 %vm6038_vm2, %v7942_v37 }
 0x9d5   :  { %10451 = vmatpush3.msk.msra.mxu0 %vm6038_vm2, %v7942_v37  ;;  %10591 = vmatpush3.msk.msra.mxu1 %vm6038_vm2, %v7942_v37 }
 0x9d6   :  { %10453 = vmatmul.mubr.msk.f32.vlgmr.msra.gmra.mrb[0].mxu0 %vm307_vm1, %v14873_v27  ;;  %10465 = vmatmul.mubr.msk.f32.vlgmr.msra.gmra.mrb[0].mxu1 %vm307_vm1, %v14881_v58  ;;  %v8791_v27 = vld [vmem:[#allocation3] ss:$0 sm:$0xff] }
 0x9d7   :  { %10455 = vmatprep.mubr.msk.f32.mxu0 %vm307_vm1, %v14876_v7  ;;  %10467 = vmatprep.mubr.msk.f32.mxu1 %vm307_vm1, %v14883_v8 }
 0x9da   :  { %10456 = vmatmul.mubr.msk.f32.gmra.mrb[2].mxu0 %vm307_vm1, %v14875_v44  ;;  %10468 = vmatmul.mubr.msk.f32.gmra.mrb[2].mxu1 %vm307_vm1, %v14882_v53 }
 0x9db   :  { %10458 = vmatprep.mubr.msk.f32.mxu0 %vm307_vm1, %v14878_v4  ;;  %10470 = vmatprep.mubr.msk.f32.mxu1 %vm307_vm1, %v7932_v45 }
 0x9de   :  { %10459 = vmatmul.mubr.msk.f32.gmra.mrb[4].mxu0 %vm307_vm1, %v14877_v5  ;;  %10471 = vmatmul.mubr.msk.f32.gmra.mrb[4].mxu1 %vm307_vm1, %v14884_v6 }
 0x9df   :  { %10461 = vmatprep.mubr.msk.f32.mxu0 %vm307_vm1, %v14880_v34  ;;  %10473 = vmatprep.mubr.msk.f32.mxu1 %vm307_vm1, %v7934_v13 }
 0x9e2   :  { %10462 = vmatmul.mubr.msk.f32.gmra.mrb[6].mxu0 %vm307_vm1, %v14879_v29  ;;  %10474 = vmatmul.mubr.msk.f32.gmra.mrb[6].mxu1 %vm307_vm1, %v14885_v48 }
 0xaa9   :  { %v10454_v44 = vpop.f32.mrb[0].mxu0  ;;  %v10466_v7 = vpop.f32.mrb[0].mxu1 }
 0xaaa   :  { %v8074_v19 = vadd.f32 %v10454_v44, %v8791_v27  ;;  %v8114_v12 = vadd.f32 %v10466_v7, %v8791_v27  ;;  %v8068_v51 = vpop.f32.mrb[1].mxu0  ;;  %v8108_v5 = vpop.f32.mrb[1].mxu1 }
 0xaab   :  { %v8069_v24 = vadd.f32 %v8791_v27, %v8068_v51  ;;  %v8109_v4 = vadd.f32 %v8791_v27, %v8108_v5 }
 0xaac   :  { %8149 = vst.msk [vmem:[%s14817_s12 + $0x8] sm:$0xff] %vm8147_vm3, %v8074_v19  ;;  %8157 = vst.msk [vmem:[%s14817_s12 + $0x48] sm:$0xff] %vm8147_vm3, %v8114_v12 }
 0xaad   :  { %8148 = vst.msk [vmem:[%s14817_s12] sm:$0xff] %vm8147_vm3, %v8069_v24  ;;  %8156 = vst.msk [vmem:[%s14817_s12 + $0x40] sm:$0xff] %vm8147_vm3, %v8109_v4  ;;  %v10457_v26 = vpop.f32.mrb[2].mxu0  ;;  %v10469_v55 = vpop.f32.mrb[2].mxu1 }
 0xaae   :  { %v8084_v61 = vadd.f32 %v10457_v26, %v8791_v27  ;;  %v8124_v42 = vadd.f32 %v10469_v55, %v8791_v27  ;;  %v8078_v10 = vpop.f32.mrb[3].mxu0  ;;  %v8118_v31 = vpop.f32.mrb[3].mxu1 }
 0xaaf   :  { %v8079_v22 = vadd.f32 %v8791_v27, %v8078_v10  ;;  %v8119_v29 = vadd.f32 %v8791_v27, %v8118_v31 }
 0xab0   :  { %8151 = vst.msk [vmem:[%s14817_s12 + $0x18] sm:$0xff] %vm8147_vm3, %v8084_v61  ;;  %8159 = vst.msk [vmem:[%s14817_s12 + $0x58] sm:$0xff] %vm8147_vm3, %v8124_v42 }
 0xab1   :  { %8150 = vst.msk [vmem:[%s14817_s12 + $0x10] sm:$0xff] %vm8147_vm3, %v8079_v22  ;;  %8158 = vst.msk [vmem:[%s14817_s12 + $0x50] sm:$0xff] %vm8147_vm3, %v8119_v29  ;;  %v10460_v32 = vpop.f32.mrb[4].mxu0  ;;  %v10472_v34 = vpop.f32.mrb[4].mxu1 }
 0xab2   :  { %v8094_v33 = vadd.f32 %v10460_v32, %v8791_v27  ;;  %v8134_v54 = vadd.f32 %v10472_v34, %v8791_v27  ;;  %v8088_v36 = vpop.f32.mrb[5].mxu0  ;;  %v8128_v21 = vpop.f32.mrb[5].mxu1 }
 0xab3   :  { %v8089_v62 = vadd.f32 %v8791_v27, %v8088_v36  ;;  %v8129_v3 = vadd.f32 %v8791_v27, %v8128_v21 }
 0xab4   :  { %8153 = vst.msk [vmem:[%s14817_s12 + $0x28] sm:$0xff] %vm8147_vm3, %v8094_v33  ;;  %8161 = vst.msk [vmem:[%s14817_s12 + $0x68] sm:$0xff] %vm8147_vm3, %v8134_v54 }
 0xab5   :  { %8152 = vst.msk [vmem:[%s14817_s12 + $0x20] sm:$0xff] %vm8147_vm3, %v8089_v62  ;;  %8160 = vst.msk [vmem:[%s14817_s12 + $0x60] sm:$0xff] %vm8147_vm3, %v8129_v3  ;;  %v10463_v39 = vpop.f32.mrb[6].mxu0  ;;  %v10475_v58 = vpop.f32.mrb[6].mxu1 }
 0xab6   :  { %v8104_v41 = vadd.f32 %v10463_v39, %v8791_v27  ;;  %v8144_v11 = vadd.f32 %v10475_v58, %v8791_v27  ;;  %v8098_v43 = vpop.f32.mrb[7].mxu0  ;;  %v8138_v40 = vpop.f32.mrb[7].mxu1 }
 0xab7   :  { %v8099_v47 = vadd.f32 %v8791_v27, %v8098_v43  ;;  %v8139_v28 = vadd.f32 %v8791_v27, %v8138_v40 }
 0xab8   :  { %8155 = vst.msk [vmem:[%s14817_s12 + $0x38] sm:$0xff] %vm8147_vm3, %v8104_v41  ;;  %8163 = vst.msk [vmem:[%s14817_s12 + $0x78] sm:$0xff] %vm8147_vm3, %v8144_v11 }
 0xab9   :  { %8154 = vst.msk [vmem:[%s14817_s12 + $0x30] sm:$0xff] %vm8147_vm3, %v8099_v47  ;;  %8162 = vst.msk [vmem:[%s14817_s12 + $0x70] sm:$0xff] %vm8147_vm3, %v8139_v28 }
 0xaba   :  { %8168 = vsyncpa [#allocation5], 1 }
 0xabb   :  { %8169 = vsyncpa [#allocation7], 1 }

</bundles_post_ra>
